<compile_context>
chip_gen: v7x
topology: tpu7x:2x2x1
jax: 0.10.0
libtpu: 0.0.40
codegen_flags: <defaults>
</compile_context>

<pallas_src>
import jax
import jax.numpy as jnp
from jax import lax
from jax.experimental import pallas as pl
from jax.experimental.pallas import tpu as pltpu
import numpy as np


# ---------------------------------------------------------------------------
# Architecture constants (from the PyTorch module).
# ---------------------------------------------------------------------------
CHANNELS = [3, 24, 36, 48, 64, 64, 1000]
KERNELS = [[5, 5], [5, 5], [3, 3], [3, 3], [3, 3], [1, 24]]
STRIDES = [[2, 2], [2, 2], [2, 2], [1, 1], [1, 1], [1, 1]]
UNITS = [1000, 100, 1]          # num_classes = 1

VMEM_LIMIT = 32 * 1024 * 1024   # <= 64 MiB, valid on every TPU generation
HEAD_TN = 256                   # column tile for streaming the conv6 weight
HEAD_NPAD = 1024                # 1000 -> 1024 so the head grid tiles evenly


# ---------------------------------------------------------------------------
# Pallas kernel 1: transposed conv-as-matmul,  out(Cout, M) = relu(Wt @ P + b)
# The M (= N*Ho*Wo) dimension sits in lanes, so loads/stores are lane-dense.
# ---------------------------------------------------------------------------
def _conv_mm_kernel(wt_ref, p_ref, b_ref, o_ref):
    acc = jnp.dot(wt_ref[...], p_ref[...], preferred_element_type=jnp.float32)
    acc = acc + b_ref[...]                    # (Cout, 1) broadcasts over lanes
    o_ref[...] = jnp.maximum(acc, 0.0)


def conv_matmul_t(wt, p_t, b_col):
    """wt: (Cout, K), p_t: (K, M), b_col: (Cout, 1) -> relu(wt @ p_t + b)."""
    cout, k = wt.shape
    m = p_t.shape[1]
    return pl.pallas_call(
        _conv_mm_kernel,
        out_shape=jax.ShapeDtypeStruct((cout, m), jnp.float32),
        grid_spec=pltpu.PrefetchScalarGridSpec(
            num_scalar_prefetch=0,
            grid=(1,),
            in_specs=[
                pl.BlockSpec((cout, k), lambda i: (0, 0)),
                pl.BlockSpec((k, m), lambda i: (0, 0)),
                pl.BlockSpec((cout, 1), lambda i: (0, 0)),
            ],
            out_specs=pl.BlockSpec((cout, m), lambda i: (0, 0)),
        ),
        compiler_params=pltpu.CompilerParams(
            dimension_semantics=("arbitrary",),
            vmem_limit_bytes=VMEM_LIMIT,
        ),
    )(wt, p_t, b_col)


# ---------------------------------------------------------------------------
# Pallas kernel 2: fused head  conv6 (1x24, as matmul) + ReLU + fc1 + ReLU + fc2
# The 6 MB conv6 weight and fc1 weight are streamed in blocks over the grid,
# the fc1 partial sums are accumulated in a VMEM scratch, fc2 runs last step.
# ---------------------------------------------------------------------------
def _head_kernel(x_ref, w6_ref, b6_ref, w1_ref, b1_ref, w2_ref, b2_ref,
                 o_ref, acc_ref):
    k = pl.program_id(0)

    @pl.when(k == 0)
    def _():
        acc_ref[...] = jnp.zeros_like(acc_ref)

    h1 = jnp.dot(x_ref[...], w6_ref[...], preferred_element_type=jnp.float32)
    h1 = jnp.maximum(h1 + b6_ref[...], 0.0)                  # conv6 chunk + ReLU
    acc_ref[...] += jnp.dot(h1, w1_ref[...],
                            preferred_element_type=jnp.float32)  # fc1 partial

    @pl.when(k == pl.num_programs(0) - 1)
    def _():
        h2 = jnp.maximum(acc_ref[...] + b1_ref[...], 0.0)    # fc1 bias + ReLU
        o_ref[...] = (jnp.dot(h2, w2_ref[...],
                              preferred_element_type=jnp.float32)
                      + b2_ref[...])                          # fc2 (padded to 128)


def head_forward(x_head, hp):
    """x_head: (B, 1536) -> (B, 128); column 0 holds the logit."""
    b = x_head.shape[0]
    k6 = hp["w6"].shape[0]           # 1536
    n_fc1 = hp["w1"].shape[1]        # 100
    n_out = hp["w2"].shape[1]        # 128 (padded)
    grid = (HEAD_NPAD // HEAD_TN,)
    return pl.pallas_call(
        _head_kernel,
        out_shape=jax.ShapeDtypeStruct((b, n_out), jnp.float32),
        grid_spec=pltpu.PrefetchScalarGridSpec(
            num_scalar_prefetch=0,
            grid=grid,
            in_specs=[
                pl.BlockSpec((b, k6), lambda k: (0, 0)),           # x (resident)
                pl.BlockSpec((k6, HEAD_TN), lambda k: (0, k)),     # conv6 W stream
                pl.BlockSpec((1, HEAD_TN), lambda k: (0, k)),      # conv6 bias
                pl.BlockSpec((HEAD_TN, n_fc1), lambda k: (k, 0)),  # fc1 W stream
                pl.BlockSpec((1, n_fc1), lambda k: (0, 0)),        # fc1 bias
                pl.BlockSpec((UNITS[1], n_out), lambda k: (0, 0)), # fc2 W
                pl.BlockSpec((1, n_out), lambda k: (0, 0)),        # fc2 bias
            ],
            out_specs=pl.BlockSpec((b, n_out), lambda k: (0, 0)),
            scratch_shapes=[pltpu.VMEM((b, n_fc1), jnp.float32)],
        ),
        compiler_params=pltpu.CompilerParams(
            dimension_semantics=("arbitrary",),
            vmem_limit_bytes=VMEM_LIMIT,
        ),
    )(x_head, hp["w6"], hp["b6"], hp["w1"], hp["b1"], hp["w2"], hp["b2"])


# ---------------------------------------------------------------------------
# Parameters: PyTorch-layout init + one-time layout preparation.
# ---------------------------------------------------------------------------
def init_params(key):
    params = {"conv": [], "linear": []}
    for ell in range(len(KERNELS)):
        key, kw_, kb_ = jax.random.split(key, 3)
        kh, kw = KERNELS[ell]
        w = 0.05 * jax.random.normal(
            kw_, (CHANNELS[ell + 1], CHANNELS[ell], kh, kw), jnp.float32)
        b = 0.01 * jax.random.normal(kb_, (CHANNELS[ell + 1],), jnp.float32)
        params["conv"].append((w, b))
    for ell in range(len(UNITS) - 1):
        key, kw_, kb_ = jax.random.split(key, 3)
        w = 0.05 * jax.random.normal(
            kw_, (UNITS[ell + 1], UNITS[ell]), jnp.float32)
        b = 0.01 * jax.random.normal(kb_, (UNITS[ell + 1],), jnp.float32)
        params["linear"].append((w, b))
    return params


def prepare_params(params):
    """One-time weight/bias layout prep (hoisted out of the forward pass)."""
    prepped = {"conv": [], "head": {}}
    # conv1..conv5: (Cout, Cin, kh, kw) -> (Cout, K) with K ordered (ci, i, j),
    # matching the channel ordering of lax.conv_general_dilated_patches.
    for (w, b) in params["conv"][:5]:
        cout = w.shape[0]
        prepped["conv"].append((w.reshape(cout, -1), b.reshape(cout, 1)))
    # Head: conv6 (1000, 64, 1, 24) -> (1536, 1024) (zero-padded columns),
    #       fc1 (100, 1000) -> (1024, 100), fc2 (1, 100) -> (100, 128).
    w6, b6 = params["conv"][5]
    w6m = w6.reshape(w6.shape[0], -1).T
    w6m = jnp.pad(w6m, ((0, 0), (0, HEAD_NPAD - w6m.shape[1])))
    b6v = jnp.pad(b6, (0, HEAD_NPAD - b6.shape[0])).reshape(1, HEAD_NPAD)
    (w1, b1), (w2, b2) = params["linear"]
    w1m = jnp.pad(w1.T, ((0, HEAD_NPAD - w1.shape[1]), (0, 0)))   # (1024, 100)
    b1v = b1.reshape(1, -1)                                       # (1, 100)
    w2m = jnp.pad(w2.T, ((0, 0), (0, 128 - w2.shape[0])))         # (100, 128)
    b2v = jnp.pad(b2, (0, 128 - b2.shape[0])).reshape(1, 128)     # (1, 128)
    prepped["head"] = {"w6": w6m, "b6": b6v, "w1": w1m, "b1": b1v,
                       "w2": w2m, "b2": b2v}
    return prepped


# ---------------------------------------------------------------------------
# Forward pass.
# ---------------------------------------------------------------------------
def deepknight_forward_pallas(x_nchw, prepped):
    n = x_nchw.shape[0]
    act = x_nchw                  # conv1 consumes NCHW directly
    lhs_spec = "NCHW"
    for ell, (wt, b_col) in enumerate(prepped["conv"]):
        kh, kw = KERNELS[ell]
        sh, sw = STRIDES[ell]
        # One fused XLA gather producing (K, N, Ho, Wo); the K (patch) channel
        # is ordered (ci, i, j), matching the flattened PyTorch weight.
        patches = lax.conv_general_dilated_patches(
            act, filter_shape=(kh, kw), window_strides=(sh, sw),
            padding="VALID",
            dimension_numbers=(lhs_spec, "OIHW", "CNHW"))
        k_dim, _, ho, wo = patches.shape
        p_t = patches.reshape(k_dim, n * ho * wo)
        # Fused Pallas matmul + bias + ReLU; output (Cout, M) is lane-dense.
        act = conv_matmul_t(wt, p_t, b_col)
        act = act.reshape(act.shape[0], n, ho, wo)
        lhs_spec = "CNHW"

    # act: (64, N, 1, 24) -> head input (N, 1536) ordered (ci, j), which is how
    # the conv6 weight (1000, 64, 1, 24) flattens.
    x_head = act.reshape(64, n, 24).transpose(1, 0, 2).reshape(n, 64 * 24)
    out = head_forward(x_head, prepped["head"])     # (N, 128)
    return out[:, :1]                               # columns 1..127 are padding


# ---------------------------------------------------------------------------
# Pure-JAX reference (validation only).
# ---------------------------------------------------------------------------
def deepknight_forward_ref(x_nchw, params):
    h = x_nchw
    for (w, b), stride in zip(params["conv"], STRIDES):
        h = lax.conv_general_dilated(
            h, w, window_strides=tuple(stride), padding="VALID",
            dimension_numbers=("NCHW", "OIHW", "NCHW"),
            precision=lax.Precision.HIGHEST)
        h = jnp.maximum(h + b.reshape(1, -1, 1, 1), 0.0)
    h = h.reshape(h.shape[0], -1)
    (w0, b0), (w1, b1) = params["linear"]
    h = jnp.maximum(
        jnp.dot(h, w0.T, precision=lax.Precision.HIGHEST) + b0, 0.0)
    h = jnp.dot(h, w1.T, precision=lax.Precision.HIGHEST) + b1
    return h


if __name__ == "__main__":
    key = jax.random.PRNGKey(0)
    key, kx = jax.random.split(key)
    # Smallest input the architecture supports (conv stack must flatten to 1000).
    x = jax.random.normal(kx, (2, 3, 53, 237), jnp.float32)
    params = init_params(key)
    prepped = prepare_params(params)          # one-time layout prep

    fwd = jax.jit(deepknight_forward_pallas)
    out = jax.block_until_ready(fwd(x, prepped))
    assert out.shape == (2, 1), out.shape

    ref = jax.block_until_ready(jax.jit(deepknight_forward_ref)(x, params))
    np.testing.assert_allclose(np.asarray(out), np.asarray(ref),
                               rtol=2e-3, atol=2e-3)

    print("KERNEL_OK")
</pallas_src>

<mosaic_0001>
module attributes {stable_mosaic.version = 11 : i64} {
  func.func @_conv_mm_kernel(%arg0: i32, %arg1: memref<24x75xf32, #tpu.memory_space<vmem>>, %arg2: memref<75x5850xf32, #tpu.memory_space<vmem>>, %arg3: memref<24x1xf32, #tpu.memory_space<vmem>>, %arg4: memref<24x5850xf32, #tpu.memory_space<vmem>>) attributes {dimension_semantics = [#tpu.dimension_semantics<arbitrary>], iteration_bounds = array<i64: 1>, scalar_prefetch = 0 : i64, scratch_operands = 0 : i64, tpu.core_type = #tpu.core_type<tc>, window_params = [{pipeline_mode = #tpu.pipeline_mode<synchronous>, transform_indices = @transform_0, window_bounds = array<i64: 24, 75>}, {pipeline_mode = #tpu.pipeline_mode<synchronous>, transform_indices = @transform_1, window_bounds = array<i64: 75, 5850>}, {pipeline_mode = #tpu.pipeline_mode<synchronous>, transform_indices = @transform_2, window_bounds = array<i64: 24, 1>}, {pipeline_mode = #tpu.pipeline_mode<synchronous>, transform_indices = @transform_3, window_bounds = array<i64: 24, 5850>}]} {
    %c0 = arith.constant 0 : index
    %c0_0 = arith.constant 0 : index
    %0 = vector.load %arg1[%c0, %c0_0] : memref<24x75xf32, #tpu.memory_space<vmem>>, vector<24x75xf32>
    %c0_1 = arith.constant 0 : index
    %c0_2 = arith.constant 0 : index
    %1 = vector.load %arg2[%c0_1, %c0_2] : memref<75x5850xf32, #tpu.memory_space<vmem>>, vector<75x5850xf32>
    %cst = arith.constant dense<0.000000e+00> : vector<24x5850xf32>
    %2 = tpu.matmul %0, %1, %cst {dimension_numbers = #tpu.dot_dimension_numbers<[1], [0], [0], [1], [0, 0, 1, 1], [], []>} : vector<24x75xf32>, vector<75x5850xf32>, vector<24x5850xf32> -> vector<24x5850xf32>
    %c0_3 = arith.constant 0 : index
    %c0_4 = arith.constant 0 : index
    %3 = vector.load %arg3[%c0_3, %c0_4] : memref<24x1xf32, #tpu.memory_space<vmem>>, vector<24x1xf32>
    %4 = vector.broadcast %3 : vector<24x1xf32> to vector<24x5850xf32>
    %5 = arith.addf %2, %4 : vector<24x5850xf32>
    %cst_5 = arith.constant 0.000000e+00 : f32
    %6 = vector.broadcast %cst_5 : f32 to vector<24x5850xf32>
    %7 = arith.maximumf %5, %6 : vector<24x5850xf32>
    %c0_6 = arith.constant 0 : index
    %c0_7 = arith.constant 0 : index
    %8 = vector.load %arg4[%c0_6, %c0_7] : memref<24x5850xf32, #tpu.memory_space<vmem>>, vector<24x5850xf32>
    tpu.vector_store %arg4[%c0_6, %c0_7], %7 {strides = array<i32>} : memref<24x5850xf32, #tpu.memory_space<vmem>>, vector<24x5850xf32>,
    return
  }
  func.func @transform_0(%arg0: i32) -> (i32, i32) {
    %c0_i32 = arith.constant 0 : i32
    %c0_i32_0 = arith.constant 0 : i32
    %c0_i32_1 = arith.constant 0 : i32
    return %c0_i32, %c0_i32_0 : i32, i32
  }
  func.func @transform_1(%arg0: i32) -> (i32, i32) {
    %c0_i32 = arith.constant 0 : i32
    %c0_i32_0 = arith.constant 0 : i32
    %c0_i32_1 = arith.constant 0 : i32
    return %c0_i32, %c0_i32_0 : i32, i32
  }
  func.func @transform_2(%arg0: i32) -> (i32, i32) {
    %c0_i32 = arith.constant 0 : i32
    %c0_i32_0 = arith.constant 0 : i32
    %c0_i32_1 = arith.constant 0 : i32
    return %c0_i32, %c0_i32_0 : i32, i32
  }
  func.func @transform_3(%arg0: i32) -> (i32, i32) {
    %c0_i32 = arith.constant 0 : i32
    %c0_i32_0 = arith.constant 0 : i32
    %c0_i32_1 = arith.constant 0 : i32
    return %c0_i32, %c0_i32_0 : i32, i32
  }
}

module attributes {stable_mosaic.version = 11 : i64} {
  func.func @_conv_mm_kernel(%arg0: i32, %arg1: memref<36x600xf32, #tpu.memory_space<vmem>>, %arg2: memref<600x1254xf32, #tpu.memory_space<vmem>>, %arg3: memref<36x1xf32, #tpu.memory_space<vmem>>, %arg4: memref<36x1254xf32, #tpu.memory_space<vmem>>) attributes {dimension_semantics = [#tpu.dimension_semantics<arbitrary>], iteration_bounds = array<i64: 1>, scalar_prefetch = 0 : i64, scratch_operands = 0 : i64, tpu.core_type = #tpu.core_type<tc>, window_params = [{pipeline_mode = #tpu.pipeline_mode<synchronous>, transform_indices = @transform_0, window_bounds = array<i64: 36, 600>}, {pipeline_mode = #tpu.pipeline_mode<synchronous>, transform_indices = @transform_1, window_bounds = array<i64: 600, 1254>}, {pipeline_mode = #tpu.pipeline_mode<synchronous>, transform_indices = @transform_2, window_bounds = array<i64: 36, 1>}, {pipeline_mode = #tpu.pipeline_mode<synchronous>, transform_indices = @transform_3, window_bounds = array<i64: 36, 1254>}]} {
    %c0 = arith.constant 0 : index
    %c0_0 = arith.constant 0 : index
    %0 = vector.load %arg1[%c0, %c0_0] : memref<36x600xf32, #tpu.memory_space<vmem>>, vector<36x600xf32>
    %c0_1 = arith.constant 0 : index
    %c0_2 = arith.constant 0 : index
    %1 = vector.load %arg2[%c0_1, %c0_2] : memref<600x1254xf32, #tpu.memory_space<vmem>>, vector<600x1254xf32>
    %cst = arith.constant dense<0.000000e+00> : vector<36x1254xf32>
    %2 = tpu.matmul %0, %1, %cst {dimension_numbers = #tpu.dot_dimension_numbers<[1], [0], [0], [1], [0, 0, 1, 1], [], []>} : vector<36x600xf32>, vector<600x1254xf32>, vector<36x1254xf32> -> vector<36x1254xf32>
    %c0_3 = arith.constant 0 : index
    %c0_4 = arith.constant 0 : index
    %3 = vector.load %arg3[%c0_3, %c0_4] : memref<36x1xf32, #tpu.memory_space<vmem>>, vector<36x1xf32>
    %4 = vector.broadcast %3 : vector<36x1xf32> to vector<36x1254xf32>
    %5 = arith.addf %2, %4 : vector<36x1254xf32>
    %cst_5 = arith.constant 0.000000e+00 : f32
    %6 = vector.broadcast %cst_5 : f32 to vector<36x1254xf32>
    %7 = arith.maximumf %5, %6 : vector<36x1254xf32>
    %c0_6 = arith.constant 0 : index
    %c0_7 = arith.constant 0 : index
    %8 = vector.load %arg4[%c0_6, %c0_7] : memref<36x1254xf32, #tpu.memory_space<vmem>>, vector<36x1254xf32>
    tpu.vector_store %arg4[%c0_6, %c0_7], %7 {strides = array<i32>} : memref<36x1254xf32, #tpu.memory_space<vmem>>, vector<36x1254xf32>,
    return
  }
  func.func @transform_0(%arg0: i32) -> (i32, i32) {
    %c0_i32 = arith.constant 0 : i32
    %c0_i32_0 = arith.constant 0 : i32
    %c0_i32_1 = arith.constant 0 : i32
    return %c0_i32, %c0_i32_0 : i32, i32
  }
  func.func @transform_1(%arg0: i32) -> (i32, i32) {
    %c0_i32 = arith.constant 0 : i32
    %c0_i32_0 = arith.constant 0 : i32
    %c0_i32_1 = arith.constant 0 : i32
    return %c0_i32, %c0_i32_0 : i32, i32
  }
  func.func @transform_2(%arg0: i32) -> (i32, i32) {
    %c0_i32 = arith.constant 0 : i32
    %c0_i32_0 = arith.constant 0 : i32
    %c0_i32_1 = arith.constant 0 : i32
    return %c0_i32, %c0_i32_0 : i32, i32
  }
  func.func @transform_3(%arg0: i32) -> (i32, i32) {
    %c0_i32 = arith.constant 0 : i32
    %c0_i32_0 = arith.constant 0 : i32
    %c0_i32_1 = arith.constant 0 : i32
    return %c0_i32, %c0_i32_0 : i32, i32
  }
}

module attributes {stable_mosaic.version = 11 : i64} {
  func.func @_conv_mm_kernel(%arg0: i32, %arg1: memref<48x324xf32, #tpu.memory_space<vmem>>, %arg2: memref<324x280xf32, #tpu.memory_space<vmem>>, %arg3: memref<48x1xf32, #tpu.memory_space<vmem>>, %arg4: memref<48x280xf32, #tpu.memory_space<vmem>>) attributes {dimension_semantics = [#tpu.dimension_semantics<arbitrary>], iteration_bounds = array<i64: 1>, scalar_prefetch = 0 : i64, scratch_operands = 0 : i64, tpu.core_type = #tpu.core_type<tc>, window_params = [{pipeline_mode = #tpu.pipeline_mode<synchronous>, transform_indices = @transform_0, window_bounds = array<i64: 48, 324>}, {pipeline_mode = #tpu.pipeline_mode<synchronous>, transform_indices = @transform_1, window_bounds = array<i64: 324, 280>}, {pipeline_mode = #tpu.pipeline_mode<synchronous>, transform_indices = @transform_2, window_bounds = array<i64: 48, 1>}, {pipeline_mode = #tpu.pipeline_mode<synchronous>, transform_indices = @transform_3, window_bounds = array<i64: 48, 280>}]} {
    %c0 = arith.constant 0 : index
    %c0_0 = arith.constant 0 : index
    %0 = vector.load %arg1[%c0, %c0_0] : memref<48x324xf32, #tpu.memory_space<vmem>>, vector<48x324xf32>
    %c0_1 = arith.constant 0 : index
    %c0_2 = arith.constant 0 : index
    %1 = vector.load %arg2[%c0_1, %c0_2] : memref<324x280xf32, #tpu.memory_space<vmem>>, vector<324x280xf32>
    %cst = arith.constant dense<0.000000e+00> : vector<48x280xf32>
    %2 = tpu.matmul %0, %1, %cst {dimension_numbers = #tpu.dot_dimension_numbers<[1], [0], [0], [1], [0, 0, 1, 1], [], []>} : vector<48x324xf32>, vector<324x280xf32>, vector<48x280xf32> -> vector<48x280xf32>
    %c0_3 = arith.constant 0 : index
    %c0_4 = arith.constant 0 : index
    %3 = vector.load %arg3[%c0_3, %c0_4] : memref<48x1xf32, #tpu.memory_space<vmem>>, vector<48x1xf32>
    %4 = vector.broadcast %3 : vector<48x1xf32> to vector<48x280xf32>
    %5 = arith.addf %2, %4 : vector<48x280xf32>
    %cst_5 = arith.constant 0.000000e+00 : f32
    %6 = vector.broadcast %cst_5 : f32 to vector<48x280xf32>
    %7 = arith.maximumf %5, %6 : vector<48x280xf32>
    %c0_6 = arith.constant 0 : index
    %c0_7 = arith.constant 0 : index
    %8 = vector.load %arg4[%c0_6, %c0_7] : memref<48x280xf32, #tpu.memory_space<vmem>>, vector<48x280xf32>
    tpu.vector_store %arg4[%c0_6, %c0_7], %7 {strides = array<i32>} : memref<48x280xf32, #tpu.memory_space<vmem>>, vector<48x280xf32>,
    return
  }
  func.func @transform_0(%arg0: i32) -> (i32, i32) {
    %c0_i32 = arith.constant 0 : i32
    %c0_i32_0 = arith.constant 0 : i32
    %c0_i32_1 = arith.constant 0 : i32
    return %c0_i32, %c0_i32_0 : i32, i32
  }
  func.func @transform_1(%arg0: i32) -> (i32, i32) {
    %c0_i32 = arith.constant 0 : i32
    %c0_i32_0 = arith.constant 0 : i32
    %c0_i32_1 = arith.constant 0 : i32
    return %c0_i32, %c0_i32_0 : i32, i32
  }
  func.func @transform_2(%arg0: i32) -> (i32, i32) {
    %c0_i32 = arith.constant 0 : i32
    %c0_i32_0 = arith.constant 0 : i32
    %c0_i32_1 = arith.constant 0 : i32
    return %c0_i32, %c0_i32_0 : i32, i32
  }
  func.func @transform_3(%arg0: i32) -> (i32, i32) {
    %c0_i32 = arith.constant 0 : i32
    %c0_i32_0 = arith.constant 0 : i32
    %c0_i32_1 = arith.constant 0 : i32
    return %c0_i32, %c0_i32_0 : i32, i32
  }
}

module attributes {stable_mosaic.version = 11 : i64} {
  func.func @_conv_mm_kernel(%arg0: i32, %arg1: memref<64x432xf32, #tpu.memory_space<vmem>>, %arg2: memref<432x156xf32, #tpu.memory_space<vmem>>, %arg3: memref<64x1xf32, #tpu.memory_space<vmem>>, %arg4: memref<64x156xf32, #tpu.memory_space<vmem>>) attributes {dimension_semantics = [#tpu.dimension_semantics<arbitrary>], iteration_bounds = array<i64: 1>, scalar_prefetch = 0 : i64, scratch_operands = 0 : i64, tpu.core_type = #tpu.core_type<tc>, window_params = [{pipeline_mode = #tpu.pipeline_mode<synchronous>, transform_indices = @transform_0, window_bounds = array<i64: 64, 432>}, {pipeline_mode = #tpu.pipeline_mode<synchronous>, transform_indices = @transform_1, window_bounds = array<i64: 432, 156>}, {pipeline_mode = #tpu.pipeline_mode<synchronous>, transform_indices = @transform_2, window_bounds = array<i64: 64, 1>}, {pipeline_mode = #tpu.pipeline_mode<synchronous>, transform_indices = @transform_3, window_bounds = array<i64: 64, 156>}]} {
    %c0 = arith.constant 0 : index
    %c0_0 = arith.constant 0 : index
    %0 = vector.load %arg1[%c0, %c0_0] : memref<64x432xf32, #tpu.memory_space<vmem>>, vector<64x432xf32>
    %c0_1 = arith.constant 0 : index
    %c0_2 = arith.constant 0 : index
    %1 = vector.load %arg2[%c0_1, %c0_2] : memref<432x156xf32, #tpu.memory_space<vmem>>, vector<432x156xf32>
    %cst = arith.constant dense<0.000000e+00> : vector<64x156xf32>
    %2 = tpu.matmul %0, %1, %cst {dimension_numbers = #tpu.dot_dimension_numbers<[1], [0], [0], [1], [0, 0, 1, 1], [], []>} : vector<64x432xf32>, vector<432x156xf32>, vector<64x156xf32> -> vector<64x156xf32>
    %c0_3 = arith.constant 0 : index
    %c0_4 = arith.constant 0 : index
    %3 = vector.load %arg3[%c0_3, %c0_4] : memref<64x1xf32, #tpu.memory_space<vmem>>, vector<64x1xf32>
    %4 = vector.broadcast %3 : vector<64x1xf32> to vector<64x156xf32>
    %5 = arith.addf %2, %4 : vector<64x156xf32>
    %cst_5 = arith.constant 0.000000e+00 : f32
    %6 = vector.broadcast %cst_5 : f32 to vector<64x156xf32>
    %7 = arith.maximumf %5, %6 : vector<64x156xf32>
    %c0_6 = arith.constant 0 : index
    %c0_7 = arith.constant 0 : index
    %8 = vector.load %arg4[%c0_6, %c0_7] : memref<64x156xf32, #tpu.memory_space<vmem>>, vector<64x156xf32>
    tpu.vector_store %arg4[%c0_6, %c0_7], %7 {strides = array<i32>} : memref<64x156xf32, #tpu.memory_space<vmem>>, vector<64x156xf32>,
    return
  }
  func.func @transform_0(%arg0: i32) -> (i32, i32) {
    %c0_i32 = arith.constant 0 : i32
    %c0_i32_0 = arith.constant 0 : i32
    %c0_i32_1 = arith.constant 0 : i32
    return %c0_i32, %c0_i32_0 : i32, i32
  }
  func.func @transform_1(%arg0: i32) -> (i32, i32) {
    %c0_i32 = arith.constant 0 : i32
    %c0_i32_0 = arith.constant 0 : i32
    %c0_i32_1 = arith.constant 0 : i32
    return %c0_i32, %c0_i32_0 : i32, i32
  }
  func.func @transform_2(%arg0: i32) -> (i32, i32) {
    %c0_i32 = arith.constant 0 : i32
    %c0_i32_0 = arith.constant 0 : i32
    %c0_i32_1 = arith.constant 0 : i32
    return %c0_i32, %c0_i32_0 : i32, i32
  }
  func.func @transform_3(%arg0: i32) -> (i32, i32) {
    %c0_i32 = arith.constant 0 : i32
    %c0_i32_0 = arith.constant 0 : i32
    %c0_i32_1 = arith.constant 0 : i32
    return %c0_i32, %c0_i32_0 : i32, i32
  }
}

module attributes {stable_mosaic.version = 11 : i64} {
  func.func @_conv_mm_kernel(%arg0: i32, %arg1: memref<64x576xf32, #tpu.memory_space<vmem>>, %arg2: memref<576x48xf32, #tpu.memory_space<vmem>>, %arg3: memref<64x1xf32, #tpu.memory_space<vmem>>, %arg4: memref<64x48xf32, #tpu.memory_space<vmem>>) attributes {dimension_semantics = [#tpu.dimension_semantics<arbitrary>], iteration_bounds = array<i64: 1>, scalar_prefetch = 0 : i64, scratch_operands = 0 : i64, tpu.core_type = #tpu.core_type<tc>, window_params = [{pipeline_mode = #tpu.pipeline_mode<synchronous>, transform_indices = @transform_0, window_bounds = array<i64: 64, 576>}, {pipeline_mode = #tpu.pipeline_mode<synchronous>, transform_indices = @transform_1, window_bounds = array<i64: 576, 48>}, {pipeline_mode = #tpu.pipeline_mode<synchronous>, transform_indices = @transform_2, window_bounds = array<i64: 64, 1>}, {pipeline_mode = #tpu.pipeline_mode<synchronous>, transform_indices = @transform_3, window_bounds = array<i64: 64, 48>}]} {
    %c0 = arith.constant 0 : index
    %c0_0 = arith.constant 0 : index
    %0 = vector.load %arg1[%c0, %c0_0] : memref<64x576xf32, #tpu.memory_space<vmem>>, vector<64x576xf32>
    %c0_1 = arith.constant 0 : index
    %c0_2 = arith.constant 0 : index
    %1 = vector.load %arg2[%c0_1, %c0_2] : memref<576x48xf32, #tpu.memory_space<vmem>>, vector<576x48xf32>
    %cst = arith.constant dense<0.000000e+00> : vector<64x48xf32>
    %2 = tpu.matmul %0, %1, %cst {dimension_numbers = #tpu.dot_dimension_numbers<[1], [0], [0], [1], [0, 0, 1, 1], [], []>} : vector<64x576xf32>, vector<576x48xf32>, vector<64x48xf32> -> vector<64x48xf32>
    %c0_3 = arith.constant 0 : index
    %c0_4 = arith.constant 0 : index
    %3 = vector.load %arg3[%c0_3, %c0_4] : memref<64x1xf32, #tpu.memory_space<vmem>>, vector<64x1xf32>
    %4 = vector.broadcast %3 : vector<64x1xf32> to vector<64x48xf32>
    %5 = arith.addf %2, %4 : vector<64x48xf32>
    %cst_5 = arith.constant 0.000000e+00 : f32
    %6 = vector.broadcast %cst_5 : f32 to vector<64x48xf32>
    %7 = arith.maximumf %5, %6 : vector<64x48xf32>
    %c0_6 = arith.constant 0 : index
    %c0_7 = arith.constant 0 : index
    %8 = vector.load %arg4[%c0_6, %c0_7] : memref<64x48xf32, #tpu.memory_space<vmem>>, vector<64x48xf32>
    tpu.vector_store %arg4[%c0_6, %c0_7], %7 {strides = array<i32>} : memref<64x48xf32, #tpu.memory_space<vmem>>, vector<64x48xf32>,
    return
  }
  func.func @transform_0(%arg0: i32) -> (i32, i32) {
    %c0_i32 = arith.constant 0 : i32
    %c0_i32_0 = arith.constant 0 : i32
    %c0_i32_1 = arith.constant 0 : i32
    return %c0_i32, %c0_i32_0 : i32, i32
  }
  func.func @transform_1(%arg0: i32) -> (i32, i32) {
    %c0_i32 = arith.constant 0 : i32
    %c0_i32_0 = arith.constant 0 : i32
    %c0_i32_1 = arith.constant 0 : i32
    return %c0_i32, %c0_i32_0 : i32, i32
  }
  func.func @transform_2(%arg0: i32) -> (i32, i32) {
    %c0_i32 = arith.constant 0 : i32
    %c0_i32_0 = arith.constant 0 : i32
    %c0_i32_1 = arith.constant 0 : i32
    return %c0_i32, %c0_i32_0 : i32, i32
  }
  func.func @transform_3(%arg0: i32) -> (i32, i32) {
    %c0_i32 = arith.constant 0 : i32
    %c0_i32_0 = arith.constant 0 : i32
    %c0_i32_1 = arith.constant 0 : i32
    return %c0_i32, %c0_i32_0 : i32, i32
  }
}

module attributes {stable_mosaic.version = 11 : i64} {
  func.func @_head_kernel(%arg0: i32, %arg1: memref<2x1536xf32, #tpu.memory_space<vmem>>, %arg2: memref<1536x256xf32, #tpu.memory_space<vmem>>, %arg3: memref<1x256xf32, #tpu.memory_space<vmem>>, %arg4: memref<256x100xf32, #tpu.memory_space<vmem>>, %arg5: memref<1x100xf32, #tpu.memory_space<vmem>>, %arg6: memref<100x128xf32, #tpu.memory_space<vmem>>, %arg7: memref<1x128xf32, #tpu.memory_space<vmem>>, %arg8: memref<2x128xf32, #tpu.memory_space<vmem>>, %arg9: memref<2x100xf32, #tpu.memory_space<vmem>>) attributes {dimension_semantics = [#tpu.dimension_semantics<arbitrary>], iteration_bounds = array<i64: 4>, scalar_prefetch = 0 : i64, scratch_operands = 1 : i64, tpu.core_type = #tpu.core_type<tc>, window_params = [{pipeline_mode = #tpu.pipeline_mode<synchronous>, transform_indices = @transform_0, window_bounds = array<i64: 2, 1536>}, {transform_indices = @transform_1, window_bounds = array<i64: 1536, 256>}, {transform_indices = @transform_2, window_bounds = array<i64: 1, 256>}, {transform_indices = @transform_3, window_bounds = array<i64: 256, 100>}, {pipeline_mode = #tpu.pipeline_mode<synchronous>, transform_indices = @transform_4, window_bounds = array<i64: 1, 100>}, {pipeline_mode = #tpu.pipeline_mode<synchronous>, transform_indices = @transform_5, window_bounds = array<i64: 100, 128>}, {pipeline_mode = #tpu.pipeline_mode<synchronous>, transform_indices = @transform_6, window_bounds = array<i64: 1, 128>}, {pipeline_mode = #tpu.pipeline_mode<synchronous>, transform_indices = @transform_7, window_bounds = array<i64: 2, 128>}]} {
    %c0_i32 = arith.constant 0 : i32
    %0 = arith.cmpi eq, %arg0, %c0_i32 : i32
    %1 = arith.extui %0 : i1 to i32
    %c0_i32_0 = arith.constant 0 : i32
    %2 = arith.cmpi ne, %1, %c0_i32_0 : i32
    scf.if %2 {
      %cst_15 = arith.constant 0.000000e+00 : f32
      %19 = vector.broadcast %cst_15 : f32 to vector<2x100xf32>
      %c0_16 = arith.constant 0 : index
      %c0_17 = arith.constant 0 : index
      %20 = vector.load %arg9[%c0_16, %c0_17] : memref<2x100xf32, #tpu.memory_space<vmem>>, vector<2x100xf32>
      tpu.vector_store %arg9[%c0_16, %c0_17], %19 {strides = array<i32>} : memref<2x100xf32, #tpu.memory_space<vmem>>, vector<2x100xf32>,
    } else {
    }
    %c0 = arith.constant 0 : index
    %c0_1 = arith.constant 0 : index
    %3 = vector.load %arg1[%c0, %c0_1] : memref<2x1536xf32, #tpu.memory_space<vmem>>, vector<2x1536xf32>
    %c0_2 = arith.constant 0 : index
    %c0_3 = arith.constant 0 : index
    %4 = vector.load %arg2[%c0_2, %c0_3] : memref<1536x256xf32, #tpu.memory_space<vmem>>, vector<1536x256xf32>
    %cst = arith.constant dense<0.000000e+00> : vector<2x256xf32>
    %5 = tpu.matmul %3, %4, %cst {dimension_numbers = #tpu.dot_dimension_numbers<[1], [0], [0], [1], [0, 0, 1, 1], [], []>} : vector<2x1536xf32>, vector<1536x256xf32>, vector<2x256xf32> -> vector<2x256xf32>
    %c0_4 = arith.constant 0 : index
    %c0_5 = arith.constant 0 : index
    %6 = vector.load %arg3[%c0_4, %c0_5] : memref<1x256xf32, #tpu.memory_space<vmem>>, vector<1x256xf32>
    %7 = vector.broadcast %6 : vector<1x256xf32> to vector<2x256xf32>
    %8 = arith.addf %5, %7 : vector<2x256xf32>
    %cst_6 = arith.constant 0.000000e+00 : f32
    %9 = vector.broadcast %cst_6 : f32 to vector<2x256xf32>
    %10 = arith.maximumf %8, %9 : vector<2x256xf32>
    %c0_7 = arith.constant 0 : index
    %c0_8 = arith.constant 0 : index
    %11 = vector.load %arg9[%c0_7, %c0_8] : memref<2x100xf32, #tpu.memory_space<vmem>>, vector<2x100xf32>
    %c0_9 = arith.constant 0 : index
    %c0_10 = arith.constant 0 : index
    %12 = vector.load %arg4[%c0_9, %c0_10] : memref<256x100xf32, #tpu.memory_space<vmem>>, vector<256x100xf32>
    %cst_11 = arith.constant dense<0.000000e+00> : vector<2x100xf32>
    %13 = tpu.matmul %10, %12, %cst_11 {dimension_numbers = #tpu.dot_dimension_numbers<[1], [0], [0], [1], [0, 0, 1, 1], [], []>} : vector<2x256xf32>, vector<256x100xf32>, vector<2x100xf32> -> vector<2x100xf32>
    %14 = arith.addf %11, %13 : vector<2x100xf32>
    %c0_12 = arith.constant 0 : index
    %c0_13 = arith.constant 0 : index
    %15 = vector.load %arg9[%c0_12, %c0_13] : memref<2x100xf32, #tpu.memory_space<vmem>>, vector<2x100xf32>
    tpu.vector_store %arg9[%c0_12, %c0_13], %14 {strides = array<i32>} : memref<2x100xf32, #tpu.memory_space<vmem>>, vector<2x100xf32>,
    %c3_i32 = arith.constant 3 : i32
    %16 = arith.cmpi eq, %arg0, %c3_i32 : i32
    %17 = arith.extui %16 : i1 to i32
    %c0_i32_14 = arith.constant 0 : i32
    %18 = arith.cmpi ne, %17, %c0_i32_14 : i32
    scf.if %18 {
      %c0_15 = arith.constant 0 : index
      %c0_16 = arith.constant 0 : index
      %19 = vector.load %arg9[%c0_15, %c0_16] : memref<2x100xf32, #tpu.memory_space<vmem>>, vector<2x100xf32>
      %c0_17 = arith.constant 0 : index
      %c0_18 = arith.constant 0 : index
      %20 = vector.load %arg5[%c0_17, %c0_18] : memref<1x100xf32, #tpu.memory_space<vmem>>, vector<1x100xf32>
      %21 = vector.broadcast %20 : vector<1x100xf32> to vector<2x100xf32>
      %22 = arith.addf %19, %21 : vector<2x100xf32>
      %cst_19 = arith.constant 0.000000e+00 : f32
      %23 = vector.broadcast %cst_19 : f32 to vector<2x100xf32>
      %24 = arith.maximumf %22, %23 : vector<2x100xf32>
      %c0_20 = arith.constant 0 : index
      %c0_21 = arith.constant 0 : index
      %25 = vector.load %arg6[%c0_20, %c0_21] : memref<100x128xf32, #tpu.memory_space<vmem>>, vector<100x128xf32>
      %cst_22 = arith.constant dense<0.000000e+00> : vector<2x128xf32>
      %26 = tpu.matmul %24, %25, %cst_22 {dimension_numbers = #tpu.dot_dimension_numbers<[1], [0], [0], [1], [0, 0, 1, 1], [], []>} : vector<2x100xf32>, vector<100x128xf32>, vector<2x128xf32> -> vector<2x128xf32>
      %c0_23 = arith.constant 0 : index
      %c0_24 = arith.constant 0 : index
      %27 = vector.load %arg7[%c0_23, %c0_24] : memref<1x128xf32, #tpu.memory_space<vmem>>, vector<1x128xf32>
      %28 = vector.broadcast %27 : vector<1x128xf32> to vector<2x128xf32>
      %29 = arith.addf %26, %28 : vector<2x128xf32>
      %c0_25 = arith.constant 0 : index
      %c0_26 = arith.constant 0 : index
      %30 = vector.load %arg8[%c0_25, %c0_26] : memref<2x128xf32, #tpu.memory_space<vmem>>, vector<2x128xf32>
      tpu.vector_store %arg8[%c0_25, %c0_26], %29 {strides = array<i32>} : memref<2x128xf32, #tpu.memory_space<vmem>>, vector<2x128xf32>,
    } else {
    }
    return
  }
  func.func @transform_0(%arg0: i32) -> (i32, i32) {
    %c0_i32 = arith.constant 0 : i32
    %c0_i32_0 = arith.constant 0 : i32
    %c0_i32_1 = arith.constant 0 : i32
    return %c0_i32, %c0_i32_0 : i32, i32
  }
  func.func @transform_1(%arg0: i32) -> (i32, i32) {
    %c0_i32 = arith.constant 0 : i32
    %c0_i32_0 = arith.constant 0 : i32
    return %c0_i32, %arg0 : i32, i32
  }
  func.func @transform_2(%arg0: i32) -> (i32, i32) {
    %c0_i32 = arith.constant 0 : i32
    %c0_i32_0 = arith.constant 0 : i32
    return %c0_i32, %arg0 : i32, i32
  }
  func.func @transform_3(%arg0: i32) -> (i32, i32) {
    %c0_i32 = arith.constant 0 : i32
    %c0_i32_0 = arith.constant 0 : i32
    return %arg0, %c0_i32 : i32, i32
  }
  func.func @transform_4(%arg0: i32) -> (i32, i32) {
    %c0_i32 = arith.constant 0 : i32
    %c0_i32_0 = arith.constant 0 : i32
    %c0_i32_1 = arith.constant 0 : i32
    return %c0_i32, %c0_i32_0 : i32, i32
  }
  func.func @transform_5(%arg0: i32) -> (i32, i32) {
    %c0_i32 = arith.constant 0 : i32
    %c0_i32_0 = arith.constant 0 : i32
    %c0_i32_1 = arith.constant 0 : i32
    return %c0_i32, %c0_i32_0 : i32, i32
  }
  func.func @transform_6(%arg0: i32) -> (i32, i32) {
    %c0_i32 = arith.constant 0 : i32
    %c0_i32_0 = arith.constant 0 : i32
    %c0_i32_1 = arith.constant 0 : i32
    return %c0_i32, %c0_i32_0 : i32, i32
  }
  func.func @transform_7(%arg0: i32) -> (i32, i32) {
    %c0_i32 = arith.constant 0 : i32
    %c0_i32_0 = arith.constant 0 : i32
    %c0_i32_1 = arith.constant 0 : i32
    return %c0_i32, %c0_i32_0 : i32, i32
  }
}

</mosaic_0001>

<bundles_post_ra>
// kernel: deepknight_forward_pallas.6
= control target key start
LH: loop header
LB: loop body
LE: loop exit
PB: predicated region body
PF: predicated region fallthrough
CT: control target
= control target key end

     0   :  { %v3473_v3 = vmov 0.0   ;;  %v3474_v8 = vmov 0   ;;  %vm505_vm0 = vcmask 1042432   ;;  %vm3475_vm1 = vmmov 1   ;;  %s5783_s1 = inlined_call_operand.vmem [shape: f32[75,5850], index: 1, kind: input, shape index: {}]   ;;  %s5784_s0 = inlined_call_operand.vmem [shape: f32[24,75], index: 0, kind: input, shape index: {}]   ;;  %s5785_s2 = inlined_call_operand.vmem [shape: f32[24,1], index: 2, kind: input, shape index: {}]   ;;  %s5786_s3 = inlined_call_operand.vmem [shape: f32[24,5850], index: 3, kind: output, shape index: {}]  }
   0x1   :  { %v18_v0 = vld [vmem:[%s5783_s1 + $0x8] sm:$0xff]  ;;  %v64_v1 = vld [vmem:[%s5783_s1 + $0x178] sm:$0xff]  ;;  %791 = vmatprep.mubr.f32.mxu1 %v3473_v3  ;;  %708 = vmatprep.mubr.f32.mxu0 %v3473_v3  ;;  %v17_v6 = vld [vmem:[%s5783_s1] sm:$0xff]  ;;  %vm495_vm3 = vcmask 613376   ;;  %vm2736_vm4 = vcmask 736256  }
   0x2   :  { %v20_v2 = vld [vmem:[%s5783_s1 + $0x18] sm:$0xff]  ;;  %v2949_v4 = vpack.c.bf16 %v64_v1, %v18_v0  ;;  %v66_v5 = vld [vmem:[%s5783_s1 + $0x188] sm:$0xff]  ;;  %v63_v7 = vld [vmem:[%s5783_s1 + $0x170] sm:$0xff]  ;;  %3468 = vset.pattern.permute.xlu0 %v3474_v8  ;;  %3469 = vset.pattern.permute.xlu1 %v3474_v8 }
   0x3   :  { %v2971_v9 = vpack.c.bf16 %v66_v5, %v20_v2  ;;  %v2951_v10 = vpack.c.bf16 %v63_v7, %v17_v6  ;;  %v19_v11 = vld [vmem:[%s5783_s1 + $0x10] sm:$0xff]  ;;  %v65_v12 = vld [vmem:[%s5783_s1 + $0x180] sm:$0xff]  ;;  %v110_v13 = vld [vmem:[%s5783_s1 + $0x2e8] sm:$0xff] }
   0x4   :  { %2950 = vmatprep.subr.bf16.mxu0 %v2949_v4  ;;  %v2973_v14 = vpack.c.bf16 %v65_v12, %v19_v11  ;;  %v156_v15 = vld [vmem:[%s5783_s1 + $0x458] sm:$0xff]  ;;  %v158_v17 = vld [vmem:[%s5783_s1 + $0x468] sm:$0xff]  ;;  %v109_v20 = vld [vmem:[%s5783_s1 + $0x2e0] sm:$0xff] }
   0x5   :  { %v112_v16 = vld [vmem:[%s5783_s1 + $0x2f8] sm:$0xff]  ;;  %2972 = vmatprep.subr.bf16.mxu1 %v2971_v9  ;;  %2952 = vmatpush1.bf16.msra.mxu0 %v2951_v10  ;;  %v2953_v18 = vpack.c.bf16 %v156_v15, %v110_v13  ;;  %v155_v21 = vld [vmem:[%s5783_s1 + $0x450] sm:$0xff]  ;;  %v157_v24 = vld [vmem:[%s5783_s1 + $0x460] sm:$0xff] }
   0x6   :  { %v2975_v19 = vpack.c.bf16 %v158_v17, %v112_v16  ;;  %v111_v22 = vld [vmem:[%s5783_s1 + $0x2f0] sm:$0xff]  ;;  %2974 = vmatpush1.bf16.msra.mxu1 %v2973_v14  ;;  %v2955_v23 = vpack.c.bf16 %v155_v21, %v109_v20  ;;  %v202_v25 = vld [vmem:[%s5783_s1 + $0x5c8] sm:$0xff]  ;;  %v248_v26 = vld [vmem:[%s5783_s1 + $0x738] sm:$0xff] }
   0x7   :  { %2954 = vmatprep.subr.bf16.mxu0 %v2953_v18  ;;  %v2977_v27 = vpack.c.bf16 %v157_v24, %v111_v22  ;;  %v2957_v28 = vpack.c.bf16 %v248_v26, %v202_v25  ;;  %v204_v29 = vld [vmem:[%s5783_s1 + $0x5d8] sm:$0xff]  ;;  %v250_v30 = vld [vmem:[%s5783_s1 + $0x748] sm:$0xff]  ;;  %v201_v31 = vld [vmem:[%s5783_s1 + $0x5c0] sm:$0xff] }
   0x8   :  { %2976 = vmatprep.subr.bf16.mxu1 %v2975_v19  ;;  %v2979_v32 = vpack.c.bf16 %v250_v30, %v204_v29  ;;  %v247_v33 = vld [vmem:[%s5783_s1 + $0x730] sm:$0xff]  ;;  %v249_v35 = vld [vmem:[%s5783_s1 + $0x740] sm:$0xff]  ;;  %v294_v37 = vld [vmem:[%s5783_s1 + $0x8a8] sm:$0xff] }
   0x9   :  { %v203_v34 = vld [vmem:[%s5783_s1 + $0x5d0] sm:$0xff]  ;;  %2956 = vmatpush1.bf16.msra.mxu0 %v2955_v23  ;;  %v2959_v36 = vpack.c.bf16 %v247_v33, %v201_v31  ;;  %v340_v38 = vld [vmem:[%s5783_s1 + $0xa18] sm:$0xff]  ;;  %v342_v42 = vld [vmem:[%s5783_s1 + $0xa28] sm:$0xff] }
   0xa   :  { %v296_v39 = vld [vmem:[%s5783_s1 + $0x8b8] sm:$0xff]  ;;  %2978 = vmatpush1.bf16.msra.mxu1 %v2977_v27  ;;  %2958 = vmatprep.subr.bf16.mxu0 %v2957_v28  ;;  %v2981_v40 = vpack.c.bf16 %v249_v35, %v203_v34  ;;  %v2961_v41 = vpack.c.bf16 %v340_v38, %v294_v37  ;;  %v293_v43 = vld [vmem:[%s5783_s1 + $0x8a0] sm:$0xff]  ;;  %v339_v44 = vld [vmem:[%s5783_s1 + $0xa10] sm:$0xff] }
   0xb   :  { %2980 = vmatprep.subr.bf16.mxu1 %v2979_v32  ;;  %v2983_v45 = vpack.c.bf16 %v342_v42, %v296_v39  ;;  %v295_v46 = vld [vmem:[%s5783_s1 + $0x8b0] sm:$0xff]  ;;  %v341_v47 = vld [vmem:[%s5783_s1 + $0xa20] sm:$0xff]  ;;  %v386_v48 = vld [vmem:[%s5783_s1 + $0xb88] sm:$0xff]  ;;  %v2963_v51 = vpack.c.bf16 %v339_v44, %v293_v43 }
   0xc   :  { %v432_v49 = vld [vmem:[%s5783_s1 + $0xcf8] sm:$0x7]  ;;  %vm3603_vm2 = vmpackc.low %vm505_vm0, %vm3475_vm1  ;;  %v434_v53 = vld [vmem:[%s5783_s1 + $0xd08] sm:$0x7]  ;;  %v2985_v54 = vpack.c.bf16 %v341_v47, %v295_v46 }
   0xd   :  { %v388_v50 = vld [vmem:[%s5783_s1 + $0xb98] sm:$0xff]  ;;  %2960 = vmatpush1.bf16.msra.mxu0 %v2959_v36  ;;  %v2965_v55 = vpack.c.bf16 %v432_v49, %v386_v48  ;;  %v385_v56 = vld [vmem:[%s5783_s1 + $0xb80] sm:$0xff]  ;;  %v431_v57 = vld [vmem:[%s5783_s1 + $0xcf0] sm:$0x7] }
   0xe   :  { %2982 = vmatpush1.bf16.msra.mxu1 %v2981_v40  ;;  %2962 = vmatprep.subr.bf16.mxu0 %v2961_v41  ;;  %v387_v58 = vld [vmem:[%s5783_s1 + $0xb90] sm:$0xff]  ;;  %v2987_v59 = vpack.c.bf16 %v434_v53, %v388_v50  ;;  %v433_v60 = vld [vmem:[%s5783_s1 + $0xd00] sm:$0x7]  ;;  %v22_v61 = vld [vmem:[%s5783_s1 + $0x28] sm:$0xff]  ;;  %v2968_v1 = vpack.c.bf16 %v431_v57, %v385_v56 }
   0xf   :  { %2984 = vmatprep.subr.bf16.mxu1 %v2983_v45  ;;  %v68_v62 = vld [vmem:[%s5783_s1 + $0x198] sm:$0xff]  ;;  %v70_v0 = vld [vmem:[%s5783_s1 + $0x1a8] sm:$0xff]  ;;  %v2990_v2 = vpack.c.bf16 %v433_v60, %v387_v58  ;;  %v21_v5 = vld [vmem:[%s5783_s1 + $0x20] sm:$0xff] }
  0x10   :  { %v24_v63 = vld [vmem:[%s5783_s1 + $0x38] sm:$0xff]  ;;  %v2993_v4 = vpack.c.bf16 %v68_v62, %v22_v61  ;;  %v67_v6 = vld [vmem:[%s5783_s1 + $0x190] sm:$0xff]  ;;  %v69_v9 = vld [vmem:[%s5783_s1 + $0x1a0] sm:$0xff] }
  0x11   :  { %2964 = vmatpush1.bf16.msra.mxu0 %v2963_v51  ;;  %v23_v7 = vld [vmem:[%s5783_s1 + $0x30] sm:$0xff]  ;;  %v3015_v8 = vpack.c.bf16 %v70_v0, %v24_v63  ;;  %v114_v10 = vld [vmem:[%s5783_s1 + $0x308] sm:$0xff]  ;;  %v160_v11 = vld [vmem:[%s5783_s1 + $0x478] sm:$0xff]  ;;  %v2995_v15 = vpack.c.bf16 %v67_v6, %v21_v5 }
  0x12   :  { %2986 = vmatpush1.bf16.msra.mxu1 %v2985_v54  ;;  %2967 = vmatprep.subr.msk.bf16.mxu0 %vm3603_vm2, %v2965_v55  ;;  %v116_v12 = vld [vmem:[%s5783_s1 + $0x318] sm:$0xff]  ;;  %v162_v13 = vld [vmem:[%s5783_s1 + $0x488] sm:$0xff]  ;;  %v3667_v14 = vld [vmem:[%s5784_s0] sm:$0xff]  ;;  %v3017_v16 = vpack.c.bf16 %v69_v9, %v23_v7  ;;  %v2997_v17 = vpack.c.bf16 %v160_v11, %v114_v10 }
  0x13   :  { %2989 = vmatprep.subr.msk.bf16.mxu1 %vm3603_vm2, %v2987_v59  ;;  %v113_v18 = vld [vmem:[%s5783_s1 + $0x300] sm:$0xff]  ;;  %v159_v19 = vld [vmem:[%s5783_s1 + $0x470] sm:$0xff]  ;;  %v3019_v21 = vpack.c.bf16 %v162_v13, %v116_v12  ;;  %v206_v23 = vld [vmem:[%s5783_s1 + $0x5e8] sm:$0xff] }
  0x14   :  { %v115_v20 = vld [vmem:[%s5783_s1 + $0x310] sm:$0xff]  ;;  %v161_v22 = vld [vmem:[%s5783_s1 + $0x480] sm:$0xff]  ;;  %v252_v24 = vld [vmem:[%s5783_s1 + $0x758] sm:$0xff]  ;;  %v2999_v27 = vpack.c.bf16 %v159_v19, %v113_v18 }
  0x15   :  { %2970 = vmatpush1.bf16.msk.msra.mxu0 %vm3603_vm2, %v2968_v1  ;;  %v208_v25 = vld [vmem:[%s5783_s1 + $0x5f8] sm:$0xff]  ;;  %v254_v26 = vld [vmem:[%s5783_s1 + $0x768] sm:$0xff]  ;;  %v205_v28 = vld [vmem:[%s5783_s1 + $0x5e0] sm:$0xff]  ;;  %v3021_v29 = vpack.c.bf16 %v161_v22, %v115_v20  ;;  %v3001_v30 = vpack.c.bf16 %v252_v24, %v206_v23 }
  0x16   :  { %2992 = vmatpush1.bf16.msk.msra.mxu1 %vm3603_vm2, %v2990_v2  ;;  %2994 = vmatprep.subr.bf16.mxu0 %v2993_v4  ;;  %v251_v31 = vld [vmem:[%s5783_s1 + $0x750] sm:$0xff]  ;;  %v3711_v33 = vld [vmem:[%s5784_s0 + $0x8] sm:$0xff]  ;;  %v3023_v34 = vpack.c.bf16 %v254_v26, %v208_v25  ;;  %v253_v35 = vld [vmem:[%s5783_s1 + $0x760] sm:$0xff] }
  0x17   :  { %3016 = vmatprep.subr.bf16.mxu1 %v3015_v8  ;;  %v207_v32 = vld [vmem:[%s5783_s1 + $0x5f0] sm:$0xff]  ;;  %v298_v36 = vld [vmem:[%s5783_s1 + $0x8c8] sm:$0xff]  ;;  %v344_v37 = vld [vmem:[%s5783_s1 + $0xa38] sm:$0xff]  ;;  %v3003_v40 = vpack.c.bf16 %v251_v31, %v205_v28 }
  0x18   :  { %2836 = vmatmul.mubr.msk.f32.vlgmr.msra.gmra.mrb[0].mxu0 %vm495_vm3, %v3667_v14  ;;  %v300_v38 = vld [vmem:[%s5783_s1 + $0x8d8] sm:$0xff]  ;;  %v346_v39 = vld [vmem:[%s5783_s1 + $0xa48] sm:$0xff]  ;;  %v297_v41 = vld [vmem:[%s5783_s1 + $0x8c0] sm:$0xff]  ;;  %v3025_v42 = vpack.c.bf16 %v253_v35, %v207_v32  ;;  %v3005_v43 = vpack.c.bf16 %v344_v37, %v298_v36 }
  0x19   :  { %2841 = vmatmul.mubr.msk.f32.vlgmr.msra.gmra.mrb[0].mxu1 %vm495_vm3, %v3667_v14  ;;  %2996 = vmatpush1.bf16.msra.mxu0 %v2995_v15  ;;  %v343_v44 = vld [vmem:[%s5783_s1 + $0xa30] sm:$0xff]  ;;  %v3027_v47 = vpack.c.bf16 %v346_v39, %v300_v38  ;;  %v345_v48 = vld [vmem:[%s5783_s1 + $0xa40] sm:$0xff]  ;;  %v390_v49 = vld [vmem:[%s5783_s1 + $0xba8] sm:$0xff] }
  0x1a   :  { %3018 = vmatpush1.bf16.msra.mxu1 %v3017_v16  ;;  %2998 = vmatprep.subr.bf16.mxu0 %v2997_v17  ;;  %v299_v45 = vld [vmem:[%s5783_s1 + $0x8d0] sm:$0xff]  ;;  %v436_v50 = vld [vmem:[%s5783_s1 + $0xd18] sm:$0x7]  ;;  %v438_v53 = vld [vmem:[%s5783_s1 + $0xd28] sm:$0x7]  ;;  %v3007_v54 = vpack.c.bf16 %v343_v44, %v297_v41 }
  0x1b   :  { %3020 = vmatprep.subr.bf16.mxu1 %v3019_v21  ;;  %797 = vmatprep.mubr.f32.mxu1 %v3473_v3  ;;  %v3744_v46 = vld [vmem:[%s5784_s0 + $0x10] sm:$0xff]  ;;  %v392_v51 = vld [vmem:[%s5783_s1 + $0xbb8] sm:$0xff]  ;;  %v3029_v55 = vpack.c.bf16 %v345_v48, %v299_v45  ;;  %v3009_v56 = vpack.c.bf16 %v436_v50, %v390_v49  ;;  %v389_v57 = vld [vmem:[%s5783_s1 + $0xba0] sm:$0xff] }
  0x1c   :  { %714 = vmatprep.mubr.f32.mxu0 %v3473_v3  ;;  %v435_v58 = vld [vmem:[%s5783_s1 + $0xd10] sm:$0x7]  ;;  %v3031_v60 = vpack.c.bf16 %v438_v53, %v392_v51  ;;  %v437_v61 = vld [vmem:[%s5783_s1 + $0xd20] sm:$0x7]  ;;  %v26_v62 = vld [vmem:[%s5783_s1 + $0x48] sm:$0xff] }
  0x1d   :  { %3000 = vmatpush1.bf16.msra.mxu0 %v2999_v27  ;;  %2842 = vmatmul.mubr.msk.f32.gmra.mrb[2].mxu1 %vm495_vm3, %v3711_v33  ;;  %v391_v59 = vld [vmem:[%s5783_s1 + $0xbb0] sm:$0xff]  ;;  %v72_v63 = vld [vmem:[%s5783_s1 + $0x1b8] sm:$0xff]  ;;  %v74_v1 = vld [vmem:[%s5783_s1 + $0x1c8] sm:$0xff]  ;;  %v3012_v2 = vpack.c.bf16 %v435_v58, %v389_v57 }
  0x1e   :  { %3022 = vmatpush1.bf16.msra.mxu1 %v3021_v29  ;;  %3002 = vmatprep.subr.bf16.mxu0 %v3001_v30  ;;  %v28_v0 = vld [vmem:[%s5783_s1 + $0x58] sm:$0xff]  ;;  %v3034_v4 = vpack.c.bf16 %v437_v61, %v391_v59  ;;  %v3037_v5 = vpack.c.bf16 %v72_v63, %v26_v62  ;;  %v25_v6 = vld [vmem:[%s5783_s1 + $0x40] sm:$0xff]  ;;  %v71_v7 = vld [vmem:[%s5783_s1 + $0x1b0] sm:$0xff] }
  0x1f   :  { %3024 = vmatprep.subr.bf16.mxu1 %v3023_v34  ;;  %2837 = vmatmul.mubr.msk.f32.gmra.mrb[2].mxu0 %vm495_vm3, %v3711_v33  ;;  %v27_v8 = vld [vmem:[%s5783_s1 + $0x50] sm:$0xff]  ;;  %v3059_v9 = vpack.c.bf16 %v74_v1, %v28_v0  ;;  %v73_v10 = vld [vmem:[%s5783_s1 + $0x1c0] sm:$0xff]  ;;  %v118_v11 = vld [vmem:[%s5783_s1 + $0x328] sm:$0xff]  ;;  %v3039_v16 = vpack.c.bf16 %v71_v7, %v25_v6 }
  0x20   :  { %803 = vmatprep.mubr.f32.mxu1 %v3473_v3  ;;  %720 = vmatprep.mubr.f32.mxu0 %v3473_v3  ;;  %v164_v12 = vld [vmem:[%s5783_s1 + $0x498] sm:$0xff]  ;;  %v166_v15 = vld [vmem:[%s5783_s1 + $0x4a8] sm:$0xff]  ;;  %v3061_v17 = vpack.c.bf16 %v73_v10, %v27_v8  ;;  %v117_v19 = vld [vmem:[%s5783_s1 + $0x320] sm:$0xff] }
  0x21   :  { %3004 = vmatpush1.bf16.msra.mxu0 %v3003_v40  ;;  %2843 = vmatmul.mubr.msk.f32.gmra.mrb[4].mxu1 %vm495_vm3, %v3744_v46  ;;  %v120_v13 = vld [vmem:[%s5783_s1 + $0x338] sm:$0xff]  ;;  %v3041_v18 = vpack.c.bf16 %v164_v12, %v118_v11  ;;  %v163_v20 = vld [vmem:[%s5783_s1 + $0x490] sm:$0xff]  ;;  %v165_v23 = vld [vmem:[%s5783_s1 + $0x4a0] sm:$0xff] }
  0x22   :  { %3026 = vmatpush1.bf16.msra.mxu1 %v3025_v42  ;;  %3006 = vmatprep.subr.bf16.mxu0 %v3005_v43  ;;  %v119_v21 = vld [vmem:[%s5783_s1 + $0x330] sm:$0xff]  ;;  %v3063_v22 = vpack.c.bf16 %v166_v15, %v120_v13  ;;  %v210_v24 = vld [vmem:[%s5783_s1 + $0x608] sm:$0xff]  ;;  %v256_v25 = vld [vmem:[%s5783_s1 + $0x778] sm:$0xff]  ;;  %v3043_v28 = vpack.c.bf16 %v163_v20, %v117_v19 }
  0x23   :  { %3028 = vmatprep.subr.bf16.mxu1 %v3027_v47  ;;  %2838 = vmatmul.mubr.msk.f32.gmra.mrb[4].mxu0 %vm495_vm3, %v3744_v46  ;;  %v212_v26 = vld [vmem:[%s5783_s1 + $0x618] sm:$0xff]  ;;  %v258_v27 = vld [vmem:[%s5783_s1 + $0x788] sm:$0xff]  ;;  %v3065_v29 = vpack.c.bf16 %v165_v23, %v119_v21  ;;  %v3045_v30 = vpack.c.bf16 %v256_v25, %v210_v24  ;;  %v209_v31 = vld [vmem:[%s5783_s1 + $0x600] sm:$0xff] }
  0x24   :  { %957 = vmatprep.mubr.f32.mxu1 %v3473_v3  ;;  %874 = vmatprep.mubr.f32.mxu0 %v3473_v3  ;;  %v255_v32 = vld [vmem:[%s5783_s1 + $0x770] sm:$0xff]  ;;  %v3067_v35 = vpack.c.bf16 %v258_v27, %v212_v26  ;;  %v257_v36 = vld [vmem:[%s5783_s1 + $0x780] sm:$0xff]  ;;  %v302_v37 = vld [vmem:[%s5783_s1 + $0x8e8] sm:$0xff] }
  0x25   :  { %3008 = vmatpush1.bf16.msra.mxu0 %v3007_v54  ;;  %v211_v34 = vld [vmem:[%s5783_s1 + $0x610] sm:$0xff]  ;;  %v348_v38 = vld [vmem:[%s5783_s1 + $0xa58] sm:$0xff]  ;;  %v350_v40 = vld [vmem:[%s5783_s1 + $0xa68] sm:$0xff]  ;;  %v3047_v41 = vpack.c.bf16 %v255_v32, %v209_v31 }
  0x26   :  { %3030 = vmatpush1.bf16.msra.mxu1 %v3029_v55  ;;  %3011 = vmatprep.subr.msk.bf16.mxu0 %vm3603_vm2, %v3009_v56  ;;  %v304_v39 = vld [vmem:[%s5783_s1 + $0x8f8] sm:$0xff]  ;;  %v3069_v42 = vpack.c.bf16 %v257_v36, %v211_v34  ;;  %v3049_v43 = vpack.c.bf16 %v348_v38, %v302_v37  ;;  %v301_v44 = vld [vmem:[%s5783_s1 + $0x8e0] sm:$0xff]  ;;  %v347_v45 = vld [vmem:[%s5783_s1 + $0xa50] sm:$0xff] }
  0x27   :  { %3033 = vmatprep.subr.msk.bf16.mxu1 %vm3603_vm2, %v3031_v60  ;;  %v303_v47 = vld [vmem:[%s5783_s1 + $0x8f0] sm:$0xff]  ;;  %v3071_v48 = vpack.c.bf16 %v350_v40, %v304_v39  ;;  %v349_v49 = vld [vmem:[%s5783_s1 + $0xa60] sm:$0xff]  ;;  %v394_v50 = vld [vmem:[%s5783_s1 + $0xbc8] sm:$0xff]  ;;  %v3051_v55 = vpack.c.bf16 %v347_v45, %v301_v44 }
  0x28   :  { %v440_v51 = vld [vmem:[%s5783_s1 + $0xd38] sm:$0x7]  ;;  %v442_v54 = vld [vmem:[%s5783_s1 + $0xd48] sm:$0x7]  ;;  %v3073_v56 = vpack.c.bf16 %v349_v49, %v303_v47  ;;  %v393_v58 = vld [vmem:[%s5783_s1 + $0xbc0] sm:$0xff] }
  0x29   :  { %3014 = vmatpush1.bf16.msk.msra.mxu0 %vm3603_vm2, %v3012_v2  ;;  %v396_v53 = vld [vmem:[%s5783_s1 + $0xbd8] sm:$0xff]  ;;  %v3053_v57 = vpack.c.bf16 %v440_v51, %v394_v50  ;;  %v439_v59 = vld [vmem:[%s5783_s1 + $0xd30] sm:$0x7]  ;;  %v441_v62 = vld [vmem:[%s5783_s1 + $0xd40] sm:$0x7] }
  0x2a   :  { %3036 = vmatpush1.bf16.msk.msra.mxu1 %vm3603_vm2, %v3034_v4  ;;  %3038 = vmatprep.subr.bf16.mxu0 %v3037_v5  ;;  %v395_v60 = vld [vmem:[%s5783_s1 + $0xbd0] sm:$0xff]  ;;  %v3075_v61 = vpack.c.bf16 %v442_v54, %v396_v53  ;;  %v30_v63 = vld [vmem:[%s5783_s1 + $0x68] sm:$0xff]  ;;  %v76_v0 = vld [vmem:[%s5783_s1 + $0x1d8] sm:$0xff]  ;;  %v3056_v4 = vpack.c.bf16 %v439_v59, %v393_v58 }
  0x2b   :  { %3060 = vmatprep.subr.bf16.mxu1 %v3059_v9  ;;  %v32_v1 = vld [vmem:[%s5783_s1 + $0x78] sm:$0xff]  ;;  %v78_v2 = vld [vmem:[%s5783_s1 + $0x1e8] sm:$0xff]  ;;  %v3078_v5 = vpack.c.bf16 %v441_v62, %v395_v60  ;;  %v3081_v6 = vpack.c.bf16 %v76_v0, %v30_v63  ;;  %v29_v7 = vld [vmem:[%s5783_s1 + $0x60] sm:$0xff] }
  0x2c   :  { %2846 = vmatmul.mubr.msk.f32.vlgmr.msra.gmra.mrb[6].mxu0 %vm495_vm3, %v3667_v14  ;;  %v75_v8 = vld [vmem:[%s5783_s1 + $0x1d0] sm:$0xff]  ;;  %v3103_v10 = vpack.c.bf16 %v78_v2, %v32_v1  ;;  %v77_v11 = vld [vmem:[%s5783_s1 + $0x1e0] sm:$0xff]  ;;  %v122_v12 = vld [vmem:[%s5783_s1 + $0x348] sm:$0xff] }
  0x2d   :  { %2851 = vmatmul.mubr.msk.f32.vlgmr.msra.gmra.mrb[6].mxu1 %vm495_vm3, %v3667_v14  ;;  %3040 = vmatpush1.bf16.msra.mxu0 %v3039_v16  ;;  %v31_v9 = vld [vmem:[%s5783_s1 + $0x70] sm:$0xff]  ;;  %v168_v13 = vld [vmem:[%s5783_s1 + $0x4b8] sm:$0xff]  ;;  %v170_v16 = vld [vmem:[%s5783_s1 + $0x4c8] sm:$0xff] }
  0x2e   :  { %3062 = vmatpush1.bf16.msra.mxu1 %v3061_v17  ;;  %3042 = vmatprep.subr.bf16.mxu0 %v3041_v18  ;;  %v124_v15 = vld [vmem:[%s5783_s1 + $0x358] sm:$0xff]  ;;  %v3083_v17 = vpack.c.bf16 %v75_v8, %v29_v7  ;;  %v3105_v18 = vpack.c.bf16 %v77_v11, %v31_v9  ;;  %v3085_v19 = vpack.c.bf16 %v168_v13, %v122_v12  ;;  %v121_v20 = vld [vmem:[%s5783_s1 + $0x340] sm:$0xff]  ;;  %v167_v21 = vld [vmem:[%s5783_s1 + $0x4b0] sm:$0xff] }
  0x2f   :  { %3064 = vmatprep.subr.bf16.mxu1 %v3063_v22  ;;  %963 = vmatprep.mubr.f32.mxu1 %v3473_v3  ;;  %v123_v22 = vld [vmem:[%s5783_s1 + $0x350] sm:$0xff]  ;;  %v3107_v23 = vpack.c.bf16 %v170_v16, %v124_v15  ;;  %v169_v24 = vld [vmem:[%s5783_s1 + $0x4c0] sm:$0xff]  ;;  %v214_v25 = vld [vmem:[%s5783_s1 + $0x628] sm:$0xff] }
  0x30   :  { %880 = vmatprep.mubr.f32.mxu0 %v3473_v3  ;;  %v260_v26 = vld [vmem:[%s5783_s1 + $0x798] sm:$0xff]  ;;  %v213_v32 = vld [vmem:[%s5783_s1 + $0x620] sm:$0xff]  ;;  %v259_v34 = vld [vmem:[%s5783_s1 + $0x790] sm:$0xff] }
  0x31   :  { %3044 = vmatpush1.bf16.msra.mxu0 %v3043_v28  ;;  %2852 = vmatmul.mubr.msk.f32.gmra.mrb[8].mxu1 %vm495_vm3, %v3711_v33  ;;  %v216_v27 = vld [vmem:[%s5783_s1 + $0x638] sm:$0xff]  ;;  %v262_v28 = vld [vmem:[%s5783_s1 + $0x7a8] sm:$0xff]  ;;  %v3089_v31 = vpack.c.bf16 %v260_v26, %v214_v25  ;;  %v261_v37 = vld [vmem:[%s5783_s1 + $0x7a0] sm:$0xff] }
  0x32   :  { %3066 = vmatpush1.bf16.msra.mxu1 %v3065_v29  ;;  %3046 = vmatprep.subr.bf16.mxu0 %v3045_v30  ;;  %v3087_v29 = vpack.c.bf16 %v167_v21, %v121_v20  ;;  %v3109_v30 = vpack.c.bf16 %v169_v24, %v123_v22  ;;  %v3111_v36 = vpack.c.bf16 %v262_v28, %v216_v27  ;;  %v306_v38 = vld [vmem:[%s5783_s1 + $0x908] sm:$0xff]  ;;  %v352_v39 = vld [vmem:[%s5783_s1 + $0xa78] sm:$0xff]  ;;  %v305_v45 = vld [vmem:[%s5783_s1 + $0x900] sm:$0xff] }
  0x33   :  { %3068 = vmatprep.subr.bf16.mxu1 %v3067_v35  ;;  %2847 = vmatmul.mubr.msk.f32.gmra.mrb[8].mxu0 %vm495_vm3, %v3711_v33  ;;  %v215_v35 = vld [vmem:[%s5783_s1 + $0x630] sm:$0xff]  ;;  %v308_v40 = vld [vmem:[%s5783_s1 + $0x918] sm:$0xff]  ;;  %v3093_v44 = vpack.c.bf16 %v352_v39, %v306_v38  ;;  %v353_v50 = vld [vmem:[%s5783_s1 + $0xa80] sm:$0xff] }
  0x34   :  { %969 = vmatprep.mubr.f32.mxu1 %v3473_v3  ;;  %886 = vmatprep.mubr.f32.mxu0 %v3473_v3  ;;  %v351_v47 = vld [vmem:[%s5783_s1 + $0xa70] sm:$0xff]  ;;  %v398_v51 = vld [vmem:[%s5783_s1 + $0xbe8] sm:$0xff]  ;;  %v444_v53 = vld [vmem:[%s5783_s1 + $0xd58] sm:$0x7] }
  0x35   :  { %3048 = vmatpush1.bf16.msra.mxu0 %v3047_v41  ;;  %2853 = vmatmul.mubr.msk.f32.gmra.mrb[10].mxu1 %vm495_vm3, %v3744_v46  ;;  %v354_v41 = vld [vmem:[%s5783_s1 + $0xa88] sm:$0xff]  ;;  %v400_v54 = vld [vmem:[%s5783_s1 + $0xbf8] sm:$0xff]  ;;  %v3097_v59 = vpack.c.bf16 %v444_v53, %v398_v51  ;;  %v443_v60 = vld [vmem:[%s5783_s1 + $0xd50] sm:$0x7] }
  0x36   :  { %3070 = vmatpush1.bf16.msra.mxu1 %v3069_v42  ;;  %3050 = vmatprep.subr.bf16.mxu0 %v3049_v43  ;;  %v3091_v42 = vpack.c.bf16 %v259_v34, %v213_v32  ;;  %v3113_v43 = vpack.c.bf16 %v261_v37, %v215_v35  ;;  %v3115_v49 = vpack.c.bf16 %v354_v41, %v308_v40  ;;  %v477_v62 = vld [vmem:[%s5785_s2] sm:$0xff]  ;;  %v34_v1 = vld [vmem:[%s5783_s1 + $0x88] sm:$0xff]  ;;  %v80_v2 = vld [vmem:[%s5783_s1 + $0x1f8] sm:$0xff] }
  0x37   :  { %3072 = vmatprep.subr.bf16.mxu1 %v3071_v48  ;;  %2848 = vmatmul.mubr.msk.f32.gmra.mrb[10].mxu0 %vm495_vm3, %v3744_v46  ;;  %v307_v48 = vld [vmem:[%s5783_s1 + $0x910] sm:$0xff]  ;;  %v445_v0 = vld [vmem:[%s5783_s1 + $0xd60] sm:$0x7]  ;;  %v3125_v8 = vpack.c.bf16 %v80_v2, %v34_v1  ;;  %v126_v15 = vld [vmem:[%s5783_s1 + $0x368] sm:$0xff] }
  0x38   :  { %1123 = vmatprep.mubr.f32.mxu1 %v3473_v3  ;;  %1040 = vmatprep.mubr.f32.mxu0 %v3473_v3  ;;  %v3117_v58 = vpack.c.bf16 %v353_v50, %v307_v48  ;;  %v33_v9 = vld [vmem:[%s5783_s1 + $0x80] sm:$0xff]  ;;  %v35_v11 = vld [vmem:[%s5783_s1 + $0x90] sm:$0xff]  ;;  %v172_v16 = vld [vmem:[%s5783_s1 + $0x4d8] sm:$0xff] }
  0x39   :  { %3052 = vmatpush1.bf16.msra.mxu0 %v3051_v55  ;;  %v446_v55 = vld [vmem:[%s5783_s1 + $0xd68] sm:$0x7]  ;;  %482 = vperm.xlu0 %3468, %v477_v62   ;;  %v81_v13 = vld [vmem:[%s5783_s1 + $0x200] sm:$0xff]  ;;  %v3129_v22 = vpack.c.bf16 %v172_v16, %v126_v15  ;;  %v171_v24 = vld [vmem:[%s5783_s1 + $0x4d0] sm:$0xff] }
  0x3a   :  { %3074 = vmatpush1.bf16.msra.mxu1 %v3073_v56  ;;  %3055 = vmatprep.subr.msk.bf16.mxu0 %vm3603_vm2, %v3053_v57  ;;  %v3095_v56 = vpack.c.bf16 %v351_v47, %v305_v45  ;;  %v397_v57 = vld [vmem:[%s5783_s1 + $0xbe0] sm:$0xff]  ;;  %v3119_v63 = vpack.c.bf16 %v446_v55, %v400_v54  ;;  %v478_v20 = vld [vmem:[%s5785_s2 + $0x8] sm:$0xff]  ;;  %v3149_v21 = vpack.c.bf16 %v81_v13, %v35_v11  ;;  %v127_v25 = vld [vmem:[%s5783_s1 + $0x370] sm:$0xff] }
  0x3b   :  { %3077 = vmatprep.subr.msk.bf16.mxu1 %vm3603_vm2, %v3075_v61  ;;  %v399_v61 = vld [vmem:[%s5783_s1 + $0xbf0] sm:$0xff]  ;;  %v173_v27 = vld [vmem:[%s5783_s1 + $0x4e0] sm:$0xff]  ;;  %v218_v28 = vld [vmem:[%s5783_s1 + $0x648] sm:$0xff] }
  0x3c   :  { %v3122_v7 = vpack.c.bf16 %v445_v0, %v399_v61  ;;  %v479_v34 = vld [vmem:[%s5785_s2 + $0x10] sm:$0xff]  ;;  %v3153_v35 = vpack.c.bf16 %v173_v27, %v127_v25  ;;  %v217_v37 = vld [vmem:[%s5783_s1 + $0x640] sm:$0xff]  ;;  %v358_v45 = vld [vmem:[%s5783_s1 + $0xaa8] sm:$0xff] }
  0x3d   :  { %3058 = vmatpush1.bf16.msk.msra.mxu0 %vm3603_vm2, %v3056_v4  ;;  %v36_v4 = vld [vmem:[%s5783_s1 + $0x98] sm:$0xff]  ;;  %487 = vperm.xlu0 %3468, %v478_v20   ;;  %v263_v38 = vld [vmem:[%s5783_s1 + $0x7b0] sm:$0xff]  ;;  %v265_v41 = vld [vmem:[%s5783_s1 + $0x7c0] sm:$0xff] }
  0x3e   :  { %3080 = vmatpush1.bf16.msk.msra.mxu1 %vm3603_vm2, %v3078_v5  ;;  %3082 = vmatprep.subr.bf16.mxu0 %v3081_v6  ;;  %v82_v5 = vld [vmem:[%s5783_s1 + $0x208] sm:$0xff]  ;;  %v3100_v6 = vpack.c.bf16 %v443_v60, %v397_v57  ;;  %v219_v39 = vld [vmem:[%s5783_s1 + $0x650] sm:$0xff]  ;;  %v3135_v47 = vpack.c.bf16 %v263_v38, %v217_v37  ;;  %v309_v50 = vld [vmem:[%s5783_s1 + $0x920] sm:$0xff] }
  0x3f   :  { %3104 = vmatprep.subr.bf16.mxu1 %v3103_v10  ;;  %v79_v10 = vld [vmem:[%s5783_s1 + $0x1f0] sm:$0xff]  ;;  %v3147_v12 = vpack.c.bf16 %v82_v5, %v36_v4  ;;  %492 = vperm.xlu1 %3469, %v479_v34   ;;  %v3157_v48 = vpack.c.bf16 %v265_v41, %v219_v39  ;;  %v357_v55 = vld [vmem:[%s5783_s1 + $0xaa0] sm:$0xff]  ;;  %v448_v57 = vld [vmem:[%s5783_s1 + $0xd78] sm:$0x7] }
  0x40   :  { %2856 = vmatmul.mubr.msk.f32.vlgmr.msra.gmra.mrb[12].mxu0 %vm495_vm3, %v3667_v14  ;;  %v355_v51 = vld [vmem:[%s5783_s1 + $0xa90] sm:$0xff]  ;;  %v449_v4 = vld [vmem:[%s5783_s1 + $0xd80] sm:$0x7]  ;;  %v38_v5 = vld [vmem:[%s5783_s1 + $0xa8] sm:$0xff] }
  0x41   :  { %2861 = vmatmul.mubr.msk.f32.vlgmr.msra.gmra.mrb[12].mxu1 %vm495_vm3, %v3667_v14  ;;  %3084 = vmatpush1.bf16.msra.mxu0 %v3083_v17  ;;  %v128_v17 = vld [vmem:[%s5783_s1 + $0x378] sm:$0xff]  ;;  %v311_v53 = vld [vmem:[%s5783_s1 + $0x930] sm:$0xff]  ;;  %v3139_v60 = vpack.c.bf16 %v355_v51, %v309_v50  ;;  %v129_v25 = vld [vmem:[%s5783_s1 + $0x380] sm:$0xff] }
  0x42   :  { %3106 = vmatpush1.bf16.msra.mxu1 %v3105_v18  ;;  %3086 = vmatprep.subr.bf16.mxu0 %v3085_v19  ;;  %v174_v18 = vld [vmem:[%s5783_s1 + $0x4e8] sm:$0xff]  ;;  %v3127_v19 = vpack.c.bf16 %v79_v10, %v33_v9  ;;  %v3161_v61 = vpack.c.bf16 %v357_v55, %v311_v53  ;;  %v447_v0 = vld [vmem:[%s5783_s1 + $0xd70] sm:$0x7]  ;;  %v132_v20 = vld [vmem:[%s5783_s1 + $0x398] sm:$0xff] }
  0x43   :  { %3108 = vmatprep.subr.bf16.mxu1 %v3107_v23  ;;  %1129 = vmatprep.mubr.f32.mxu1 %v3473_v3  ;;  %v125_v23 = vld [vmem:[%s5783_s1 + $0x360] sm:$0xff]  ;;  %v3151_v26 = vpack.c.bf16 %v174_v18, %v128_v17  ;;  %v403_v1 = vld [vmem:[%s5783_s1 + $0xc10] sm:$0xff]  ;;  %v130_v18 = vld [vmem:[%s5783_s1 + $0x388] sm:$0xff] }
  0x44   :  { %1046 = vmatprep.mubr.f32.mxu0 %v3473_v3  ;;  %v3131_v32 = vpack.c.bf16 %v171_v24, %v125_v23  ;;  %v3166_v10 = vpack.c.bf16 %v449_v4, %v403_v1  ;;  %v83_v13 = vld [vmem:[%s5783_s1 + $0x210] sm:$0xff]  ;;  %v85_v17 = vld [vmem:[%s5783_s1 + $0x220] sm:$0xff]  ;;  %v270_v34 = vld [vmem:[%s5783_s1 + $0x7e8] sm:$0xff] }
  0x45   :  { %3088 = vmatpush1.bf16.msra.mxu0 %v3087_v29  ;;  %2862 = vmatmul.mubr.msk.f32.gmra.mrb[14].mxu1 %vm495_vm3, %v3711_v33  ;;  %v264_v29 = vld [vmem:[%s5783_s1 + $0x7b8] sm:$0xff]  ;;  %v39_v15 = vld [vmem:[%s5783_s1 + $0xb0] sm:$0xff]  ;;  %v221_v38 = vld [vmem:[%s5783_s1 + $0x660] sm:$0xff] }
  0x46   :  { %3110 = vmatpush1.bf16.msra.mxu1 %v3109_v30  ;;  %3090 = vmatprep.subr.bf16.mxu0 %v3089_v31  ;;  %v220_v30 = vld [vmem:[%s5783_s1 + $0x658] sm:$0xff]  ;;  %v266_v31 = vld [vmem:[%s5783_s1 + $0x7c8] sm:$0xff]  ;;  %v3193_v23 = vpack.c.bf16 %v85_v17, %v39_v15  ;;  %v131_v27 = vld [vmem:[%s5783_s1 + $0x390] sm:$0xff] }
  0x47   :  { %3112 = vmatprep.subr.bf16.mxu1 %v3111_v36  ;;  %2857 = vmatmul.mubr.msk.f32.gmra.mrb[14].mxu0 %vm495_vm3, %v3711_v33  ;;  %v3133_v36 = vpack.c.bf16 %v264_v29, %v218_v28  ;;  %v3155_v40 = vpack.c.bf16 %v266_v31, %v220_v30  ;;  %v177_v29 = vld [vmem:[%s5783_s1 + $0x500] sm:$0xff]  ;;  %v222_v30 = vld [vmem:[%s5783_s1 + $0x668] sm:$0xff]  ;;  %v268_v31 = vld [vmem:[%s5783_s1 + $0x7d8] sm:$0xff] }
  0x48   :  { %1135 = vmatprep.mubr.f32.mxu1 %v3473_v3  ;;  %1052 = vmatprep.mubr.f32.mxu0 %v3473_v3  ;;  %v3177_v37 = vpack.c.bf16 %v268_v31, %v222_v30  ;;  %v267_v39 = vld [vmem:[%s5783_s1 + $0x7d0] sm:$0xff]  ;;  %v313_v51 = vld [vmem:[%s5783_s1 + $0x940] sm:$0xff]  ;;  %v226_v31 = vld [vmem:[%s5783_s1 + $0x688] sm:$0xff] }
  0x49   :  { %3092 = vmatpush1.bf16.msra.mxu0 %v3091_v42  ;;  %2863 = vmatmul.mubr.msk.f32.gmra.mrb[16].mxu1 %vm495_vm3, %v3744_v46  ;;  %v310_v42 = vld [vmem:[%s5783_s1 + $0x928] sm:$0xff]  ;;  %v359_v53 = vld [vmem:[%s5783_s1 + $0xab0] sm:$0xff]  ;;  %v181_v30 = vld [vmem:[%s5783_s1 + $0x520] sm:$0xff] }
  0x4a   :  { %3114 = vmatpush1.bf16.msra.mxu1 %v3113_v43  ;;  %3094 = vmatprep.subr.bf16.mxu0 %v3093_v44  ;;  %v356_v43 = vld [vmem:[%s5783_s1 + $0xa98] sm:$0xff]  ;;  %v451_v1 = vld [vmem:[%s5783_s1 + $0xd90] sm:$0x7] }
  0x4b   :  { %3116 = vmatprep.subr.bf16.mxu1 %v3115_v49  ;;  %2858 = vmatmul.mubr.msk.f32.gmra.mrb[16].mxu0 %vm495_vm3, %v3744_v46  ;;  %v312_v44 = vld [vmem:[%s5783_s1 + $0x938] sm:$0xff]  ;;  %v3137_v49 = vpack.c.bf16 %v356_v43, %v310_v42  ;;  %v269_v42 = vld [vmem:[%s5783_s1 + $0x7e0] sm:$0xff]  ;;  %v314_v43 = vld [vmem:[%s5783_s1 + $0x948] sm:$0xff] }
  0x4c   :  { %1289 = vmatprep.mubr.f32.mxu1 %v3473_v3  ;;  %1206 = vmatprep.mubr.f32.mxu0 %v3473_v3  ;;  %v3159_v54 = vpack.c.bf16 %v358_v45, %v312_v44  ;;  %v360_v44 = vld [vmem:[%s5783_s1 + $0xab8] sm:$0xff]  ;;  %v87_v15 = vld [vmem:[%s5783_s1 + $0x230] sm:$0xff] }
  0x4d   :  { %3096 = vmatpush1.bf16.msra.mxu0 %v3095_v56  ;;  %v402_v56 = vld [vmem:[%s5783_s1 + $0xc08] sm:$0xff]  ;;  %v316_v45 = vld [vmem:[%s5783_s1 + $0x958] sm:$0xff]  ;;  %v3181_v50 = vpack.c.bf16 %v360_v44, %v314_v43 }
  0x4e   :  { %3118 = vmatpush1.bf16.msra.mxu1 %v3117_v58  ;;  %3099 = vmatprep.subr.msk.bf16.mxu0 %vm3603_vm2, %v3097_v59  ;;  %v404_v58 = vld [vmem:[%s5783_s1 + $0xc18] sm:$0xff]  ;;  %v450_v59 = vld [vmem:[%s5783_s1 + $0xd88] sm:$0x7]  ;;  %v3141_v62 = vpack.c.bf16 %v448_v57, %v402_v56  ;;  %v361_v56 = vld [vmem:[%s5783_s1 + $0xac0] sm:$0xff] }
  0x4f   :  { %3121 = vmatprep.subr.msk.bf16.mxu1 %vm3603_vm2, %v3119_v63  ;;  %v401_v63 = vld [vmem:[%s5783_s1 + $0xc00] sm:$0xff]  ;;  %v3163_v2 = vpack.c.bf16 %v450_v59, %v404_v58  ;;  %v406_v57 = vld [vmem:[%s5783_s1 + $0xc28] sm:$0xff]  ;;  %v452_v58 = vld [vmem:[%s5783_s1 + $0xd98] sm:$0x7] }
  0x50   :  { %v3144_v9 = vpack.c.bf16 %v447_v0, %v401_v63  ;;  %v408_v59 = vld [vmem:[%s5783_s1 + $0xc38] sm:$0xff]  ;;  %v3185_v63 = vpack.c.bf16 %v452_v58, %v406_v57  ;;  %v405_v0 = vld [vmem:[%s5783_s1 + $0xc20] sm:$0xff]  ;;  %v318_v43 = vld [vmem:[%s5783_s1 + $0x968] sm:$0xff] }
  0x51   :  { %3102 = vmatpush1.bf16.msk.msra.mxu0 %vm3603_vm2, %v3100_v6  ;;  %v84_v6 = vld [vmem:[%s5783_s1 + $0x218] sm:$0xff]  ;;  %v410_v57 = vld [vmem:[%s5783_s1 + $0xc48] sm:$0xff] }
  0x52   :  { %3124 = vmatpush1.bf16.msk.msra.mxu1 %vm3603_vm2, %v3122_v7  ;;  %3126 = vmatprep.subr.bf16.mxu0 %v3125_v8  ;;  %v40_v7 = vld [vmem:[%s5783_s1 + $0xb8] sm:$0xff]  ;;  %v86_v8 = vld [vmem:[%s5783_s1 + $0x228] sm:$0xff]  ;;  %v3169_v11 = vpack.c.bf16 %v84_v6, %v38_v5  ;;  %v453_v5 = vld [vmem:[%s5783_s1 + $0xda0] sm:$0x7] }
  0x53   :  { %3148 = vmatprep.subr.bf16.mxu1 %v3147_v12  ;;  %v37_v12 = vld [vmem:[%s5783_s1 + $0xa0] sm:$0xff]  ;;  %v3191_v16 = vpack.c.bf16 %v86_v8, %v40_v7  ;;  %v42_v6 = vld [vmem:[%s5783_s1 + $0xc8] sm:$0xff]  ;;  %v88_v7 = vld [vmem:[%s5783_s1 + $0x238] sm:$0xff] }
  0x54   :  { %2866 = vmatmul.mubr.msk.f32.vlgmr.msra.gmra.mrb[18].mxu0 %vm495_vm3, %v3667_v14  ;;  %v44_v8 = vld [vmem:[%s5783_s1 + $0xd8] sm:$0xff] }
  0x55   :  { %2871 = vmatmul.mubr.msk.f32.vlgmr.msra.gmra.mrb[18].mxu1 %vm495_vm3, %v3667_v14  ;;  %3128 = vmatpush1.bf16.msra.mxu0 %v3127_v19  ;;  %v176_v19 = vld [vmem:[%s5783_s1 + $0x4f8] sm:$0xff] }
  0x56   :  { %3150 = vmatpush1.bf16.msra.mxu1 %v3149_v21  ;;  %3130 = vmatprep.subr.bf16.mxu0 %v3129_v22  ;;  %v178_v21 = vld [vmem:[%s5783_s1 + $0x508] sm:$0xff]  ;;  %v3171_v22 = vpack.c.bf16 %v83_v13, %v37_v12  ;;  %v3173_v24 = vpack.c.bf16 %v176_v19, %v130_v18  ;;  %v3213_v12 = vpack.c.bf16 %v88_v7, %v42_v6  ;;  %v41_v13 = vld [vmem:[%s5783_s1 + $0xc0] sm:$0xff]  ;;  %v364_v44 = vld [vmem:[%s5783_s1 + $0xad8] sm:$0xff] }
  0x57   :  { %3152 = vmatprep.subr.bf16.mxu1 %v3151_v26  ;;  %1295 = vmatprep.mubr.f32.mxu1 %v3473_v3  ;;  %v175_v26 = vld [vmem:[%s5783_s1 + $0x4f0] sm:$0xff]  ;;  %v3195_v28 = vpack.c.bf16 %v178_v21, %v132_v20  ;;  %v89_v18 = vld [vmem:[%s5783_s1 + $0x240] sm:$0xff]  ;;  %v134_v19 = vld [vmem:[%s5783_s1 + $0x3a8] sm:$0xff] }
  0x58   :  { %1212 = vmatprep.mubr.f32.mxu0 %v3473_v3  ;;  %v180_v20 = vld [vmem:[%s5783_s1 + $0x518] sm:$0xff]  ;;  %v94_v7 = vld [vmem:[%s5783_s1 + $0x268] sm:$0xff] }
  0x59   :  { %3132 = vmatpush1.bf16.msra.mxu0 %v3131_v32  ;;  %2872 = vmatmul.mubr.msk.f32.gmra.mrb[20].mxu1 %vm495_vm3, %v3711_v33  ;;  %v224_v32 = vld [vmem:[%s5783_s1 + $0x678] sm:$0xff] }
  0x5a   :  { %3154 = vmatpush1.bf16.msra.mxu1 %v3153_v35  ;;  %3134 = vmatprep.subr.bf16.mxu0 %v3133_v36  ;;  %v3175_v35 = vpack.c.bf16 %v175_v26, %v129_v25  ;;  %v3197_v36 = vpack.c.bf16 %v177_v29, %v131_v27  ;;  %v3199_v41 = vpack.c.bf16 %v270_v34, %v224_v32  ;;  %v136_v21 = vld [vmem:[%s5783_s1 + $0x3b8] sm:$0xff]  ;;  %v133_v26 = vld [vmem:[%s5783_s1 + $0x3a0] sm:$0xff]  ;;  %v179_v27 = vld [vmem:[%s5783_s1 + $0x510] sm:$0xff] }
  0x5b   :  { %3156 = vmatprep.subr.bf16.mxu1 %v3155_v40  ;;  %2867 = vmatmul.mubr.msk.f32.gmra.mrb[20].mxu0 %vm495_vm3, %v3711_v33  ;;  %v223_v40 = vld [vmem:[%s5783_s1 + $0x670] sm:$0xff]  ;;  %v3217_v25 = vpack.c.bf16 %v180_v20, %v134_v19  ;;  %v272_v32 = vld [vmem:[%s5783_s1 + $0x7f8] sm:$0xff]  ;;  %v186_v20 = vld [vmem:[%s5783_s1 + $0x548] sm:$0xff] }
  0x5c   :  { %1301 = vmatprep.mubr.f32.mxu1 %v3473_v3  ;;  %1218 = vmatprep.mubr.f32.mxu0 %v3473_v3  ;;  %v228_v34 = vld [vmem:[%s5783_s1 + $0x698] sm:$0xff] }
  0x5d   :  { %3136 = vmatpush1.bf16.msra.mxu0 %v3135_v47  ;;  %2873 = vmatmul.mubr.msk.f32.gmra.mrb[22].mxu1 %vm495_vm3, %v3744_v46  ;;  %v362_v47 = vld [vmem:[%s5783_s1 + $0xac8] sm:$0xff]  ;;  %v456_v58 = vld [vmem:[%s5783_s1 + $0xdb8] sm:$0x7] }
  0x5e   :  { %3158 = vmatpush1.bf16.msra.mxu1 %v3157_v48  ;;  %3138 = vmatprep.subr.bf16.mxu0 %v3137_v49  ;;  %v3179_v48 = vpack.c.bf16 %v267_v39, %v221_v38  ;;  %v3201_v49 = vpack.c.bf16 %v269_v42, %v223_v40  ;;  %v3203_v55 = vpack.c.bf16 %v362_v47, %v316_v45  ;;  %v225_v39 = vld [vmem:[%s5783_s1 + $0x680] sm:$0xff]  ;;  %v271_v40 = vld [vmem:[%s5783_s1 + $0x7f0] sm:$0xff]  ;;  %v320_v45 = vld [vmem:[%s5783_s1 + $0x978] sm:$0xff] }
  0x5f   :  { %3160 = vmatprep.subr.bf16.mxu1 %v3159_v54  ;;  %2868 = vmatmul.mubr.msk.f32.gmra.mrb[22].mxu0 %vm495_vm3, %v3744_v46  ;;  %v315_v54 = vld [vmem:[%s5783_s1 + $0x950] sm:$0xff]  ;;  %v3221_v38 = vpack.c.bf16 %v272_v32, %v226_v31  ;;  %v273_v42 = vld [vmem:[%s5783_s1 + $0x800] sm:$0xff]  ;;  %v366_v47 = vld [vmem:[%s5783_s1 + $0xae8] sm:$0xff] }
  0x60   :  { %1455 = vmatprep.mubr.f32.mxu1 %v3473_v3  ;;  %1372 = vmatprep.mubr.f32.mxu0 %v3473_v3  ;;  %v92_v6 = vld [vmem:[%s5783_s1 + $0x258] sm:$0xff]  ;;  %v4587_v31 = vld [vmem:[%s5784_s0] sm:$0xff] }
  0x61   :  { %3140 = vmatpush1.bf16.msra.mxu0 %v3139_v60  ;;  %v454_v60 = vld [vmem:[%s5783_s1 + $0xda8] sm:$0x7]  ;;  %v140_v19 = vld [vmem:[%s5783_s1 + $0x3d8] sm:$0xff] }
  0x62   :  { %3162 = vmatpush1.bf16.msra.mxu1 %v3161_v61  ;;  %3143 = vmatprep.subr.msk.bf16.mxu0 %vm3603_vm2, %v3141_v62  ;;  %v3183_v61 = vpack.c.bf16 %v359_v53, %v313_v51  ;;  %v3205_v62 = vpack.c.bf16 %v361_v56, %v315_v54  ;;  %v3207_v4 = vpack.c.bf16 %v454_v60, %v408_v59  ;;  %v317_v51 = vld [vmem:[%s5783_s1 + $0x960] sm:$0xff]  ;;  %v363_v53 = vld [vmem:[%s5783_s1 + $0xad0] sm:$0xff]  ;;  %v458_v59 = vld [vmem:[%s5783_s1 + $0xdc8] sm:$0x7] }
  0x63   :  { %3165 = vmatprep.subr.msk.bf16.mxu1 %vm3603_vm2, %v3163_v2  ;;  %v407_v2 = vld [vmem:[%s5783_s1 + $0xc30] sm:$0xff]  ;;  %v365_v56 = vld [vmem:[%s5783_s1 + $0xae0] sm:$0xff]  ;;  %v3227_v60 = vpack.c.bf16 %v363_v53, %v317_v51  ;;  %v232_v32 = vld [vmem:[%s5783_s1 + $0x6b8] sm:$0xff] }
  0x64   :  { %v319_v54 = vld [vmem:[%s5783_s1 + $0x970] sm:$0xff]  ;;  %v321_v51 = vld [vmem:[%s5783_s1 + $0x980] sm:$0xff] }
  0x65   :  { %3146 = vmatpush1.bf16.msk.msra.mxu0 %vm3603_vm2, %v3144_v9  ;;  %v90_v9 = vld [vmem:[%s5783_s1 + $0x248] sm:$0xff]  ;;  %v367_v53 = vld [vmem:[%s5783_s1 + $0xaf0] sm:$0xff] }
  0x66   :  { %3168 = vmatpush1.bf16.msk.msra.mxu1 %vm3603_vm2, %v3166_v10  ;;  %3170 = vmatprep.subr.bf16.mxu0 %v3169_v11  ;;  %v3188_v10 = vpack.c.bf16 %v451_v1, %v405_v0  ;;  %v3210_v11 = vpack.c.bf16 %v453_v5, %v407_v2  ;;  %v3235_v17 = vpack.c.bf16 %v90_v9, %v44_v8  ;;  %v455_v0 = vld [vmem:[%s5783_s1 + $0xdb0] sm:$0x7]  ;;  %v46_v5 = vld [vmem:[%s5783_s1 + $0xe8] sm:$0xff] }
  0x67   :  { %3192 = vmatprep.subr.bf16.mxu1 %v3191_v16  ;;  %v43_v16 = vld [vmem:[%s5783_s1 + $0xd0] sm:$0xff] }
  0x68   :  { %2876 = vmatmul.mubr.msk.f32.vlgmr.msra.gmra.mrb[24].mxu0 %vm495_vm3, %v3667_v14  ;;  %v411_v1 = vld [vmem:[%s5783_s1 + $0xc50] sm:$0xff] }
  0x69   :  { %2881 = vmatmul.mubr.msk.f32.vlgmr.msra.gmra.mrb[24].mxu1 %vm495_vm3, %v3667_v14  ;;  %3172 = vmatpush1.bf16.msra.mxu0 %v3171_v22  ;;  %v182_v22 = vld [vmem:[%s5783_s1 + $0x528] sm:$0xff] }
  0x6a   :  { %3194 = vmatpush1.bf16.msra.mxu1 %v3193_v23  ;;  %3174 = vmatprep.subr.bf16.mxu0 %v3173_v24  ;;  %v3215_v23 = vpack.c.bf16 %v87_v15, %v41_v13  ;;  %v3237_v24 = vpack.c.bf16 %v89_v18, %v43_v16  ;;  %v3239_v29 = vpack.c.bf16 %v182_v22, %v136_v21  ;;  %v47_v13 = vld [vmem:[%s5783_s1 + $0xf0] sm:$0xff]  ;;  %v93_v16 = vld [vmem:[%s5783_s1 + $0x260] sm:$0xff]  ;;  %v184_v18 = vld [vmem:[%s5783_s1 + $0x538] sm:$0xff] }
  0x6b   :  { %3196 = vmatprep.subr.bf16.mxu1 %v3195_v28  ;;  %1461 = vmatprep.mubr.f32.mxu1 %v3473_v3  ;;  %v135_v28 = vld [vmem:[%s5783_s1 + $0x3b0] sm:$0xff]  ;;  %v3281_v22 = vpack.c.bf16 %v93_v16, %v47_v13 }
  0x6c   :  { %1378 = vmatprep.mubr.f32.mxu0 %v3473_v3  ;;  %v95_v13 = vld [vmem:[%s5783_s1 + $0x270] sm:$0xff] }
  0x6d   :  { %3176 = vmatpush1.bf16.msra.mxu0 %v3175_v35  ;;  %2882 = vmatmul.mubr.msk.f32.gmra.mrb[26].mxu1 %vm495_vm3, %v3711_v33  ;;  %v274_v35 = vld [vmem:[%s5783_s1 + $0x808] sm:$0xff] }
  0x6e   :  { %3198 = vmatpush1.bf16.msra.mxu1 %v3197_v36  ;;  %3178 = vmatprep.subr.bf16.mxu0 %v3177_v37  ;;  %v3219_v36 = vpack.c.bf16 %v179_v27, %v133_v26  ;;  %v3241_v37 = vpack.c.bf16 %v181_v30, %v135_v28  ;;  %v139_v26 = vld [vmem:[%s5783_s1 + $0x3d0] sm:$0xff]  ;;  %v3283_v27 = vpack.c.bf16 %v186_v20, %v140_v19  ;;  %v185_v28 = vld [vmem:[%s5783_s1 + $0x540] sm:$0xff]  ;;  %v276_v30 = vld [vmem:[%s5783_s1 + $0x818] sm:$0xff] }
  0x6f   :  { %3200 = vmatprep.subr.bf16.mxu1 %v3199_v41  ;;  %2877 = vmatmul.mubr.msk.f32.gmra.mrb[26].mxu0 %vm495_vm3, %v3711_v33  ;;  %v227_v41 = vld [vmem:[%s5783_s1 + $0x690] sm:$0xff]  ;;  %v188_v19 = vld [vmem:[%s5783_s1 + $0x558] sm:$0xff] }
  0x70   :  { %1467 = vmatprep.mubr.f32.mxu1 %v3473_v3  ;;  %1384 = vmatprep.mubr.f32.mxu0 %v3473_v3  ;;  %v144_v20 = vld [vmem:[%s5783_s1 + $0x3f8] sm:$0xff] }
  0x71   :  { %3180 = vmatpush1.bf16.msra.mxu0 %v3179_v48  ;;  %2883 = vmatmul.mubr.msk.f32.gmra.mrb[28].mxu1 %vm495_vm3, %v3744_v46  ;;  %v3223_v48 = vpack.c.bf16 %v271_v40, %v225_v39  ;;  %v275_v39 = vld [vmem:[%s5783_s1 + $0x810] sm:$0xff] }
  0x72   :  { %3202 = vmatpush1.bf16.msra.mxu1 %v3201_v49  ;;  %3182 = vmatprep.subr.bf16.mxu0 %v3181_v50  ;;  %v3245_v49 = vpack.c.bf16 %v273_v42, %v227_v41  ;;  %v3225_v50 = vpack.c.bf16 %v364_v44, %v318_v43  ;;  %v231_v40 = vld [vmem:[%s5783_s1 + $0x6b0] sm:$0xff]  ;;  %v322_v42 = vld [vmem:[%s5783_s1 + $0x988] sm:$0xff]  ;;  %v368_v43 = vld [vmem:[%s5783_s1 + $0xaf8] sm:$0xff] }
  0x73   :  { %3204 = vmatprep.subr.bf16.mxu1 %v3203_v55  ;;  %2878 = vmatmul.mubr.msk.f32.gmra.mrb[28].mxu0 %vm495_vm3, %v3744_v46  ;;  %v3247_v55 = vpack.c.bf16 %v366_v47, %v320_v45  ;;  %v324_v44 = vld [vmem:[%s5783_s1 + $0x998] sm:$0xff]  ;;  %v370_v45 = vld [vmem:[%s5783_s1 + $0xb08] sm:$0xff] }
  0x74   :  { %1621 = vmatprep.mubr.f32.mxu1 %v3473_v3  ;;  %1538 = vmatprep.mubr.f32.mxu0 %v3473_v3 }
  0x75   :  { %3184 = vmatpush1.bf16.msra.mxu0 %v3183_v61  ;;  %v3249_v61 = vpack.c.bf16 %v365_v56, %v319_v54  ;;  %v323_v54 = vld [vmem:[%s5783_s1 + $0x990] sm:$0xff]  ;;  %v369_v56 = vld [vmem:[%s5783_s1 + $0xb00] sm:$0xff] }
  0x76   :  { %3206 = vmatpush1.bf16.msra.mxu1 %v3205_v62  ;;  %3187 = vmatprep.subr.msk.bf16.mxu0 %vm3603_vm2, %v3185_v63  ;;  %v3229_v62 = vpack.c.bf16 %v456_v58, %v410_v57  ;;  %v409_v63 = vld [vmem:[%s5783_s1 + $0xc40] sm:$0xff]  ;;  %v414_v57 = vld [vmem:[%s5783_s1 + $0xc68] sm:$0xff]  ;;  %v460_v58 = vld [vmem:[%s5783_s1 + $0xdd8] sm:$0x7] }
  0x77   :  { %3209 = vmatprep.subr.msk.bf16.mxu1 %vm3603_vm2, %v3207_v4  ;;  %v457_v4 = vld [vmem:[%s5783_s1 + $0xdc0] sm:$0x7]  ;;  %v3232_v8 = vpack.c.bf16 %v455_v0, %v409_v63  ;;  %v3273_v63 = vpack.c.bf16 %v460_v58, %v414_v57  ;;  %v418_v58 = vld [vmem:[%s5783_s1 + $0xc88] sm:$0xff] }
  0x78   :  { %v3254_v9 = vpack.c.bf16 %v457_v4, %v411_v1  ;;  %v413_v0 = vld [vmem:[%s5783_s1 + $0xc60] sm:$0xff]  ;;  %v459_v1 = vld [vmem:[%s5783_s1 + $0xdd0] sm:$0x7] }
  0x79   :  { %3190 = vmatpush1.bf16.msk.msra.mxu0 %vm3603_vm2, %v3188_v10  ;;  %v3257_v10 = vpack.c.bf16 %v92_v6, %v46_v5  ;;  %v461_v5 = vld [vmem:[%s5783_s1 + $0xde0] sm:$0x7]  ;;  %v50_v6 = vld [vmem:[%s5783_s1 + $0x108] sm:$0xff] }
  0x7a   :  { %3212 = vmatpush1.bf16.msk.msra.mxu1 %vm3603_vm2, %v3210_v11  ;;  %3214 = vmatprep.subr.bf16.mxu0 %v3213_v12  ;;  %v45_v11 = vld [vmem:[%s5783_s1 + $0xe0] sm:$0xff]  ;;  %v91_v12 = vld [vmem:[%s5783_s1 + $0x250] sm:$0xff] }
  0x7b   :  { %3236 = vmatprep.subr.bf16.mxu1 %v3235_v17  ;;  %v138_v17 = vld [vmem:[%s5783_s1 + $0x3c8] sm:$0xff]  ;;  %v3259_v21 = vpack.c.bf16 %v91_v12, %v45_v11  ;;  %v49_v12 = vld [vmem:[%s5783_s1 + $0x100] sm:$0xff] }
  0x7c   :  { %2886 = vmatmul.mubr.msk.f32.vlgmr.msra.gmra.mrb[30].mxu0 %vm495_vm3, %v3667_v14  ;;  %v373_v57 = vld [vmem:[%s5783_s1 + $0xb20] sm:$0xff] }
  0x7d   :  { %2891 = vmatmul.mubr.msk.f32.vlgmr.msra.gmra.mrb[30].mxu1 %vm495_vm3, %v3667_v14  ;;  %3216 = vmatpush1.bf16.msra.mxu0 %v3215_v23  ;;  %v3243_v14 = vpack.c.bf16 %v274_v35, %v228_v34  ;;  %v3261_v23 = vpack.c.bf16 %v184_v18, %v138_v17  ;;  %v278_v34 = vld [vmem:[%s5783_s1 + $0x828] sm:$0xff]  ;;  %v97_v17 = vld [vmem:[%s5783_s1 + $0x280] sm:$0xff] }
  0x7e   :  { %3238 = vmatpush1.bf16.msra.mxu1 %v3237_v24  ;;  %3218 = vmatprep.subr.bf16.mxu0 %v3217_v25  ;;  %v137_v24 = vld [vmem:[%s5783_s1 + $0x3c0] sm:$0xff]  ;;  %v183_v25 = vld [vmem:[%s5783_s1 + $0x530] sm:$0xff]  ;;  %v3287_v41 = vpack.c.bf16 %v278_v34, %v232_v32  ;;  %v142_v18 = vld [vmem:[%s5783_s1 + $0x3e8] sm:$0xff] }
  0x7f   :  { %3240 = vmatprep.subr.bf16.mxu1 %v3239_v29  ;;  %1627 = vmatprep.mubr.f32.mxu1 %v3473_v3  ;;  %v230_v29 = vld [vmem:[%s5783_s1 + $0x6a8] sm:$0xff]  ;;  %v3263_v35 = vpack.c.bf16 %v183_v25, %v137_v24  ;;  %v3305_v24 = vpack.c.bf16 %v188_v19, %v142_v18  ;;  %v141_v25 = vld [vmem:[%s5783_s1 + $0x3e0] sm:$0xff]  ;;  %v280_v32 = vld [vmem:[%s5783_s1 + $0x838] sm:$0xff] }
  0x80   :  { %1544 = vmatprep.mubr.f32.mxu0 %v3473_v3  ;;  %v236_v34 = vld [vmem:[%s5783_s1 + $0x6d8] sm:$0xff]  ;;  %v101_v18 = vld [vmem:[%s5783_s1 + $0x2a0] sm:$0xff]  ;;  %v146_v19 = vld [vmem:[%s5783_s1 + $0x408] sm:$0xff] }
  0x81   :  { %3220 = vmatpush1.bf16.msra.mxu0 %v3219_v36  ;;  %2892 = vmatmul.mubr.msk.f32.gmra.mrb[32].mxu1 %vm495_vm3, %v3711_v33  ;;  %v3285_v36 = vpack.c.bf16 %v185_v28, %v139_v26  ;;  %v187_v26 = vld [vmem:[%s5783_s1 + $0x550] sm:$0xff] }
  0x82   :  { %3242 = vmatpush1.bf16.msra.mxu1 %v3241_v37  ;;  %3222 = vmatprep.subr.bf16.mxu0 %v3221_v38  ;;  %v3265_v37 = vpack.c.bf16 %v276_v30, %v230_v29  ;;  %v229_v38 = vld [vmem:[%s5783_s1 + $0x6a0] sm:$0xff]  ;;  %v234_v30 = vld [vmem:[%s5783_s1 + $0x6c8] sm:$0xff] }
  0x83   :  { %3244 = vmatprep.subr.bf16.mxu1 %v3243_v14  ;;  %2887 = vmatmul.mubr.msk.f32.gmra.mrb[32].mxu0 %vm495_vm3, %v3711_v33  ;;  %v412_v33 = vld [vmem:[%s5783_s1 + $0xc58] sm:$0xff]  ;;  %v277_v14 = vld [vmem:[%s5783_s1 + $0x820] sm:$0xff]  ;;  %v3267_v47 = vpack.c.bf16 %v275_v39, %v229_v38  ;;  %v3309_v38 = vpack.c.bf16 %v280_v32, %v234_v30  ;;  %v238_v32 = vld [vmem:[%s5783_s1 + $0x6e8] sm:$0xff] }
  0x84   :  { %1633 = vmatprep.mubr.f32.mxu1 %v3473_v3  ;;  %1550 = vmatprep.mubr.f32.mxu0 %v3473_v3  ;;  %v3251_v2 = vpack.c.bf16 %v458_v59, %v412_v33  ;;  %v416_v33 = vld [vmem:[%s5783_s1 + $0xc78] sm:$0xff]  ;;  %v462_v59 = vld [vmem:[%s5783_s1 + $0xde8] sm:$0x7]  ;;  %v189_v29 = vld [vmem:[%s5783_s1 + $0x560] sm:$0xff] }
  0x85   :  { %3224 = vmatpush1.bf16.msra.mxu0 %v3223_v48  ;;  %2893 = vmatmul.mubr.msk.f32.gmra.mrb[34].mxu1 %vm495_vm3, %v3744_v46  ;;  %v4628_v48 = vld [vmem:[%s5784_s0 + $0x8] sm:$0xff]  ;;  %v3295_v4 = vpack.c.bf16 %v462_v59, %v416_v33  ;;  %v233_v39 = vld [vmem:[%s5783_s1 + $0x6c0] sm:$0xff]  ;;  %v464_v33 = vld [vmem:[%s5783_s1 + $0xdf8] sm:$0x7] }
  0x86   :  { %3246 = vmatpush1.bf16.msra.mxu1 %v3245_v49  ;;  %3226 = vmatprep.subr.bf16.mxu0 %v3225_v50  ;;  %v3289_v49 = vpack.c.bf16 %v277_v14, %v231_v40  ;;  %v3269_v50 = vpack.c.bf16 %v368_v43, %v322_v42  ;;  %v279_v40 = vld [vmem:[%s5783_s1 + $0x830] sm:$0xff]  ;;  %v281_v42 = vld [vmem:[%s5783_s1 + $0x840] sm:$0xff]  ;;  %v326_v43 = vld [vmem:[%s5783_s1 + $0x9a8] sm:$0xff] }
  0x87   :  { %3248 = vmatprep.subr.bf16.mxu1 %v3247_v55  ;;  %2888 = vmatmul.mubr.msk.f32.gmra.mrb[34].mxu0 %vm495_vm3, %v3744_v46  ;;  %v48_v46 = vld [vmem:[%s5783_s1 + $0xf8] sm:$0xff]  ;;  %v3291_v55 = vpack.c.bf16 %v370_v45, %v324_v44  ;;  %v193_v30 = vld [vmem:[%s5783_s1 + $0x580] sm:$0xff] }
  0x88   :  { %1787 = vmatprep.mubr.f32.mxu1 %v3473_v3  ;;  %1704 = vmatprep.mubr.f32.mxu0 %v3473_v3  ;;  %v3279_v15 = vpack.c.bf16 %v94_v7, %v48_v46  ;;  %v96_v46 = vld [vmem:[%s5783_s1 + $0x278] sm:$0xff] }
  0x89   :  { %3228 = vmatpush1.bf16.msra.mxu0 %v3227_v60  ;;  %v3271_v60 = vpack.c.bf16 %v367_v53, %v321_v51  ;;  %v52_v7 = vld [vmem:[%s5783_s1 + $0x118] sm:$0xff]  ;;  %v3301_v11 = vpack.c.bf16 %v96_v46, %v50_v6  ;;  %v325_v53 = vld [vmem:[%s5783_s1 + $0x9a0] sm:$0xff]  ;;  %v54_v46 = vld [vmem:[%s5783_s1 + $0x128] sm:$0xff] }
  0x8a   :  { %3250 = vmatpush1.bf16.msra.mxu1 %v3249_v61  ;;  %3231 = vmatprep.subr.msk.bf16.mxu0 %vm3603_vm2, %v3229_v62  ;;  %v4663_v61 = vld [vmem:[%s5784_s0 + $0x10] sm:$0xff]  ;;  %v3293_v62 = vpack.c.bf16 %v369_v56, %v323_v54  ;;  %v372_v44 = vld [vmem:[%s5783_s1 + $0xb18] sm:$0xff]  ;;  %v465_v6 = vld [vmem:[%s5783_s1 + $0xe00] sm:$0x7] }
  0x8b   :  { %3253 = vmatprep.subr.msk.bf16.mxu1 %vm3603_vm2, %v3251_v2  ;;  %v415_v2 = vld [vmem:[%s5783_s1 + $0xc70] sm:$0xff]  ;;  %v328_v45 = vld [vmem:[%s5783_s1 + $0x9b8] sm:$0xff]  ;;  %v3313_v51 = vpack.c.bf16 %v372_v44, %v326_v43  ;;  %v285_v43 = vld [vmem:[%s5783_s1 + $0x860] sm:$0xff] }
  0x8c   :  { %v371_v54 = vld [vmem:[%s5783_s1 + $0xb10] sm:$0xff]  ;;  %v420_v59 = vld [vmem:[%s5783_s1 + $0xc98] sm:$0xff]  ;;  %v330_v44 = vld [vmem:[%s5783_s1 + $0x9c8] sm:$0xff] }
  0x8d   :  { %3234 = vmatpush1.bf16.msk.msra.mxu0 %vm3603_vm2, %v3232_v8  ;;  %v98_v8 = vld [vmem:[%s5783_s1 + $0x288] sm:$0xff] }
  0x8e   :  { %3256 = vmatpush1.bf16.msk.msra.mxu1 %vm3603_vm2, %v3254_v9  ;;  %3258 = vmatprep.subr.bf16.mxu0 %v3257_v10  ;;  %v3276_v9 = vpack.c.bf16 %v459_v1, %v413_v0  ;;  %v3298_v10 = vpack.c.bf16 %v461_v5, %v415_v2  ;;  %v3323_v16 = vpack.c.bf16 %v98_v8, %v52_v7  ;;  %v417_v1 = vld [vmem:[%s5783_s1 + $0xc80] sm:$0xff]  ;;  %v463_v2 = vld [vmem:[%s5783_s1 + $0xdf0] sm:$0x7]  ;;  %v100_v7 = vld [vmem:[%s5783_s1 + $0x298] sm:$0xff] }
  0x8f   :  { %3280 = vmatprep.subr.bf16.mxu1 %v3279_v15  ;;  %v51_v15 = vld [vmem:[%s5783_s1 + $0x110] sm:$0xff]  ;;  %v3317_v0 = vpack.c.bf16 %v464_v33, %v418_v58  ;;  %v56_v8 = vld [vmem:[%s5783_s1 + $0x138] sm:$0xff]  ;;  %v377_v58 = vld [vmem:[%s5783_s1 + $0xb40] sm:$0xff] }
  0x90   :  { %2896 = vmatmul.mubr.msk.f32.vlgmr.msra.gmra.mrb[36].mxu0 %vm495_vm3, %v4587_v31  ;;  %v422_v33 = vld [vmem:[%s5783_s1 + $0xca8] sm:$0xff] }
  0x91   :  { %2901 = vmatmul.mubr.msk.f32.vlgmr.msra.gmra.mrb[36].mxu1 %vm495_vm3, %v4587_v31  ;;  %3260 = vmatpush1.bf16.msra.mxu0 %v3259_v21  ;;  %v190_v21 = vld [vmem:[%s5783_s1 + $0x568] sm:$0xff] }
  0x92   :  { %3282 = vmatpush1.bf16.msra.mxu1 %v3281_v22  ;;  %3262 = vmatprep.subr.bf16.mxu0 %v3261_v23  ;;  %v3303_v22 = vpack.c.bf16 %v95_v13, %v49_v12  ;;  %v3325_v23 = vpack.c.bf16 %v97_v17, %v51_v15  ;;  %v3327_v28 = vpack.c.bf16 %v190_v21, %v144_v20  ;;  %v53_v13 = vld [vmem:[%s5783_s1 + $0x120] sm:$0xff]  ;;  %v99_v15 = vld [vmem:[%s5783_s1 + $0x290] sm:$0xff]  ;;  %v192_v20 = vld [vmem:[%s5783_s1 + $0x578] sm:$0xff] }
  0x93   :  { %3284 = vmatprep.subr.bf16.mxu1 %v3283_v27  ;;  %1793 = vmatprep.mubr.f32.mxu1 %v3473_v3  ;;  %v143_v27 = vld [vmem:[%s5783_s1 + $0x3f0] sm:$0xff]  ;;  %v3345_v12 = vpack.c.bf16 %v100_v7, %v54_v46  ;;  %v148_v21 = vld [vmem:[%s5783_s1 + $0x418] sm:$0xff]  ;;  %v469_v46 = vld [vmem:[%s5783_s1 + $0xe20] sm:$0x7] }
  0x94   :  { %1710 = vmatprep.mubr.f32.mxu0 %v3473_v3  ;;  %v58_v7 = vld [vmem:[%s5783_s1 + $0x148] sm:$0xff] }
  0x95   :  { %3264 = vmatpush1.bf16.msra.mxu0 %v3263_v35  ;;  %2902 = vmatmul.mubr.msk.f32.gmra.mrb[38].mxu1 %vm495_vm3, %v4628_v48  ;;  %v282_v35 = vld [vmem:[%s5783_s1 + $0x848] sm:$0xff] }
  0x96   :  { %3286 = vmatpush1.bf16.msra.mxu1 %v3285_v36  ;;  %3266 = vmatprep.subr.bf16.mxu0 %v3265_v37  ;;  %v3307_v36 = vpack.c.bf16 %v187_v26, %v141_v25  ;;  %v3329_v37 = vpack.c.bf16 %v189_v29, %v143_v27  ;;  %v3331_v14 = vpack.c.bf16 %v282_v35, %v236_v34  ;;  %v145_v26 = vld [vmem:[%s5783_s1 + $0x400] sm:$0xff]  ;;  %v191_v27 = vld [vmem:[%s5783_s1 + $0x570] sm:$0xff]  ;;  %v284_v34 = vld [vmem:[%s5783_s1 + $0x858] sm:$0xff] }
  0x97   :  { %3288 = vmatprep.subr.bf16.mxu1 %v3287_v41  ;;  %2897 = vmatmul.mubr.msk.f32.gmra.mrb[38].mxu0 %vm495_vm3, %v4628_v48  ;;  %v235_v41 = vld [vmem:[%s5783_s1 + $0x6d0] sm:$0xff]  ;;  %v3349_v25 = vpack.c.bf16 %v192_v20, %v146_v19  ;;  %v240_v35 = vld [vmem:[%s5783_s1 + $0x6f8] sm:$0xff]  ;;  %v105_v19 = vld [vmem:[%s5783_s1 + $0x2c0] sm:$0xff] }
  0x98   :  { %1799 = vmatprep.mubr.f32.mxu1 %v3473_v3  ;;  %1716 = vmatprep.mubr.f32.mxu0 %v3473_v3  ;;  %v150_v20 = vld [vmem:[%s5783_s1 + $0x428] sm:$0xff] }
  0x99   :  { %3268 = vmatpush1.bf16.msra.mxu0 %v3267_v47  ;;  %2903 = vmatmul.mubr.msk.f32.gmra.mrb[40].mxu1 %vm495_vm3, %v4663_v61  ;;  %v374_v47 = vld [vmem:[%s5783_s1 + $0xb28] sm:$0xff] }
  0x9a   :  { %3290 = vmatpush1.bf16.msra.mxu1 %v3289_v49  ;;  %3270 = vmatprep.subr.bf16.mxu0 %v3269_v50  ;;  %v3311_v49 = vpack.c.bf16 %v279_v40, %v233_v39  ;;  %v3333_v50 = vpack.c.bf16 %v281_v42, %v235_v41  ;;  %v3335_v56 = vpack.c.bf16 %v374_v47, %v328_v45  ;;  %v237_v40 = vld [vmem:[%s5783_s1 + $0x6e0] sm:$0xff]  ;;  %v283_v41 = vld [vmem:[%s5783_s1 + $0x850] sm:$0xff]  ;;  %v376_v45 = vld [vmem:[%s5783_s1 + $0xb38] sm:$0xff] }
  0x9b   :  { %3292 = vmatprep.subr.bf16.mxu1 %v3291_v55  ;;  %2898 = vmatmul.mubr.msk.f32.gmra.mrb[40].mxu0 %vm495_vm3, %v4663_v61  ;;  %v327_v55 = vld [vmem:[%s5783_s1 + $0x9b0] sm:$0xff]  ;;  %v3353_v39 = vpack.c.bf16 %v284_v34, %v238_v32  ;;  %v332_v47 = vld [vmem:[%s5783_s1 + $0x9d8] sm:$0xff]  ;;  %v197_v32 = vld [vmem:[%s5783_s1 + $0x5a0] sm:$0xff] }
  0x9c   :  { %1953 = vmatprep.mubr.f32.mxu1 %v3473_v3  ;;  %1870 = vmatprep.mubr.f32.mxu0 %v3473_v3  ;;  %v242_v34 = vld [vmem:[%s5783_s1 + $0x708] sm:$0xff] }
  0x9d   :  { %3272 = vmatpush1.bf16.msra.mxu0 %v3271_v60  ;;  %v466_v60 = vld [vmem:[%s5783_s1 + $0xe08] sm:$0x7] }
  0x9e   :  { %3294 = vmatpush1.bf16.msra.mxu1 %v3293_v62  ;;  %3275 = vmatprep.subr.msk.bf16.mxu0 %vm3603_vm2, %v3273_v63  ;;  %v3315_v62 = vpack.c.bf16 %v371_v54, %v325_v53  ;;  %v3337_v63 = vpack.c.bf16 %v373_v57, %v327_v55  ;;  %v3339_v5 = vpack.c.bf16 %v466_v60, %v420_v59  ;;  %v329_v54 = vld [vmem:[%s5783_s1 + $0x9c0] sm:$0xff]  ;;  %v375_v55 = vld [vmem:[%s5783_s1 + $0xb30] sm:$0xff]  ;;  %v468_v59 = vld [vmem:[%s5783_s1 + $0xe18] sm:$0x7] }
  0x9f   :  { %3297 = vmatprep.subr.msk.bf16.mxu1 %vm3603_vm2, %v3295_v4  ;;  %v419_v4 = vld [vmem:[%s5783_s1 + $0xc90] sm:$0xff]  ;;  %v3357_v53 = vpack.c.bf16 %v376_v45, %v330_v44  ;;  %v424_v60 = vld [vmem:[%s5783_s1 + $0xcb8] sm:$0xff]  ;;  %v289_v44 = vld [vmem:[%s5783_s1 + $0x880] sm:$0xff] }
  0xa0   :  { %v334_v45 = vld [vmem:[%s5783_s1 + $0x9e8] sm:$0xff] }
  0xa1   :  { %3278 = vmatpush1.bf16.msk.msra.mxu0 %vm3603_vm2, %v3276_v9  ;;  %v102_v9 = vld [vmem:[%s5783_s1 + $0x2a8] sm:$0xff] }
  0xa2   :  { %3300 = vmatpush1.bf16.msk.msra.mxu1 %vm3603_vm2, %v3298_v10  ;;  %3302 = vmatprep.subr.bf16.mxu0 %v3301_v11  ;;  %v3320_v10 = vpack.c.bf16 %v463_v2, %v417_v1  ;;  %v3342_v11 = vpack.c.bf16 %v465_v6, %v419_v4  ;;  %v3367_v17 = vpack.c.bf16 %v102_v9, %v56_v8  ;;  %v421_v2 = vld [vmem:[%s5783_s1 + $0xca0] sm:$0xff]  ;;  %v467_v4 = vld [vmem:[%s5783_s1 + $0xe10] sm:$0x7]  ;;  %v104_v8 = vld [vmem:[%s5783_s1 + $0x2b8] sm:$0xff] }
  0xa3   :  { %3324 = vmatprep.subr.bf16.mxu1 %v3323_v16  ;;  %v55_v16 = vld [vmem:[%s5783_s1 + $0x130] sm:$0xff]  ;;  %v3361_v1 = vpack.c.bf16 %v468_v59, %v422_v33  ;;  %v60_v9 = vld [vmem:[%s5783_s1 + $0x158] sm:$0xff]  ;;  %v381_v33 = vld [vmem:[%s5783_s1 + $0xb60] sm:$0xff] }
  0xa4   :  { %2906 = vmatmul.mubr.msk.f32.vlgmr.msra.gmra.mrb[42].mxu0 %vm495_vm3, %v4587_v31  ;;  %v426_v59 = vld [vmem:[%s5783_s1 + $0xcc8] sm:$0xff] }
  0xa5   :  { %2911 = vmatmul.mubr.msk.f32.vlgmr.msra.gmra.mrb[42].mxu1 %vm495_vm3, %v4587_v31  ;;  %3304 = vmatpush1.bf16.msra.mxu0 %v3303_v22  ;;  %v194_v22 = vld [vmem:[%s5783_s1 + $0x588] sm:$0xff] }
  0xa6   :  { %3326 = vmatpush1.bf16.msra.mxu1 %v3325_v23  ;;  %3306 = vmatprep.subr.bf16.mxu0 %v3305_v24  ;;  %v3347_v23 = vpack.c.bf16 %v99_v15, %v53_v13  ;;  %v3369_v24 = vpack.c.bf16 %v101_v18, %v55_v16  ;;  %v3371_v29 = vpack.c.bf16 %v194_v22, %v148_v21  ;;  %v57_v15 = vld [vmem:[%s5783_s1 + $0x140] sm:$0xff]  ;;  %v103_v16 = vld [vmem:[%s5783_s1 + $0x2b0] sm:$0xff]  ;;  %v196_v21 = vld [vmem:[%s5783_s1 + $0x598] sm:$0xff] }
  0xa7   :  { %3328 = vmatprep.subr.bf16.mxu1 %v3327_v28  ;;  %1959 = vmatprep.mubr.f32.mxu1 %v3473_v3  ;;  %v147_v28 = vld [vmem:[%s5783_s1 + $0x410] sm:$0xff]  ;;  %v3389_v13 = vpack.c.bf16 %v104_v8, %v58_v7  ;;  %v152_v22 = vld [vmem:[%s5783_s1 + $0x438] sm:$0xff]  ;;  %v473_v7 = vld [vmem:[%s5783_s1 + $0xe40] sm:$0x7] }
  0xa8   :  { %1876 = vmatprep.mubr.f32.mxu0 %v3473_v3  ;;  %v62_v8 = vld [vmem:[%s5783_s1 + $0x168] sm:$0xff] }
  0xa9   :  { %3308 = vmatpush1.bf16.msra.mxu0 %v3307_v36  ;;  %2912 = vmatmul.mubr.msk.f32.gmra.mrb[44].mxu1 %vm495_vm3, %v4628_v48  ;;  %v286_v36 = vld [vmem:[%s5783_s1 + $0x868] sm:$0xff] }
  0xaa   :  { %3330 = vmatpush1.bf16.msra.mxu1 %v3329_v37  ;;  %3310 = vmatprep.subr.bf16.mxu0 %v3309_v38  ;;  %v3351_v37 = vpack.c.bf16 %v191_v27, %v145_v26  ;;  %v3373_v38 = vpack.c.bf16 %v193_v30, %v147_v28  ;;  %v3375_v42 = vpack.c.bf16 %v286_v36, %v240_v35  ;;  %v149_v27 = vld [vmem:[%s5783_s1 + $0x420] sm:$0xff]  ;;  %v195_v28 = vld [vmem:[%s5783_s1 + $0x590] sm:$0xff]  ;;  %v288_v35 = vld [vmem:[%s5783_s1 + $0x878] sm:$0xff] }
  0xab   :  { %3332 = vmatprep.subr.bf16.mxu1 %v3331_v14  ;;  %2907 = vmatmul.mubr.msk.f32.gmra.mrb[44].mxu0 %vm495_vm3, %v4628_v48  ;;  %v239_v14 = vld [vmem:[%s5783_s1 + $0x6f0] sm:$0xff]  ;;  %v3393_v26 = vpack.c.bf16 %v196_v21, %v150_v20  ;;  %v244_v36 = vld [vmem:[%s5783_s1 + $0x718] sm:$0xff]  ;;  %v153_v20 = vld [vmem:[%s5783_s1 + $0x440] sm:$0xff] }
  0xac   :  { %1965 = vmatprep.mubr.f32.mxu1 %v3473_v3  ;;  %1882 = vmatprep.mubr.f32.mxu0 %v3473_v3  ;;  %v199_v21 = vld [vmem:[%s5783_s1 + $0x5b0] sm:$0xff] }
  0xad   :  { %3312 = vmatpush1.bf16.msra.mxu0 %v3311_v49  ;;  %2913 = vmatmul.mubr.msk.f32.gmra.mrb[46].mxu1 %vm495_vm3, %v4663_v61  ;;  %v378_v49 = vld [vmem:[%s5783_s1 + $0xb48] sm:$0xff] }
  0xae   :  { %3334 = vmatpush1.bf16.msra.mxu1 %v3333_v50  ;;  %3314 = vmatprep.subr.bf16.mxu0 %v3313_v51  ;;  %v3355_v50 = vpack.c.bf16 %v283_v41, %v237_v40  ;;  %v3377_v51 = vpack.c.bf16 %v285_v43, %v239_v14  ;;  %v3379_v57 = vpack.c.bf16 %v378_v49, %v332_v47  ;;  %v241_v41 = vld [vmem:[%s5783_s1 + $0x700] sm:$0xff]  ;;  %v287_v14 = vld [vmem:[%s5783_s1 + $0x870] sm:$0xff]  ;;  %v380_v47 = vld [vmem:[%s5783_s1 + $0xb58] sm:$0xff] }
  0xaf   :  { %3336 = vmatprep.subr.bf16.mxu1 %v3335_v56  ;;  %2908 = vmatmul.mubr.msk.f32.gmra.mrb[46].mxu0 %vm495_vm3, %v4663_v61  ;;  %v331_v56 = vld [vmem:[%s5783_s1 + $0x9d0] sm:$0xff]  ;;  %v3397_v40 = vpack.c.bf16 %v288_v35, %v242_v34  ;;  %v336_v49 = vld [vmem:[%s5783_s1 + $0x9f8] sm:$0xff]  ;;  %v337_v34 = vld [vmem:[%s5783_s1 + $0xa00] sm:$0xff] }
  0xb0   :  { %2119 = vmatprep.mubr.f32.mxu1 %v3473_v3  ;;  %2036 = vmatprep.mubr.f32.mxu0 %v3473_v3  ;;  %v383_v35 = vld [vmem:[%s5783_s1 + $0xb70] sm:$0xff] }
  0xb1   :  { %3316 = vmatpush1.bf16.msra.mxu0 %v3315_v62  ;;  %v470_v62 = vld [vmem:[%s5783_s1 + $0xe28] sm:$0x7] }
  0xb2   :  { %3338 = vmatpush1.bf16.msra.mxu1 %v3337_v63  ;;  %3319 = vmatprep.subr.msk.bf16.mxu0 %vm3603_vm2, %v3317_v0  ;;  %v3359_v63 = vpack.c.bf16 %v375_v55, %v329_v54  ;;  %v3381_v0 = vpack.c.bf16 %v377_v58, %v331_v56  ;;  %v3383_v6 = vpack.c.bf16 %v470_v62, %v424_v60  ;;  %v333_v55 = vld [vmem:[%s5783_s1 + $0x9e0] sm:$0xff]  ;;  %v379_v56 = vld [vmem:[%s5783_s1 + $0xb50] sm:$0xff]  ;;  %v472_v60 = vld [vmem:[%s5783_s1 + $0xe38] sm:$0x7] }
  0xb3   :  { %3341 = vmatprep.subr.msk.bf16.mxu1 %vm3603_vm2, %v3339_v5  ;;  %v423_v5 = vld [vmem:[%s5783_s1 + $0xcb0] sm:$0xff]  ;;  %v3401_v54 = vpack.c.bf16 %v380_v47, %v334_v45  ;;  %v428_v62 = vld [vmem:[%s5783_s1 + $0xcd8] sm:$0xff] }
  0xb5   :  { %3322 = vmatpush1.bf16.msk.msra.mxu0 %vm3603_vm2, %v3320_v10  ;;  %v106_v10 = vld [vmem:[%s5783_s1 + $0x2c8] sm:$0xff] }
  0xb6   :  { %3344 = vmatpush1.bf16.msk.msra.mxu1 %vm3603_vm2, %v3342_v11  ;;  %3346 = vmatprep.subr.bf16.mxu0 %v3345_v12  ;;  %v3364_v11 = vpack.c.bf16 %v467_v4, %v421_v2  ;;  %v3386_v12 = vpack.c.bf16 %v469_v46, %v423_v5  ;;  %v3411_v18 = vpack.c.bf16 %v106_v10, %v60_v9  ;;  %v425_v4 = vld [vmem:[%s5783_s1 + $0xcc0] sm:$0xff]  ;;  %v471_v5 = vld [vmem:[%s5783_s1 + $0xe30] sm:$0x7]  ;;  %v108_v9 = vld [vmem:[%s5783_s1 + $0x2d8] sm:$0xff] }
  0xb7   :  { %3368 = vmatprep.subr.bf16.mxu1 %v3367_v17  ;;  %v59_v17 = vld [vmem:[%s5783_s1 + $0x150] sm:$0xff]  ;;  %v3405_v2 = vpack.c.bf16 %v472_v60, %v426_v59  ;;  %v3408_v10 = vpack.c.bf16 %v471_v5, %v425_v4 }
  0xb8   :  { %2916 = vmatmul.mubr.msk.f32.vlgmr.msra.gmra.mrb[48].mxu0 %vm495_vm3, %v4587_v31 }
  0xb9   :  { %2921 = vmatmul.mubr.msk.f32.vlgmr.msra.gmra.mrb[48].mxu1 %vm495_vm3, %v4587_v31  ;;  %3348 = vmatpush1.bf16.msra.mxu0 %v3347_v23  ;;  %v198_v23 = vld [vmem:[%s5783_s1 + $0x5a8] sm:$0xff] }
  0xba   :  { %3370 = vmatpush1.bf16.msra.mxu1 %v3369_v24  ;;  %3350 = vmatprep.subr.bf16.mxu0 %v3349_v25  ;;  %v3391_v24 = vpack.c.bf16 %v103_v16, %v57_v15  ;;  %v3413_v25 = vpack.c.bf16 %v105_v19, %v59_v17  ;;  %v3415_v30 = vpack.c.bf16 %v198_v23, %v152_v22  ;;  %v107_v15 = vld [vmem:[%s5783_s1 + $0x2d0] sm:$0xff]  ;;  %v154_v16 = vld [vmem:[%s5783_s1 + $0x448] sm:$0xff]  ;;  %v200_v17 = vld [vmem:[%s5783_s1 + $0x5b8] sm:$0xff] }
  0xbb   :  { %3372 = vmatprep.subr.bf16.mxu1 %v3371_v29  ;;  %2125 = vmatprep.mubr.f32.mxu1 %v3473_v3  ;;  %v151_v29 = vld [vmem:[%s5783_s1 + $0x430] sm:$0xff]  ;;  %v3437_v19 = vpack.c.bf16 %v200_v17, %v154_v16  ;;  %v246_v22 = vld [vmem:[%s5783_s1 + $0x728] sm:$0xff]  ;;  %v292_v23 = vld [vmem:[%s5783_s1 + $0x898] sm:$0xff] }
  0xbc   :  { %2042 = vmatprep.mubr.f32.mxu0 %v3473_v3 }
  0xbd   :  { %3352 = vmatpush1.bf16.msra.mxu0 %v3351_v37  ;;  %2922 = vmatmul.mubr.msk.f32.gmra.mrb[50].mxu1 %vm495_vm3, %v4628_v48  ;;  %v290_v37 = vld [vmem:[%s5783_s1 + $0x888] sm:$0xff] }
  0xbe   :  { %3374 = vmatpush1.bf16.msra.mxu1 %v3373_v38  ;;  %3354 = vmatprep.subr.bf16.mxu0 %v3353_v39  ;;  %v3395_v38 = vpack.c.bf16 %v195_v28, %v149_v27  ;;  %v3417_v39 = vpack.c.bf16 %v197_v32, %v151_v29  ;;  %v3419_v43 = vpack.c.bf16 %v290_v37, %v244_v36  ;;  %v291_v27 = vld [vmem:[%s5783_s1 + $0x890] sm:$0xff]  ;;  %v338_v28 = vld [vmem:[%s5783_s1 + $0xa08] sm:$0xff]  ;;  %v384_v29 = vld [vmem:[%s5783_s1 + $0xb78] sm:$0xff] }
  0xbf   :  { %3376 = vmatprep.subr.bf16.mxu1 %v3375_v42  ;;  %2917 = vmatmul.mubr.msk.f32.gmra.mrb[50].mxu0 %vm495_vm3, %v4628_v48  ;;  %v243_v42 = vld [vmem:[%s5783_s1 + $0x710] sm:$0xff]  ;;  %v3445_v32 = vpack.c.bf16 %v384_v29, %v338_v28  ;;  %v430_v36 = vld [vmem:[%s5783_s1 + $0xce8] sm:$0xff]  ;;  %v476_v37 = vld [vmem:[%s5783_s1 + $0xe58] sm:$0x7] }
  0xc0   :  { %2131 = vmatprep.mubr.f32.mxu1 %v3473_v3  ;;  %2048 = vmatprep.mubr.f32.mxu0 %v3473_v3 }
  0xc1   :  { %3356 = vmatpush1.bf16.msra.mxu0 %v3355_v50  ;;  %2923 = vmatmul.mubr.msk.f32.gmra.mrb[52].mxu1 %vm495_vm3, %v4663_v61  ;;  %v382_v50 = vld [vmem:[%s5783_s1 + $0xb68] sm:$0xff] }
  0xc2   :  { %3378 = vmatpush1.bf16.msra.mxu1 %v3377_v51  ;;  %3358 = vmatprep.subr.bf16.mxu0 %v3357_v53  ;;  %v3399_v51 = vpack.c.bf16 %v287_v14, %v241_v41  ;;  %v3421_v53 = vpack.c.bf16 %v289_v44, %v243_v42  ;;  %v3423_v58 = vpack.c.bf16 %v382_v50, %v336_v49  ;;  %v429_v41 = vld [vmem:[%s5783_s1 + $0xce0] sm:$0xff]  ;;  %v475_v14 = vld [vmem:[%s5783_s1 + $0xe50] sm:$0x7] }
  0xc3   :  { %3380 = vmatprep.subr.bf16.mxu1 %v3379_v57  ;;  %2918 = vmatmul.mubr.msk.f32.gmra.mrb[52].mxu0 %vm495_vm3, %v4663_v61  ;;  %v335_v57 = vld [vmem:[%s5783_s1 + $0x9f0] sm:$0xff] }
  0xc4   :  { %2285 = vmatprep.mubr.f32.mxu1 %v3473_v3  ;;  %2202 = vmatprep.mubr.f32.mxu0 %v3473_v3 }
  0xc5   :  { %3360 = vmatpush1.bf16.msra.mxu0 %v3359_v63  ;;  %v474_v63 = vld [vmem:[%s5783_s1 + $0xe48] sm:$0x7] }
  0xc6   :  { %3382 = vmatpush1.bf16.msra.mxu1 %v3381_v0  ;;  %3363 = vmatprep.subr.msk.bf16.mxu0 %vm3603_vm2, %v3361_v1  ;;  %v3403_v0 = vpack.c.bf16 %v379_v56, %v333_v55  ;;  %v3425_v1 = vpack.c.bf16 %v381_v33, %v335_v57  ;;  %v3427_v46 = vpack.c.bf16 %v474_v63, %v428_v62 }
  0xc7   :  { %3385 = vmatprep.subr.msk.bf16.mxu1 %vm3603_vm2, %v3383_v6  ;;  %v427_v6 = vld [vmem:[%s5783_s1 + $0xcd0] sm:$0xff] }
  0xc9   :  { %3366 = vmatpush1.bf16.msk.msra.mxu0 %vm3603_vm2, %v3364_v11  ;;  %v3430_v11 = vpack.c.bf16 %v473_v7, %v427_v6 }
  0xca   :  { %3388 = vmatpush1.bf16.msk.msra.mxu1 %vm3603_vm2, %v3386_v12  ;;  %3390 = vmatprep.subr.bf16.mxu0 %v3389_v13  ;;  %v3433_v12 = vpack.c.bf16 %v108_v9, %v62_v8  ;;  %v61_v13 = vld [vmem:[%s5783_s1 + $0x160] sm:$0xff] }
  0xcb   :  { %3412 = vmatprep.subr.bf16.mxu1 %v3411_v18  ;;  %v3435_v18 = vpack.c.bf16 %v107_v15, %v61_v13 }
  0xcc   :  { %2926 = vmatmul.mubr.msk.f32.vlgmr.msra.gmra.mrb[54].mxu0 %vm495_vm3, %v4587_v31 }
  0xcd   :  { %2931 = vmatmul.mubr.msk.f32.vlgmr.msra.gmra.mrb[54].mxu1 %vm495_vm3, %v4587_v31  ;;  %3392 = vmatpush1.bf16.msra.mxu0 %v3391_v24  ;;  %v3439_v24 = vpack.c.bf16 %v199_v21, %v153_v20 }
  0xce   :  { %3414 = vmatpush1.bf16.msra.mxu1 %v3413_v25  ;;  %3394 = vmatprep.subr.bf16.mxu0 %v3393_v26  ;;  %v3441_v25 = vpack.c.bf16 %v292_v23, %v246_v22  ;;  %v245_v26 = vld [vmem:[%s5783_s1 + $0x720] sm:$0xff] }
  0xcf   :  { %3416 = vmatprep.subr.bf16.mxu1 %v3415_v30  ;;  %2291 = vmatprep.mubr.f32.mxu1 %v3473_v3  ;;  %v3443_v30 = vpack.c.bf16 %v291_v27, %v245_v26 }
  0xd0   :  { %2208 = vmatprep.mubr.f32.mxu0 %v3473_v3 }
  0xd1   :  { %3396 = vmatpush1.bf16.msra.mxu0 %v3395_v38  ;;  %2932 = vmatmul.mubr.msk.f32.gmra.mrb[56].mxu1 %vm495_vm3, %v4628_v48  ;;  %v3447_v38 = vpack.c.bf16 %v383_v35, %v337_v34 }
  0xd2   :  { %3418 = vmatpush1.bf16.msra.mxu1 %v3417_v39  ;;  %3398 = vmatprep.subr.bf16.mxu0 %v3397_v40  ;;  %v5197_v39 = vpop.permute.xlu0 %482  ;;  %v3449_v40 = vpack.c.bf16 %v476_v37, %v430_v36 }
  0xd3   :  { %3420 = vmatprep.subr.bf16.mxu1 %v3419_v43  ;;  %2927 = vmatmul.mubr.msk.f32.gmra.mrb[56].mxu0 %vm495_vm3, %v4628_v48 }
  0xd4   :  { %2297 = vmatprep.mubr.f32.mxu1 %v3473_v3  ;;  %2214 = vmatprep.mubr.f32.mxu0 %v3473_v3 }
  0xd5   :  { %3400 = vmatpush1.bf16.msra.mxu0 %v3399_v51  ;;  %2933 = vmatmul.mubr.msk.f32.gmra.mrb[58].mxu1 %vm495_vm3, %v4663_v61  ;;  %v3452_v51 = vpack.c.bf16 %v475_v14, %v429_v41 }
  0xd6   :  { %3422 = vmatpush1.bf16.msra.mxu1 %v3421_v53  ;;  %3402 = vmatprep.subr.bf16.mxu0 %v3401_v54  ;;  %v5215_v55 = vpop.permute.xlu0 %487 }
  0xd7   :  { %3424 = vmatprep.subr.bf16.mxu1 %v3423_v58  ;;  %2928 = vmatmul.mubr.msk.f32.gmra.mrb[58].mxu0 %vm495_vm3, %v4663_v61 }
  0xd8   :  { %2451 = vmatprep.mubr.f32.mxu1 %v3473_v3  ;;  %2368 = vmatprep.mubr.f32.mxu0 %v3473_v3 }
  0xd9   :  { %3404 = vmatpush1.bf16.msra.mxu0 %v3403_v0  ;;  %v5237_v0 = vpop.permute.xlu1 %492 }
  0xda   :  { %3426 = vmatpush1.bf16.msra.mxu1 %v3425_v1  ;;  %3407 = vmatprep.subr.msk.bf16.mxu0 %vm3603_vm2, %v3405_v2 }
  0xdb   :  { %3429 = vmatprep.subr.msk.bf16.mxu1 %vm3603_vm2, %v3427_v46 }
  0xdd   :  { %3410 = vmatpush1.bf16.msk.msra.mxu0 %vm3603_vm2, %v3408_v10 }
  0xde   :  { %3432 = vmatpush1.bf16.msk.msra.mxu1 %vm3603_vm2, %v3430_v11  ;;  %3434 = vmatprep.subr.bf16.mxu0 %v3433_v12 }
  0xdf   :  { %3455 = vmatprep.subr.bf16.mxu1 %v3433_v12 }
  0xe0   :  { %2936 = vmatmul.mubr.msk.f32.vlgmr.msra.gmra.mrb[60].mxu0 %vm495_vm3, %v4587_v31 }
  0xe1   :  { %2941 = vmatmul.mubr.msk.f32.vlgmr.msra.gmra.mrb[60].mxu1 %vm495_vm3, %v4587_v31  ;;  %3436 = vmatpush1.bf16.msra.mxu0 %v3435_v18 }
  0xe2   :  { %3460 = vmatpush1.bf16.msra.mxu1 %v3435_v18  ;;  %3438 = vmatprep.subr.bf16.mxu0 %v3437_v19 }
  0xe3   :  { %3456 = vmatprep.subr.bf16.mxu1 %v3437_v19  ;;  %2457 = vmatprep.mubr.f32.mxu1 %v3473_v3 }
  0xe4   :  { %2374 = vmatprep.mubr.f32.mxu0 %v3473_v3 }
  0xe5   :  { %3440 = vmatpush1.bf16.msra.mxu0 %v3439_v24  ;;  %2942 = vmatmul.mubr.msk.f32.gmra.mrb[62].mxu1 %vm495_vm3, %v4628_v48 }
  0xe6   :  { %3461 = vmatpush1.bf16.msra.mxu1 %v3439_v24  ;;  %3442 = vmatprep.subr.bf16.mxu0 %v3441_v25 }
  0xe7   :  { %3457 = vmatprep.subr.bf16.mxu1 %v3441_v25  ;;  %2937 = vmatmul.mubr.msk.f32.gmra.mrb[62].mxu0 %vm495_vm3, %v4628_v48 }
  0xe8   :  { %2463 = vmatprep.mubr.f32.mxu1 %v3473_v3  ;;  %2380 = vmatprep.mubr.f32.mxu0 %v3473_v3 }
  0xe9   :  { %3444 = vmatpush1.bf16.msra.mxu0 %v3443_v30  ;;  %2943 = vmatmul.mubr.msk.f32.gmra.mrb[64].mxu1 %vm495_vm3, %v4663_v61 }
  0xea   :  { %3462 = vmatpush1.bf16.msra.mxu1 %v3443_v30  ;;  %3446 = vmatprep.subr.bf16.mxu0 %v3445_v32 }
  0xeb   :  { %3458 = vmatprep.subr.bf16.mxu1 %v3445_v32  ;;  %v710_v42 = vpop.f32.mrb[0].mxu0  ;;  %2938 = vmatmul.mubr.msk.f32.gmra.mrb[64].mxu0 %vm495_vm3, %v4663_v61 }
  0xec   :  { %v793_v43 = vpop.f32.mrb[0].mxu1  ;;  %v711_v44 = vadd.f32 %v710_v42, %v5197_v39  ;;  %v712_v45 = vpop.f32.mrb[1].mxu0  ;;  %2534 = vmatprep.mubr.f32.mxu0 %v3473_v3  ;;  %2540 = vmatprep.mubr.f32.mxu1 %v3473_v3 }
  0xed   :  { %v794_v47 = vadd.f32 %v793_v43, %v5197_v39  ;;  %v795_v49 = vpop.f32.mrb[1].mxu1  ;;  %3448 = vmatpush1.bf16.msra.mxu0 %v3447_v38  ;;  %v713_v50 = vadd.f32 %v712_v45, %v5197_v39 }
  0xee   :  { %v796_v53 = vadd.f32 %v795_v49, %v5197_v39  ;;  %3463 = vmatpush1.bf16.msra.mxu1 %v3447_v38  ;;  %v2553_v54 = vmax.f32 %v711_v44, 0.0  ;;  %3451 = vmatprep.subr.msk.bf16.mxu0 %vm3603_vm2, %v3449_v40 }
  0xef   :  { %v2555_v56 = vmax.f32 %v794_v47, 0.0  ;;  %v2554_v57 = vmax.f32 %v713_v50, 0.0  ;;  %3459 = vmatprep.subr.msk.bf16.mxu1 %vm3603_vm2, %v3449_v40 }
  0xf0   :  { %v2556_v58 = vmax.f32 %v796_v53, 0.0  ;;  %2691 = vst [vmem:[%s5786_s3] sm:$0xff] %v2553_v54  ;;  %v799_v33 = vpop.f32.mrb[2].mxu1 }
  0xf1   :  { %2693 = vst [vmem:[%s5786_s3 + $0x10] sm:$0xff] %v2555_v56  ;;  %2692 = vst [vmem:[%s5786_s3 + $0x8] sm:$0xff] %v2554_v57  ;;  %3454 = vmatpush1.bf16.msk.msra.mxu0 %vm3603_vm2, %v3452_v51  ;;  %v800_v59 = vadd.f32 %v799_v33, %v5215_v55  ;;  %v801_v60 = vpop.f32.mrb[3].mxu1 }
  0xf2   :  { %2694 = vst [vmem:[%s5786_s3 + $0x18] sm:$0xff] %v2556_v58  ;;  %3464 = vmatpush1.bf16.msk.msra.mxu1 %vm3603_vm2, %v3452_v51  ;;  %v802_v62 = vadd.f32 %v801_v60, %v5215_v55  ;;  %v716_v63 = vpop.f32.mrb[2].mxu0 }
  0xf3   :  { %v2601_v1 = vmax.f32 %v800_v59, 0.0  ;;  %v717_v2 = vadd.f32 %v716_v63, %v5215_v55  ;;  %v718_v4 = vpop.f32.mrb[3].mxu0 }
  0xf4   :  { %2946 = vmatmul.mubr.msk.f32.vlgmr.msra.gmra.mrb[66].mxu0 %vm495_vm3, %v4587_v31  ;;  %v2602_v5 = vmax.f32 %v802_v62, 0.0  ;;  %v805_v6 = vpop.f32.mrb[4].mxu1  ;;  %v719_v46 = vadd.f32 %v718_v4, %v5215_v55 }
  0xf5   :  { %2947 = vmatmul.mubr.msk.f32.vlgmr.msra.gmra.mrb[66].mxu1 %vm495_vm3, %v4628_v48  ;;  %2740 = vst [vmem:[%s5786_s3 + $0x180] sm:$0xff] %v2601_v1  ;;  %v2599_v52 = vmax.f32 %v717_v2, 0.0  ;;  %v806_v7 = vadd.f32 %v805_v6, %v5237_v0  ;;  %v807_v8 = vpop.f32.mrb[5].mxu1 }
  0xf6   :  { %2546 = vmatprep.mubr.f32.mxu1 %v3473_v3  ;;  %2741 = vst [vmem:[%s5786_s3 + $0x188] sm:$0xff] %v2602_v5  ;;  %v2600_v31 = vmax.f32 %v719_v46, 0.0  ;;  %v808_v9 = vadd.f32 %v807_v8, %v5237_v0  ;;  %v722_v10 = vpop.f32.mrb[4].mxu0 }
  0xf7   :  { %2738 = vst [vmem:[%s5786_s3 + $0x170] sm:$0xff] %v2599_v52  ;;  %v2647_v48 = vmax.f32 %v806_v7, 0.0  ;;  %v723_v11 = vadd.f32 %v722_v10, %v5237_v0  ;;  %v724_v12 = vpop.f32.mrb[5].mxu0 }
  0xf8   :  { %2739 = vst [vmem:[%s5786_s3 + $0x178] sm:$0xff] %v2600_v31  ;;  %v2648_v3 = vmax.f32 %v808_v9, 0.0  ;;  %v725_v13 = vadd.f32 %v724_v12, %v5237_v0 }
  0xf9   :  { %2948 = vmatmul.mubr.msk.f32.gmra.mrb[68].mxu1 %vm495_vm3, %v4663_v61  ;;  %2786 = vst [vmem:[%s5786_s3 + $0x2f0] sm:$0xff] %v2647_v48  ;;  %v2645_v15 = vmax.f32 %v723_v11, 0.0 }
  0xfa   :  { %2787 = vst [vmem:[%s5786_s3 + $0x2f8] sm:$0xff] %v2648_v3  ;;  %v2646_v16 = vmax.f32 %v725_v13, 0.0 }
  0xfb   :  { %2784 = vst [vmem:[%s5786_s3 + $0x2e0] sm:$0xff] %v2645_v15 }
  0xfc   :  { %2785 = vst [vmem:[%s5786_s3 + $0x2e8] sm:$0xff] %v2646_v16 }
  0xff   :  { %v876_v17 = vpop.f32.mrb[6].mxu0 }
 0x100   :  { %v959_v61 = vpop.f32.mrb[6].mxu1  ;;  %v877_v18 = vadd.f32 %v876_v17, %v5197_v39  ;;  %v878_v19 = vpop.f32.mrb[7].mxu0 }
 0x101   :  { %v960_v20 = vadd.f32 %v959_v61, %v5197_v39  ;;  %v961_v21 = vpop.f32.mrb[7].mxu1  ;;  %v879_v22 = vadd.f32 %v878_v19, %v5197_v39 }
 0x102   :  { %v962_v23 = vadd.f32 %v961_v21, %v5197_v39  ;;  %v2557_v24 = vmax.f32 %v877_v18, 0.0 }
 0x103   :  { %v2559_v25 = vmax.f32 %v960_v20, 0.0  ;;  %v2558_v26 = vmax.f32 %v879_v22, 0.0 }
 0x104   :  { %v2560_v27 = vmax.f32 %v962_v23, 0.0  ;;  %2695 = vst [vmem:[%s5786_s3 + $0x20] sm:$0xff] %v2557_v24  ;;  %v965_v28 = vpop.f32.mrb[8].mxu1 }
 0x105   :  { %2697 = vst [vmem:[%s5786_s3 + $0x30] sm:$0xff] %v2559_v25  ;;  %2696 = vst [vmem:[%s5786_s3 + $0x28] sm:$0xff] %v2558_v26  ;;  %v966_v29 = vadd.f32 %v965_v28, %v5215_v55  ;;  %v967_v30 = vpop.f32.mrb[9].mxu1 }
 0x106   :  { %2698 = vst [vmem:[%s5786_s3 + $0x38] sm:$0xff] %v2560_v27  ;;  %v968_v32 = vadd.f32 %v967_v30, %v5215_v55  ;;  %v882_v34 = vpop.f32.mrb[8].mxu0 }
 0x107   :  { %v2605_v35 = vmax.f32 %v966_v29, 0.0  ;;  %v883_v36 = vadd.f32 %v882_v34, %v5215_v55  ;;  %v884_v37 = vpop.f32.mrb[9].mxu0 }
 0x108   :  { %v2606_v38 = vmax.f32 %v968_v32, 0.0  ;;  %v971_v40 = vpop.f32.mrb[10].mxu1  ;;  %v885_v41 = vadd.f32 %v884_v37, %v5215_v55 }
 0x109   :  { %2744 = vst [vmem:[%s5786_s3 + $0x1a0] sm:$0xff] %v2605_v35  ;;  %v2603_v14 = vmax.f32 %v883_v36, 0.0  ;;  %v972_v42 = vadd.f32 %v971_v40, %v5237_v0  ;;  %v973_v43 = vpop.f32.mrb[11].mxu1 }
 0x10a   :  { %2745 = vst [vmem:[%s5786_s3 + $0x1a8] sm:$0xff] %v2606_v38  ;;  %v2604_v44 = vmax.f32 %v885_v41, 0.0  ;;  %v974_v45 = vadd.f32 %v973_v43, %v5237_v0  ;;  %v888_v47 = vpop.f32.mrb[10].mxu0 }
 0x10b   :  { %2742 = vst [vmem:[%s5786_s3 + $0x190] sm:$0xff] %v2603_v14  ;;  %v2651_v49 = vmax.f32 %v972_v42, 0.0  ;;  %v889_v50 = vadd.f32 %v888_v47, %v5237_v0  ;;  %v890_v51 = vpop.f32.mrb[11].mxu0 }
 0x10c   :  { %2743 = vst [vmem:[%s5786_s3 + $0x198] sm:$0xff] %v2604_v44  ;;  %v2652_v53 = vmax.f32 %v974_v45, 0.0  ;;  %v891_v54 = vadd.f32 %v890_v51, %v5237_v0 }
 0x10d   :  { %2790 = vst [vmem:[%s5786_s3 + $0x310] sm:$0xff] %v2651_v49  ;;  %v2649_v56 = vmax.f32 %v889_v50, 0.0 }
 0x10e   :  { %2791 = vst [vmem:[%s5786_s3 + $0x318] sm:$0xff] %v2652_v53  ;;  %v2650_v57 = vmax.f32 %v891_v54, 0.0 }
 0x10f   :  { %2788 = vst [vmem:[%s5786_s3 + $0x300] sm:$0xff] %v2649_v56 }
 0x110   :  { %2789 = vst [vmem:[%s5786_s3 + $0x308] sm:$0xff] %v2650_v57 }
 0x113   :  { %v1042_v58 = vpop.f32.mrb[12].mxu0 }
 0x114   :  { %v1125_v33 = vpop.f32.mrb[12].mxu1  ;;  %v1043_v59 = vadd.f32 %v1042_v58, %v5197_v39  ;;  %v1044_v60 = vpop.f32.mrb[13].mxu0 }
 0x115   :  { %v1126_v62 = vadd.f32 %v1125_v33, %v5197_v39  ;;  %v1127_v63 = vpop.f32.mrb[13].mxu1  ;;  %v1045_v1 = vadd.f32 %v1044_v60, %v5197_v39 }
 0x116   :  { %v1128_v2 = vadd.f32 %v1127_v63, %v5197_v39  ;;  %v2561_v4 = vmax.f32 %v1043_v59, 0.0 }
 0x117   :  { %v2563_v5 = vmax.f32 %v1126_v62, 0.0  ;;  %v2562_v6 = vmax.f32 %v1045_v1, 0.0 }
 0x118   :  { %v2564_v46 = vmax.f32 %v1128_v2, 0.0  ;;  %2699 = vst [vmem:[%s5786_s3 + $0x40] sm:$0xff] %v2561_v4  ;;  %v1131_v52 = vpop.f32.mrb[14].mxu1 }
 0x119   :  { %2701 = vst [vmem:[%s5786_s3 + $0x50] sm:$0xff] %v2563_v5  ;;  %2700 = vst [vmem:[%s5786_s3 + $0x48] sm:$0xff] %v2562_v6  ;;  %v1132_v7 = vadd.f32 %v1131_v52, %v5215_v55  ;;  %v1133_v8 = vpop.f32.mrb[15].mxu1 }
 0x11a   :  { %2702 = vst [vmem:[%s5786_s3 + $0x58] sm:$0xff] %v2564_v46  ;;  %v1134_v31 = vadd.f32 %v1133_v8, %v5215_v55  ;;  %v1048_v9 = vpop.f32.mrb[14].mxu0 }
 0x11b   :  { %v2609_v10 = vmax.f32 %v1132_v7, 0.0  ;;  %v1049_v48 = vadd.f32 %v1048_v9, %v5215_v55  ;;  %v1050_v11 = vpop.f32.mrb[15].mxu0 }
 0x11c   :  { %v2610_v12 = vmax.f32 %v1134_v31, 0.0  ;;  %v1137_v3 = vpop.f32.mrb[16].mxu1  ;;  %v1051_v13 = vadd.f32 %v1050_v11, %v5215_v55 }
 0x11d   :  { %2748 = vst [vmem:[%s5786_s3 + $0x1c0] sm:$0xff] %v2609_v10  ;;  %v2607_v15 = vmax.f32 %v1049_v48, 0.0  ;;  %v1138_v16 = vadd.f32 %v1137_v3, %v5237_v0  ;;  %v1139_v17 = vpop.f32.mrb[17].mxu1 }
 0x11e   :  { %2749 = vst [vmem:[%s5786_s3 + $0x1c8] sm:$0xff] %v2610_v12  ;;  %v2608_v61 = vmax.f32 %v1051_v13, 0.0  ;;  %v1140_v18 = vadd.f32 %v1139_v17, %v5237_v0  ;;  %v1054_v19 = vpop.f32.mrb[16].mxu0 }
 0x11f   :  { %2746 = vst [vmem:[%s5786_s3 + $0x1b0] sm:$0xff] %v2607_v15  ;;  %v2655_v20 = vmax.f32 %v1138_v16, 0.0  ;;  %v1055_v21 = vadd.f32 %v1054_v19, %v5237_v0  ;;  %v1056_v22 = vpop.f32.mrb[17].mxu0 }
 0x120   :  { %2747 = vst [vmem:[%s5786_s3 + $0x1b8] sm:$0xff] %v2608_v61  ;;  %v2656_v23 = vmax.f32 %v1140_v18, 0.0  ;;  %v1057_v24 = vadd.f32 %v1056_v22, %v5237_v0 }
 0x121   :  { %2794 = vst [vmem:[%s5786_s3 + $0x330] sm:$0xff] %v2655_v20  ;;  %v2653_v25 = vmax.f32 %v1055_v21, 0.0 }
 0x122   :  { %2795 = vst [vmem:[%s5786_s3 + $0x338] sm:$0xff] %v2656_v23  ;;  %v2654_v26 = vmax.f32 %v1057_v24, 0.0 }
 0x123   :  { %2792 = vst [vmem:[%s5786_s3 + $0x320] sm:$0xff] %v2653_v25 }
 0x124   :  { %2793 = vst [vmem:[%s5786_s3 + $0x328] sm:$0xff] %v2654_v26 }
 0x127   :  { %v1208_v27 = vpop.f32.mrb[18].mxu0 }
 0x128   :  { %v1291_v28 = vpop.f32.mrb[18].mxu1  ;;  %v1209_v29 = vadd.f32 %v1208_v27, %v5197_v39  ;;  %v1210_v30 = vpop.f32.mrb[19].mxu0 }
 0x129   :  { %v1292_v32 = vadd.f32 %v1291_v28, %v5197_v39  ;;  %v1293_v34 = vpop.f32.mrb[19].mxu1  ;;  %v1211_v35 = vadd.f32 %v1210_v30, %v5197_v39 }
 0x12a   :  { %v1294_v36 = vadd.f32 %v1293_v34, %v5197_v39  ;;  %v2565_v37 = vmax.f32 %v1209_v29, 0.0 }
 0x12b   :  { %v2567_v38 = vmax.f32 %v1292_v32, 0.0  ;;  %v2566_v40 = vmax.f32 %v1211_v35, 0.0 }
 0x12c   :  { %v2568_v41 = vmax.f32 %v1294_v36, 0.0  ;;  %2703 = vst [vmem:[%s5786_s3 + $0x60] sm:$0xff] %v2565_v37  ;;  %v1297_v14 = vpop.f32.mrb[20].mxu1 }
 0x12d   :  { %2705 = vst [vmem:[%s5786_s3 + $0x70] sm:$0xff] %v2567_v38  ;;  %2704 = vst [vmem:[%s5786_s3 + $0x68] sm:$0xff] %v2566_v40  ;;  %v1298_v42 = vadd.f32 %v1297_v14, %v5215_v55  ;;  %v1299_v43 = vpop.f32.mrb[21].mxu1 }
 0x12e   :  { %2706 = vst [vmem:[%s5786_s3 + $0x78] sm:$0xff] %v2568_v41  ;;  %v1300_v44 = vadd.f32 %v1299_v43, %v5215_v55  ;;  %v1214_v45 = vpop.f32.mrb[20].mxu0 }
 0x12f   :  { %v2613_v47 = vmax.f32 %v1298_v42, 0.0  ;;  %v1215_v49 = vadd.f32 %v1214_v45, %v5215_v55  ;;  %v1216_v50 = vpop.f32.mrb[21].mxu0 }
 0x130   :  { %v2614_v51 = vmax.f32 %v1300_v44, 0.0  ;;  %v1303_v53 = vpop.f32.mrb[22].mxu1  ;;  %v1217_v54 = vadd.f32 %v1216_v50, %v5215_v55 }
 0x131   :  { %2752 = vst [vmem:[%s5786_s3 + $0x1e0] sm:$0xff] %v2613_v47  ;;  %v2611_v56 = vmax.f32 %v1215_v49, 0.0  ;;  %v1304_v57 = vadd.f32 %v1303_v53, %v5237_v0  ;;  %v1305_v58 = vpop.f32.mrb[23].mxu1 }
 0x132   :  { %2753 = vst [vmem:[%s5786_s3 + $0x1e8] sm:$0xff] %v2614_v51  ;;  %v2612_v33 = vmax.f32 %v1217_v54, 0.0  ;;  %v1306_v59 = vadd.f32 %v1305_v58, %v5237_v0  ;;  %v1220_v60 = vpop.f32.mrb[22].mxu0 }
 0x133   :  { %2750 = vst [vmem:[%s5786_s3 + $0x1d0] sm:$0xff] %v2611_v56  ;;  %v2659_v62 = vmax.f32 %v1304_v57, 0.0  ;;  %v1221_v63 = vadd.f32 %v1220_v60, %v5237_v0  ;;  %v1222_v1 = vpop.f32.mrb[23].mxu0 }
 0x134   :  { %2751 = vst [vmem:[%s5786_s3 + $0x1d8] sm:$0xff] %v2612_v33  ;;  %v2660_v2 = vmax.f32 %v1306_v59, 0.0  ;;  %v1223_v4 = vadd.f32 %v1222_v1, %v5237_v0 }
 0x135   :  { %2798 = vst [vmem:[%s5786_s3 + $0x350] sm:$0xff] %v2659_v62  ;;  %v2657_v5 = vmax.f32 %v1221_v63, 0.0 }
 0x136   :  { %2799 = vst [vmem:[%s5786_s3 + $0x358] sm:$0xff] %v2660_v2  ;;  %v2658_v6 = vmax.f32 %v1223_v4, 0.0 }
 0x137   :  { %2796 = vst [vmem:[%s5786_s3 + $0x340] sm:$0xff] %v2657_v5 }
 0x138   :  { %2797 = vst [vmem:[%s5786_s3 + $0x348] sm:$0xff] %v2658_v6 }
 0x13b   :  { %v1374_v46 = vpop.f32.mrb[24].mxu0 }
 0x13c   :  { %v1457_v52 = vpop.f32.mrb[24].mxu1  ;;  %v1375_v7 = vadd.f32 %v1374_v46, %v5197_v39  ;;  %v1376_v8 = vpop.f32.mrb[25].mxu0 }
 0x13d   :  { %v1458_v31 = vadd.f32 %v1457_v52, %v5197_v39  ;;  %v1459_v9 = vpop.f32.mrb[25].mxu1  ;;  %v1377_v10 = vadd.f32 %v1376_v8, %v5197_v39 }
 0x13e   :  { %v1460_v48 = vadd.f32 %v1459_v9, %v5197_v39  ;;  %v2569_v11 = vmax.f32 %v1375_v7, 0.0 }
 0x13f   :  { %v2571_v12 = vmax.f32 %v1458_v31, 0.0  ;;  %v2570_v3 = vmax.f32 %v1377_v10, 0.0 }
 0x140   :  { %v2572_v13 = vmax.f32 %v1460_v48, 0.0  ;;  %2707 = vst [vmem:[%s5786_s3 + $0x80] sm:$0xff] %v2569_v11  ;;  %v1463_v15 = vpop.f32.mrb[26].mxu1 }
 0x141   :  { %2709 = vst [vmem:[%s5786_s3 + $0x90] sm:$0xff] %v2571_v12  ;;  %2708 = vst [vmem:[%s5786_s3 + $0x88] sm:$0xff] %v2570_v3  ;;  %v1464_v16 = vadd.f32 %v1463_v15, %v5215_v55  ;;  %v1465_v17 = vpop.f32.mrb[27].mxu1 }
 0x142   :  { %2710 = vst [vmem:[%s5786_s3 + $0x98] sm:$0xff] %v2572_v13  ;;  %v1466_v61 = vadd.f32 %v1465_v17, %v5215_v55  ;;  %v1380_v18 = vpop.f32.mrb[26].mxu0 }
 0x143   :  { %v2617_v19 = vmax.f32 %v1464_v16, 0.0  ;;  %v1381_v20 = vadd.f32 %v1380_v18, %v5215_v55  ;;  %v1382_v21 = vpop.f32.mrb[27].mxu0 }
 0x144   :  { %v2618_v22 = vmax.f32 %v1466_v61, 0.0  ;;  %v1469_v23 = vpop.f32.mrb[28].mxu1  ;;  %v1383_v24 = vadd.f32 %v1382_v21, %v5215_v55 }
 0x145   :  { %2756 = vst [vmem:[%s5786_s3 + $0x200] sm:$0xff] %v2617_v19  ;;  %v2615_v25 = vmax.f32 %v1381_v20, 0.0  ;;  %v1470_v26 = vadd.f32 %v1469_v23, %v5237_v0  ;;  %v1471_v27 = vpop.f32.mrb[29].mxu1 }
 0x146   :  { %2757 = vst [vmem:[%s5786_s3 + $0x208] sm:$0xff] %v2618_v22  ;;  %v2616_v28 = vmax.f32 %v1383_v24, 0.0  ;;  %v1472_v29 = vadd.f32 %v1471_v27, %v5237_v0  ;;  %v1386_v30 = vpop.f32.mrb[28].mxu0 }
 0x147   :  { %2754 = vst [vmem:[%s5786_s3 + $0x1f0] sm:$0xff] %v2615_v25  ;;  %v2663_v32 = vmax.f32 %v1470_v26, 0.0  ;;  %v1387_v34 = vadd.f32 %v1386_v30, %v5237_v0  ;;  %v1388_v35 = vpop.f32.mrb[29].mxu0 }
 0x148   :  { %2755 = vst [vmem:[%s5786_s3 + $0x1f8] sm:$0xff] %v2616_v28  ;;  %v2664_v36 = vmax.f32 %v1472_v29, 0.0  ;;  %v1389_v37 = vadd.f32 %v1388_v35, %v5237_v0 }
 0x149   :  { %2802 = vst [vmem:[%s5786_s3 + $0x370] sm:$0xff] %v2663_v32  ;;  %v2661_v38 = vmax.f32 %v1387_v34, 0.0 }
 0x14a   :  { %2803 = vst [vmem:[%s5786_s3 + $0x378] sm:$0xff] %v2664_v36  ;;  %v2662_v40 = vmax.f32 %v1389_v37, 0.0 }
 0x14b   :  { %2800 = vst [vmem:[%s5786_s3 + $0x360] sm:$0xff] %v2661_v38 }
 0x14c   :  { %2801 = vst [vmem:[%s5786_s3 + $0x368] sm:$0xff] %v2662_v40 }
 0x14f   :  { %v1540_v41 = vpop.f32.mrb[30].mxu0 }
 0x150   :  { %v1623_v14 = vpop.f32.mrb[30].mxu1  ;;  %v1541_v42 = vadd.f32 %v1540_v41, %v5197_v39  ;;  %v1542_v43 = vpop.f32.mrb[31].mxu0 }
 0x151   :  { %v1624_v44 = vadd.f32 %v1623_v14, %v5197_v39  ;;  %v1625_v45 = vpop.f32.mrb[31].mxu1  ;;  %v1543_v47 = vadd.f32 %v1542_v43, %v5197_v39 }
 0x152   :  { %v1626_v49 = vadd.f32 %v1625_v45, %v5197_v39  ;;  %v2573_v50 = vmax.f32 %v1541_v42, 0.0 }
 0x153   :  { %v2575_v51 = vmax.f32 %v1624_v44, 0.0  ;;  %v2574_v53 = vmax.f32 %v1543_v47, 0.0 }
 0x154   :  { %v2576_v54 = vmax.f32 %v1626_v49, 0.0  ;;  %2711 = vst [vmem:[%s5786_s3 + $0xa0] sm:$0xff] %v2573_v50  ;;  %v1629_v56 = vpop.f32.mrb[32].mxu1 }
 0x155   :  { %2713 = vst [vmem:[%s5786_s3 + $0xb0] sm:$0xff] %v2575_v51  ;;  %2712 = vst [vmem:[%s5786_s3 + $0xa8] sm:$0xff] %v2574_v53  ;;  %v1630_v57 = vadd.f32 %v1629_v56, %v5215_v55  ;;  %v1631_v58 = vpop.f32.mrb[33].mxu1 }
 0x156   :  { %2714 = vst [vmem:[%s5786_s3 + $0xb8] sm:$0xff] %v2576_v54  ;;  %v1632_v33 = vadd.f32 %v1631_v58, %v5215_v55  ;;  %v1546_v59 = vpop.f32.mrb[32].mxu0 }
 0x157   :  { %v2621_v60 = vmax.f32 %v1630_v57, 0.0  ;;  %v1547_v62 = vadd.f32 %v1546_v59, %v5215_v55  ;;  %v1548_v63 = vpop.f32.mrb[33].mxu0 }
 0x158   :  { %v2622_v1 = vmax.f32 %v1632_v33, 0.0  ;;  %v1635_v2 = vpop.f32.mrb[34].mxu1  ;;  %v1549_v4 = vadd.f32 %v1548_v63, %v5215_v55 }
 0x159   :  { %2760 = vst [vmem:[%s5786_s3 + $0x220] sm:$0xff] %v2621_v60  ;;  %v2619_v5 = vmax.f32 %v1547_v62, 0.0  ;;  %v1636_v6 = vadd.f32 %v1635_v2, %v5237_v0  ;;  %v1637_v46 = vpop.f32.mrb[35].mxu1 }
 0x15a   :  { %2761 = vst [vmem:[%s5786_s3 + $0x228] sm:$0xff] %v2622_v1  ;;  %v2620_v52 = vmax.f32 %v1549_v4, 0.0  ;;  %v1638_v7 = vadd.f32 %v1637_v46, %v5237_v0  ;;  %v1552_v8 = vpop.f32.mrb[34].mxu0 }
 0x15b   :  { %2758 = vst [vmem:[%s5786_s3 + $0x210] sm:$0xff] %v2619_v5  ;;  %v2667_v31 = vmax.f32 %v1636_v6, 0.0  ;;  %v1553_v9 = vadd.f32 %v1552_v8, %v5237_v0  ;;  %v1554_v10 = vpop.f32.mrb[35].mxu0 }
 0x15c   :  { %2759 = vst [vmem:[%s5786_s3 + $0x218] sm:$0xff] %v2620_v52  ;;  %v2668_v48 = vmax.f32 %v1638_v7, 0.0  ;;  %v1555_v11 = vadd.f32 %v1554_v10, %v5237_v0 }
 0x15d   :  { %2806 = vst [vmem:[%s5786_s3 + $0x390] sm:$0xff] %v2667_v31  ;;  %v2665_v12 = vmax.f32 %v1553_v9, 0.0 }
 0x15e   :  { %2807 = vst [vmem:[%s5786_s3 + $0x398] sm:$0xff] %v2668_v48  ;;  %v2666_v3 = vmax.f32 %v1555_v11, 0.0 }
 0x15f   :  { %2804 = vst [vmem:[%s5786_s3 + $0x380] sm:$0xff] %v2665_v12 }
 0x160   :  { %2805 = vst [vmem:[%s5786_s3 + $0x388] sm:$0xff] %v2666_v3 }
 0x163   :  { %v1706_v13 = vpop.f32.mrb[36].mxu0 }
 0x164   :  { %v1789_v15 = vpop.f32.mrb[36].mxu1  ;;  %v1707_v16 = vadd.f32 %v1706_v13, %v5197_v39  ;;  %v1708_v17 = vpop.f32.mrb[37].mxu0 }
 0x165   :  { %v1790_v61 = vadd.f32 %v1789_v15, %v5197_v39  ;;  %v1791_v18 = vpop.f32.mrb[37].mxu1  ;;  %v1709_v19 = vadd.f32 %v1708_v17, %v5197_v39 }
 0x166   :  { %v1792_v20 = vadd.f32 %v1791_v18, %v5197_v39  ;;  %v2577_v21 = vmax.f32 %v1707_v16, 0.0 }
 0x167   :  { %v2579_v22 = vmax.f32 %v1790_v61, 0.0  ;;  %v2578_v23 = vmax.f32 %v1709_v19, 0.0 }
 0x168   :  { %v2580_v24 = vmax.f32 %v1792_v20, 0.0  ;;  %2715 = vst [vmem:[%s5786_s3 + $0xc0] sm:$0xff] %v2577_v21  ;;  %v1795_v25 = vpop.f32.mrb[38].mxu1 }
 0x169   :  { %2717 = vst [vmem:[%s5786_s3 + $0xd0] sm:$0xff] %v2579_v22  ;;  %2716 = vst [vmem:[%s5786_s3 + $0xc8] sm:$0xff] %v2578_v23  ;;  %v1796_v26 = vadd.f32 %v1795_v25, %v5215_v55  ;;  %v1797_v27 = vpop.f32.mrb[39].mxu1 }
 0x16a   :  { %2718 = vst [vmem:[%s5786_s3 + $0xd8] sm:$0xff] %v2580_v24  ;;  %v1798_v28 = vadd.f32 %v1797_v27, %v5215_v55  ;;  %v1712_v29 = vpop.f32.mrb[38].mxu0 }
 0x16b   :  { %v2625_v30 = vmax.f32 %v1796_v26, 0.0  ;;  %v1713_v32 = vadd.f32 %v1712_v29, %v5215_v55  ;;  %v1714_v34 = vpop.f32.mrb[39].mxu0 }
 0x16c   :  { %v2626_v35 = vmax.f32 %v1798_v28, 0.0  ;;  %v1801_v36 = vpop.f32.mrb[40].mxu1  ;;  %v1715_v37 = vadd.f32 %v1714_v34, %v5215_v55 }
 0x16d   :  { %2764 = vst [vmem:[%s5786_s3 + $0x240] sm:$0xff] %v2625_v30  ;;  %v2623_v38 = vmax.f32 %v1713_v32, 0.0  ;;  %v1802_v40 = vadd.f32 %v1801_v36, %v5237_v0  ;;  %v1803_v41 = vpop.f32.mrb[41].mxu1 }
 0x16e   :  { %2765 = vst [vmem:[%s5786_s3 + $0x248] sm:$0xff] %v2626_v35  ;;  %v2624_v14 = vmax.f32 %v1715_v37, 0.0  ;;  %v1804_v42 = vadd.f32 %v1803_v41, %v5237_v0  ;;  %v1718_v43 = vpop.f32.mrb[40].mxu0 }
 0x16f   :  { %2762 = vst [vmem:[%s5786_s3 + $0x230] sm:$0xff] %v2623_v38  ;;  %v2671_v44 = vmax.f32 %v1802_v40, 0.0  ;;  %v1719_v45 = vadd.f32 %v1718_v43, %v5237_v0  ;;  %v1720_v47 = vpop.f32.mrb[41].mxu0 }
 0x170   :  { %2763 = vst [vmem:[%s5786_s3 + $0x238] sm:$0xff] %v2624_v14  ;;  %v2672_v49 = vmax.f32 %v1804_v42, 0.0  ;;  %v1721_v50 = vadd.f32 %v1720_v47, %v5237_v0 }
 0x171   :  { %2810 = vst [vmem:[%s5786_s3 + $0x3b0] sm:$0xff] %v2671_v44  ;;  %v2669_v51 = vmax.f32 %v1719_v45, 0.0 }
 0x172   :  { %2811 = vst [vmem:[%s5786_s3 + $0x3b8] sm:$0xff] %v2672_v49  ;;  %v2670_v53 = vmax.f32 %v1721_v50, 0.0 }
 0x173   :  { %2808 = vst [vmem:[%s5786_s3 + $0x3a0] sm:$0xff] %v2669_v51 }
 0x174   :  { %2809 = vst [vmem:[%s5786_s3 + $0x3a8] sm:$0xff] %v2670_v53 }
 0x177   :  { %v1872_v54 = vpop.f32.mrb[42].mxu0 }
 0x178   :  { %v1955_v56 = vpop.f32.mrb[42].mxu1  ;;  %v1873_v57 = vadd.f32 %v1872_v54, %v5197_v39  ;;  %v1874_v58 = vpop.f32.mrb[43].mxu0 }
 0x179   :  { %v1956_v33 = vadd.f32 %v1955_v56, %v5197_v39  ;;  %v1957_v59 = vpop.f32.mrb[43].mxu1  ;;  %v1875_v60 = vadd.f32 %v1874_v58, %v5197_v39 }
 0x17a   :  { %v1958_v62 = vadd.f32 %v1957_v59, %v5197_v39  ;;  %v2581_v63 = vmax.f32 %v1873_v57, 0.0 }
 0x17b   :  { %v2583_v1 = vmax.f32 %v1956_v33, 0.0  ;;  %v2582_v2 = vmax.f32 %v1875_v60, 0.0 }
 0x17c   :  { %v2584_v4 = vmax.f32 %v1958_v62, 0.0  ;;  %2719 = vst [vmem:[%s5786_s3 + $0xe0] sm:$0xff] %v2581_v63  ;;  %v1961_v5 = vpop.f32.mrb[44].mxu1 }
 0x17d   :  { %2721 = vst [vmem:[%s5786_s3 + $0xf0] sm:$0xff] %v2583_v1  ;;  %2720 = vst [vmem:[%s5786_s3 + $0xe8] sm:$0xff] %v2582_v2  ;;  %v1962_v6 = vadd.f32 %v1961_v5, %v5215_v55  ;;  %v1963_v46 = vpop.f32.mrb[45].mxu1 }
 0x17e   :  { %2722 = vst [vmem:[%s5786_s3 + $0xf8] sm:$0xff] %v2584_v4  ;;  %v1964_v52 = vadd.f32 %v1963_v46, %v5215_v55  ;;  %v1878_v7 = vpop.f32.mrb[44].mxu0 }
 0x17f   :  { %v2629_v8 = vmax.f32 %v1962_v6, 0.0  ;;  %v1879_v31 = vadd.f32 %v1878_v7, %v5215_v55  ;;  %v1880_v9 = vpop.f32.mrb[45].mxu0 }
 0x180   :  { %v2630_v10 = vmax.f32 %v1964_v52, 0.0  ;;  %v1967_v48 = vpop.f32.mrb[46].mxu1  ;;  %v1881_v11 = vadd.f32 %v1880_v9, %v5215_v55 }
 0x181   :  { %2768 = vst [vmem:[%s5786_s3 + $0x260] sm:$0xff] %v2629_v8  ;;  %v2627_v12 = vmax.f32 %v1879_v31, 0.0  ;;  %v1968_v3 = vadd.f32 %v1967_v48, %v5237_v0  ;;  %v1969_v13 = vpop.f32.mrb[47].mxu1 }
 0x182   :  { %2769 = vst [vmem:[%s5786_s3 + $0x268] sm:$0xff] %v2630_v10  ;;  %v2628_v15 = vmax.f32 %v1881_v11, 0.0  ;;  %v1970_v16 = vadd.f32 %v1969_v13, %v5237_v0  ;;  %v1884_v17 = vpop.f32.mrb[46].mxu0 }
 0x183   :  { %2766 = vst [vmem:[%s5786_s3 + $0x250] sm:$0xff] %v2627_v12  ;;  %v2675_v61 = vmax.f32 %v1968_v3, 0.0  ;;  %v1885_v18 = vadd.f32 %v1884_v17, %v5237_v0  ;;  %v1886_v19 = vpop.f32.mrb[47].mxu0 }
 0x184   :  { %2767 = vst [vmem:[%s5786_s3 + $0x258] sm:$0xff] %v2628_v15  ;;  %v2676_v20 = vmax.f32 %v1970_v16, 0.0  ;;  %v1887_v21 = vadd.f32 %v1886_v19, %v5237_v0 }
 0x185   :  { %2814 = vst [vmem:[%s5786_s3 + $0x3d0] sm:$0xff] %v2675_v61  ;;  %v2673_v22 = vmax.f32 %v1885_v18, 0.0 }
 0x186   :  { %2815 = vst [vmem:[%s5786_s3 + $0x3d8] sm:$0xff] %v2676_v20  ;;  %v2674_v23 = vmax.f32 %v1887_v21, 0.0 }
 0x187   :  { %2812 = vst [vmem:[%s5786_s3 + $0x3c0] sm:$0xff] %v2673_v22 }
 0x188   :  { %2813 = vst [vmem:[%s5786_s3 + $0x3c8] sm:$0xff] %v2674_v23 }
 0x18b   :  { %v2038_v24 = vpop.f32.mrb[48].mxu0 }
 0x18c   :  { %v2121_v25 = vpop.f32.mrb[48].mxu1  ;;  %v2039_v26 = vadd.f32 %v2038_v24, %v5197_v39  ;;  %v2040_v27 = vpop.f32.mrb[49].mxu0 }
 0x18d   :  { %v2122_v28 = vadd.f32 %v2121_v25, %v5197_v39  ;;  %v2123_v29 = vpop.f32.mrb[49].mxu1  ;;  %v2041_v30 = vadd.f32 %v2040_v27, %v5197_v39 }
 0x18e   :  { %v2124_v32 = vadd.f32 %v2123_v29, %v5197_v39  ;;  %v2585_v34 = vmax.f32 %v2039_v26, 0.0 }
 0x18f   :  { %v2587_v35 = vmax.f32 %v2122_v28, 0.0  ;;  %v2586_v36 = vmax.f32 %v2041_v30, 0.0 }
 0x190   :  { %v2588_v37 = vmax.f32 %v2124_v32, 0.0  ;;  %2723 = vst [vmem:[%s5786_s3 + $0x100] sm:$0xff] %v2585_v34  ;;  %v2127_v38 = vpop.f32.mrb[50].mxu1 }
 0x191   :  { %2725 = vst [vmem:[%s5786_s3 + $0x110] sm:$0xff] %v2587_v35  ;;  %2724 = vst [vmem:[%s5786_s3 + $0x108] sm:$0xff] %v2586_v36  ;;  %v2128_v40 = vadd.f32 %v2127_v38, %v5215_v55  ;;  %v2129_v41 = vpop.f32.mrb[51].mxu1 }
 0x192   :  { %2726 = vst [vmem:[%s5786_s3 + $0x118] sm:$0xff] %v2588_v37  ;;  %v2130_v14 = vadd.f32 %v2129_v41, %v5215_v55  ;;  %v2044_v42 = vpop.f32.mrb[50].mxu0 }
 0x193   :  { %v2633_v43 = vmax.f32 %v2128_v40, 0.0  ;;  %v2045_v44 = vadd.f32 %v2044_v42, %v5215_v55  ;;  %v2046_v45 = vpop.f32.mrb[51].mxu0 }
 0x194   :  { %v2634_v47 = vmax.f32 %v2130_v14, 0.0  ;;  %v2133_v49 = vpop.f32.mrb[52].mxu1  ;;  %v2047_v50 = vadd.f32 %v2046_v45, %v5215_v55 }
 0x195   :  { %2772 = vst [vmem:[%s5786_s3 + $0x280] sm:$0xff] %v2633_v43  ;;  %v2631_v51 = vmax.f32 %v2045_v44, 0.0  ;;  %v2134_v53 = vadd.f32 %v2133_v49, %v5237_v0  ;;  %v2135_v54 = vpop.f32.mrb[53].mxu1 }
 0x196   :  { %2773 = vst [vmem:[%s5786_s3 + $0x288] sm:$0xff] %v2634_v47  ;;  %v2632_v56 = vmax.f32 %v2047_v50, 0.0  ;;  %v2136_v57 = vadd.f32 %v2135_v54, %v5237_v0  ;;  %v2050_v58 = vpop.f32.mrb[52].mxu0 }
 0x197   :  { %2770 = vst [vmem:[%s5786_s3 + $0x270] sm:$0xff] %v2631_v51  ;;  %v2679_v33 = vmax.f32 %v2134_v53, 0.0  ;;  %v2051_v59 = vadd.f32 %v2050_v58, %v5237_v0  ;;  %v2052_v60 = vpop.f32.mrb[53].mxu0 }
 0x198   :  { %2771 = vst [vmem:[%s5786_s3 + $0x278] sm:$0xff] %v2632_v56  ;;  %v2680_v62 = vmax.f32 %v2136_v57, 0.0  ;;  %v2053_v63 = vadd.f32 %v2052_v60, %v5237_v0 }
 0x199   :  { %2818 = vst [vmem:[%s5786_s3 + $0x3f0] sm:$0xff] %v2679_v33  ;;  %v2677_v1 = vmax.f32 %v2051_v59, 0.0 }
 0x19a   :  { %2819 = vst [vmem:[%s5786_s3 + $0x3f8] sm:$0xff] %v2680_v62  ;;  %v2678_v2 = vmax.f32 %v2053_v63, 0.0 }
 0x19b   :  { %2816 = vst [vmem:[%s5786_s3 + $0x3e0] sm:$0xff] %v2677_v1 }
 0x19c   :  { %2817 = vst [vmem:[%s5786_s3 + $0x3e8] sm:$0xff] %v2678_v2 }
 0x19f   :  { %v2204_v4 = vpop.f32.mrb[54].mxu0 }
 0x1a0   :  { %v2287_v5 = vpop.f32.mrb[54].mxu1  ;;  %v2205_v6 = vadd.f32 %v2204_v4, %v5197_v39  ;;  %v2206_v46 = vpop.f32.mrb[55].mxu0 }
 0x1a1   :  { %v2288_v52 = vadd.f32 %v2287_v5, %v5197_v39  ;;  %v2289_v7 = vpop.f32.mrb[55].mxu1  ;;  %v2207_v8 = vadd.f32 %v2206_v46, %v5197_v39 }
 0x1a2   :  { %v2290_v31 = vadd.f32 %v2289_v7, %v5197_v39  ;;  %v2589_v9 = vmax.f32 %v2205_v6, 0.0 }
 0x1a3   :  { %v2591_v10 = vmax.f32 %v2288_v52, 0.0  ;;  %v2590_v48 = vmax.f32 %v2207_v8, 0.0 }
 0x1a4   :  { %v2592_v11 = vmax.f32 %v2290_v31, 0.0  ;;  %2727 = vst [vmem:[%s5786_s3 + $0x120] sm:$0xff] %v2589_v9  ;;  %v2293_v12 = vpop.f32.mrb[56].mxu1 }
 0x1a5   :  { %2729 = vst [vmem:[%s5786_s3 + $0x130] sm:$0xff] %v2591_v10  ;;  %2728 = vst [vmem:[%s5786_s3 + $0x128] sm:$0xff] %v2590_v48  ;;  %v2294_v3 = vadd.f32 %v2293_v12, %v5215_v55  ;;  %v2295_v13 = vpop.f32.mrb[57].mxu1 }
 0x1a6   :  { %2730 = vst [vmem:[%s5786_s3 + $0x138] sm:$0xff] %v2592_v11  ;;  %v2296_v15 = vadd.f32 %v2295_v13, %v5215_v55  ;;  %v2210_v16 = vpop.f32.mrb[56].mxu0 }
 0x1a7   :  { %v2637_v17 = vmax.f32 %v2294_v3, 0.0  ;;  %v2211_v61 = vadd.f32 %v2210_v16, %v5215_v55  ;;  %v2212_v18 = vpop.f32.mrb[57].mxu0 }
 0x1a8   :  { %v2638_v19 = vmax.f32 %v2296_v15, 0.0  ;;  %v2299_v20 = vpop.f32.mrb[58].mxu1  ;;  %v2213_v21 = vadd.f32 %v2212_v18, %v5215_v55 }
 0x1a9   :  { %2776 = vst [vmem:[%s5786_s3 + $0x2a0] sm:$0xff] %v2637_v17  ;;  %v2635_v22 = vmax.f32 %v2211_v61, 0.0  ;;  %v2300_v23 = vadd.f32 %v2299_v20, %v5237_v0  ;;  %v2301_v24 = vpop.f32.mrb[59].mxu1 }
 0x1aa   :  { %2777 = vst [vmem:[%s5786_s3 + $0x2a8] sm:$0xff] %v2638_v19  ;;  %v2636_v25 = vmax.f32 %v2213_v21, 0.0  ;;  %v2302_v26 = vadd.f32 %v2301_v24, %v5237_v0  ;;  %v2216_v27 = vpop.f32.mrb[58].mxu0 }
 0x1ab   :  { %2774 = vst [vmem:[%s5786_s3 + $0x290] sm:$0xff] %v2635_v22  ;;  %v2683_v28 = vmax.f32 %v2300_v23, 0.0  ;;  %v2217_v29 = vadd.f32 %v2216_v27, %v5237_v0  ;;  %v2218_v30 = vpop.f32.mrb[59].mxu0 }
 0x1ac   :  { %2775 = vst [vmem:[%s5786_s3 + $0x298] sm:$0xff] %v2636_v25  ;;  %v2684_v32 = vmax.f32 %v2302_v26, 0.0  ;;  %v2219_v34 = vadd.f32 %v2218_v30, %v5237_v0 }
 0x1ad   :  { %2822 = vst [vmem:[%s5786_s3 + $0x410] sm:$0xff] %v2683_v28  ;;  %v2681_v35 = vmax.f32 %v2217_v29, 0.0 }
 0x1ae   :  { %2823 = vst [vmem:[%s5786_s3 + $0x418] sm:$0xff] %v2684_v32  ;;  %v2682_v36 = vmax.f32 %v2219_v34, 0.0 }
 0x1af   :  { %2820 = vst [vmem:[%s5786_s3 + $0x400] sm:$0xff] %v2681_v35 }
 0x1b0   :  { %2821 = vst [vmem:[%s5786_s3 + $0x408] sm:$0xff] %v2682_v36 }
 0x1b3   :  { %v2370_v37 = vpop.f32.mrb[60].mxu0 }
 0x1b4   :  { %v2453_v38 = vpop.f32.mrb[60].mxu1  ;;  %v2371_v40 = vadd.f32 %v2370_v37, %v5197_v39  ;;  %v2372_v41 = vpop.f32.mrb[61].mxu0 }
 0x1b5   :  { %v2454_v14 = vadd.f32 %v2453_v38, %v5197_v39  ;;  %v2455_v42 = vpop.f32.mrb[61].mxu1  ;;  %v2373_v43 = vadd.f32 %v2372_v41, %v5197_v39 }
 0x1b6   :  { %v2456_v44 = vadd.f32 %v2455_v42, %v5197_v39  ;;  %v2593_v45 = vmax.f32 %v2371_v40, 0.0 }
 0x1b7   :  { %v2595_v47 = vmax.f32 %v2454_v14, 0.0  ;;  %v2594_v49 = vmax.f32 %v2373_v43, 0.0 }
 0x1b8   :  { %v2596_v50 = vmax.f32 %v2456_v44, 0.0  ;;  %2731 = vst [vmem:[%s5786_s3 + $0x140] sm:$0xff] %v2593_v45  ;;  %v2459_v51 = vpop.f32.mrb[62].mxu1 }
 0x1b9   :  { %2733 = vst [vmem:[%s5786_s3 + $0x150] sm:$0xff] %v2595_v47  ;;  %2732 = vst [vmem:[%s5786_s3 + $0x148] sm:$0xff] %v2594_v49  ;;  %v2460_v53 = vadd.f32 %v2459_v51, %v5215_v55  ;;  %v2461_v54 = vpop.f32.mrb[63].mxu1 }
 0x1ba   :  { %2734 = vst [vmem:[%s5786_s3 + $0x158] sm:$0xff] %v2596_v50  ;;  %v2462_v56 = vadd.f32 %v2461_v54, %v5215_v55  ;;  %v2376_v57 = vpop.f32.mrb[62].mxu0 }
 0x1bb   :  { %v2641_v58 = vmax.f32 %v2460_v53, 0.0  ;;  %v2377_v33 = vadd.f32 %v2376_v57, %v5215_v55  ;;  %v2378_v59 = vpop.f32.mrb[63].mxu0 }
 0x1bc   :  { %v2642_v60 = vmax.f32 %v2462_v56, 0.0  ;;  %v2465_v62 = vpop.f32.mrb[64].mxu1  ;;  %v2379_v63 = vadd.f32 %v2378_v59, %v5215_v55 }
 0x1bd   :  { %2780 = vst [vmem:[%s5786_s3 + $0x2c0] sm:$0xff] %v2641_v58  ;;  %v2639_v1 = vmax.f32 %v2377_v33, 0.0  ;;  %v2466_v2 = vadd.f32 %v2465_v62, %v5237_v0  ;;  %v2467_v4 = vpop.f32.mrb[65].mxu1 }
 0x1be   :  { %2781 = vst [vmem:[%s5786_s3 + $0x2c8] sm:$0xff] %v2642_v60  ;;  %v2640_v5 = vmax.f32 %v2379_v63, 0.0  ;;  %v2468_v6 = vadd.f32 %v2467_v4, %v5237_v0  ;;  %v2382_v46 = vpop.f32.mrb[64].mxu0 }
 0x1bf   :  { %2778 = vst [vmem:[%s5786_s3 + $0x2b0] sm:$0xff] %v2639_v1  ;;  %v2687_v52 = vmax.f32 %v2466_v2, 0.0  ;;  %v2383_v7 = vadd.f32 %v2382_v46, %v5237_v0  ;;  %v2384_v8 = vpop.f32.mrb[65].mxu0 }
 0x1c0   :  { %2779 = vst [vmem:[%s5786_s3 + $0x2b8] sm:$0xff] %v2640_v5  ;;  %v2688_v31 = vmax.f32 %v2468_v6, 0.0  ;;  %v2385_v9 = vadd.f32 %v2384_v8, %v5237_v0 }
 0x1c1   :  { %2826 = vst [vmem:[%s5786_s3 + $0x430] sm:$0xff] %v2687_v52  ;;  %v2685_v10 = vmax.f32 %v2383_v7, 0.0 }
 0x1c2   :  { %2827 = vst [vmem:[%s5786_s3 + $0x438] sm:$0xff] %v2688_v31  ;;  %v2686_v48 = vmax.f32 %v2385_v9, 0.0 }
 0x1c3   :  { %2824 = vst [vmem:[%s5786_s3 + $0x420] sm:$0xff] %v2685_v10 }
 0x1c4   :  { %2825 = vst [vmem:[%s5786_s3 + $0x428] sm:$0xff] %v2686_v48 }
 0x1c7   :  { %v2536_v11 = vpop.f32.mrb[66].mxu0 }
 0x1c8   :  { %v2537_v12 = vadd.f32 %v2536_v11, %v5197_v39  ;;  %v2542_v3 = vpop.f32.mrb[66].mxu1  ;;  %v2538_v13 = vpop.f32.mrb[67].mxu0 }
 0x1c9   :  { %v2543_v15 = vadd.f32 %v2542_v3, %v5215_v55  ;;  %v2539_v16 = vadd.f32 %v2538_v13, %v5197_v39  ;;  %v2544_v17 = vpop.f32.mrb[67].mxu1 }
 0x1ca   :  { %v2597_v61 = vmax.f32 %v2537_v12, 0.0  ;;  %v2545_v18 = vadd.f32 %v2544_v17, %v5215_v55 }
 0x1cb   :  { %v2643_v19 = vmax.f32 %v2543_v15, 0.0  ;;  %v2598_v20 = vmax.f32 %v2539_v16, 0.0 }
 0x1cc   :  { %2735 = vst [vmem:[%s5786_s3 + $0x160] sm:$0xff] %v2597_v61  ;;  %v2644_v21 = vmax.f32 %v2545_v18, 0.0  ;;  %v2548_v22 = vpop.f32.mrb[68].mxu1 }
 0x1cd   :  { %2782 = vst [vmem:[%s5786_s3 + $0x2d0] sm:$0xff] %v2643_v19  ;;  %2737 = vst.msk [vmem:[%s5786_s3 + $0x168] sm:$0xff] %vm2736_vm4, %v2598_v20  ;;  %v2549_v39 = vadd.f32 %v2548_v22, %v5237_v0  ;;  %v2550_v55 = vpop.f32.mrb[69].mxu1 }
 0x1ce   :  { %2783 = vst.msk [vmem:[%s5786_s3 + $0x2d8] sm:$0xff] %vm2736_vm4, %v2644_v21  ;;  %v2551_v23 = vadd.f32 %v2550_v55, %v5237_v0 }
 0x1cf   :  { %v2689_v24 = vmax.f32 %v2549_v39, 0.0 }
 0x1d0   :  { %v2690_v25 = vmax.f32 %v2551_v23, 0.0 }
 0x1d1   :  { %2828 = vst [vmem:[%s5786_s3 + $0x440] sm:$0xff] %v2689_v24 }
 0x1d2   :  { %2829 = vst.msk [vmem:[%s5786_s3 + $0x448] sm:$0xff] %vm2736_vm4, %v2690_v25 }

// kernel: deepknight_forward_pallas.7
= control target key start
LH: loop header
LB: loop body
LE: loop exit
PB: predicated region body
PF: predicated region fallthrough
CT: control target
= control target key end

     0   :  { %vm819_vm0 = vcmask 719872   ;;  %vm2319_vm1 = vcmask 834560   ;;  %vm2360_vm2 = vcmask 830464   ;;  %s6295_s1 = inlined_call_operand.vmem [shape: f32[600,1254], index: 1, kind: input, shape index: {}]   ;;  %s6296_s0 = inlined_call_operand.vmem [shape: f32[36,600], index: 0, kind: input, shape index: {}]   ;;  %s6297_s2 = inlined_call_operand.vmem [shape: f32[36,1], index: 2, kind: input, shape index: {}]   ;;  %s6298_s3 = inlined_call_operand.vmem [shape: f32[36,1254], index: 3, kind: output, shape index: {}]  }
   0x1   :  { %v40_v0 = vld [vmem:[%s6295_s1 + $0x8] sm:$0xff]  ;;  %v50_v1 = vld [vmem:[%s6295_s1 + $0x58] sm:$0xff]  ;;  %v39_v5 = vld [vmem:[%s6295_s1] sm:$0xff] }
   0x2   :  { %v360_v2 = vld [vmem:[%s6295_s1 + $0xa08] sm:$0xff]  ;;  %v2391_v3 = vpack.c.bf16 %v50_v1, %v40_v0  ;;  %v370_v4 = vld [vmem:[%s6295_s1 + $0xa58] sm:$0xff]  ;;  %v49_v6 = vld [vmem:[%s6295_s1 + $0x50] sm:$0xff] }
   0x3   :  { %v2455_v7 = vpack.c.bf16 %v370_v4, %v360_v2  ;;  %v2393_v8 = vpack.c.bf16 %v49_v6, %v39_v5  ;;  %v359_v9 = vld [vmem:[%s6295_s1 + $0xa00] sm:$0xff]  ;;  %v369_v10 = vld [vmem:[%s6295_s1 + $0xa50] sm:$0xff]  ;;  %v60_v11 = vld [vmem:[%s6295_s1 + $0xa8] sm:$0xff] }
   0x4   :  { %2392 = vmatprep.subr.bf16.mxu1 %v2391_v3  ;;  %v2457_v12 = vpack.c.bf16 %v369_v10, %v359_v9  ;;  %v70_v13 = vld [vmem:[%s6295_s1 + $0xf8] sm:$0xff]  ;;  %v380_v14 = vld [vmem:[%s6295_s1 + $0xaa8] sm:$0xff]  ;;  %v59_v18 = vld [vmem:[%s6295_s1 + $0xa0] sm:$0xff] }
   0x5   :  { %v390_v15 = vld [vmem:[%s6295_s1 + $0xaf8] sm:$0xff]  ;;  %2456 = vmatprep.subr.bf16.mxu0 %v2455_v7  ;;  %2394 = vmatpush1.bf16.msra.mxu1 %v2393_v8  ;;  %v2395_v16 = vpack.c.bf16 %v70_v13, %v60_v11  ;;  %v69_v19 = vld [vmem:[%s6295_s1 + $0xf0] sm:$0xff]  ;;  %v379_v20 = vld [vmem:[%s6295_s1 + $0xaa0] sm:$0xff] }
   0x6   :  { %v2459_v17 = vpack.c.bf16 %v390_v15, %v380_v14  ;;  %2458 = vmatpush1.bf16.msra.mxu0 %v2457_v12  ;;  %v2397_v21 = vpack.c.bf16 %v69_v19, %v59_v18  ;;  %v389_v22 = vld [vmem:[%s6295_s1 + $0xaf0] sm:$0xff]  ;;  %v80_v23 = vld [vmem:[%s6295_s1 + $0x148] sm:$0xff]  ;;  %v90_v24 = vld [vmem:[%s6295_s1 + $0x198] sm:$0xff] }
   0x7   :  { %2396 = vmatprep.subr.bf16.mxu1 %v2395_v16  ;;  %v2461_v25 = vpack.c.bf16 %v389_v22, %v379_v20  ;;  %v2399_v26 = vpack.c.bf16 %v90_v24, %v80_v23  ;;  %v400_v27 = vld [vmem:[%s6295_s1 + $0xb48] sm:$0xff]  ;;  %v410_v28 = vld [vmem:[%s6295_s1 + $0xb98] sm:$0xff]  ;;  %v79_v29 = vld [vmem:[%s6295_s1 + $0x140] sm:$0xff] }
   0x8   :  { %2460 = vmatprep.subr.bf16.mxu0 %v2459_v17  ;;  %v2463_v30 = vpack.c.bf16 %v410_v28, %v400_v27  ;;  %v89_v31 = vld [vmem:[%s6295_s1 + $0x190] sm:$0xff]  ;;  %v399_v32 = vld [vmem:[%s6295_s1 + $0xb40] sm:$0xff]  ;;  %v100_v35 = vld [vmem:[%s6295_s1 + $0x1e8] sm:$0xff] }
   0x9   :  { %v409_v33 = vld [vmem:[%s6295_s1 + $0xb90] sm:$0xff]  ;;  %2398 = vmatpush1.bf16.msra.mxu1 %v2397_v21  ;;  %v2401_v34 = vpack.c.bf16 %v89_v31, %v79_v29  ;;  %v110_v36 = vld [vmem:[%s6295_s1 + $0x238] sm:$0xff]  ;;  %v420_v37 = vld [vmem:[%s6295_s1 + $0xbe8] sm:$0xff] }
   0xa   :  { %2462 = vmatpush1.bf16.msra.mxu0 %v2461_v25  ;;  %2400 = vmatprep.subr.bf16.mxu1 %v2399_v26  ;;  %v2465_v38 = vpack.c.bf16 %v409_v33, %v399_v32  ;;  %v2403_v39 = vpack.c.bf16 %v110_v36, %v100_v35  ;;  %v430_v40 = vld [vmem:[%s6295_s1 + $0xc38] sm:$0xff]  ;;  %v99_v41 = vld [vmem:[%s6295_s1 + $0x1e0] sm:$0xff]  ;;  %v109_v42 = vld [vmem:[%s6295_s1 + $0x230] sm:$0xff]  ;;  %v3337_v35 = vmov 0  }
   0xb   :  { %2464 = vmatprep.subr.bf16.mxu0 %v2463_v30  ;;  %v2467_v43 = vpack.c.bf16 %v430_v40, %v420_v37  ;;  %v419_v44 = vld [vmem:[%s6295_s1 + $0xbe0] sm:$0xff]  ;;  %v429_v45 = vld [vmem:[%s6295_s1 + $0xc30] sm:$0xff]  ;;  %v120_v46 = vld [vmem:[%s6295_s1 + $0x288] sm:$0xff]  ;;  %v2405_v50 = vpack.c.bf16 %v109_v42, %v99_v41  ;;  %3295 = vset.pattern.permute.xlu0 %v3337_v35 }
   0xc   :  { %v130_v47 = vld [vmem:[%s6295_s1 + $0x2d8] sm:$0xff]  ;;  %v440_v48 = vld [vmem:[%s6295_s1 + $0xc88] sm:$0xff]  ;;  %v2469_v51 = vpack.c.bf16 %v429_v45, %v419_v44  ;;  %v119_v53 = vld [vmem:[%s6295_s1 + $0x280] sm:$0xff]  ;;  %3296 = vset.pattern.permute.xlu1 %v3337_v35 }
   0xd   :  { %v450_v49 = vld [vmem:[%s6295_s1 + $0xcd8] sm:$0xff]  ;;  %2402 = vmatpush1.bf16.msra.mxu1 %v2401_v34  ;;  %v2407_v52 = vpack.c.bf16 %v130_v47, %v120_v46  ;;  %v129_v54 = vld [vmem:[%s6295_s1 + $0x2d0] sm:$0xff]  ;;  %v439_v55 = vld [vmem:[%s6295_s1 + $0xc80] sm:$0xff] }
   0xe   :  { %2466 = vmatpush1.bf16.msra.mxu0 %v2465_v38  ;;  %2404 = vmatprep.subr.bf16.mxu1 %v2403_v39  ;;  %v2471_v56 = vpack.c.bf16 %v450_v49, %v440_v48  ;;  %v449_v57 = vld [vmem:[%s6295_s1 + $0xcd0] sm:$0xff]  ;;  %v140_v58 = vld [vmem:[%s6295_s1 + $0x328] sm:$0xff]  ;;  %v150_v59 = vld [vmem:[%s6295_s1 + $0x378] sm:$0xff]  ;;  %v2409_v62 = vpack.c.bf16 %v129_v54, %v119_v53 }
   0xf   :  { %2468 = vmatprep.subr.bf16.mxu0 %v2467_v43  ;;  %v460_v60 = vld [vmem:[%s6295_s1 + $0xd28] sm:$0xff]  ;;  %v470_v61 = vld [vmem:[%s6295_s1 + $0xd78] sm:$0xff]  ;;  %v2473_v63 = vpack.c.bf16 %v449_v57, %v439_v55  ;;  %v2411_v0 = vpack.c.bf16 %v150_v59, %v140_v58  ;;  %v139_v1 = vld [vmem:[%s6295_s1 + $0x320] sm:$0xff] }
  0x10   :  { %v149_v2 = vld [vmem:[%s6295_s1 + $0x370] sm:$0xff]  ;;  %v459_v3 = vld [vmem:[%s6295_s1 + $0xd20] sm:$0xff]  ;;  %v2475_v4 = vpack.c.bf16 %v470_v61, %v460_v60  ;;  %v160_v6 = vld [vmem:[%s6295_s1 + $0x3c8] sm:$0xff] }
  0x11   :  { %2406 = vmatpush1.bf16.msra.mxu1 %v2405_v50  ;;  %v469_v5 = vld [vmem:[%s6295_s1 + $0xd70] sm:$0xff]  ;;  %v170_v7 = vld [vmem:[%s6295_s1 + $0x418] sm:$0xff]  ;;  %v480_v8 = vld [vmem:[%s6295_s1 + $0xdc8] sm:$0xff]  ;;  %v2413_v10 = vpack.c.bf16 %v149_v2, %v139_v1 }
  0x12   :  { %2470 = vmatpush1.bf16.msra.mxu0 %v2469_v51  ;;  %2408 = vmatprep.subr.bf16.mxu1 %v2407_v52  ;;  %v490_v9 = vld [vmem:[%s6295_s1 + $0xe18] sm:$0xff]  ;;  %v2477_v11 = vpack.c.bf16 %v469_v5, %v459_v3  ;;  %v2415_v12 = vpack.c.bf16 %v170_v7, %v160_v6  ;;  %v159_v13 = vld [vmem:[%s6295_s1 + $0x3c0] sm:$0xff]  ;;  %v169_v14 = vld [vmem:[%s6295_s1 + $0x410] sm:$0xff] }
  0x13   :  { %2472 = vmatprep.subr.bf16.mxu0 %v2471_v56  ;;  %v479_v15 = vld [vmem:[%s6295_s1 + $0xdc0] sm:$0xff]  ;;  %v2479_v16 = vpack.c.bf16 %v490_v9, %v480_v8  ;;  %v489_v17 = vld [vmem:[%s6295_s1 + $0xe10] sm:$0xff]  ;;  %v180_v18 = vld [vmem:[%s6295_s1 + $0x468] sm:$0xff]  ;;  %v2417_v22 = vpack.c.bf16 %v169_v14, %v159_v13 }
  0x14   :  { %v190_v19 = vld [vmem:[%s6295_s1 + $0x4b8] sm:$0xff]  ;;  %v500_v20 = vld [vmem:[%s6295_s1 + $0xe68] sm:$0xff]  ;;  %v2481_v23 = vpack.c.bf16 %v489_v17, %v479_v15  ;;  %v179_v25 = vld [vmem:[%s6295_s1 + $0x460] sm:$0xff] }
  0x15   :  { %2410 = vmatpush1.bf16.msra.mxu1 %v2409_v62  ;;  %v510_v21 = vld [vmem:[%s6295_s1 + $0xeb8] sm:$0xff]  ;;  %v2419_v24 = vpack.c.bf16 %v190_v19, %v180_v18  ;;  %v189_v26 = vld [vmem:[%s6295_s1 + $0x4b0] sm:$0xff]  ;;  %v499_v27 = vld [vmem:[%s6295_s1 + $0xe60] sm:$0xff] }
  0x16   :  { %2474 = vmatpush1.bf16.msra.mxu0 %v2473_v63  ;;  %2412 = vmatprep.subr.bf16.mxu1 %v2411_v0  ;;  %v2483_v28 = vpack.c.bf16 %v510_v21, %v500_v20  ;;  %v509_v29 = vld [vmem:[%s6295_s1 + $0xeb0] sm:$0xff]  ;;  %v200_v30 = vld [vmem:[%s6295_s1 + $0x508] sm:$0xff]  ;;  %v210_v31 = vld [vmem:[%s6295_s1 + $0x558] sm:$0xff]  ;;  %v2421_v34 = vpack.c.bf16 %v189_v26, %v179_v25 }
  0x17   :  { %2476 = vmatprep.subr.bf16.mxu0 %v2475_v4  ;;  %v520_v32 = vld [vmem:[%s6295_s1 + $0xf08] sm:$0xff]  ;;  %v530_v33 = vld [vmem:[%s6295_s1 + $0xf58] sm:$0xff]  ;;  %v2485_v36 = vpack.c.bf16 %v509_v29, %v499_v27  ;;  %v2423_v37 = vpack.c.bf16 %v210_v31, %v200_v30  ;;  %v199_v38 = vld [vmem:[%s6295_s1 + $0x500] sm:$0xff] }
  0x18   :  { %v209_v39 = vld [vmem:[%s6295_s1 + $0x550] sm:$0xff]  ;;  %v519_v40 = vld [vmem:[%s6295_s1 + $0xf00] sm:$0xff]  ;;  %v2487_v41 = vpack.c.bf16 %v530_v33, %v520_v32  ;;  %v220_v43 = vld [vmem:[%s6295_s1 + $0x5a8] sm:$0xff] }
  0x19   :  { %2414 = vmatpush1.bf16.msra.mxu1 %v2413_v10  ;;  %v529_v42 = vld [vmem:[%s6295_s1 + $0xf50] sm:$0xff]  ;;  %v230_v44 = vld [vmem:[%s6295_s1 + $0x5f8] sm:$0xff]  ;;  %v540_v45 = vld [vmem:[%s6295_s1 + $0xfa8] sm:$0xff]  ;;  %v2425_v47 = vpack.c.bf16 %v209_v39, %v199_v38 }
  0x1a   :  { %2478 = vmatpush1.bf16.msra.mxu0 %v2477_v11  ;;  %2416 = vmatprep.subr.bf16.mxu1 %v2415_v12  ;;  %v550_v46 = vld [vmem:[%s6295_s1 + $0xff8] sm:$0xff]  ;;  %v2489_v48 = vpack.c.bf16 %v529_v42, %v519_v40  ;;  %v2427_v49 = vpack.c.bf16 %v230_v44, %v220_v43  ;;  %v219_v50 = vld [vmem:[%s6295_s1 + $0x5a0] sm:$0xff]  ;;  %v229_v51 = vld [vmem:[%s6295_s1 + $0x5f0] sm:$0xff] }
  0x1b   :  { %2480 = vmatprep.subr.bf16.mxu0 %v2479_v16  ;;  %v539_v52 = vld [vmem:[%s6295_s1 + $0xfa0] sm:$0xff]  ;;  %v2491_v53 = vpack.c.bf16 %v550_v46, %v540_v45  ;;  %v549_v54 = vld [vmem:[%s6295_s1 + $0xff0] sm:$0xff]  ;;  %v240_v55 = vld [vmem:[%s6295_s1 + $0x648] sm:$0xff]  ;;  %v2429_v59 = vpack.c.bf16 %v229_v51, %v219_v50 }
  0x1c   :  { %v250_v56 = vld [vmem:[%s6295_s1 + $0x698] sm:$0xff]  ;;  %v560_v57 = vld [vmem:[%s6295_s1 + $0x1048] sm:$0xff]  ;;  %v2493_v60 = vpack.c.bf16 %v549_v54, %v539_v52  ;;  %v239_v62 = vld [vmem:[%s6295_s1 + $0x640] sm:$0xff] }
  0x1d   :  { %2418 = vmatpush1.bf16.msra.mxu1 %v2417_v22  ;;  %v570_v58 = vld [vmem:[%s6295_s1 + $0x1098] sm:$0xff]  ;;  %v2431_v61 = vpack.c.bf16 %v250_v56, %v240_v55  ;;  %v249_v63 = vld [vmem:[%s6295_s1 + $0x690] sm:$0xff]  ;;  %v559_v0 = vld [vmem:[%s6295_s1 + $0x1040] sm:$0xff] }
  0x1e   :  { %2482 = vmatpush1.bf16.msra.mxu0 %v2481_v23  ;;  %2420 = vmatprep.subr.bf16.mxu1 %v2419_v24  ;;  %v2495_v1 = vpack.c.bf16 %v570_v58, %v560_v57  ;;  %v569_v2 = vld [vmem:[%s6295_s1 + $0x1090] sm:$0xff]  ;;  %v260_v3 = vld [vmem:[%s6295_s1 + $0x6e8] sm:$0xff]  ;;  %v270_v4 = vld [vmem:[%s6295_s1 + $0x738] sm:$0xff]  ;;  %v2433_v7 = vpack.c.bf16 %v249_v63, %v239_v62 }
  0x1f   :  { %2484 = vmatprep.subr.bf16.mxu0 %v2483_v28  ;;  %v580_v5 = vld [vmem:[%s6295_s1 + $0x10e8] sm:$0xff]  ;;  %v590_v6 = vld [vmem:[%s6295_s1 + $0x1138] sm:$0xff]  ;;  %v259_v8 = vld [vmem:[%s6295_s1 + $0x6e0] sm:$0xff]  ;;  %v2497_v9 = vpack.c.bf16 %v569_v2, %v559_v0  ;;  %v2435_v10 = vpack.c.bf16 %v270_v4, %v260_v3 }
  0x20   :  { %v269_v11 = vld [vmem:[%s6295_s1 + $0x730] sm:$0xff]  ;;  %v579_v12 = vld [vmem:[%s6295_s1 + $0x10e0] sm:$0xff]  ;;  %v2499_v14 = vpack.c.bf16 %v590_v6, %v580_v5  ;;  %v280_v15 = vld [vmem:[%s6295_s1 + $0x788] sm:$0xff] }
  0x21   :  { %2422 = vmatpush1.bf16.msra.mxu1 %v2421_v34  ;;  %v589_v13 = vld [vmem:[%s6295_s1 + $0x1130] sm:$0xff]  ;;  %v290_v16 = vld [vmem:[%s6295_s1 + $0x7d8] sm:$0xff]  ;;  %v3656_v17 = vld [vmem:[%s6296_s0 + $0x8] sm:$0xff]  ;;  %v2437_v21 = vpack.c.bf16 %v269_v11, %v259_v8 }
  0x22   :  { %2486 = vmatpush1.bf16.msra.mxu0 %v2485_v36  ;;  %2424 = vmatprep.subr.bf16.mxu1 %v2423_v37  ;;  %v600_v18 = vld [vmem:[%s6295_s1 + $0x1188] sm:$0xff]  ;;  %v610_v19 = vld [vmem:[%s6295_s1 + $0x11d8] sm:$0xff]  ;;  %v2501_v22 = vpack.c.bf16 %v589_v13, %v579_v12  ;;  %v2439_v23 = vpack.c.bf16 %v290_v16, %v280_v15  ;;  %v279_v24 = vld [vmem:[%s6295_s1 + $0x780] sm:$0xff] }
  0x23   :  { %2488 = vmatprep.subr.bf16.mxu0 %v2487_v41  ;;  %899 = vmatprep.mubr.f32.mxu1 %v3656_v17  ;;  %v3668_v20 = vld [vmem:[%s6296_s0 + $0x18] sm:$0xff]  ;;  %v289_v25 = vld [vmem:[%s6295_s1 + $0x7d0] sm:$0xff]  ;;  %v599_v26 = vld [vmem:[%s6295_s1 + $0x1180] sm:$0xff]  ;;  %v2503_v27 = vpack.c.bf16 %v610_v19, %v600_v18 }
  0x24   :  { %994 = vmatprep.mubr.f32.mxu0 %v3668_v20  ;;  %v609_v28 = vld [vmem:[%s6295_s1 + $0x11d0] sm:$0xff]  ;;  %v300_v29 = vld [vmem:[%s6295_s1 + $0x828] sm:$0xff]  ;;  %v310_v30 = vld [vmem:[%s6295_s1 + $0x878] sm:$0xff]  ;;  %v2441_v33 = vpack.c.bf16 %v289_v25, %v279_v24 }
  0x25   :  { %2426 = vmatpush1.bf16.msra.mxu1 %v2425_v47  ;;  %v620_v31 = vld [vmem:[%s6295_s1 + $0x1228] sm:$0xff]  ;;  %v630_v32 = vld [vmem:[%s6295_s1 + $0x1278] sm:$0xff]  ;;  %v2505_v34 = vpack.c.bf16 %v609_v28, %v599_v26  ;;  %v2443_v35 = vpack.c.bf16 %v310_v30, %v300_v29  ;;  %v299_v36 = vld [vmem:[%s6295_s1 + $0x820] sm:$0xff] }
  0x26   :  { %2490 = vmatpush1.bf16.msra.mxu0 %v2489_v48  ;;  %2428 = vmatprep.subr.bf16.mxu1 %v2427_v49  ;;  %v309_v37 = vld [vmem:[%s6295_s1 + $0x870] sm:$0xff]  ;;  %v619_v38 = vld [vmem:[%s6295_s1 + $0x1220] sm:$0xff]  ;;  %v2507_v39 = vpack.c.bf16 %v630_v32, %v620_v31  ;;  %v320_v41 = vld [vmem:[%s6295_s1 + $0x8c8] sm:$0xff] }
  0x27   :  { %2492 = vmatprep.subr.bf16.mxu0 %v2491_v53  ;;  %v629_v40 = vld [vmem:[%s6295_s1 + $0x1270] sm:$0xff]  ;;  %v330_v42 = vld [vmem:[%s6295_s1 + $0x918] sm:$0xff]  ;;  %v640_v43 = vld [vmem:[%s6295_s1 + $0x12c8] sm:$0xff]  ;;  %v2445_v45 = vpack.c.bf16 %v309_v37, %v299_v36 }
  0x28   :  { %v650_v44 = vld [vmem:[%s6295_s1 + $0x1318] sm:$0xff]  ;;  %v2509_v46 = vpack.c.bf16 %v629_v40, %v619_v38  ;;  %v2447_v47 = vpack.c.bf16 %v330_v42, %v320_v41  ;;  %v319_v48 = vld [vmem:[%s6295_s1 + $0x8c0] sm:$0xff]  ;;  %v329_v49 = vld [vmem:[%s6295_s1 + $0x910] sm:$0xff] }
  0x29   :  { %2430 = vmatpush1.bf16.msra.mxu1 %v2429_v59  ;;  %v639_v50 = vld [vmem:[%s6295_s1 + $0x12c0] sm:$0xff]  ;;  %v2511_v51 = vpack.c.bf16 %v650_v44, %v640_v43  ;;  %v649_v52 = vld [vmem:[%s6295_s1 + $0x1310] sm:$0xff]  ;;  %v340_v53 = vld [vmem:[%s6295_s1 + $0x968] sm:$0xff]  ;;  %v2449_v57 = vpack.c.bf16 %v329_v49, %v319_v48 }
  0x2a   :  { %2494 = vmatpush1.bf16.msra.mxu0 %v2493_v60  ;;  %2432 = vmatprep.subr.bf16.mxu1 %v2431_v61  ;;  %v350_v54 = vld [vmem:[%s6295_s1 + $0x9b8] sm:$0xff]  ;;  %v660_v55 = vld [vmem:[%s6295_s1 + $0x1368] sm:$0xff]  ;;  %v2513_v58 = vpack.c.bf16 %v649_v52, %v639_v50  ;;  %v339_v60 = vld [vmem:[%s6295_s1 + $0x960] sm:$0xff] }
  0x2b   :  { %2496 = vmatprep.subr.bf16.mxu0 %v2495_v1  ;;  %v670_v56 = vld [vmem:[%s6295_s1 + $0x13b8] sm:$0xff]  ;;  %v2451_v59 = vpack.c.bf16 %v350_v54, %v340_v53  ;;  %v349_v61 = vld [vmem:[%s6295_s1 + $0x9b0] sm:$0xff]  ;;  %v659_v62 = vld [vmem:[%s6295_s1 + $0x1360] sm:$0xff] }
  0x2c   :  { %v2515_v63 = vpack.c.bf16 %v670_v56, %v660_v55  ;;  %v669_v0 = vld [vmem:[%s6295_s1 + $0x13b0] sm:$0xff]  ;;  %v42_v1 = vld [vmem:[%s6295_s1 + $0x18] sm:$0xff]  ;;  %v52_v2 = vld [vmem:[%s6295_s1 + $0x68] sm:$0xff]  ;;  %v2453_v5 = vpack.c.bf16 %v349_v61, %v339_v60 }
  0x2d   :  { %2434 = vmatpush1.bf16.msra.mxu1 %v2433_v7  ;;  %v680_v3 = vld [vmem:[%s6295_s1 + $0x1408] sm:$0xff]  ;;  %v690_v4 = vld [vmem:[%s6295_s1 + $0x1458] sm:$0xff]  ;;  %v2517_v6 = vpack.c.bf16 %v669_v0, %v659_v62  ;;  %v2539_v7 = vpack.c.bf16 %v52_v2, %v42_v1  ;;  %v679_v8 = vld [vmem:[%s6295_s1 + $0x1400] sm:$0xff] }
  0x2e   :  { %2498 = vmatpush1.bf16.msra.mxu0 %v2497_v9  ;;  %2436 = vmatprep.subr.bf16.mxu1 %v2435_v10  ;;  %v41_v9 = vld [vmem:[%s6295_s1 + $0x10] sm:$0xff]  ;;  %v51_v10 = vld [vmem:[%s6295_s1 + $0x60] sm:$0xff]  ;;  %v2519_v11 = vpack.c.bf16 %v690_v4, %v680_v3  ;;  %v62_v13 = vld [vmem:[%s6295_s1 + $0xb8] sm:$0xff] }
  0x2f   :  { %2500 = vmatprep.subr.bf16.mxu0 %v2499_v14  ;;  %v689_v12 = vld [vmem:[%s6295_s1 + $0x1450] sm:$0xff]  ;;  %v72_v14 = vld [vmem:[%s6295_s1 + $0x108] sm:$0xff]  ;;  %v710_v16 = vld [vmem:[%s6295_s1 + $0x14f8] sm:$0xff] }
  0x30   :  { %v700_v15 = vld [vmem:[%s6295_s1 + $0x14a8] sm:$0xff]  ;;  %v3794_v18 = vld [vmem:[%s6296_s0] sm:$0xff]  ;;  %v16_v19 = vld [vmem:[%s6296_s0 + $0x10] sm:$0xff] }
  0x31   :  { %2438 = vmatpush1.bf16.msra.mxu1 %v2437_v21  ;;  %v2541_v21 = vpack.c.bf16 %v51_v10, %v41_v9  ;;  %v699_v24 = vld [vmem:[%s6295_s1 + $0x14a0] sm:$0xff]  ;;  %v61_v25 = vld [vmem:[%s6295_s1 + $0xb0] sm:$0xff]  ;;  %v82_v29 = vld [vmem:[%s6295_s1 + $0x158] sm:$0xff] }
  0x32   :  { %2502 = vmatpush1.bf16.msra.mxu0 %v2501_v22  ;;  %2440 = vmatprep.subr.bf16.mxu1 %v2439_v23  ;;  %v2521_v22 = vpack.c.bf16 %v689_v12, %v679_v8  ;;  %v2543_v23 = vpack.c.bf16 %v72_v14, %v62_v13  ;;  %v71_v26 = vld [vmem:[%s6295_s1 + $0x100] sm:$0xff]  ;;  %v709_v28 = vld [vmem:[%s6295_s1 + $0x14f0] sm:$0xff]  ;;  %v92_v30 = vld [vmem:[%s6295_s1 + $0x1a8] sm:$0xff] }
  0x33   :  { %2504 = vmatprep.subr.bf16.mxu0 %v2503_v27  ;;  %v2523_v27 = vpack.c.bf16 %v710_v16, %v700_v15  ;;  %v22_v31 = vld [vmem:[%s6296_s0 + $0x40] sm:$0xff]  ;;  %v720_v32 = vld [vmem:[%s6295_s1 + $0x1548] sm:$0xff]  ;;  %v3833_v36 = vld [vmem:[%s6296_s0 + $0x30] sm:$0xff]  ;;  %v2525_v37 = vpack.c.bf16 %v709_v28, %v699_v24  ;;  %v2547_v38 = vpack.c.bf16 %v92_v30, %v82_v29 }
  0x34   :  { %v81_v40 = vld [vmem:[%s6295_s1 + $0x150] sm:$0xff]  ;;  %v91_v41 = vld [vmem:[%s6295_s1 + $0x1a0] sm:$0xff]  ;;  %v102_v44 = vld [vmem:[%s6295_s1 + $0x1f8] sm:$0xff] }
  0x35   :  { %2442 = vmatpush1.bf16.msra.mxu1 %v2441_v33  ;;  %v730_v33 = vld [vmem:[%s6295_s1 + $0x1598] sm:$0xff]  ;;  %v729_v43 = vld [vmem:[%s6295_s1 + $0x1590] sm:$0xff]  ;;  %v2549_v49 = vpack.c.bf16 %v91_v41, %v81_v40  ;;  %v26_v50 = vld [vmem:[%s6296_s0 + $0x60] sm:$0xff] }
  0x36   :  { %2506 = vmatpush1.bf16.msra.mxu0 %v2505_v34  ;;  %2444 = vmatprep.subr.bf16.mxu1 %v2443_v35  ;;  %v2545_v34 = vpack.c.bf16 %v71_v26, %v61_v25  ;;  %v21_v35 = vld [vmem:[%s6296_s0 + $0x38] sm:$0xff]  ;;  %v2527_v42 = vpack.c.bf16 %v730_v33, %v720_v32  ;;  %v739_v54 = vld [vmem:[%s6295_s1 + $0x15e0] sm:$0xff]  ;;  %v101_v55 = vld [vmem:[%s6295_s1 + $0x1f0] sm:$0xff] }
  0x37   :  { %2508 = vmatprep.subr.bf16.mxu0 %v2507_v39  ;;  %v719_v39 = vld [vmem:[%s6295_s1 + $0x1540] sm:$0xff]  ;;  %v750_v48 = vld [vmem:[%s6295_s1 + $0x1638] sm:$0xff]  ;;  %v132_v60 = vld [vmem:[%s6295_s1 + $0x2e8] sm:$0xff] }
  0x38   :  { %v2529_v52 = vpack.c.bf16 %v729_v43, %v719_v39  ;;  %v111_v56 = vld [vmem:[%s6295_s1 + $0x240] sm:$0xff]  ;;  %v32_v61 = vld [vmem:[%s6296_s0 + $0x90] sm:$0xff]  ;;  %v760_v62 = vld [vmem:[%s6295_s1 + $0x1688] sm:$0xff]  ;;  %v3338_v39 = vmov 0.0  }
  0x39   :  { %2446 = vmatpush1.bf16.msra.mxu1 %v2445_v45  ;;  %v112_v45 = vld [vmem:[%s6295_s1 + $0x248] sm:$0xff]  ;;  %v2553_v0 = vpack.c.bf16 %v111_v56, %v101_v55  ;;  %v3905_v2 = vld [vmem:[%s6296_s0 + $0x58] sm:$0xff]  ;;  %v769_v9 = vld [vmem:[%s6295_s1 + $0x16d0] sm:$0xff] }
  0x3a   :  { %2510 = vmatpush1.bf16.msra.mxu0 %v2509_v46  ;;  %2448 = vmatprep.subr.bf16.mxu1 %v2447_v47  ;;  %v27_v46 = vld [vmem:[%s6296_s0 + $0x68] sm:$0xff]  ;;  %v2551_v53 = vpack.c.bf16 %v112_v45, %v102_v44  ;;  %v142_v10 = vld [vmem:[%s6295_s1 + $0x338] sm:$0xff]  ;;  %v3932_v14 = vld [vmem:[%s6296_s0 + $0x50] sm:$0xff] }
  0x3b   :  { %2512 = vmatprep.subr.bf16.mxu0 %v2511_v51  ;;  %v740_v47 = vld [vmem:[%s6295_s1 + $0x15e8] sm:$0xff]  ;;  %v37_v12 = vld [vmem:[%s6296_s0 + $0xb8] sm:$0xf]  ;;  %v36_v16 = vld [vmem:[%s6296_s0 + $0xb0] sm:$0xf] }
  0x3c   :  { %v3869_v51 = vld [vmem:[%s6296_s0 + $0x28] sm:$0xff]  ;;  %v162_v24 = vld [vmem:[%s6295_s1 + $0x3d8] sm:$0xff]  ;;  %v43_v28 = vld [vmem:[%s6295_s1 + $0x20] sm:$0xff] }
  0x3d   :  { %2450 = vmatpush1.bf16.msra.mxu1 %v2449_v57  ;;  %v2531_v57 = vpack.c.bf16 %v750_v48, %v740_v47  ;;  %v31_v1 = vld [vmem:[%s6296_s0 + $0x88] sm:$0xff]  ;;  %v53_v30 = vld [vmem:[%s6295_s1 + $0x70] sm:$0xff]  ;;  %v3971_v32 = vld [vmem:[%s6296_s0 + $0x80] sm:$0xff] }
  0x3e   :  { %2514 = vmatpush1.bf16.msra.mxu0 %v2513_v58  ;;  %2452 = vmatprep.subr.bf16.mxu1 %v2451_v59  ;;  %v749_v58 = vld [vmem:[%s6295_s1 + $0x1630] sm:$0xff]  ;;  %v122_v59 = vld [vmem:[%s6295_s1 + $0x298] sm:$0xff]  ;;  %v172_v25 = vld [vmem:[%s6295_s1 + $0x428] sm:$0xff]  ;;  %v2689_v44 = vpack.c.bf16 %v53_v30, %v43_v28 }
  0x3f   :  { %2516 = vmatprep.subr.bf16.mxu0 %v2515_v63  ;;  %v770_v63 = vld [vmem:[%s6295_s1 + $0x16d8] sm:$0xff]  ;;  %v2533_v3 = vpack.c.bf16 %v749_v58, %v739_v54  ;;  %v2555_v4 = vpack.c.bf16 %v132_v60, %v122_v59  ;;  %v44_v26 = vld [vmem:[%s6295_s1 + $0x28] sm:$0xff]  ;;  %v2563_v33 = vpack.c.bf16 %v172_v25, %v162_v24  ;;  %v18_v43 = vld [vmem:[%s6296_s0 + $0x20] sm:$0xff] }
  0x40   :  { %v2535_v8 = vpack.c.bf16 %v770_v63, %v760_v62  ;;  %v182_v41 = vld [vmem:[%s6295_s1 + $0x478] sm:$0xff]  ;;  %v63_v47 = vld [vmem:[%s6295_s1 + $0xc0] sm:$0xff]  ;;  %v73_v48 = vld [vmem:[%s6295_s1 + $0x110] sm:$0xff] }
  0x41   :  { %2454 = vmatpush1.bf16.msra.mxu1 %v2453_v5  ;;  %v759_v5 = vld [vmem:[%s6295_s1 + $0x1680] sm:$0xff]  ;;  %v94_v54 = vld [vmem:[%s6295_s1 + $0x1b8] sm:$0xff]  ;;  %v23_v58 = vld [vmem:[%s6296_s0 + $0x48] sm:$0xff]  ;;  %v2693_v59 = vpack.c.bf16 %v73_v48, %v63_v47 }
  0x42   :  { %2518 = vmatpush1.bf16.msra.mxu0 %v2517_v6  ;;  %2540 = vmatprep.subr.bf16.mxu1 %v2539_v7  ;;  %v121_v6 = vld [vmem:[%s6295_s1 + $0x290] sm:$0xff]  ;;  %v131_v7 = vld [vmem:[%s6295_s1 + $0x2e0] sm:$0xff]  ;;  %v2537_v15 = vpack.c.bf16 %v769_v9, %v759_v5  ;;  %v4018_v55 = vld [vmem:[%s6296_s0 + $0x78] sm:$0xff] }
  0x43   :  { %2520 = vmatprep.subr.bf16.mxu0 %v2519_v11  ;;  %v152_v11 = vld [vmem:[%s6295_s1 + $0x388] sm:$0xff]  ;;  %v2557_v13 = vpack.c.bf16 %v131_v7, %v121_v6  ;;  %v202_v56 = vld [vmem:[%s6295_s1 + $0x518] sm:$0xff]  ;;  %v83_v63 = vld [vmem:[%s6295_s1 + $0x160] sm:$0xff] }
  0x44   :  { %900 = vmatmul.mubr.f32.vlgmr.msra.gmra.mrb[0].mxu1 %v3794_v18  ;;  %v4033_v60 = vld [vmem:[%s6296_s0 + $0xa8] sm:$0xf]  ;;  %v114_v6 = vld [vmem:[%s6295_s1 + $0x258] sm:$0xff]  ;;  %v4059_v7 = vld [vmem:[%s6296_s0 + $0xa0] sm:$0xf] }
  0x45   :  { %995 = vmatmul.mubr.f32.vlgmr.msra.gmra.mrb[0].mxu0 %v16_v19  ;;  %2542 = vmatpush1.bf16.msra.mxu1 %v2541_v21  ;;  %v2559_v19 = vpack.c.bf16 %v152_v11, %v142_v10  ;;  %v141_v21 = vld [vmem:[%s6295_s1 + $0x330] sm:$0xff]  ;;  %v104_v5 = vld [vmem:[%s6295_s1 + $0x208] sm:$0xff]  ;;  %v134_v24 = vld [vmem:[%s6295_s1 + $0x2f8] sm:$0xff] }
  0x46   :  { %2522 = vmatpush1.bf16.msra.mxu0 %v2521_v22  ;;  %2544 = vmatprep.subr.bf16.mxu1 %v2543_v23  ;;  %v151_v22 = vld [vmem:[%s6295_s1 + $0x380] sm:$0xff]  ;;  %v780_v23 = vld [vmem:[%s6295_s1 + $0x1728] sm:$0xff]  ;;  %v28_v10 = vld [vmem:[%s6296_s0 + $0x70] sm:$0xff] }
  0x47   :  { %2524 = vmatprep.subr.bf16.mxu0 %v2523_v27  ;;  %1000 = vmatprep.mubr.f32.mxu0 %v22_v31  ;;  %v54_v27 = vld [vmem:[%s6295_s1 + $0x78] sm:$0xff]  ;;  %v2561_v29 = vpack.c.bf16 %v151_v22, %v141_v21  ;;  %v161_v31 = vld [vmem:[%s6295_s1 + $0x3d0] sm:$0xff]  ;;  %v232_v9 = vld [vmem:[%s6295_s1 + $0x608] sm:$0xff] }
  0x48   :  { %905 = vmatprep.mubr.f32.mxu1 %v3833_v36  ;;  %v2687_v40 = vpack.c.bf16 %v54_v27, %v44_v26  ;;  %v231_v22 = vld [vmem:[%s6295_s1 + $0x600] sm:$0xff]  ;;  %v242_v25 = vld [vmem:[%s6295_s1 + $0x658] sm:$0xff]  ;;  %v252_v26 = vld [vmem:[%s6295_s1 + $0x6a8] sm:$0xff] }
  0x49   :  { %2546 = vmatpush1.bf16.msra.mxu1 %v2545_v34  ;;  %1001 = vmatmul.mubr.f32.gmra.mrb[2].mxu0 %v21_v35  ;;  %v171_v34 = vld [vmem:[%s6295_s1 + $0x420] sm:$0xff]  ;;  %v64_v35 = vld [vmem:[%s6295_s1 + $0xc8] sm:$0xff]  ;;  %v33_v27 = vld [vmem:[%s6296_s0 + $0x98] sm:$0xff] }
  0x4a   :  { %2526 = vmatpush1.bf16.msra.mxu0 %v2525_v37  ;;  %2548 = vmatprep.subr.bf16.mxu1 %v2547_v38  ;;  %v74_v37 = vld [vmem:[%s6295_s1 + $0x118] sm:$0xff]  ;;  %v779_v38 = vld [vmem:[%s6295_s1 + $0x1720] sm:$0xff]  ;;  %v2565_v45 = vpack.c.bf16 %v171_v34, %v161_v31  ;;  %v241_v34 = vld [vmem:[%s6295_s1 + $0x650] sm:$0xff] }
  0x4b   :  { %2528 = vmatprep.subr.bf16.mxu0 %v2527_v42  ;;  %1006 = vmatprep.mubr.f32.mxu0 %v27_v46  ;;  %v192_v42 = vld [vmem:[%s6295_s1 + $0x4c8] sm:$0xff]  ;;  %v2691_v46 = vpack.c.bf16 %v74_v37, %v64_v35  ;;  %v123_v31 = vld [vmem:[%s6295_s1 + $0x2a0] sm:$0xff]  ;;  %v2579_v35 = vpack.c.bf16 %v252_v26, %v242_v25  ;;  %v153_v48 = vld [vmem:[%s6295_s1 + $0x390] sm:$0xff] }
  0x4c   :  { %906 = vmatmul.mubr.f32.gmra.mrb[2].mxu1 %v3869_v51  ;;  %v251_v37 = vld [vmem:[%s6295_s1 + $0x6a0] sm:$0xff] }
  0x4d   :  { %2550 = vmatpush1.bf16.msra.mxu1 %v2549_v49  ;;  %1007 = vmatmul.mubr.f32.gmra.mrb[4].mxu0 %v26_v50  ;;  %v181_v49 = vld [vmem:[%s6295_s1 + $0x470] sm:$0xff]  ;;  %v2567_v50 = vpack.c.bf16 %v192_v42, %v182_v41  ;;  %v262_v41 = vld [vmem:[%s6295_s1 + $0x6f8] sm:$0xff]  ;;  %v272_v42 = vld [vmem:[%s6295_s1 + $0x748] sm:$0xff] }
  0x4e   :  { %2530 = vmatpush1.bf16.msra.mxu0 %v2529_v52  ;;  %2552 = vmatprep.subr.bf16.mxu1 %v2551_v53  ;;  %v191_v52 = vld [vmem:[%s6295_s1 + $0x4c0] sm:$0xff]  ;;  %v84_v53 = vld [vmem:[%s6295_s1 + $0x168] sm:$0xff] }
  0x4f   :  { %2532 = vmatprep.subr.bf16.mxu0 %v2531_v57  ;;  %1012 = vmatprep.mubr.f32.mxu0 %v32_v61  ;;  %v212_v57 = vld [vmem:[%s6295_s1 + $0x568] sm:$0xff]  ;;  %v2569_v61 = vpack.c.bf16 %v191_v52, %v181_v49  ;;  %v2695_v62 = vpack.c.bf16 %v94_v54, %v84_v53  ;;  %v143_v47 = vld [vmem:[%s6295_s1 + $0x340] sm:$0xff]  ;;  %v261_v49 = vld [vmem:[%s6295_s1 + $0x6f0] sm:$0xff] }
  0x50   :  { %911 = vmatprep.mubr.f32.mxu1 %v3905_v2  ;;  %v271_v52 = vld [vmem:[%s6295_s1 + $0x740] sm:$0xff]  ;;  %v164_v53 = vld [vmem:[%s6295_s1 + $0x3e8] sm:$0xff]  ;;  %v174_v54 = vld [vmem:[%s6295_s1 + $0x438] sm:$0xff] }
  0x51   :  { %2554 = vmatpush1.bf16.msra.mxu1 %v2553_v0  ;;  %1013 = vmatmul.mubr.f32.gmra.mrb[6].mxu0 %v31_v1  ;;  %v93_v0 = vld [vmem:[%s6295_s1 + $0x1b0] sm:$0xff] }
  0x52   :  { %2534 = vmatpush1.bf16.msra.mxu0 %v2533_v3  ;;  %2556 = vmatprep.subr.bf16.mxu1 %v2555_v4  ;;  %v201_v1 = vld [vmem:[%s6295_s1 + $0x510] sm:$0xff]  ;;  %v2571_v3 = vpack.c.bf16 %v212_v57, %v202_v56  ;;  %v211_v4 = vld [vmem:[%s6295_s1 + $0x560] sm:$0xff]  ;;  %v2697_v11 = vpack.c.bf16 %v93_v0, %v83_v63  ;;  %v282_v56 = vld [vmem:[%s6295_s1 + $0x798] sm:$0xff] }
  0x53   :  { %2536 = vmatprep.subr.bf16.mxu0 %v2535_v8  ;;  %1018 = vmatprep.mubr.f32.mxu0 %v37_v12  ;;  %v222_v8 = vld [vmem:[%s6295_s1 + $0x5b8] sm:$0xff]  ;;  %v2573_v12 = vpack.c.bf16 %v211_v4, %v201_v1  ;;  %v292_v57 = vld [vmem:[%s6295_s1 + $0x7e8] sm:$0xff]  ;;  %v173_v63 = vld [vmem:[%s6295_s1 + $0x430] sm:$0xff] }
  0x54   :  { %912 = vmatmul.mubr.f32.gmra.mrb[4].mxu1 %v3932_v14  ;;  %v2575_v21 = vpack.c.bf16 %v232_v9, %v222_v8  ;;  %v281_v0 = vld [vmem:[%s6295_s1 + $0x790] sm:$0xff]  ;;  %v2587_v1 = vpack.c.bf16 %v292_v57, %v282_v56  ;;  %v194_v4 = vld [vmem:[%s6295_s1 + $0x4d8] sm:$0xff]  ;;  %v789_v9 = vld [vmem:[%s6297_s2] sm:$0xff] }
  0x55   :  { %2558 = vmatpush1.bf16.msra.mxu1 %v2557_v13  ;;  %1019 = vmatmul.mubr.f32.gmra.mrb[8].mxu0 %v36_v16  ;;  %v2699_v13 = vpack.c.bf16 %v114_v6, %v104_v5  ;;  %v113_v16 = vld [vmem:[%s6295_s1 + $0x250] sm:$0xff]  ;;  %v302_v5 = vld [vmem:[%s6295_s1 + $0x838] sm:$0xff]  ;;  %v312_v6 = vld [vmem:[%s6295_s1 + $0x888] sm:$0xff] }
  0x56   :  { %2538 = vmatpush1.bf16.msra.mxu0 %v2537_v15  ;;  %2560 = vmatprep.subr.bf16.mxu1 %v2559_v19  ;;  %v103_v15 = vld [vmem:[%s6295_s1 + $0x200] sm:$0xff]  ;;  %v221_v19 = vld [vmem:[%s6295_s1 + $0x5b0] sm:$0xff] }
  0x57   :  { %1045 = vmatprep.subr.mxu0 %v780_v23  ;;  %1089 = vmatprep.mubr.f32.mxu0 %v3338_v39  ;;  %v124_v23 = vld [vmem:[%s6295_s1 + $0x2a8] sm:$0xff]  ;;  %v2701_v28 = vpack.c.bf16 %v113_v16, %v103_v15  ;;  %v301_v15 = vld [vmem:[%s6295_s1 + $0x830] sm:$0xff]  ;;  %v2591_v16 = vpack.c.bf16 %v312_v6, %v302_v5 }
  0x58   :  { %917 = vmatprep.mubr.f32.mxu1 %v3971_v32  ;;  %v2703_v30 = vpack.c.bf16 %v134_v24, %v124_v23  ;;  %796 = vperm.xlu0 %3295, %v789_v9   ;;  %v322_v23 = vld [vmem:[%s6295_s1 + $0x8d8] sm:$0xff]  ;;  %v332_v24 = vld [vmem:[%s6295_s1 + $0x928] sm:$0xff]  ;;  %v791_v5 = vld [vmem:[%s6297_s2 + $0x10] sm:$0xff] }
  0x59   :  { %2562 = vmatpush1.bf16.msra.mxu1 %v2561_v29  ;;  %v2577_v29 = vpack.c.bf16 %v231_v22, %v221_v19  ;;  %v311_v19 = vld [vmem:[%s6295_s1 + $0x880] sm:$0xff]  ;;  %v214_v22 = vld [vmem:[%s6295_s1 + $0x578] sm:$0xff]  ;;  %806 = vperm.xlu1 %3296, %v791_v5  }
  0x5a   :  { %1046 = vmatpush1.msra.mxu0 %v779_v38  ;;  %2564 = vmatprep.subr.bf16.mxu1 %v2563_v33  ;;  %v133_v33 = vld [vmem:[%s6295_s1 + $0x2f0] sm:$0xff]  ;;  %v144_v38 = vld [vmem:[%s6295_s1 + $0x348] sm:$0xff]  ;;  %v2593_v26 = vpack.c.bf16 %v311_v19, %v301_v15  ;;  %v263_v9 = vld [vmem:[%s6295_s1 + $0x700] sm:$0xff] }
  0x5b   :  { %2366 = vmatmul.mubr.msk.f32.vlgmr.msra.gmra.mrb[0].mxu0 %vm819_vm0, %v18_v43  ;;  %2688 = vmatprep.subr.bf16.mxu0 %v2687_v40  ;;  %v154_v40 = vld [vmem:[%s6295_s1 + $0x398] sm:$0xff]  ;;  %v38_v43 = vld [vmem:[%s6296_s0 + $0xc0] sm:$0xf]  ;;  %v284_v15 = vld [vmem:[%s6295_s1 + $0x7a8] sm:$0xff] }
  0x5c   :  { %2690 = vmatpush1.bf16.msra.mxu0 %v2689_v44  ;;  %1095 = vmatprep.mubr.f32.mxu0 %v3338_v39  ;;  %v2705_v44 = vpack.c.bf16 %v133_v33, %v123_v31  ;;  %v2595_v31 = vpack.c.bf16 %v332_v24, %v322_v23  ;;  %v331_v33 = vld [vmem:[%s6295_s1 + $0x920] sm:$0xff]  ;;  %v402_v19 = vld [vmem:[%s6295_s1 + $0xb58] sm:$0xff] }
  0x5d   :  { %2566 = vmatpush1.bf16.msra.mxu1 %v2565_v45  ;;  %2692 = vmatprep.subr.bf16.mxu0 %v2691_v46  ;;  %v2581_v45 = vpack.c.bf16 %v251_v37, %v241_v34  ;;  %v2707_v46 = vpack.c.bf16 %v154_v40, %v144_v38  ;;  %v224_v34 = vld [vmem:[%s6295_s1 + $0x5c8] sm:$0xff]  ;;  %v342_v37 = vld [vmem:[%s6295_s1 + $0x978] sm:$0xff]  ;;  %v283_v23 = vld [vmem:[%s6295_s1 + $0x7a0] sm:$0xff] }
  0x5e   :  { %2568 = vmatprep.subr.bf16.mxu1 %v2567_v50  ;;  %918 = vmatmul.mubr.f32.gmra.mrb[6].mxu1 %v4018_v55  ;;  %v2583_v50 = vpack.c.bf16 %v272_v42, %v262_v41  ;;  %v352_v38 = vld [vmem:[%s6295_s1 + $0x9c8] sm:$0xff]  ;;  %v792_v24 = vld [vmem:[%s6297_s2 + $0x18] sm:$0xff]  ;;  %v343_v5 = vld [vmem:[%s6295_s1 + $0x980] sm:$0xff] }
  0x5f   :  { %2367 = vmatmul.mubr.msk.f32.gmra.mrb[2].mxu0 %vm819_vm0, %v23_v58  ;;  %923 = vmatprep.mubr.f32.mxu1 %v4033_v60  ;;  %v2709_v58 = vpack.c.bf16 %v153_v48, %v143_v47  ;;  %v351_v47 = vld [vmem:[%s6295_s1 + $0x9c0] sm:$0xff]  ;;  %v244_v48 = vld [vmem:[%s6295_s1 + $0x668] sm:$0xff] }
  0x60   :  { %2694 = vmatpush1.bf16.msra.mxu0 %v2693_v59  ;;  %1101 = vmatprep.mubr.f32.mxu0 %v3338_v39  ;;  %v2585_v59 = vpack.c.bf16 %v271_v52, %v261_v49  ;;  %v254_v49 = vld [vmem:[%s6295_s1 + $0x6b8] sm:$0xff]  ;;  %v372_v52 = vld [vmem:[%s6295_s1 + $0xa68] sm:$0xff] }
  0x61   :  { %2570 = vmatpush1.bf16.msra.mxu1 %v2569_v61  ;;  %2696 = vmatprep.subr.bf16.mxu0 %v2695_v62  ;;  %v2711_v61 = vpack.c.bf16 %v174_v54, %v164_v53  ;;  %v163_v62 = vld [vmem:[%s6295_s1 + $0x3e0] sm:$0xff]  ;;  %v2727_v57 = vpack.c.bf16 %v254_v49, %v244_v48  ;;  %v334_v48 = vld [vmem:[%s6295_s1 + $0x938] sm:$0xff] }
  0x62   :  { %2572 = vmatprep.subr.bf16.mxu1 %v2571_v3  ;;  %924 = vmatmul.mubr.f32.gmra.mrb[8].mxu1 %v4059_v7  ;;  %v184_v3 = vld [vmem:[%s6295_s1 + $0x488] sm:$0xff]  ;;  %v2713_v8 = vpack.c.bf16 %v173_v63, %v163_v62  ;;  %v243_v54 = vld [vmem:[%s6295_s1 + $0x660] sm:$0xff]  ;;  %v442_v49 = vld [vmem:[%s6295_s1 + $0xc98] sm:$0xff] }
  0x63   :  { %2368 = vmatmul.mubr.msk.f32.gmra.mrb[4].mxu0 %vm819_vm0, %v28_v10  ;;  %1184 = vmatprep.mubr.f32.mxu1 %v3656_v17  ;;  %v371_v63 = vld [vmem:[%s6295_s1 + $0xa60] sm:$0xff] }
  0x64   :  { %2698 = vmatpush1.bf16.msra.mxu0 %v2697_v11  ;;  %1107 = vmatprep.mubr.f32.mxu0 %v3338_v39  ;;  %v2715_v11 = vpack.c.bf16 %v194_v4, %v184_v3  ;;  %v392_v3 = vld [vmem:[%s6295_s1 + $0xb08] sm:$0xff] }
  0x65   :  { %2574 = vmatpush1.bf16.msra.mxu1 %v2573_v12  ;;  %2700 = vmatprep.subr.bf16.mxu0 %v2699_v13  ;;  %v183_v12 = vld [vmem:[%s6295_s1 + $0x480] sm:$0xff]  ;;  %v193_v13 = vld [vmem:[%s6295_s1 + $0x4d0] sm:$0xff] }
  0x66   :  { %2576 = vmatprep.subr.bf16.mxu1 %v2575_v21  ;;  %v204_v21 = vld [vmem:[%s6295_s1 + $0x528] sm:$0xff]  ;;  %v2717_v25 = vpack.c.bf16 %v193_v13, %v183_v12  ;;  %v391_v13 = vld [vmem:[%s6295_s1 + $0xb00] sm:$0xff]  ;;  %811 = vperm.xlu1 %3296, %v792_v24   ;;  %v481_v24 = vld [vmem:[%s6295_s1 + $0xdd0] sm:$0xff] }
  0x67   :  { %2369 = vmatmul.mubr.msk.f32.gmra.mrb[6].mxu0 %vm819_vm0, %v33_v27  ;;  %v2719_v27 = vpack.c.bf16 %v214_v22, %v204_v21  ;;  %v412_v21 = vld [vmem:[%s6295_s1 + $0xba8] sm:$0xff] }
  0x68   :  { %2702 = vmatpush1.bf16.msra.mxu0 %v2701_v28  ;;  %1113 = vmatprep.mubr.f32.mxu0 %v3338_v39  ;;  %v203_v28 = vld [vmem:[%s6295_s1 + $0x520] sm:$0xff] }
  0x69   :  { %2578 = vmatpush1.bf16.msra.mxu1 %v2577_v29  ;;  %2704 = vmatprep.subr.bf16.mxu0 %v2703_v30  ;;  %v213_v29 = vld [vmem:[%s6295_s1 + $0x570] sm:$0xff] }
  0x6a   :  { %2580 = vmatprep.subr.bf16.mxu1 %v2579_v35  ;;  %v321_v30 = vld [vmem:[%s6295_s1 + $0x8d0] sm:$0xff]  ;;  %v234_v35 = vld [vmem:[%s6295_s1 + $0x618] sm:$0xff]  ;;  %v2721_v40 = vpack.c.bf16 %v213_v29, %v203_v28  ;;  %v411_v29 = vld [vmem:[%s6295_s1 + $0xba0] sm:$0xff] }
  0x6b   :  { %2370 = vmatmul.mubr.msk.f32.gmra.mrb[8].mxu0 %vm819_vm0, %v38_v43  ;;  %v2597_v41 = vpack.c.bf16 %v331_v33, %v321_v30  ;;  %v2723_v42 = vpack.c.bf16 %v234_v35, %v224_v34  ;;  %v223_v43 = vld [vmem:[%s6295_s1 + $0x5c0] sm:$0xff]  ;;  %v401_v28 = vld [vmem:[%s6295_s1 + $0xb50] sm:$0xff]  ;;  %v2611_v30 = vpack.c.bf16 %v412_v21, %v402_v19  ;;  %v314_v33 = vld [vmem:[%s6295_s1 + $0x898] sm:$0xff] }
  0x6c   :  { %2706 = vmatpush1.bf16.msra.mxu0 %v2705_v44  ;;  %1469 = vmatprep.mubr.f32.mxu0 %v3656_v17  ;;  %v291_v17 = vld [vmem:[%s6295_s1 + $0x7e0] sm:$0xff]  ;;  %v233_v44 = vld [vmem:[%s6295_s1 + $0x610] sm:$0xff]  ;;  %v422_v35 = vld [vmem:[%s6295_s1 + $0xbf8] sm:$0xff] }
  0x6d   :  { %2582 = vmatpush1.bf16.msra.mxu1 %v2581_v45  ;;  %2708 = vmatprep.subr.bf16.mxu0 %v2707_v46  ;;  %v2589_v10 = vpack.c.bf16 %v291_v17, %v281_v0  ;;  %v341_v45 = vld [vmem:[%s6295_s1 + $0x970] sm:$0xff]  ;;  %v2599_v46 = vpack.c.bf16 %v352_v38, %v342_v37  ;;  %v2725_v53 = vpack.c.bf16 %v233_v44, %v223_v43  ;;  %v264_v0 = vld [vmem:[%s6295_s1 + $0x708] sm:$0xff]  ;;  %v382_v17 = vld [vmem:[%s6295_s1 + $0xab8] sm:$0xff] }
  0x6e   :  { %2584 = vmatprep.subr.bf16.mxu1 %v2583_v50  ;;  %v362_v50 = vld [vmem:[%s6295_s1 + $0xa18] sm:$0xff]  ;;  %v2601_v56 = vpack.c.bf16 %v351_v47, %v341_v45  ;;  %v2607_v12 = vpack.c.bf16 %v392_v3, %v382_v17  ;;  %v793_v34 = vld [vmem:[%s6297_s2 + $0x20] sm:$0xf]  ;;  %v432_v37 = vld [vmem:[%s6295_s1 + $0xc48] sm:$0xff] }
  0x6f   :  { %v2603_v62 = vpack.c.bf16 %v372_v52, %v362_v50  ;;  %v313_v43 = vld [vmem:[%s6295_s1 + $0x890] sm:$0xff]  ;;  %v2615_v45 = vpack.c.bf16 %v432_v37, %v422_v35  ;;  %v324_v47 = vld [vmem:[%s6295_s1 + $0x8e8] sm:$0xff]  ;;  %v383_v35 = vld [vmem:[%s6295_s1 + $0xac0] sm:$0xff] }
  0x70   :  { %2710 = vmatpush1.bf16.msra.mxu0 %v2709_v58  ;;  %v253_v58 = vld [vmem:[%s6295_s1 + $0x6b0] sm:$0xff]  ;;  %v452_v50 = vld [vmem:[%s6295_s1 + $0xce8] sm:$0xff] }
  0x71   :  { %2586 = vmatpush1.bf16.msra.mxu1 %v2585_v59  ;;  %2712 = vmatprep.subr.bf16.mxu0 %v2711_v61  ;;  %v361_v59 = vld [vmem:[%s6295_s1 + $0xa10] sm:$0xff]  ;;  %v790_v61 = vld [vmem:[%s6297_s2 + $0x8] sm:$0xff]  ;;  %v2729_v4 = vpack.c.bf16 %v253_v58, %v243_v54  ;;  %v2743_v54 = vpack.c.bf16 %v334_v48, %v324_v47 }
  0x72   :  { %2588 = vmatprep.subr.bf16.mxu1 %v2587_v1  ;;  %v274_v1 = vld [vmem:[%s6295_s1 + $0x758] sm:$0xff]  ;;  %801 = vperm.xlu0 %3295, %v790_v61   ;;  %v2605_v6 = vpack.c.bf16 %v371_v63, %v361_v59  ;;  %v421_v44 = vld [vmem:[%s6295_s1 + $0xbf0] sm:$0xff]  ;;  %v2619_v59 = vpack.c.bf16 %v452_v50, %v442_v49  ;;  %v451_v61 = vld [vmem:[%s6295_s1 + $0xce0] sm:$0xff] }
  0x73   :  { %v441_v58 = vld [vmem:[%s6295_s1 + $0xc90] sm:$0xff]  ;;  %v354_v63 = vld [vmem:[%s6295_s1 + $0x9d8] sm:$0xff] }
  0x74   :  { %2714 = vmatpush1.bf16.msra.mxu0 %v2713_v8  ;;  %v2731_v8 = vpack.c.bf16 %v274_v1, %v264_v0  ;;  %v462_v0 = vld [vmem:[%s6295_s1 + $0xd38] sm:$0xff]  ;;  %v472_v1 = vld [vmem:[%s6295_s1 + $0xd88] sm:$0xff]  ;;  %v2621_v3 = vpack.c.bf16 %v451_v61, %v441_v58  ;;  %v501_v37 = vld [vmem:[%s6295_s1 + $0xe70] sm:$0xff] }
  0x75   :  { %2590 = vmatpush1.bf16.msra.mxu1 %v2589_v10  ;;  %2716 = vmatprep.subr.bf16.mxu0 %v2715_v11  ;;  %v273_v10 = vld [vmem:[%s6295_s1 + $0x750] sm:$0xff]  ;;  %v423_v61 = vld [vmem:[%s6295_s1 + $0xc00] sm:$0xff] }
  0x76   :  { %2592 = vmatprep.subr.bf16.mxu1 %v2591_v16  ;;  %v381_v11 = vld [vmem:[%s6295_s1 + $0xab0] sm:$0xff]  ;;  %v294_v16 = vld [vmem:[%s6295_s1 + $0x7f8] sm:$0xff]  ;;  %v2733_v22 = vpack.c.bf16 %v273_v10, %v263_v9  ;;  %816 = vperm.xlu0 %3295, %v793_v34   ;;  %v2623_v9 = vpack.c.bf16 %v472_v1, %v462_v0  ;;  %v471_v10 = vld [vmem:[%s6295_s1 + $0xd80] sm:$0xff] }
  0x77   :  { %v413_v48 = vld [vmem:[%s6295_s1 + $0xbb0] sm:$0xff]  ;;  %v444_v0 = vld [vmem:[%s6295_s1 + $0xca8] sm:$0xff]  ;;  %v454_v1 = vld [vmem:[%s6295_s1 + $0xcf8] sm:$0xff] }
  0x78   :  { %2718 = vmatpush1.bf16.msra.mxu0 %v2717_v25  ;;  %v2609_v25 = vpack.c.bf16 %v391_v13, %v381_v11  ;;  %v364_v11 = vld [vmem:[%s6295_s1 + $0xa28] sm:$0xff]  ;;  %v482_v13 = vld [vmem:[%s6295_s1 + $0xdd8] sm:$0xff]  ;;  %v521_v49 = vld [vmem:[%s6295_s1 + $0xf10] sm:$0xff] }
  0x79   :  { %2594 = vmatpush1.bf16.msra.mxu1 %v2593_v26  ;;  %2720 = vmatprep.subr.bf16.mxu0 %v2719_v27  ;;  %v2735_v26 = vpack.c.bf16 %v294_v16, %v284_v15  ;;  %v293_v27 = vld [vmem:[%s6295_s1 + $0x7f0] sm:$0xff]  ;;  %v492_v15 = vld [vmem:[%s6295_s1 + $0xe28] sm:$0xff] }
  0x7a   :  { %2596 = vmatprep.subr.bf16.mxu1 %v2595_v31  ;;  %v304_v31 = vld [vmem:[%s6295_s1 + $0x848] sm:$0xff]  ;;  %v2737_v38 = vpack.c.bf16 %v293_v27, %v283_v23  ;;  %v373_v23 = vld [vmem:[%s6295_s1 + $0xa70] sm:$0xff] }
  0x7b   :  { %v384_v27 = vld [vmem:[%s6295_s1 + $0xac8] sm:$0xff] }
  0x7c   :  { %2722 = vmatpush1.bf16.msra.mxu0 %v2721_v40  ;;  %v2613_v40 = vpack.c.bf16 %v411_v29, %v401_v28  ;;  %v394_v28 = vld [vmem:[%s6295_s1 + $0xb18] sm:$0xff] }
  0x7d   :  { %2598 = vmatpush1.bf16.msra.mxu1 %v2597_v41  ;;  %2724 = vmatprep.subr.bf16.mxu0 %v2723_v42  ;;  %v2739_v41 = vpack.c.bf16 %v314_v33, %v304_v31  ;;  %v303_v42 = vld [vmem:[%s6295_s1 + $0x840] sm:$0xff]  ;;  %v502_v29 = vld [vmem:[%s6295_s1 + $0xe78] sm:$0xff]  ;;  %v2755_v34 = vpack.c.bf16 %v394_v28, %v384_v27  ;;  %v612_v28 = vld [vmem:[%s6295_s1 + $0x11e8] sm:$0xff] }
  0x7e   :  { %2600 = vmatprep.subr.bf16.mxu1 %v2599_v46  ;;  %v431_v46 = vld [vmem:[%s6295_s1 + $0xc40] sm:$0xff]  ;;  %v2741_v52 = vpack.c.bf16 %v313_v43, %v303_v42  ;;  %v414_v42 = vld [vmem:[%s6295_s1 + $0xbb8] sm:$0xff] }
  0x7f   :  { %v522_v43 = vld [vmem:[%s6295_s1 + $0xf18] sm:$0xff] }
  0x80   :  { %2726 = vmatpush1.bf16.msra.mxu0 %v2725_v53  ;;  %v2617_v53 = vpack.c.bf16 %v431_v46, %v421_v44  ;;  %v532_v44 = vld [vmem:[%s6295_s1 + $0xf68] sm:$0xff]  ;;  %v602_v27 = vld [vmem:[%s6295_s1 + $0x1198] sm:$0xff] }
  0x81   :  { %2602 = vmatpush1.bf16.msra.mxu1 %v2601_v56  ;;  %2728 = vmatprep.subr.bf16.mxu0 %v2727_v57  ;;  %v323_v56 = vld [vmem:[%s6295_s1 + $0x8e0] sm:$0xff]  ;;  %v333_v57 = vld [vmem:[%s6295_s1 + $0x930] sm:$0xff]  ;;  %v2635_v50 = vpack.c.bf16 %v532_v44, %v522_v43 }
  0x82   :  { %2604 = vmatprep.subr.bf16.mxu1 %v2603_v62  ;;  %v344_v62 = vld [vmem:[%s6295_s1 + $0x988] sm:$0xff]  ;;  %v2745_v17 = vpack.c.bf16 %v333_v57, %v323_v56 }
  0x83   :  { %v552_v56 = vld [vmem:[%s6295_s1 + $0x1008] sm:$0xff] }
  0x84   :  { %2730 = vmatpush1.bf16.msra.mxu0 %v2729_v4  ;;  %1185 = vmatmul.mubr.f32.vlgmr.msra.gmra.mrb[10].mxu1 %v3794_v18  ;;  %v2747_v4 = vpack.c.bf16 %v354_v63, %v344_v62  ;;  %v433_v62 = vld [vmem:[%s6295_s1 + $0xc50] sm:$0xff] }
  0x85   :  { %2606 = vmatpush1.bf16.msra.mxu1 %v2605_v6  ;;  %2732 = vmatprep.subr.bf16.mxu0 %v2731_v8  ;;  %v353_v6 = vld [vmem:[%s6295_s1 + $0x9d0] sm:$0xff] }
  0x86   :  { %2608 = vmatprep.subr.bf16.mxu1 %v2607_v12  ;;  %1190 = vmatprep.mubr.f32.mxu1 %v3833_v36  ;;  %v461_v8 = vld [vmem:[%s6295_s1 + $0xd30] sm:$0xff]  ;;  %v374_v12 = vld [vmem:[%s6295_s1 + $0xa78] sm:$0xff]  ;;  %v2749_v16 = vpack.c.bf16 %v353_v6, %v343_v5  ;;  %v2767_v6 = vpack.c.bf16 %v454_v1, %v444_v0  ;;  %v672_v1 = vld [vmem:[%s6295_s1 + $0x13c8] sm:$0xff] }
  0x87   :  { %v2625_v19 = vpack.c.bf16 %v471_v10, %v461_v8  ;;  %v2751_v21 = vpack.c.bf16 %v374_v12, %v364_v11  ;;  %v443_v8 = vld [vmem:[%s6295_s1 + $0xca0] sm:$0xff]  ;;  %v464_v11 = vld [vmem:[%s6295_s1 + $0xd48] sm:$0xff]  ;;  %v474_v12 = vld [vmem:[%s6295_s1 + $0xd98] sm:$0xff] }
  0x88   :  { %2734 = vmatpush1.bf16.msra.mxu0 %v2733_v22  ;;  %1191 = vmatmul.mubr.f32.gmra.mrb[12].mxu1 %v3869_v51  ;;  %v363_v22 = vld [vmem:[%s6295_s1 + $0xa20] sm:$0xff]  ;;  %v662_v0 = vld [vmem:[%s6295_s1 + $0x1378] sm:$0xff] }
  0x89   :  { %2610 = vmatpush1.bf16.msra.mxu1 %v2609_v25  ;;  %2736 = vmatprep.subr.bf16.mxu0 %v2735_v26  ;;  %v2627_v25 = vpack.c.bf16 %v492_v15, %v482_v13  ;;  %v491_v26 = vld [vmem:[%s6295_s1 + $0xe20] sm:$0xff]  ;;  %v2753_v31 = vpack.c.bf16 %v373_v23, %v363_v22  ;;  %v582_v13 = vld [vmem:[%s6295_s1 + $0x10f8] sm:$0xff]  ;;  %v592_v15 = vld [vmem:[%s6295_s1 + $0x1148] sm:$0xff] }
  0x8a   :  { %2612 = vmatprep.subr.bf16.mxu1 %v2611_v30  ;;  %1196 = vmatprep.mubr.f32.mxu1 %v3905_v2  ;;  %v512_v30 = vld [vmem:[%s6295_s1 + $0xec8] sm:$0xff]  ;;  %v2629_v33 = vpack.c.bf16 %v491_v26, %v481_v24  ;;  %v463_v22 = vld [vmem:[%s6295_s1 + $0xd40] sm:$0xff]  ;;  %v473_v23 = vld [vmem:[%s6295_s1 + $0xd90] sm:$0xff]  ;;  %v2647_v24 = vpack.c.bf16 %v592_v15, %v582_v13 }
  0x8b   :  { %v494_v26 = vld [vmem:[%s6295_s1 + $0xe38] sm:$0xff] }
  0x8c   :  { %2738 = vmatpush1.bf16.msra.mxu0 %v2737_v38  ;;  %1197 = vmatmul.mubr.f32.gmra.mrb[14].mxu1 %v3932_v14  ;;  %v2631_v38 = vpack.c.bf16 %v512_v30, %v502_v29  ;;  %v2773_v29 = vpack.c.bf16 %v473_v23, %v463_v22  ;;  %v3297_v30 = vld [vmem:[%s6296_s0 + $0x18] sm:$0xff]  ;;  %v681_v22 = vld [vmem:[%s6295_s1 + $0x1410] sm:$0xff] }
  0x8d   :  { %2614 = vmatpush1.bf16.msra.mxu1 %v2613_v40  ;;  %2740 = vmatprep.subr.bf16.mxu0 %v2739_v41  ;;  %v511_v40 = vld [vmem:[%s6295_s1 + $0xec0] sm:$0xff]  ;;  %v404_v41 = vld [vmem:[%s6295_s1 + $0xb68] sm:$0xff] }
  0x8e   :  { %2616 = vmatprep.subr.bf16.mxu1 %v2615_v45  ;;  %1202 = vmatprep.mubr.f32.mxu1 %v3971_v32  ;;  %v2633_v46 = vpack.c.bf16 %v511_v40, %v501_v37  ;;  %v2759_v47 = vpack.c.bf16 %v414_v42, %v404_v41  ;;  %v611_v37 = vld [vmem:[%s6295_s1 + $0x11e0] sm:$0xff]  ;;  %v514_v40 = vld [vmem:[%s6295_s1 + $0xed8] sm:$0xff]  ;;  %v632_v42 = vld [vmem:[%s6295_s1 + $0x1288] sm:$0xff] }
  0x8f   :  { %v622_v41 = vld [vmem:[%s6295_s1 + $0x1238] sm:$0xff] }
  0x90   :  { %2742 = vmatpush1.bf16.msra.mxu0 %v2741_v52  ;;  %1203 = vmatmul.mubr.f32.gmra.mrb[16].mxu1 %v4018_v55  ;;  %v424_v52 = vld [vmem:[%s6295_s1 + $0xc08] sm:$0xff] }
  0x91   :  { %2618 = vmatpush1.bf16.msra.mxu1 %v2617_v53  ;;  %2744 = vmatprep.subr.bf16.mxu0 %v2743_v54  ;;  %v434_v53 = vld [vmem:[%s6295_s1 + $0xc58] sm:$0xff] }
  0x92   :  { %2620 = vmatprep.subr.bf16.mxu1 %v2619_v59  ;;  %1208 = vmatprep.mubr.f32.mxu1 %v4033_v60  ;;  %v542_v54 = vld [vmem:[%s6295_s1 + $0xfb8] sm:$0xff]  ;;  %v2763_v59 = vpack.c.bf16 %v434_v53, %v424_v52  ;;  %v652_v53 = vld [vmem:[%s6295_s1 + $0x1328] sm:$0xff] }
  0x93   :  { %v2639_v63 = vpack.c.bf16 %v552_v56, %v542_v54  ;;  %v642_v52 = vld [vmem:[%s6295_s1 + $0x12d8] sm:$0xff] }
  0x94   :  { %2746 = vmatpush1.bf16.msra.mxu0 %v2745_v17  ;;  %1209 = vmatmul.mubr.f32.gmra.mrb[18].mxu1 %v4059_v7  ;;  %v562_v17 = vld [vmem:[%s6295_s1 + $0x1058] sm:$0xff] }
  0x95   :  { %2622 = vmatpush1.bf16.msra.mxu1 %v2621_v3  ;;  %2748 = vmatprep.subr.bf16.mxu0 %v2747_v4  ;;  %v572_v3 = vld [vmem:[%s6295_s1 + $0x10a8] sm:$0xff]  ;;  %v2765_v4 = vpack.c.bf16 %v433_v62, %v423_v61  ;;  %v641_v61 = vld [vmem:[%s6295_s1 + $0x12d0] sm:$0xff]  ;;  %v2659_v62 = vpack.c.bf16 %v652_v53, %v642_v52  ;;  %v4761_v53 = vld [vmem:[%s6296_s0 + $0x38] sm:$0xff] }
  0x96   :  { %2624 = vmatprep.subr.bf16.mxu1 %v2623_v9  ;;  %1279 = vmatprep.mubr.f32.mxu1 %v3668_v20  ;;  %v393_v20 = vld [vmem:[%s6295_s1 + $0xb10] sm:$0xff]  ;;  %v2643_v10 = vpack.c.bf16 %v572_v3, %v562_v17  ;;  %v752_v52 = vld [vmem:[%s6295_s1 + $0x1648] sm:$0xff] }
  0x97   :  { %v2757_v45 = vpack.c.bf16 %v393_v20, %v383_v35  ;;  %v453_v9 = vld [vmem:[%s6295_s1 + $0xcf0] sm:$0xff]  ;;  %v2651_v20 = vpack.c.bf16 %v612_v28, %v602_v27 }
  0x98   :  { %2750 = vmatpush1.bf16.msra.mxu0 %v2749_v16  ;;  %v2769_v16 = vpack.c.bf16 %v453_v9, %v443_v8  ;;  %v493_v35 = vld [vmem:[%s6295_s1 + $0xe30] sm:$0xff]  ;;  %v2663_v9 = vpack.c.bf16 %v672_v1, %v662_v0  ;;  %v654_v0 = vld [vmem:[%s6295_s1 + $0x1338] sm:$0xff] }
  0x99   :  { %2626 = vmatpush1.bf16.msra.mxu1 %v2625_v19  ;;  %2752 = vmatprep.subr.bf16.mxu0 %v2751_v21  ;;  %v2771_v21 = vpack.c.bf16 %v474_v12, %v464_v11  ;;  %v661_v8 = vld [vmem:[%s6295_s1 + $0x1370] sm:$0xff]  ;;  %v682_v11 = vld [vmem:[%s6295_s1 + $0x1418] sm:$0xff]  ;;  %v692_v12 = vld [vmem:[%s6295_s1 + $0x1468] sm:$0xff] }
  0x9a   :  { %2628 = vmatprep.subr.bf16.mxu1 %v2627_v25  ;;  %v484_v25 = vld [vmem:[%s6295_s1 + $0xde8] sm:$0xff]  ;;  %v2667_v23 = vpack.c.bf16 %v692_v12, %v682_v11  ;;  %v762_v1 = vld [vmem:[%s6295_s1 + $0x1698] sm:$0xff]  ;;  %v771_v11 = vld [vmem:[%s6295_s1 + $0x16e0] sm:$0xff] }
  0x9b   :  { %1470 = vmatmul.mubr.f32.vlgmr.msra.gmra.mrb[10].mxu0 %v3794_v18  ;;  %v403_v18 = vld [vmem:[%s6295_s1 + $0xb60] sm:$0xff]  ;;  %v664_v12 = vld [vmem:[%s6295_s1 + $0x1388] sm:$0xff] }
  0x9c   :  { %2754 = vmatpush1.bf16.msra.mxu0 %v2753_v31  ;;  %1475 = vmatprep.mubr.f32.mxu0 %v3833_v36  ;;  %v531_v36 = vld [vmem:[%s6295_s1 + $0xf60] sm:$0xff]  ;;  %v2761_v57 = vpack.c.bf16 %v413_v48, %v403_v18  ;;  %v621_v18 = vld [vmem:[%s6295_s1 + $0x1230] sm:$0xff]  ;;  %v2655_v48 = vpack.c.bf16 %v632_v42, %v622_v41 }
  0x9d   :  { %2630 = vmatpush1.bf16.msra.mxu1 %v2629_v33  ;;  %2756 = vmatprep.subr.bf16.mxu0 %v2755_v34  ;;  %v2637_v58 = vpack.c.bf16 %v531_v36, %v521_v49  ;;  %v2775_v33 = vpack.c.bf16 %v494_v26, %v484_v25  ;;  %v483_v34 = vld [vmem:[%s6295_s1 + $0xde0] sm:$0xff]  ;;  %v534_v36 = vld [vmem:[%s6295_s1 + $0xf78] sm:$0xff]  ;;  %v712_v26 = vld [vmem:[%s6295_s1 + $0x1508] sm:$0xff] }
  0x9e   :  { %2632 = vmatprep.subr.bf16.mxu1 %v2631_v38  ;;  %v504_v38 = vld [vmem:[%s6295_s1 + $0xe88] sm:$0xff]  ;;  %v2777_v43 = vpack.c.bf16 %v493_v35, %v483_v34  ;;  %v631_v49 = vld [vmem:[%s6295_s1 + $0x1280] sm:$0xff]  ;;  %v702_v25 = vld [vmem:[%s6295_s1 + $0x14b8] sm:$0xff] }
  0x9f   :  { %1476 = vmatmul.mubr.f32.gmra.mrb[12].mxu0 %v3869_v51  ;;  %v541_v51 = vld [vmem:[%s6295_s1 + $0xfb0] sm:$0xff]  ;;  %v2657_v56 = vpack.c.bf16 %v631_v49, %v621_v18  ;;  %v2671_v34 = vpack.c.bf16 %v712_v26, %v702_v25  ;;  %v711_v35 = vld [vmem:[%s6295_s1 + $0x1500] sm:$0xff]  ;;  %v624_v49 = vld [vmem:[%s6295_s1 + $0x1248] sm:$0xff] }
  0xa0   :  { %2758 = vmatpush1.bf16.msra.mxu0 %v2757_v45  ;;  %1481 = vmatprep.mubr.f32.mxu0 %v3905_v2  ;;  %v551_v2 = vld [vmem:[%s6295_s1 + $0x1000] sm:$0xff]  ;;  %v2779_v45 = vpack.c.bf16 %v514_v40, %v504_v38  ;;  %v732_v38 = vld [vmem:[%s6295_s1 + $0x15a8] sm:$0xff]  ;;  %v4725_v40 = vld [vmem:[%s6296_s0 + $0x10] sm:$0xff] }
  0xa1   :  { %2634 = vmatpush1.bf16.msra.mxu1 %v2633_v46  ;;  %2760 = vmatprep.subr.bf16.mxu0 %v2759_v47  ;;  %v2641_v5 = vpack.c.bf16 %v551_v2, %v541_v51  ;;  %v503_v46 = vld [vmem:[%s6295_s1 + $0xe80] sm:$0xff]  ;;  %v513_v47 = vld [vmem:[%s6295_s1 + $0xed0] sm:$0xff]  ;;  %v554_v2 = vld [vmem:[%s6295_s1 + $0x1018] sm:$0xff] }
  0xa2   :  { %2636 = vmatprep.subr.bf16.mxu1 %v2635_v50  ;;  %v524_v50 = vld [vmem:[%s6295_s1 + $0xf28] sm:$0xff]  ;;  %v2781_v54 = vpack.c.bf16 %v513_v47, %v503_v46  ;;  %v651_v51 = vld [vmem:[%s6295_s1 + $0x1320] sm:$0xff]  ;;  %v721_v46 = vld [vmem:[%s6295_s1 + $0x1550] sm:$0xff] }
  0xa3   :  { %1482 = vmatmul.mubr.f32.gmra.mrb[14].mxu0 %v3932_v14  ;;  %v561_v14 = vld [vmem:[%s6295_s1 + $0x1050] sm:$0xff]  ;;  %v2661_v3 = vpack.c.bf16 %v651_v51, %v641_v61  ;;  %v4740_v47 = vld [vmem:[%s6296_s0 + $0x40] sm:$0xff]  ;;  %v782_v25 = vld [vmem:[%s6295_s1 + $0x1738] sm:$0xff] }
  0xa4   :  { %2762 = vmatpush1.bf16.msra.mxu0 %v2761_v57  ;;  %1487 = vmatprep.mubr.f32.mxu0 %v3971_v32  ;;  %v571_v32 = vld [vmem:[%s6295_s1 + $0x10a0] sm:$0xff]  ;;  %v2783_v57 = vpack.c.bf16 %v534_v36, %v524_v50  ;;  %v634_v50 = vld [vmem:[%s6295_s1 + $0x1298] sm:$0xff]  ;;  %v741_v61 = vld [vmem:[%s6295_s1 + $0x15f0] sm:$0xff] }
  0xa5   :  { %2638 = vmatpush1.bf16.msra.mxu1 %v2637_v58  ;;  %2764 = vmatprep.subr.bf16.mxu0 %v2763_v59  ;;  %v2645_v19 = vpack.c.bf16 %v571_v32, %v561_v14  ;;  %v523_v58 = vld [vmem:[%s6295_s1 + $0xf20] sm:$0xff]  ;;  %v533_v59 = vld [vmem:[%s6295_s1 + $0xf70] sm:$0xff]  ;;  %v574_v32 = vld [vmem:[%s6295_s1 + $0x10b8] sm:$0xff] }
  0xa6   :  { %2640 = vmatprep.subr.bf16.mxu1 %v2639_v63  ;;  %v544_v63 = vld [vmem:[%s6295_s1 + $0xfc8] sm:$0xff]  ;;  %v2785_v17 = vpack.c.bf16 %v533_v59, %v523_v58  ;;  %v671_v14 = vld [vmem:[%s6295_s1 + $0x13c0] sm:$0xff]  ;;  %v742_v36 = vld [vmem:[%s6295_s1 + $0x15f8] sm:$0xff] }
  0xa7   :  { %1488 = vmatmul.mubr.f32.gmra.mrb[16].mxu0 %v4018_v55  ;;  %v581_v55 = vld [vmem:[%s6295_s1 + $0x10f0] sm:$0xff]  ;;  %v2665_v15 = vpack.c.bf16 %v671_v14, %v661_v8  ;;  %v623_v58 = vld [vmem:[%s6295_s1 + $0x1240] sm:$0xff]  ;;  %v2679_v51 = vpack.c.bf16 %v752_v52, %v742_v36  ;;  %v46_v26 = vld [vmem:[%s6295_s1 + $0x38] sm:$0xff] }
  0xa8   :  { %2766 = vmatpush1.bf16.msra.mxu0 %v2765_v4  ;;  %1493 = vmatprep.mubr.f32.mxu0 %v4033_v60  ;;  %v591_v60 = vld [vmem:[%s6295_s1 + $0x1140] sm:$0xff]  ;;  %v2787_v4 = vpack.c.bf16 %v554_v2, %v544_v63  ;;  %v633_v59 = vld [vmem:[%s6295_s1 + $0x1290] sm:$0xff]  ;;  %v644_v2 = vld [vmem:[%s6295_s1 + $0x12e8] sm:$0xff] }
  0xa9   :  { %2642 = vmatpush1.bf16.msra.mxu1 %v2641_v5  ;;  %2768 = vmatprep.subr.bf16.mxu0 %v2767_v6  ;;  %v2649_v31 = vpack.c.bf16 %v591_v60, %v581_v55  ;;  %v543_v5 = vld [vmem:[%s6295_s1 + $0xfc0] sm:$0xff]  ;;  %v553_v6 = vld [vmem:[%s6295_s1 + $0x1010] sm:$0xff]  ;;  %v594_v60 = vld [vmem:[%s6295_s1 + $0x1158] sm:$0xff] }
  0xaa   :  { %2644 = vmatprep.subr.bf16.mxu1 %v2643_v10  ;;  %v564_v10 = vld [vmem:[%s6295_s1 + $0x1068] sm:$0xff]  ;;  %v2789_v13 = vpack.c.bf16 %v553_v6, %v543_v5  ;;  %v691_v55 = vld [vmem:[%s6295_s1 + $0x1460] sm:$0xff]  ;;  %v2807_v6 = vpack.c.bf16 %v654_v0, %v644_v2  ;;  %v761_v14 = vld [vmem:[%s6295_s1 + $0x1690] sm:$0xff] }
  0xab   :  { %1494 = vmatmul.mubr.f32.gmra.mrb[18].mxu0 %v4059_v7  ;;  %v601_v7 = vld [vmem:[%s6295_s1 + $0x1190] sm:$0xff]  ;;  %v2669_v28 = vpack.c.bf16 %v691_v55, %v681_v22  ;;  %v751_v63 = vld [vmem:[%s6295_s1 + $0x1640] sm:$0xff]  ;;  %v4839_v55 = vld [vmem:[%s6296_s0 + $0xb8] sm:$0xf] }
  0xac   :  { %2770 = vmatpush1.bf16.msra.mxu0 %v2769_v16  ;;  %1564 = vmatprep.mubr.f32.mxu0 %v3297_v30  ;;  %v2653_v44 = vpack.c.bf16 %v611_v37, %v601_v7  ;;  %v2791_v16 = vpack.c.bf16 %v574_v32, %v564_v10  ;;  %v583_v30 = vld [vmem:[%s6295_s1 + $0x1100] sm:$0xff]  ;;  %v604_v7 = vld [vmem:[%s6295_s1 + $0x11a8] sm:$0xff]  ;;  %v722_v37 = vld [vmem:[%s6295_s1 + $0x1558] sm:$0xff]  ;;  %v2681_v5 = vpack.c.bf16 %v751_v63, %v741_v61 }
  0xad   :  { %2646 = vmatpush1.bf16.msra.mxu1 %v2645_v19  ;;  %2772 = vmatprep.subr.bf16.mxu0 %v2771_v21  ;;  %v563_v19 = vld [vmem:[%s6295_s1 + $0x1060] sm:$0xff]  ;;  %v573_v21 = vld [vmem:[%s6295_s1 + $0x10b0] sm:$0xff]  ;;  %v2675_v18 = vpack.c.bf16 %v732_v38, %v722_v37  ;;  %v714_v38 = vld [vmem:[%s6295_s1 + $0x1518] sm:$0xff] }
  0xae   :  { %2648 = vmatprep.subr.bf16.mxu1 %v2647_v24  ;;  %v584_v24 = vld [vmem:[%s6295_s1 + $0x1108] sm:$0xff]  ;;  %v2793_v27 = vpack.c.bf16 %v573_v21, %v563_v19  ;;  %v643_v8 = vld [vmem:[%s6295_s1 + $0x12e0] sm:$0xff]  ;;  %v4812_v10 = vld [vmem:[%s6296_s0 + $0x90] sm:$0xff]  ;;  %v2685_v19 = vpack.c.bf16 %v771_v11, %v761_v14 }
  0xaf   :  { %v663_v22 = vld [vmem:[%s6295_s1 + $0x1380] sm:$0xff]  ;;  %v724_v36 = vld [vmem:[%s6295_s1 + $0x1568] sm:$0xff]  ;;  %v85_v61 = vld [vmem:[%s6295_s1 + $0x170] sm:$0xff] }
  0xb0   :  { %2774 = vmatpush1.bf16.msra.mxu0 %v2773_v29  ;;  %v2795_v29 = vpack.c.bf16 %v594_v60, %v584_v24  ;;  %v684_v24 = vld [vmem:[%s6295_s1 + $0x1428] sm:$0xff]  ;;  %v694_v60 = vld [vmem:[%s6295_s1 + $0x1478] sm:$0xff]  ;;  %v4909_v52 = vld [vmem:[%s6296_s0 + $0x20] sm:$0xff] }
  0xb1   :  { %2650 = vmatpush1.bf16.msra.mxu1 %v2649_v31  ;;  %2776 = vmatprep.subr.bf16.mxu0 %v2775_v33  ;;  %v593_v31 = vld [vmem:[%s6295_s1 + $0x1150] sm:$0xff]  ;;  %v115_v14 = vld [vmem:[%s6295_s1 + $0x260] sm:$0xff] }
  0xb2   :  { %2652 = vmatprep.subr.bf16.mxu1 %v2651_v20  ;;  %v701_v33 = vld [vmem:[%s6295_s1 + $0x14b0] sm:$0xff]  ;;  %v614_v20 = vld [vmem:[%s6295_s1 + $0x11f8] sm:$0xff]  ;;  %v2797_v41 = vpack.c.bf16 %v593_v31, %v583_v30 }
  0xb3   :  { %v2673_v42 = vpack.c.bf16 %v711_v35, %v701_v33  ;;  %v781_v30 = vld [vmem:[%s6295_s1 + $0x1730] sm:$0xff]  ;;  %v55_v33 = vld [vmem:[%s6295_s1 + $0x80] sm:$0xff] }
  0xb4   :  { %2778 = vmatpush1.bf16.msra.mxu0 %v2777_v43  ;;  %v2799_v43 = vpack.c.bf16 %v614_v20, %v604_v7  ;;  %v45_v31 = vld [vmem:[%s6295_s1 + $0x30] sm:$0xff]  ;;  %v683_v35 = vld [vmem:[%s6295_s1 + $0x1420] sm:$0xff]  ;;  %v704_v20 = vld [vmem:[%s6295_s1 + $0x14c8] sm:$0xff] }
  0xb5   :  { %2654 = vmatpush1.bf16.msra.mxu1 %v2653_v44  ;;  %2780 = vmatprep.subr.bf16.mxu0 %v2779_v45  ;;  %v603_v44 = vld [vmem:[%s6295_s1 + $0x11a0] sm:$0xff]  ;;  %v613_v45 = vld [vmem:[%s6295_s1 + $0x11f0] sm:$0xff] }
  0xb6   :  { %2656 = vmatprep.subr.bf16.mxu1 %v2655_v48  ;;  %v731_v48 = vld [vmem:[%s6295_s1 + $0x15a0] sm:$0xff]  ;;  %v693_v7 = vld [vmem:[%s6295_s1 + $0x1470] sm:$0xff] }
  0xb7   :  { %v733_v0 = vld [vmem:[%s6295_s1 + $0x15b0] sm:$0xff] }
  0xb8   :  { %2782 = vmatpush1.bf16.msra.mxu0 %v2781_v54  ;;  %v2801_v54 = vpack.c.bf16 %v613_v45, %v603_v44  ;;  %v2817_v44 = vpack.c.bf16 %v693_v7, %v683_v35  ;;  %v65_v45 = vld [vmem:[%s6295_s1 + $0xd0] sm:$0xff] }
  0xb9   :  { %2658 = vmatpush1.bf16.msra.mxu1 %v2657_v56  ;;  %2784 = vmatprep.subr.bf16.mxu0 %v2783_v57  ;;  %v2677_v56 = vpack.c.bf16 %v731_v48, %v721_v46  ;;  %v2803_v57 = vpack.c.bf16 %v634_v50, %v624_v49  ;;  %v75_v46 = vld [vmem:[%s6295_s1 + $0x120] sm:$0xff]  ;;  %v713_v50 = vld [vmem:[%s6295_s1 + $0x1510] sm:$0xff] }
  0xba   :  { %2660 = vmatprep.subr.bf16.mxu1 %v2659_v62  ;;  %v4776_v62 = vld [vmem:[%s6296_s0 + $0x68] sm:$0xff]  ;;  %v703_v49 = vld [vmem:[%s6295_s1 + $0x14c0] sm:$0xff]  ;;  %v145_v7 = vld [vmem:[%s6295_s1 + $0x350] sm:$0xff] }
  0xbc   :  { %2786 = vmatpush1.bf16.msra.mxu0 %v2785_v17  ;;  %v772_v17 = vld [vmem:[%s6295_s1 + $0x16e8] sm:$0xff] }
  0xbd   :  { %2662 = vmatpush1.bf16.msra.mxu1 %v2661_v3  ;;  %2788 = vmatprep.subr.bf16.mxu0 %v2787_v4  ;;  %v4797_v3 = vld [vmem:[%s6296_s0 + $0x60] sm:$0xff]  ;;  %v2805_v4 = vpack.c.bf16 %v633_v59, %v623_v58  ;;  %v2683_v32 = vpack.c.bf16 %v772_v17, %v762_v1  ;;  %v2841_v58 = vpack.c.bf16 %v75_v46, %v65_v45  ;;  %v744_v1 = vld [vmem:[%s6295_s1 + $0x1608] sm:$0xff]  ;;  %v165_v45 = vld [vmem:[%s6295_s1 + $0x3f0] sm:$0xff] }
  0xbe   :  { %2664 = vmatprep.subr.bf16.mxu1 %v2663_v9  ;;  %v653_v9 = vld [vmem:[%s6295_s1 + $0x1330] sm:$0xff]  ;;  %v2821_v59 = vpack.c.bf16 %v713_v50, %v703_v49  ;;  %v4942_v17 = vld [vmem:[%s6296_s0 + $0x48] sm:$0xff]  ;;  %v783_v49 = vld [vmem:[%s6295_s1 + $0x1740] sm:$0xff] }
  0xc0   :  { %2790 = vmatpush1.bf16.msra.mxu0 %v2789_v13  ;;  %v674_v13 = vld [vmem:[%s6295_s1 + $0x13d8] sm:$0xff] }
  0xc1   :  { %2666 = vmatpush1.bf16.msra.mxu1 %v2665_v15  ;;  %2792 = vmatprep.subr.bf16.mxu0 %v2791_v16  ;;  %v4827_v15 = vld [vmem:[%s6296_s0 + $0x88] sm:$0xff]  ;;  %v2809_v16 = vpack.c.bf16 %v653_v9, %v643_v8  ;;  %v2811_v21 = vpack.c.bf16 %v674_v13, %v664_v12  ;;  %v105_v9 = vld [vmem:[%s6295_s1 + $0x210] sm:$0xff] }
  0xc2   :  { %2668 = vmatprep.subr.bf16.mxu1 %v2667_v23  ;;  %v673_v23 = vld [vmem:[%s6295_s1 + $0x13d0] sm:$0xff]  ;;  %v764_v13 = vld [vmem:[%s6295_s1 + $0x16a8] sm:$0xff] }
  0xc3   :  { %v753_v12 = vld [vmem:[%s6295_s1 + $0x1650] sm:$0xff] }
  0xc4   :  { %2794 = vmatpush1.bf16.msra.mxu0 %v2793_v27  ;;  %1280 = vmatmul.mubr.f32.vlgmr.msra.gmra.mrb[10].mxu1 %v4725_v40  ;;  %v56_v27 = vld [vmem:[%s6295_s1 + $0x88] sm:$0xff] }
  0xc5   :  { %2670 = vmatpush1.bf16.msra.mxu1 %v2669_v28  ;;  %2796 = vmatprep.subr.bf16.mxu0 %v2795_v29  ;;  %v4860_v28 = vld [vmem:[%s6296_s0 + $0xb0] sm:$0xf]  ;;  %v2813_v29 = vpack.c.bf16 %v673_v23, %v663_v22  ;;  %v2835_v37 = vpack.c.bf16 %v56_v27, %v46_v26  ;;  %v136_v22 = vld [vmem:[%s6295_s1 + $0x308] sm:$0xff]  ;;  %v2849_v23 = vpack.c.bf16 %v115_v14, %v105_v9 }
  0xc6   :  { %2672 = vmatprep.subr.bf16.mxu1 %v2671_v34  ;;  %1285 = vmatprep.mubr.f32.mxu1 %v4740_v47  ;;  %v2815_v34 = vpack.c.bf16 %v694_v60, %v684_v24  ;;  %v763_v24 = vld [vmem:[%s6295_s1 + $0x16a0] sm:$0xff]  ;;  %v125_v60 = vld [vmem:[%s6295_s1 + $0x2b0] sm:$0xff] }
  0xc7   :  { %v773_v27 = vld [vmem:[%s6295_s1 + $0x16f0] sm:$0xff] }
  0xc8   :  { %2798 = vmatpush1.bf16.msra.mxu0 %v2797_v41  ;;  %1286 = vmatmul.mubr.f32.gmra.mrb[12].mxu1 %v4761_v53  ;;  %v66_v41 = vld [vmem:[%s6295_s1 + $0xd8] sm:$0xff]  ;;  %v97_v9 = vld [vmem:[%s6295_s1 + $0x1d0] sm:$0xff] }
  0xc9   :  { %2674 = vmatpush1.bf16.msra.mxu1 %v2673_v42  ;;  %2800 = vmatprep.subr.bf16.mxu0 %v2799_v43  ;;  %v76_v42 = vld [vmem:[%s6295_s1 + $0x128] sm:$0xff]  ;;  %v2837_v43 = vpack.c.bf16 %v55_v33, %v45_v31  ;;  %v5013_v31 = vld [vmem:[%s6296_s0 + $0x98] sm:$0xff]  ;;  %v205_v14 = vld [vmem:[%s6295_s1 + $0x530] sm:$0xff] }
  0xca   :  { %2676 = vmatprep.subr.bf16.mxu1 %v2675_v18  ;;  %1291 = vmatprep.mubr.f32.mxu1 %v4776_v62  ;;  %v2819_v18 = vpack.c.bf16 %v714_v38, %v704_v20  ;;  %v2839_v48 = vpack.c.bf16 %v76_v42, %v66_v41  ;;  %v155_v20 = vld [vmem:[%s6295_s1 + $0x3a0] sm:$0xff]  ;;  %v784_v38 = vld [vmem:[%s6295_s1 + $0x1748] sm:$0xff]  ;;  %v58_v42 = vld [vmem:[%s6295_s1 + $0x98] sm:$0xff] }
  0xcb   :  { %v48_v41 = vld [vmem:[%s6295_s1 + $0x48] sm:$0xff] }
  0xcc   :  { %2802 = vmatpush1.bf16.msra.mxu0 %v2801_v54  ;;  %1292 = vmatmul.mubr.f32.gmra.mrb[14].mxu1 %v4797_v3  ;;  %v734_v54 = vld [vmem:[%s6295_s1 + $0x15b8] sm:$0xff]  ;;  %v2983_v50 = vpack.c.bf16 %v58_v42, %v48_v41  ;;  %v276_v42 = vld [vmem:[%s6295_s1 + $0x768] sm:$0xff] }
  0xcd   :  { %2678 = vmatpush1.bf16.msra.mxu1 %v2677_v56  ;;  %2804 = vmatprep.subr.bf16.mxu0 %v2803_v57  ;;  %v86_v56 = vld [vmem:[%s6295_s1 + $0x178] sm:$0xff]  ;;  %v96_v57 = vld [vmem:[%s6295_s1 + $0x1c8] sm:$0xff]  ;;  %v2823_v63 = vpack.c.bf16 %v734_v54, %v724_v36 }
  0xce   :  { %2680 = vmatprep.subr.bf16.mxu1 %v2679_v51  ;;  %1297 = vmatprep.mubr.f32.mxu1 %v4812_v10  ;;  %v95_v51 = vld [vmem:[%s6295_s1 + $0x1c0] sm:$0xff]  ;;  %v2843_v2 = vpack.c.bf16 %v96_v57, %v86_v56  ;;  %v186_v36 = vld [vmem:[%s6295_s1 + $0x498] sm:$0xff]  ;;  %v196_v54 = vld [vmem:[%s6295_s1 + $0x4e8] sm:$0xff] }
  0xcf   :  { %v2845_v8 = vpack.c.bf16 %v95_v51, %v85_v61  ;;  %v5081_v57 = vld [vmem:[%s6296_s0 + $0x8] sm:$0xff]  ;;  %v67_v61 = vld [vmem:[%s6295_s1 + $0xe0] sm:$0xff]  ;;  %v77_v51 = vld [vmem:[%s6295_s1 + $0x130] sm:$0xff] }
  0xd0   :  { %2806 = vmatpush1.bf16.msra.mxu0 %v2805_v4  ;;  %1298 = vmatmul.mubr.f32.gmra.mrb[16].mxu1 %v4827_v15  ;;  %v754_v4 = vld [vmem:[%s6295_s1 + $0x1658] sm:$0xff] }
  0xd1   :  { %2682 = vmatpush1.bf16.msra.mxu1 %v2681_v5  ;;  %2808 = vmatprep.subr.bf16.mxu0 %v2807_v6  ;;  %v106_v5 = vld [vmem:[%s6295_s1 + $0x218] sm:$0xff]  ;;  %v116_v6 = vld [vmem:[%s6295_s1 + $0x268] sm:$0xff] }
  0xd2   :  { %2684 = vmatprep.subr.bf16.mxu1 %v2683_v32  ;;  %1303 = vmatprep.mubr.f32.mxu1 %v4839_v55  ;;  %v2827_v32 = vpack.c.bf16 %v754_v4, %v744_v1  ;;  %v2847_v11 = vpack.c.bf16 %v116_v6, %v106_v5  ;;  %v98_v1 = vld [vmem:[%s6295_s1 + $0x1d8] sm:$0xff]  ;;  %v216_v5 = vld [vmem:[%s6295_s1 + $0x588] sm:$0xff]  ;;  %v2989_v6 = vpack.c.bf16 %v77_v51, %v67_v61  ;;  %v285_v61 = vld [vmem:[%s6295_s1 + $0x7b0] sm:$0xff] }
  0xd3   :  { %v206_v4 = vld [vmem:[%s6295_s1 + $0x538] sm:$0xff] }
  0xd4   :  { %2810 = vmatpush1.bf16.msra.mxu0 %v2809_v16  ;;  %1304 = vmatmul.mubr.f32.gmra.mrb[18].mxu1 %v4860_v28  ;;  %v4976_v16 = vld [vmem:[%s6296_s0 + $0x70] sm:$0xff]  ;;  %v266_v41 = vld [vmem:[%s6295_s1 + $0x718] sm:$0xff] }
  0xd5   :  { %2686 = vmatpush1.bf16.msra.mxu1 %v2685_v19  ;;  %2812 = vmatprep.subr.bf16.mxu0 %v2811_v21  ;;  %v774_v19 = vld [vmem:[%s6295_s1 + $0x16f8] sm:$0xff] }
  0xd6   :  { %1330 = vmatprep.subr.mxu1 %v782_v25  ;;  %1374 = vmatprep.mubr.f32.mxu1 %v3338_v39  ;;  %v126_v21 = vld [vmem:[%s6295_s1 + $0x2b8] sm:$0xff]  ;;  %v135_v25 = vld [vmem:[%s6295_s1 + $0x300] sm:$0xff] }
  0xd7   :  { %v2851_v26 = vpack.c.bf16 %v136_v22, %v126_v21  ;;  %v2853_v33 = vpack.c.bf16 %v135_v25, %v125_v60  ;;  %v235_v25 = vld [vmem:[%s6295_s1 + $0x620] sm:$0xff] }
  0xd8   :  { %2814 = vmatpush1.bf16.msra.mxu0 %v2813_v29  ;;  %v146_v29 = vld [vmem:[%s6295_s1 + $0x358] sm:$0xff] }
  0xd9   :  { %1331 = vmatpush1.msra.mxu1 %v781_v30  ;;  %2816 = vmatprep.subr.bf16.mxu0 %v2815_v34  ;;  %v156_v30 = vld [vmem:[%s6295_s1 + $0x3a8] sm:$0xff]  ;;  %v2833_v34 = vpack.c.bf16 %v773_v27, %v763_v24  ;;  %v225_v24 = vld [vmem:[%s6295_s1 + $0x5d0] sm:$0xff]  ;;  %v246_v27 = vld [vmem:[%s6295_s1 + $0x678] sm:$0xff] }
  0xda   :  { %2371 = vmatmul.mubr.msk.f32.vlgmr.msra.gmra.mrb[10].mxu1 %vm819_vm0, %v4909_v52  ;;  %2836 = vmatprep.subr.bf16.mxu1 %v2835_v37  ;;  %v2855_v35 = vpack.c.bf16 %v156_v30, %v146_v29  ;;  %v5035_v37 = vld [vmem:[%s6296_s0 + $0xc0] sm:$0xf]  ;;  %v256_v29 = vld [vmem:[%s6295_s1 + $0x6c8] sm:$0xff] }
  0xdb   :  { %1565 = vmatmul.mubr.f32.vlgmr.msra.gmra.mrb[10].mxu0 %v4725_v40  ;;  %2838 = vmatpush1.bf16.msra.mxu1 %v2837_v43  ;;  %v723_v40 = vld [vmem:[%s6295_s1 + $0x1560] sm:$0xff]  ;;  %v2857_v43 = vpack.c.bf16 %v155_v20, %v145_v7  ;;  %v245_v7 = vld [vmem:[%s6295_s1 + $0x670] sm:$0xff]  ;;  %v2875_v20 = vpack.c.bf16 %v256_v29, %v246_v27 }
  0xdc   :  { %2818 = vmatpush1.bf16.msra.mxu0 %v2817_v44  ;;  %1380 = vmatprep.mubr.f32.mxu1 %v3338_v39  ;;  %v57_v44 = vld [vmem:[%s6295_s1 + $0x90] sm:$0xff] }
  0xdd   :  { %2820 = vmatprep.subr.bf16.mxu0 %v2819_v18  ;;  %2840 = vmatprep.subr.bf16.mxu1 %v2839_v48  ;;  %v68_v18 = vld [vmem:[%s6295_s1 + $0xe8] sm:$0xff]  ;;  %v78_v48 = vld [vmem:[%s6295_s1 + $0x138] sm:$0xff] }
  0xde   :  { %2372 = vmatmul.mubr.msk.f32.gmra.mrb[12].mxu1 %vm819_vm0, %v4942_v17  ;;  %1570 = vmatprep.mubr.f32.mxu0 %v4740_v47  ;;  %v2825_v47 = vpack.c.bf16 %v733_v0, %v723_v40  ;;  %v195_v40 = vld [vmem:[%s6295_s1 + $0x4e0] sm:$0xff]  ;;  %v88_v0 = vld [vmem:[%s6295_s1 + $0x188] sm:$0xff] }
  0xdf   :  { %2842 = vmatpush1.bf16.msra.mxu1 %v2841_v58  ;;  %1571 = vmatmul.mubr.f32.gmra.mrb[12].mxu0 %v4761_v53  ;;  %v743_v53 = vld [vmem:[%s6295_s1 + $0x1600] sm:$0xff] }
  0xe0   :  { %2822 = vmatpush1.bf16.msra.mxu0 %v2821_v59  ;;  %1386 = vmatprep.mubr.f32.mxu1 %v3338_v39  ;;  %v2987_v59 = vpack.c.bf16 %v78_v48, %v68_v18  ;;  %v275_v18 = vld [vmem:[%s6295_s1 + $0x760] sm:$0xff]  ;;  %v168_v48 = vld [vmem:[%s6295_s1 + $0x408] sm:$0xff] }
  0xe1   :  { %2824 = vmatprep.subr.bf16.mxu0 %v2823_v63  ;;  %2844 = vmatprep.subr.bf16.mxu1 %v2843_v2  ;;  %v185_v63 = vld [vmem:[%s6295_s1 + $0x490] sm:$0xff]  ;;  %v2863_v2 = vpack.c.bf16 %v196_v54, %v186_v36  ;;  %v296_v36 = vld [vmem:[%s6295_s1 + $0x808] sm:$0xff] }
  0xe2   :  { %2373 = vmatmul.mubr.msk.f32.gmra.mrb[14].mxu1 %vm819_vm0, %v4976_v16  ;;  %1576 = vmatprep.mubr.f32.mxu0 %v4776_v62  ;;  %v2829_v62 = vpack.c.bf16 %v753_v12, %v743_v53  ;;  %v108_v53 = vld [vmem:[%s6295_s1 + $0x228] sm:$0xff]  ;;  %v118_v12 = vld [vmem:[%s6295_s1 + $0x278] sm:$0xff] }
  0xe3   :  { %2846 = vmatpush1.bf16.msra.mxu1 %v2845_v8  ;;  %1577 = vmatmul.mubr.f32.gmra.mrb[14].mxu0 %v4797_v3  ;;  %v2831_v3 = vpack.c.bf16 %v774_v19, %v764_v13  ;;  %v2865_v8 = vpack.c.bf16 %v195_v40, %v185_v63  ;;  %v226_v13 = vld [vmem:[%s6295_s1 + $0x5d8] sm:$0xff]  ;;  %v236_v19 = vld [vmem:[%s6295_s1 + $0x628] sm:$0xff] }
  0xe4   :  { %2826 = vmatpush1.bf16.msra.mxu0 %v2825_v47  ;;  %1392 = vmatprep.mubr.f32.mxu1 %v3338_v39  ;;  %v2991_v47 = vpack.c.bf16 %v98_v1, %v88_v0  ;;  %v2871_v60 = vpack.c.bf16 %v236_v19, %v226_v13  ;;  %v188_v63 = vld [vmem:[%s6295_s1 + $0x4a8] sm:$0xff]  ;;  %v306_v40 = vld [vmem:[%s6295_s1 + $0x858] sm:$0xff] }
  0xe5   :  { %2828 = vmatprep.subr.bf16.mxu0 %v2827_v32  ;;  %2848 = vmatprep.subr.bf16.mxu1 %v2847_v11  ;;  %v2867_v32 = vpack.c.bf16 %v216_v5, %v206_v4  ;;  %v215_v11 = vld [vmem:[%s6295_s1 + $0x580] sm:$0xff]  ;;  %v316_v0 = vld [vmem:[%s6295_s1 + $0x8a8] sm:$0xff] }
  0xe6   :  { %2374 = vmatmul.mubr.msk.f32.gmra.mrb[16].mxu1 %vm819_vm0, %v5013_v31  ;;  %1582 = vmatprep.mubr.f32.mxu0 %v4812_v10  ;;  %v166_v10 = vld [vmem:[%s6295_s1 + $0x3f8] sm:$0xff]  ;;  %v2869_v22 = vpack.c.bf16 %v215_v11, %v205_v14  ;;  %v208_v14 = vld [vmem:[%s6295_s1 + $0x548] sm:$0xff] }
  0xe7   :  { %2850 = vmatpush1.bf16.msra.mxu1 %v2849_v23  ;;  %1583 = vmatmul.mubr.f32.gmra.mrb[16].mxu0 %v4827_v15  ;;  %v176_v15 = vld [vmem:[%s6295_s1 + $0x448] sm:$0xff]  ;;  %v2995_v23 = vpack.c.bf16 %v118_v12, %v108_v53  ;;  %v326_v11 = vld [vmem:[%s6295_s1 + $0x8f8] sm:$0xff] }
  0xe8   :  { %2830 = vmatpush1.bf16.msra.mxu0 %v2829_v62  ;;  %1398 = vmatprep.mubr.f32.mxu1 %v3338_v39  ;;  %v2859_v46 = vpack.c.bf16 %v176_v15, %v166_v10  ;;  %v117_v62 = vld [vmem:[%s6295_s1 + $0x270] sm:$0xff]  ;;  %v255_v10 = vld [vmem:[%s6295_s1 + $0x6c0] sm:$0xff]  ;;  %v148_v15 = vld [vmem:[%s6295_s1 + $0x368] sm:$0xff] }
  0xe9   :  { %2832 = vmatprep.subr.bf16.mxu0 %v2831_v3  ;;  %2852 = vmatprep.subr.bf16.mxu1 %v2851_v26  ;;  %v128_v3 = vld [vmem:[%s6295_s1 + $0x2c8] sm:$0xff]  ;;  %v138_v26 = vld [vmem:[%s6295_s1 + $0x318] sm:$0xff] }
  0xea   :  { %2375 = vmatmul.mubr.msk.f32.gmra.mrb[18].mxu1 %vm819_vm0, %v5035_v37  ;;  %1588 = vmatprep.mubr.f32.mxu0 %v4839_v55  ;;  %v47_v55 = vld [vmem:[%s6295_s1 + $0x40] sm:$0xff]  ;;  %v336_v53 = vld [vmem:[%s6295_s1 + $0x948] sm:$0xff] }
  0xeb   :  { %2854 = vmatpush1.bf16.msra.mxu1 %v2853_v33  ;;  %1589 = vmatmul.mubr.f32.gmra.mrb[18].mxu0 %v4860_v28  ;;  %v175_v28 = vld [vmem:[%s6295_s1 + $0x440] sm:$0xff]  ;;  %v2985_v56 = vpack.c.bf16 %v57_v44, %v47_v55  ;;  %v2873_v33 = vpack.c.bf16 %v235_v25, %v225_v24  ;;  %v2877_v55 = vpack.c.bf16 %v255_v10, %v245_v7  ;;  %v228_v24 = vld [vmem:[%s6295_s1 + $0x5e8] sm:$0xff]  ;;  %v346_v25 = vld [vmem:[%s6295_s1 + $0x998] sm:$0xff] }
  0xec   :  { %2834 = vmatpush1.bf16.msra.mxu0 %v2833_v34  ;;  %2856 = vmatprep.subr.bf16.mxu1 %v2855_v35  ;;  %v2861_v58 = vpack.c.bf16 %v175_v28, %v165_v45  ;;  %v2999_v34 = vpack.c.bf16 %v138_v26, %v128_v3  ;;  %v137_v35 = vld [vmem:[%s6295_s1 + $0x310] sm:$0xff]  ;;  %v2879_v28 = vpack.c.bf16 %v276_v42, %v266_v41  ;;  %v356_v3 = vld [vmem:[%s6295_s1 + $0x9e8] sm:$0xff]  ;;  %v366_v10 = vld [vmem:[%s6295_s1 + $0xa38] sm:$0xff] }
  0xed   :  { %1615 = vmatprep.subr.mxu0 %v784_v38  ;;  %1659 = vmatprep.mubr.f32.mxu0 %v3338_v39  ;;  %v158_v38 = vld [vmem:[%s6295_s1 + $0x3b8] sm:$0xff]  ;;  %v157_v45 = vld [vmem:[%s6295_s1 + $0x3b0] sm:$0xff]  ;;  %v248_v7 = vld [vmem:[%s6295_s1 + $0x688] sm:$0xff] }
  0xee   :  { %1754 = vmatprep.mubr.f32.mxu1 %v5081_v57  ;;  %v3003_v44 = vpack.c.bf16 %v158_v38, %v148_v15  ;;  %v376_v15 = vld [vmem:[%s6295_s1 + $0xa88] sm:$0xff] }
  0xef   :  { %2858 = vmatpush1.bf16.msra.mxu1 %v2857_v43 }
  0xf0   :  { %1616 = vmatpush1.msra.mxu0 %v783_v49  ;;  %2860 = vmatprep.subr.bf16.mxu1 %v2859_v46  ;;  %v265_v46 = vld [vmem:[%s6295_s1 + $0x710] sm:$0xff]  ;;  %v178_v49 = vld [vmem:[%s6295_s1 + $0x458] sm:$0xff] }
  0xf1   :  { %2376 = vmatmul.mubr.msk.f32.vlgmr.msra.gmra.mrb[10].mxu0 %vm819_vm0, %v4909_v52  ;;  %2984 = vmatprep.subr.bf16.mxu0 %v2983_v50  ;;  %v87_v52 = vld [vmem:[%s6295_s1 + $0x180] sm:$0xff]  ;;  %v286_v50 = vld [vmem:[%s6295_s1 + $0x7b8] sm:$0xff] }
  0xf2   :  { %2986 = vmatpush1.bf16.msra.mxu0 %v2985_v56  ;;  %1665 = vmatprep.mubr.f32.mxu0 %v3338_v39  ;;  %v2993_v21 = vpack.c.bf16 %v97_v9, %v87_v52  ;;  %v2881_v56 = vpack.c.bf16 %v275_v18, %v265_v46  ;;  %v2883_v51 = vpack.c.bf16 %v296_v36, %v286_v50  ;;  %v315_v9 = vld [vmem:[%s6295_s1 + $0x8a0] sm:$0xff]  ;;  %v268_v46 = vld [vmem:[%s6295_s1 + $0x728] sm:$0xff]  ;;  %v386_v18 = vld [vmem:[%s6295_s1 + $0xad8] sm:$0xff] }
  0xf3   :  { %2862 = vmatpush1.bf16.msra.mxu1 %v2861_v58  ;;  %2988 = vmatprep.subr.bf16.mxu0 %v2987_v59  ;;  %v3007_v58 = vpack.c.bf16 %v178_v49, %v168_v48  ;;  %v177_v59 = vld [vmem:[%s6295_s1 + $0x450] sm:$0xff]  ;;  %v2887_v52 = vpack.c.bf16 %v316_v0, %v306_v40  ;;  %v396_v48 = vld [vmem:[%s6295_s1 + $0xb28] sm:$0xff]  ;;  %v5370_v0 = vld [vmem:[%s6296_s0] sm:$0xff] }
  0xf4   :  { %2864 = vmatprep.subr.bf16.mxu1 %v2863_v2  ;;  %v198_v2 = vld [vmem:[%s6295_s1 + $0x4f8] sm:$0xff]  ;;  %v416_v40 = vld [vmem:[%s6295_s1 + $0xbc8] sm:$0xff] }
  0xf5   :  { %2377 = vmatmul.mubr.msk.f32.gmra.mrb[12].mxu0 %vm819_vm0, %v4942_v17  ;;  %v107_v17 = vld [vmem:[%s6295_s1 + $0x220] sm:$0xff]  ;;  %v3011_v5 = vpack.c.bf16 %v198_v2, %v188_v63  ;;  %v298_v63 = vld [vmem:[%s6295_s1 + $0x818] sm:$0xff] }
  0xf6   :  { %2990 = vmatpush1.bf16.msra.mxu0 %v2989_v6  ;;  %1671 = vmatprep.mubr.f32.mxu0 %v3338_v39  ;;  %v2997_v30 = vpack.c.bf16 %v117_v62, %v107_v17  ;;  %v187_v6 = vld [vmem:[%s6295_s1 + $0x4a0] sm:$0xff]  ;;  %v2891_v17 = vpack.c.bf16 %v336_v53, %v326_v11  ;;  %v406_v2 = vld [vmem:[%s6295_s1 + $0xb78] sm:$0xff]  ;;  %v5394_v11 = vld [vmem:[%s6296_s0 + $0x30] sm:$0xff] }
  0xf7   :  { %2866 = vmatpush1.bf16.msra.mxu1 %v2865_v8  ;;  %2992 = vmatprep.subr.bf16.mxu0 %v2991_v47  ;;  %v197_v8 = vld [vmem:[%s6295_s1 + $0x4f0] sm:$0xff]  ;;  %v335_v62 = vld [vmem:[%s6295_s1 + $0x940] sm:$0xff]  ;;  %v426_v53 = vld [vmem:[%s6295_s1 + $0xc18] sm:$0xff] }
  0xf8   :  { %2868 = vmatprep.subr.bf16.mxu1 %v2867_v32  ;;  %v305_v47 = vld [vmem:[%s6295_s1 + $0x850] sm:$0xff]  ;;  %v218_v32 = vld [vmem:[%s6295_s1 + $0x598] sm:$0xff]  ;;  %v3013_v12 = vpack.c.bf16 %v197_v8, %v187_v6  ;;  %v287_v6 = vld [vmem:[%s6295_s1 + $0x7c0] sm:$0xff] }
  0xf9   :  { %2378 = vmatmul.mubr.msk.f32.gmra.mrb[14].mxu0 %vm819_vm0, %v4976_v16  ;;  %v127_v16 = vld [vmem:[%s6295_s1 + $0x2c0] sm:$0xff]  ;;  %v2889_v13 = vpack.c.bf16 %v315_v9, %v305_v47  ;;  %v3015_v19 = vpack.c.bf16 %v218_v32, %v208_v14  ;;  %v297_v8 = vld [vmem:[%s6295_s1 + $0x810] sm:$0xff]  ;;  %v308_v14 = vld [vmem:[%s6295_s1 + $0x868] sm:$0xff] }
  0xfa   :  { %2994 = vmatpush1.bf16.msra.mxu0 %v2993_v21  ;;  %1677 = vmatprep.mubr.f32.mxu0 %v3338_v39  ;;  %v3001_v43 = vpack.c.bf16 %v137_v35, %v127_v16  ;;  %v207_v21 = vld [vmem:[%s6295_s1 + $0x540] sm:$0xff]  ;;  %v2895_v16 = vpack.c.bf16 %v356_v3, %v346_v25  ;;  %v405_v47 = vld [vmem:[%s6295_s1 + $0xb70] sm:$0xff]  ;;  %v318_v32 = vld [vmem:[%s6295_s1 + $0x8b8] sm:$0xff] }
  0xfb   :  { %2870 = vmatpush1.bf16.msra.mxu1 %v2869_v22  ;;  %2996 = vmatprep.subr.bf16.mxu0 %v2995_v23  ;;  %v217_v22 = vld [vmem:[%s6295_s1 + $0x590] sm:$0xff]  ;;  %v355_v35 = vld [vmem:[%s6295_s1 + $0x9e0] sm:$0xff]  ;;  %v328_v3 = vld [vmem:[%s6295_s1 + $0x908] sm:$0xff] }
  0xfc   :  { %2872 = vmatprep.subr.bf16.mxu1 %v2871_v60  ;;  %v325_v23 = vld [vmem:[%s6295_s1 + $0x8f0] sm:$0xff]  ;;  %v238_v60 = vld [vmem:[%s6295_s1 + $0x638] sm:$0xff]  ;;  %v3017_v26 = vpack.c.bf16 %v217_v22, %v207_v21  ;;  %v415_v9 = vld [vmem:[%s6295_s1 + $0xbc0] sm:$0xff]  ;;  %v3035_v22 = vpack.c.bf16 %v318_v32, %v308_v14 }
  0xfd   :  { %2379 = vmatmul.mubr.msk.f32.gmra.mrb[16].mxu0 %vm819_vm0, %v5013_v31  ;;  %v147_v31 = vld [vmem:[%s6295_s1 + $0x360] sm:$0xff]  ;;  %v2893_v27 = vpack.c.bf16 %v335_v62, %v325_v23  ;;  %v3019_v29 = vpack.c.bf16 %v238_v60, %v228_v24  ;;  %v2909_v21 = vpack.c.bf16 %v415_v9, %v405_v47  ;;  %v425_v62 = vld [vmem:[%s6295_s1 + $0xc10] sm:$0xff] }
  0xfe   :  { %2998 = vmatpush1.bf16.msra.mxu0 %v2997_v30  ;;  %1683 = vmatprep.mubr.f32.mxu0 %v3338_v39  ;;  %v3005_v54 = vpack.c.bf16 %v157_v45, %v147_v31  ;;  %v227_v30 = vld [vmem:[%s6295_s1 + $0x5e0] sm:$0xff]  ;;  %v2899_v31 = vpack.c.bf16 %v376_v15, %v366_v10  ;;  %v337_v10 = vld [vmem:[%s6295_s1 + $0x950] sm:$0xff] }
  0xff   :  { %2874 = vmatpush1.bf16.msra.mxu1 %v2873_v33  ;;  %3000 = vmatprep.subr.bf16.mxu0 %v2999_v34  ;;  %v237_v33 = vld [vmem:[%s6295_s1 + $0x630] sm:$0xff]  ;;  %v375_v45 = vld [vmem:[%s6295_s1 + $0xa80] sm:$0xff] }
 0x100   :  { %2876 = vmatprep.subr.bf16.mxu1 %v2875_v20  ;;  %v345_v34 = vld [vmem:[%s6295_s1 + $0x990] sm:$0xff]  ;;  %v258_v20 = vld [vmem:[%s6295_s1 + $0x6d8] sm:$0xff]  ;;  %v3021_v38 = vpack.c.bf16 %v237_v33, %v227_v30  ;;  %v307_v23 = vld [vmem:[%s6295_s1 + $0x860] sm:$0xff] }
 0x101   :  { %2380 = vmatmul.mubr.msk.f32.gmra.mrb[18].mxu0 %vm819_vm0, %v5035_v37  ;;  %v167_v37 = vld [vmem:[%s6295_s1 + $0x400] sm:$0xff]  ;;  %v2897_v41 = vpack.c.bf16 %v355_v35, %v345_v34  ;;  %v3023_v42 = vpack.c.bf16 %v258_v20, %v248_v7  ;;  %v446_v30 = vld [vmem:[%s6295_s1 + $0xcb8] sm:$0xff]  ;;  %v456_v33 = vld [vmem:[%s6295_s1 + $0xd08] sm:$0xff] }
 0x102   :  { %3002 = vmatpush1.bf16.msra.mxu0 %v3001_v43  ;;  %2039 = vmatprep.mubr.f32.mxu0 %v5081_v57  ;;  %v295_v57 = vld [vmem:[%s6295_s1 + $0x800] sm:$0xff]  ;;  %v3009_v1 = vpack.c.bf16 %v177_v59, %v167_v37  ;;  %v385_v37 = vld [vmem:[%s6295_s1 + $0xad0] sm:$0xff] }
 0x103   :  { %2878 = vmatpush1.bf16.msra.mxu1 %v2877_v55  ;;  %3004 = vmatprep.subr.bf16.mxu0 %v3003_v44  ;;  %v2885_v4 = vpack.c.bf16 %v295_v57, %v285_v61  ;;  %v247_v43 = vld [vmem:[%s6295_s1 + $0x680] sm:$0xff]  ;;  %v257_v55 = vld [vmem:[%s6295_s1 + $0x6d0] sm:$0xff]  ;;  %v2903_v61 = vpack.c.bf16 %v396_v48, %v386_v18  ;;  %v288_v57 = vld [vmem:[%s6295_s1 + $0x7c8] sm:$0xff] }
 0x104   :  { %2880 = vmatprep.subr.bf16.mxu1 %v2879_v28  ;;  %v365_v44 = vld [vmem:[%s6295_s1 + $0xa30] sm:$0xff]  ;;  %v278_v28 = vld [vmem:[%s6295_s1 + $0x778] sm:$0xff]  ;;  %v3025_v49 = vpack.c.bf16 %v257_v55, %v247_v43  ;;  %v435_v25 = vld [vmem:[%s6295_s1 + $0xc60] sm:$0xff] }
 0x105   :  { %v2901_v36 = vpack.c.bf16 %v375_v45, %v365_v44  ;;  %v2913_v35 = vpack.c.bf16 %v435_v25, %v425_v62  ;;  %v327_v20 = vld [vmem:[%s6295_s1 + $0x900] sm:$0xff]  ;;  %v445_v15 = vld [vmem:[%s6295_s1 + $0xcb0] sm:$0xff]  ;;  %v358_v43 = vld [vmem:[%s6295_s1 + $0x9f8] sm:$0xff]  ;;  %v5563_v25 = vpop.permute.xlu1 %806 }
 0x106   :  { %3006 = vmatpush1.bf16.msra.mxu0 %v3005_v54  ;;  %v3027_v54 = vpack.c.bf16 %v278_v28, %v268_v46  ;;  %v5470_v55 = vld [vmem:[%s6296_s0 + $0x80] sm:$0xff]  ;;  %v466_v44 = vld [vmem:[%s6295_s1 + $0xd58] sm:$0xff]  ;;  %v3041_v45 = vpack.c.bf16 %v337_v10, %v327_v20  ;;  %v377_v47 = vld [vmem:[%s6295_s1 + $0xa90] sm:$0xff] }
 0x107   :  { %2882 = vmatpush1.bf16.msra.mxu1 %v2881_v56  ;;  %3008 = vmatprep.subr.bf16.mxu0 %v3007_v58  ;;  %v267_v56 = vld [vmem:[%s6295_s1 + $0x720] sm:$0xff]  ;;  %v277_v58 = vld [vmem:[%s6295_s1 + $0x770] sm:$0xff]  ;;  %v5482_v46 = vld [vmem:[%s6296_s0 + $0x78] sm:$0xff] }
 0x108   :  { %2884 = vmatprep.subr.bf16.mxu1 %v2883_v51  ;;  %v395_v51 = vld [vmem:[%s6295_s1 + $0xb20] sm:$0xff] }
 0x109   :  { %v347_v48 = vld [vmem:[%s6295_s1 + $0x9a0] sm:$0xff] }
 0x10a   :  { %3010 = vmatpush1.bf16.msra.mxu0 %v3009_v1  ;;  %v3029_v1 = vpack.c.bf16 %v277_v58, %v267_v56  ;;  %v5496_v56 = vpop.permute.xlu0 %796  ;;  %v495_v9 = vld [vmem:[%s6295_s1 + $0xe40] sm:$0xff] }
 0x10b   :  { %2886 = vmatpush1.bf16.msra.mxu1 %v2885_v4  ;;  %3012 = vmatprep.subr.bf16.mxu0 %v3011_v5  ;;  %v2905_v4 = vpack.c.bf16 %v395_v51, %v385_v37  ;;  %v3031_v5 = vpack.c.bf16 %v298_v63, %v288_v57  ;;  %v475_v37 = vld [vmem:[%s6295_s1 + $0xda0] sm:$0xff]  ;;  %v378_v51 = vld [vmem:[%s6295_s1 + $0xa98] sm:$0xff]  ;;  %v5512_v63 = vld [vmem:[%s6296_s0 + $0xa8] sm:$0xf] }
 0x10c   :  { %2888 = vmatprep.subr.bf16.mxu1 %v2887_v52  ;;  %v2907_v52 = vpack.c.bf16 %v416_v40, %v406_v2  ;;  %v486_v2 = vld [vmem:[%s6295_s1 + $0xdf8] sm:$0xff]  ;;  %v496_v40 = vld [vmem:[%s6295_s1 + $0xe48] sm:$0xff] }
 0x10d   :  { %v2923_v32 = vpack.c.bf16 %v496_v40, %v486_v2  ;;  %v5617_v2 = vpop.permute.xlu1 %811 }
 0x10e   :  { %3014 = vmatpush1.bf16.msra.mxu0 %v3013_v12  ;;  %v436_v12 = vld [vmem:[%s6295_s1 + $0xc68] sm:$0xff]  ;;  %v5539_v14 = vpop.permute.xlu0 %801 }
 0x10f   :  { %2890 = vmatpush1.bf16.msra.mxu1 %v2889_v13  ;;  %3016 = vmatprep.subr.bf16.mxu0 %v3015_v19  ;;  %v3033_v13 = vpack.c.bf16 %v297_v8, %v287_v6  ;;  %v5406_v19 = vld [vmem:[%s6296_s0 + $0x28] sm:$0xff]  ;;  %v2911_v60 = vpack.c.bf16 %v436_v12, %v426_v53  ;;  %v398_v12 = vld [vmem:[%s6295_s1 + $0xb38] sm:$0xff] }
 0x110   :  { %2892 = vmatprep.subr.bf16.mxu1 %v2891_v17  ;;  %v317_v17 = vld [vmem:[%s6295_s1 + $0x8b0] sm:$0xff]  ;;  %v388_v53 = vld [vmem:[%s6295_s1 + $0xae8] sm:$0xff] }
 0x111   :  { %v3037_v34 = vpack.c.bf16 %v317_v17, %v307_v23  ;;  %v516_v23 = vld [vmem:[%s6295_s1 + $0xee8] sm:$0xff] }
 0x112   :  { %3018 = vmatpush1.bf16.msra.mxu0 %v3017_v26  ;;  %v338_v26 = vld [vmem:[%s6295_s1 + $0x958] sm:$0xff] }
 0x113   :  { %2894 = vmatpush1.bf16.msra.mxu1 %v2893_v27  ;;  %3020 = vmatprep.subr.bf16.mxu0 %v3019_v29  ;;  %v5434_v29 = vld [vmem:[%s6296_s0 + $0x58] sm:$0xff]  ;;  %v3039_v7 = vpack.c.bf16 %v338_v26, %v328_v3 }
 0x114   :  { %2896 = vmatprep.subr.bf16.mxu1 %v2895_v16  ;;  %v5446_v16 = vld [vmem:[%s6296_s0 + $0x50] sm:$0xff] }
 0x116   :  { %3022 = vmatpush1.bf16.msra.mxu0 %v3021_v38  ;;  %v2915_v38 = vpack.c.bf16 %v456_v33, %v446_v30 }
 0x117   :  { %2898 = vmatpush1.bf16.msra.mxu1 %v2897_v41  ;;  %3024 = vmatprep.subr.bf16.mxu0 %v3023_v42  ;;  %v5339_v50 = vpop.f32.mrb[0].mxu1  ;;  %v455_v41 = vld [vmem:[%s6295_s1 + $0xd00] sm:$0xff]  ;;  %v348_v42 = vld [vmem:[%s6295_s1 + $0x9a8] sm:$0xff] }
 0x118   :  { %2900 = vmatprep.subr.bf16.mxu1 %v2899_v31  ;;  %v5350_v59 = vpop.f32.mrb[1].mxu1  ;;  %v476_v31 = vld [vmem:[%s6295_s1 + $0xda8] sm:$0xff]  ;;  %v2917_v28 = vpack.c.bf16 %v455_v41, %v445_v15  ;;  %v3043_v18 = vpack.c.bf16 %v358_v43, %v348_v42  ;;  %v526_v43 = vld [vmem:[%s6295_s1 + $0xf38] sm:$0xff] }
 0x119   :  { %v2919_v58 = vpack.c.bf16 %v476_v31, %v466_v44  ;;  %v904_v17 = vadd.f32 %v5350_v59, %v5496_v56  ;;  %v397_v59 = vld [vmem:[%s6295_s1 + $0xb30] sm:$0xff]  ;;  %v408_v15 = vld [vmem:[%s6295_s1 + $0xb88] sm:$0xff] }
 0x11a   :  { %3026 = vmatpush1.bf16.msra.mxu0 %v3025_v49  ;;  %1755 = vmatmul.mubr.f32.vlgmr.msra.gmra.mrb[20].mxu1 %v5370_v0  ;;  %v357_v49 = vld [vmem:[%s6295_s1 + $0x9f0] sm:$0xff] }
 0x11b   :  { %2902 = vmatpush1.bf16.msra.mxu1 %v2901_v36  ;;  %3028 = vmatprep.subr.bf16.mxu0 %v3027_v54  ;;  %v465_v36 = vld [vmem:[%s6295_s1 + $0xd50] sm:$0xff] }
 0x11c   :  { %2904 = vmatprep.subr.bf16.mxu1 %v2903_v61  ;;  %1760 = vmatprep.mubr.f32.mxu1 %v5394_v11  ;;  %v368_v61 = vld [vmem:[%s6295_s1 + $0xa48] sm:$0xff]  ;;  %v2921_v6 = vpack.c.bf16 %v475_v37, %v465_v36  ;;  %v417_v37 = vld [vmem:[%s6295_s1 + $0xbd0] sm:$0xff] }
 0x11d   :  { %v3047_v8 = vpack.c.bf16 %v378_v51, %v368_v61  ;;  %v535_v61 = vld [vmem:[%s6295_s1 + $0xf80] sm:$0xff] }
 0x11e   :  { %3030 = vmatpush1.bf16.msra.mxu0 %v3029_v1  ;;  %1761 = vmatmul.mubr.f32.gmra.mrb[22].mxu1 %v5406_v19  ;;  %v3045_v1 = vpack.c.bf16 %v357_v49, %v347_v48  ;;  %v407_v48 = vld [vmem:[%s6295_s1 + $0xb80] sm:$0xff] }
 0x11f   :  { %2906 = vmatpush1.bf16.msra.mxu1 %v2905_v4  ;;  %3032 = vmatprep.subr.bf16.mxu0 %v3031_v5  ;;  %v5418_v24 = vpop.f32.mrb[2].mxu1  ;;  %v367_v4 = vld [vmem:[%s6295_s1 + $0xa40] sm:$0xff] }
 0x120   :  { %2908 = vmatprep.subr.bf16.mxu1 %v2907_v52  ;;  %v5429_v27 = vpop.f32.mrb[3].mxu1  ;;  %1766 = vmatprep.mubr.f32.mxu1 %v5434_v29  ;;  %v5527_v5 = vld [vmem:[%s6296_s0 + $0xa0] sm:$0xf]  ;;  %v485_v52 = vld [vmem:[%s6295_s1 + $0xdf0] sm:$0xff]  ;;  %v908_v33 = vadd.f32 %v5418_v24, %v5539_v14 }
 0x121   :  { %v2925_v3 = vpack.c.bf16 %v495_v9, %v485_v52  ;;  %v910_v10 = vadd.f32 %v5429_v27, %v5539_v14  ;;  %v536_v27 = vld [vmem:[%s6295_s1 + $0xf88] sm:$0xff] }
 0x122   :  { %3034 = vmatpush1.bf16.msra.mxu0 %v3033_v13  ;;  %1767 = vmatmul.mubr.f32.gmra.mrb[24].mxu1 %v5446_v16  ;;  %v5550_v13 = vld [vmem:[%s6296_s0 + $0x18] sm:$0xff]  ;;  %v2931_v40 = vpack.c.bf16 %v536_v27, %v526_v43  ;;  %v457_v27 = vld [vmem:[%s6295_s1 + $0xd10] sm:$0xff] }
 0x123   :  { %2910 = vmatpush1.bf16.msra.mxu1 %v2909_v21  ;;  %3036 = vmatprep.subr.bf16.mxu0 %v3035_v22  ;;  %v902_v21 = vadd.f32 %v5339_v50, %v5496_v56  ;;  %v506_v22 = vld [vmem:[%s6295_s1 + $0xe98] sm:$0xff]  ;;  %v387_v50 = vld [vmem:[%s6295_s1 + $0xae0] sm:$0xff] }
 0x124   :  { %2912 = vmatprep.subr.bf16.mxu1 %v2911_v60  ;;  %1772 = vmatprep.mubr.f32.mxu1 %v5470_v55  ;;  %v3049_v60 = vpack.c.bf16 %v377_v47, %v367_v4  ;;  %v2927_v24 = vpack.c.bf16 %v516_v23, %v506_v22  ;;  %v438_v4 = vld [vmem:[%s6295_s1 + $0xc78] sm:$0xff] }
 0x125   :  { %v546_v47 = vld [vmem:[%s6295_s1 + $0xfd8] sm:$0xff] }
 0x126   :  { %3038 = vmatpush1.bf16.msra.mxu0 %v3037_v34  ;;  %1773 = vmatmul.mubr.f32.gmra.mrb[26].mxu1 %v5482_v46  ;;  %v3051_v34 = vpack.c.bf16 %v398_v12, %v388_v53 }
 0x127   :  { %2914 = vmatpush1.bf16.msra.mxu1 %v2913_v35  ;;  %3040 = vmatprep.subr.bf16.mxu0 %v3039_v7  ;;  %v5494_v54 = vpop.f32.mrb[4].mxu1  ;;  %v505_v35 = vld [vmem:[%s6295_s1 + $0xe90] sm:$0xff]  ;;  %v515_v7 = vld [vmem:[%s6295_s1 + $0xee0] sm:$0xff] }
 0x128   :  { %2916 = vmatprep.subr.bf16.mxu1 %v2915_v38  ;;  %v5507_v57 = vpop.f32.mrb[5].mxu1  ;;  %1778 = vmatprep.mubr.f32.mxu1 %v5512_v63  ;;  %v418_v38 = vld [vmem:[%s6295_s1 + $0xbd8] sm:$0xff]  ;;  %v914_v36 = vadd.f32 %v5494_v54, %v5563_v25 }
 0x129   :  { %v916_v51 = vadd.f32 %v5507_v57, %v5563_v25  ;;  %v556_v57 = vld [vmem:[%s6295_s1 + $0x1028] sm:$0xff] }
 0x12a   :  { %3042 = vmatpush1.bf16.msra.mxu0 %v3041_v45  ;;  %1779 = vmatmul.mubr.f32.gmra.mrb[28].mxu1 %v5527_v5  ;;  %v3053_v45 = vpack.c.bf16 %v397_v59, %v387_v50 }
 0x12b   :  { %2918 = vmatpush1.bf16.msra.mxu1 %v2917_v28  ;;  %3044 = vmatprep.subr.bf16.mxu0 %v3043_v18  ;;  %v2929_v28 = vpack.c.bf16 %v515_v7, %v505_v35  ;;  %v566_v35 = vld [vmem:[%s6295_s1 + $0x1078] sm:$0xff]  ;;  %v576_v7 = vld [vmem:[%s6295_s1 + $0x10c8] sm:$0xff] }
 0x12c   :  { %2920 = vmatprep.subr.bf16.mxu1 %v2919_v58  ;;  %1849 = vmatprep.mubr.f32.mxu1 %v5550_v13  ;;  %v3055_v58 = vpack.c.bf16 %v418_v38, %v408_v15 }
 0x12e   :  { %v1091_v62 = vpop.f32.mrb[0].mxu0  ;;  %3046 = vmatpush1.bf16.msra.mxu0 %v3045_v1  ;;  %v428_v1 = vld [vmem:[%s6295_s1 + $0xc28] sm:$0xff] }
 0x12f   :  { %v3144_v26 = vadd.f32 %v1091_v62, %v902_v21  ;;  %v1093_v30 = vpop.f32.mrb[1].mxu0  ;;  %2922 = vmatpush1.bf16.msra.mxu1 %v2921_v6  ;;  %3048 = vmatprep.subr.bf16.mxu0 %v3047_v8  ;;  %v427_v21 = vld [vmem:[%s6295_s1 + $0xc20] sm:$0xff]  ;;  %v437_v62 = vld [vmem:[%s6295_s1 + $0xc70] sm:$0xff] }
 0x130   :  { %v3146_v20 = vadd.f32 %v1093_v30, %v904_v17  ;;  %2924 = vmatprep.subr.bf16.mxu1 %v2923_v32  ;;  %v3057_v32 = vpack.c.bf16 %v417_v37, %v407_v48  ;;  %v3059_v17 = vpack.c.bf16 %v438_v4, %v428_v1  ;;  %v2935_v30 = vpack.c.bf16 %v556_v57, %v546_v47  ;;  %v478_v48 = vld [vmem:[%s6295_s1 + $0xdb8] sm:$0xff]  ;;  %v477_v1 = vld [vmem:[%s6295_s1 + $0xdb0] sm:$0xff]  ;;  %v488_v47 = vld [vmem:[%s6295_s1 + $0xe08] sm:$0xff] }
 0x131   :  { %v2260_v41 = vmax.f32 %v3144_v26, 0.0  ;;  %2040 = vmatmul.mubr.f32.vlgmr.msra.gmra.mrb[20].mxu0 %v5370_v0  ;;  %v919_v42 = vpop.f32.mrb[6].mxu1  ;;  %v5653_v26 = vpop.permute.xlu0 %816  ;;  %v498_v57 = vld [vmem:[%s6295_s1 + $0xe58] sm:$0xff] }
 0x132   :  { %v2261_v44 = vmax.f32 %v3146_v20, 0.0  ;;  %v1097_v31 = vpop.f32.mrb[2].mxu0  ;;  %3050 = vmatpush1.bf16.msra.mxu0 %v3049_v60  ;;  %v921_v18 = vpop.f32.mrb[7].mxu1  ;;  %2045 = vmatprep.mubr.f32.mxu0 %v5394_v11  ;;  %v525_v11 = vld [vmem:[%s6295_s1 + $0xf30] sm:$0xff] }
 0x133   :  { %2310 = vst [vmem:[%s6298_s3] sm:$0xff] %v2260_v41  ;;  %v3148_v0 = vadd.f32 %v1097_v31, %v908_v33  ;;  %v1099_v49 = vpop.f32.mrb[3].mxu0  ;;  %2926 = vmatpush1.bf16.msra.mxu1 %v2925_v3  ;;  %3052 = vmatprep.subr.bf16.mxu0 %v3051_v34  ;;  %v2933_v53 = vpack.c.bf16 %v535_v61, %v525_v11  ;;  %v545_v60 = vld [vmem:[%s6295_s1 + $0xfd0] sm:$0xff]  ;;  %v448_v33 = vld [vmem:[%s6295_s1 + $0xcc8] sm:$0xff]  ;;  %v458_v34 = vld [vmem:[%s6295_s1 + $0xd18] sm:$0xff] }
 0x134   :  { %2311 = vst [vmem:[%s6298_s3 + $0x8] sm:$0xff] %v2261_v44  ;;  %v3150_v54 = vadd.f32 %v1099_v49, %v910_v10  ;;  %2928 = vmatprep.subr.bf16.mxu1 %v2927_v24  ;;  %v922_v50 = vadd.f32 %v921_v18, %v5617_v2  ;;  %v3061_v24 = vpack.c.bf16 %v437_v62, %v427_v21  ;;  %v468_v18 = vld [vmem:[%s6295_s1 + $0xd68] sm:$0xff]  ;;  %v586_v49 = vld [vmem:[%s6295_s1 + $0x1118] sm:$0xff] }
 0x135   :  { %v2270_v6 = vmax.f32 %v3148_v0, 0.0  ;;  %v925_v8 = vpop.f32.mrb[8].mxu1  ;;  %2046 = vmatmul.mubr.f32.gmra.mrb[22].mxu0 %v5406_v19  ;;  %v920_v19 = vadd.f32 %v919_v42, %v5617_v2  ;;  %v3063_v43 = vpack.c.bf16 %v458_v34, %v448_v33  ;;  %v508_v62 = vld [vmem:[%s6295_s1 + $0xea8] sm:$0xff]  ;;  %v507_v34 = vld [vmem:[%s6295_s1 + $0xea0] sm:$0xff] }
 0x136   :  { %v2271_v52 = vmax.f32 %v3150_v54, 0.0  ;;  %v1103_v9 = vpop.f32.mrb[4].mxu0  ;;  %3054 = vmatpush1.bf16.msra.mxu0 %v3053_v45  ;;  %v927_v12 = vpop.f32.mrb[9].mxu1  ;;  %2051 = vmatprep.mubr.f32.mxu0 %v5434_v29  ;;  %v555_v29 = vld [vmem:[%s6295_s1 + $0x1020] sm:$0xff]  ;;  %v926_v42 = vadd.f32 %v925_v8, %v5653_v26  ;;  %v2939_v45 = vpack.c.bf16 %v576_v7, %v566_v35  ;;  %v625_v35 = vld [vmem:[%s6295_s1 + $0x1250] sm:$0xff] }
 0x137   :  { %2321 = vst [vmem:[%s6298_s3 + $0x50] sm:$0xff] %v2270_v6  ;;  %v3152_v22 = vadd.f32 %v1103_v9, %v914_v36  ;;  %v1105_v23 = vpop.f32.mrb[5].mxu0  ;;  %2930 = vmatpush1.bf16.msra.mxu1 %v2929_v28  ;;  %3056 = vmatprep.subr.bf16.mxu0 %v3055_v58  ;;  %v2937_v15 = vpack.c.bf16 %v555_v29, %v545_v60  ;;  %v575_v28 = vld [vmem:[%s6295_s1 + $0x10c0] sm:$0xff]  ;;  %v596_v36 = vld [vmem:[%s6295_s1 + $0x1168] sm:$0xff]  ;;  %v606_v9 = vld [vmem:[%s6295_s1 + $0x11b8] sm:$0xff] }
 0x138   :  { %2322 = vst [vmem:[%s6298_s3 + $0x58] sm:$0xff] %v2271_v52  ;;  %v3154_v3 = vadd.f32 %v1105_v23, %v916_v51  ;;  %2932 = vmatprep.subr.bf16.mxu1 %v2931_v40  ;;  %v928_v31 = vadd.f32 %v927_v12, %v5653_v26  ;;  %v3067_v40 = vpack.c.bf16 %v478_v48, %v468_v18  ;;  %v595_v8 = vld [vmem:[%s6295_s1 + $0x1160] sm:$0xff]  ;;  %v518_v60 = vld [vmem:[%s6295_s1 + $0xef8] sm:$0xff]  ;;  %v676_v48 = vld [vmem:[%s6295_s1 + $0x13e8] sm:$0xff] }
 0x139   :  { %v2280_v59 = vmax.f32 %v3152_v22, 0.0  ;;  %2052 = vmatmul.mubr.f32.gmra.mrb[24].mxu0 %v5446_v16  ;;  %v447_v16 = vld [vmem:[%s6295_s1 + $0xcc0] sm:$0xff]  ;;  %v2943_v6 = vpack.c.bf16 %v596_v36, %v586_v49  ;;  %v3071_v22 = vpack.c.bf16 %v498_v57, %v488_v47  ;;  %v626_v29 = vld [vmem:[%s6295_s1 + $0x1258] sm:$0xff]  ;;  %v3075_v33 = vpack.c.bf16 %v518_v60, %v508_v62  ;;  %v577_v47 = vld [vmem:[%s6295_s1 + $0x10d0] sm:$0xff] }
 0x13a   :  { %v2281_v20 = vmax.f32 %v3154_v3, 0.0  ;;  %v1109_v10 = vpop.f32.mrb[6].mxu0  ;;  %3058 = vmatpush1.bf16.msra.mxu0 %v3057_v32  ;;  %2057 = vmatprep.mubr.f32.mxu0 %v5470_v55  ;;  %v565_v55 = vld [vmem:[%s6295_s1 + $0x1070] sm:$0xff]  ;;  %v3065_v11 = vpack.c.bf16 %v457_v27, %v447_v16  ;;  %v616_v32 = vld [vmem:[%s6295_s1 + $0x1208] sm:$0xff]  ;;  %v487_v23 = vld [vmem:[%s6295_s1 + $0xe00] sm:$0xff] }
 0x13b   :  { %2331 = vst [vmem:[%s6298_s3 + $0xa0] sm:$0xff] %v2280_v59  ;;  %v3156_v38 = vadd.f32 %v1109_v10, %v920_v19  ;;  %v1111_v41 = vpop.f32.mrb[7].mxu0  ;;  %2934 = vmatpush1.bf16.msra.mxu1 %v2933_v53  ;;  %3060 = vmatprep.subr.bf16.mxu0 %v3059_v17  ;;  %v2941_v51 = vpack.c.bf16 %v575_v28, %v565_v55  ;;  %v615_v17 = vld [vmem:[%s6295_s1 + $0x1200] sm:$0xff]  ;;  %v636_v3 = vld [vmem:[%s6295_s1 + $0x12a8] sm:$0xff]  ;;  %v517_v59 = vld [vmem:[%s6295_s1 + $0xef0] sm:$0xff] }
 0x13c   :  { %2332 = vst [vmem:[%s6298_s3 + $0xa8] sm:$0xff] %v2281_v20  ;;  %v3158_v44 = vadd.f32 %v1111_v41, %v922_v50  ;;  %2936 = vmatprep.subr.bf16.mxu1 %v2935_v30  ;;  %v2947_v19 = vpack.c.bf16 %v616_v32, %v606_v9  ;;  %v2951_v7 = vpack.c.bf16 %v636_v3, %v626_v29  ;;  %v635_v20 = vld [vmem:[%s6295_s1 + $0x12a0] sm:$0xff]  ;;  %v528_v10 = vld [vmem:[%s6295_s1 + $0xf48] sm:$0xff]  ;;  %v537_v27 = vld [vmem:[%s6295_s1 + $0xf90] sm:$0xff] }
 0x13d   :  { %v2290_v0 = vmax.f32 %v3156_v38, 0.0  ;;  %2058 = vmatmul.mubr.f32.gmra.mrb[26].mxu0 %v5482_v46  ;;  %v467_v46 = vld [vmem:[%s6295_s1 + $0xd60] sm:$0xff]  ;;  %v656_v38 = vld [vmem:[%s6295_s1 + $0x1348] sm:$0xff]  ;;  %v3077_v41 = vpack.c.bf16 %v517_v59, %v507_v34  ;;  %v645_v55 = vld [vmem:[%s6295_s1 + $0x12f0] sm:$0xff] }
 0x13e   :  { %v2291_v58 = vmax.f32 %v3158_v44, 0.0  ;;  %v1115_v37 = vpop.f32.mrb[8].mxu0  ;;  %3062 = vmatpush1.bf16.msra.mxu0 %v3061_v24  ;;  %2063 = vmatprep.mubr.f32.mxu0 %v5512_v63  ;;  %v585_v63 = vld [vmem:[%s6295_s1 + $0x1110] sm:$0xff]  ;;  %v3069_v12 = vpack.c.bf16 %v477_v1, %v467_v46  ;;  %v538_v24 = vld [vmem:[%s6295_s1 + $0xf98] sm:$0xff]  ;;  %v527_v16 = vld [vmem:[%s6295_s1 + $0xf40] sm:$0xff] }
 0x13f   :  { %2341 = vst [vmem:[%s6298_s3 + $0xf0] sm:$0xff] %v2290_v0  ;;  %v3160_v61 = vadd.f32 %v1115_v37, %v926_v42  ;;  %v1117_v54 = vpop.f32.mrb[9].mxu0  ;;  %2938 = vmatpush1.bf16.msra.mxu1 %v2937_v15  ;;  %3064 = vmatprep.subr.bf16.mxu0 %v3063_v43  ;;  %v2945_v21 = vpack.c.bf16 %v595_v8, %v585_v63  ;;  %v646_v15 = vld [vmem:[%s6295_s1 + $0x12f8] sm:$0xff]  ;;  %v557_v37 = vld [vmem:[%s6295_s1 + $0x1030] sm:$0xff]  ;;  %v696_v1 = vld [vmem:[%s6295_s1 + $0x1488] sm:$0xff] }
 0x140   :  { %2342 = vst [vmem:[%s6298_s3 + $0xf8] sm:$0xff] %v2291_v58  ;;  %v3162_v4 = vadd.f32 %v1117_v54, %v928_v31  ;;  %2940 = vmatprep.subr.bf16.mxu1 %v2939_v45  ;;  %v2953_v42 = vpack.c.bf16 %v635_v20, %v625_v35  ;;  %v3079_v43 = vpack.c.bf16 %v538_v24, %v528_v10  ;;  %v655_v31 = vld [vmem:[%s6295_s1 + $0x1340] sm:$0xff]  ;;  %v548_v45 = vld [vmem:[%s6295_s1 + $0xfe8] sm:$0xff]  ;;  %v558_v28 = vld [vmem:[%s6295_s1 + $0x1038] sm:$0xff] }
 0x141   :  { %v2300_v52 = vmax.f32 %v3160_v61, 0.0  ;;  %2064 = vmatmul.mubr.f32.gmra.mrb[28].mxu0 %v5527_v5  ;;  %v497_v5 = vld [vmem:[%s6295_s1 + $0xe50] sm:$0xff]  ;;  %v2955_v44 = vpack.c.bf16 %v656_v38, %v646_v15  ;;  %v666_v18 = vld [vmem:[%s6295_s1 + $0x1398] sm:$0xff]  ;;  %v3081_v0 = vpack.c.bf16 %v537_v27, %v527_v16  ;;  %v2957_v49 = vpack.c.bf16 %v655_v31, %v645_v55  ;;  %v547_v58 = vld [vmem:[%s6295_s1 + $0xfe0] sm:$0xff] }
 0x142   :  { %v2301_v53 = vmax.f32 %v3162_v4, 0.0  ;;  %3066 = vmatpush1.bf16.msra.mxu0 %v3065_v11  ;;  %2134 = vmatprep.mubr.f32.mxu0 %v5550_v13  ;;  %v605_v13 = vld [vmem:[%s6295_s1 + $0x11b0] sm:$0xff]  ;;  %v3073_v50 = vpack.c.bf16 %v497_v5, %v487_v23  ;;  %v3083_v36 = vpack.c.bf16 %v558_v28, %v548_v45  ;;  %v2959_v61 = vpack.c.bf16 %v676_v48, %v666_v18  ;;  %v675_v54 = vld [vmem:[%s6295_s1 + $0x13e0] sm:$0xff]  ;;  %v686_v46 = vld [vmem:[%s6295_s1 + $0x1438] sm:$0xff] }
 0x143   :  { %2351 = vst [vmem:[%s6298_s3 + $0x140] sm:$0xf] %v2300_v52  ;;  %2942 = vmatpush1.bf16.msra.mxu1 %v2941_v51  ;;  %3068 = vmatprep.subr.bf16.mxu0 %v3067_v40  ;;  %v2949_v30 = vpack.c.bf16 %v615_v17, %v605_v13  ;;  %v665_v11 = vld [vmem:[%s6295_s1 + $0x1390] sm:$0xff]  ;;  %v568_v51 = vld [vmem:[%s6295_s1 + $0x1088] sm:$0xff]  ;;  %v578_v40 = vld [vmem:[%s6295_s1 + $0x10d8] sm:$0xff]  ;;  %v3085_v63 = vpack.c.bf16 %v557_v37, %v547_v58 }
 0x144   :  { %2352 = vst [vmem:[%s6298_s3 + $0x148] sm:$0xf] %v2301_v53  ;;  %2944 = vmatprep.subr.bf16.mxu1 %v2943_v6  ;;  %v2961_v4 = vpack.c.bf16 %v675_v54, %v665_v11  ;;  %v3087_v6 = vpack.c.bf16 %v578_v40, %v568_v51  ;;  %v567_v8 = vld [vmem:[%s6295_s1 + $0x1080] sm:$0xff]  ;;  %v685_v57 = vld [vmem:[%s6295_s1 + $0x1430] sm:$0xff]  ;;  %v2963_v52 = vpack.c.bf16 %v696_v1, %v686_v46  ;;  %v588_v32 = vld [vmem:[%s6295_s1 + $0x1128] sm:$0xff] }
 0x145   :  { %v695_v9 = vld [vmem:[%s6295_s1 + $0x1480] sm:$0xff]  ;;  %v598_v53 = vld [vmem:[%s6295_s1 + $0x1178] sm:$0xff]  ;;  %v705_v17 = vld [vmem:[%s6295_s1 + $0x14d0] sm:$0xff] }
 0x146   :  { %3070 = vmatpush1.bf16.msra.mxu0 %v3069_v12  ;;  %v706_v12 = vld [vmem:[%s6295_s1 + $0x14d8] sm:$0xff]  ;;  %v2965_v23 = vpack.c.bf16 %v695_v9, %v685_v57  ;;  %v3091_v5 = vpack.c.bf16 %v598_v53, %v588_v32  ;;  %v587_v13 = vld [vmem:[%s6295_s1 + $0x1120] sm:$0xff]  ;;  %v608_v29 = vld [vmem:[%s6295_s1 + $0x11c8] sm:$0xff] }
 0x147   :  { %2946 = vmatpush1.bf16.msra.mxu1 %v2945_v21  ;;  %3072 = vmatprep.subr.bf16.mxu0 %v3071_v22  ;;  %v716_v21 = vld [vmem:[%s6295_s1 + $0x1528] sm:$0xff]  ;;  %v3089_v22 = vpack.c.bf16 %v577_v47, %v567_v8  ;;  %v715_v60 = vld [vmem:[%s6295_s1 + $0x1520] sm:$0xff]  ;;  %v618_v3 = vld [vmem:[%s6295_s1 + $0x1218] sm:$0xff] }
 0x148   :  { %2948 = vmatprep.subr.bf16.mxu1 %v2947_v19  ;;  %v597_v19 = vld [vmem:[%s6295_s1 + $0x1170] sm:$0xff]  ;;  %v2967_v62 = vpack.c.bf16 %v716_v21, %v706_v12  ;;  %v2969_v59 = vpack.c.bf16 %v715_v60, %v705_v17  ;;  %v3095_v35 = vpack.c.bf16 %v618_v3, %v608_v29  ;;  %v5903_v24 = vld [vmem:[%s6296_s0 + $0x40] sm:$0xff]  ;;  %v756_v16 = vld [vmem:[%s6295_s1 + $0x1668] sm:$0xff] }
 0x149   :  { %v3093_v34 = vpack.c.bf16 %v597_v19, %v587_v13  ;;  %v617_v20 = vld [vmem:[%s6295_s1 + $0x1210] sm:$0xff]  ;;  %v735_v38 = vld [vmem:[%s6295_s1 + $0x15c0] sm:$0xff]  ;;  %v5924_v27 = vld [vmem:[%s6296_s0 + $0x38] sm:$0xff] }
 0x14a   :  { %3074 = vmatpush1.bf16.msra.mxu0 %v3073_v50  ;;  %v726_v50 = vld [vmem:[%s6295_s1 + $0x1578] sm:$0xff]  ;;  %v725_v10 = vld [vmem:[%s6295_s1 + $0x1570] sm:$0xff]  ;;  %v627_v45 = vld [vmem:[%s6295_s1 + $0x1260] sm:$0xff] }
 0x14b   :  { %2950 = vmatpush1.bf16.msra.mxu1 %v2949_v30  ;;  %3076 = vmatprep.subr.bf16.mxu0 %v3075_v33  ;;  %v736_v30 = vld [vmem:[%s6295_s1 + $0x15c8] sm:$0xff]  ;;  %v5888_v33 = vld [vmem:[%s6296_s0 + $0x10] sm:$0xff]  ;;  %v658_v58 = vld [vmem:[%s6295_s1 + $0x1358] sm:$0xff] }
 0x14c   :  { %2952 = vmatprep.subr.bf16.mxu1 %v2951_v7  ;;  %v607_v7 = vld [vmem:[%s6295_s1 + $0x11c0] sm:$0xff]  ;;  %v2971_v15 = vpack.c.bf16 %v736_v30, %v726_v50  ;;  %v637_v28 = vld [vmem:[%s6295_s1 + $0x12b0] sm:$0xff]  ;;  %v5939_v48 = vld [vmem:[%s6296_s0 + $0x68] sm:$0xff] }
 0x14d   :  { %v3097_v55 = vpack.c.bf16 %v617_v20, %v607_v7  ;;  %v745_v18 = vld [vmem:[%s6295_s1 + $0x1610] sm:$0xff]  ;;  %v766_v37 = vld [vmem:[%s6295_s1 + $0x16b8] sm:$0xff]  ;;  %v776_v11 = vld [vmem:[%s6295_s1 + $0x1708] sm:$0xff]  ;;  %v3101_v54 = vpack.c.bf16 %v637_v28, %v627_v45 }
 0x14e   :  { %3078 = vmatpush1.bf16.msra.mxu0 %v3077_v41  ;;  %v628_v41 = vld [vmem:[%s6295_s1 + $0x1268] sm:$0xff]  ;;  %v647_v46 = vld [vmem:[%s6295_s1 + $0x1300] sm:$0xff]  ;;  %v657_v1 = vld [vmem:[%s6295_s1 + $0x1350] sm:$0xff] }
 0x14f   :  { %2954 = vmatpush1.bf16.msra.mxu1 %v2953_v42  ;;  %3080 = vmatprep.subr.bf16.mxu0 %v3079_v43  ;;  %v638_v42 = vld [vmem:[%s6295_s1 + $0x12b8] sm:$0xff]  ;;  %v775_v8 = vld [vmem:[%s6295_s1 + $0x1700] sm:$0xff]  ;;  %v668_v47 = vld [vmem:[%s6295_s1 + $0x13a8] sm:$0xff]  ;;  %v3105_v9 = vpack.c.bf16 %v657_v1, %v647_v46 }
 0x150   :  { %2956 = vmatprep.subr.bf16.mxu1 %v2955_v44  ;;  %v746_v43 = vld [vmem:[%s6295_s1 + $0x1618] sm:$0xff]  ;;  %v2973_v44 = vpack.c.bf16 %v735_v38, %v725_v10  ;;  %v3099_v31 = vpack.c.bf16 %v638_v42, %v628_v41  ;;  %v667_v12 = vld [vmem:[%s6295_s1 + $0x13a0] sm:$0xff]  ;;  %v677_v21 = vld [vmem:[%s6295_s1 + $0x13f0] sm:$0xff] }
 0x151   :  { %v678_v57 = vld [vmem:[%s6295_s1 + $0x13f8] sm:$0xff]  ;;  %v6017_v19 = vld [vmem:[%s6296_s0 + $0xb0] sm:$0xf]  ;;  %v3109_v17 = vpack.c.bf16 %v677_v21, %v667_v12  ;;  %v708_v50 = vld [vmem:[%s6295_s1 + $0x14e8] sm:$0xff] }
 0x152   :  { %3082 = vmatpush1.bf16.msra.mxu0 %v3081_v0  ;;  %v2975_v0 = vpack.c.bf16 %v756_v16, %v746_v43  ;;  %v3107_v53 = vpack.c.bf16 %v678_v57, %v668_v47  ;;  %v786_v13 = vld [vmem:[%s6295_s1 + $0x1758] sm:$0xff]  ;;  %v697_v60 = vld [vmem:[%s6295_s1 + $0x1490] sm:$0xff]  ;;  %v6045_v20 = vld [vmem:[%s6296_s0 + $0x20] sm:$0xff] }
 0x153   :  { %2958 = vmatpush1.bf16.msra.mxu1 %v2957_v49  ;;  %3084 = vmatprep.subr.bf16.mxu0 %v3083_v36  ;;  %v755_v49 = vld [vmem:[%s6295_s1 + $0x1660] sm:$0xff]  ;;  %v648_v36 = vld [vmem:[%s6295_s1 + $0x1308] sm:$0xff]  ;;  %v785_v3 = vld [vmem:[%s6295_s1 + $0x1750] sm:$0xff] }
 0x154   :  { %2960 = vmatprep.subr.bf16.mxu1 %v2959_v61  ;;  %v5960_v61 = vld [vmem:[%s6296_s0 + $0x60] sm:$0xff]  ;;  %v2977_v51 = vpack.c.bf16 %v755_v49, %v745_v18  ;;  %v3103_v40 = vpack.c.bf16 %v658_v58, %v648_v36  ;;  %v718_v30 = vld [vmem:[%s6295_s1 + $0x1538] sm:$0xff]  ;;  %v728_v10 = vld [vmem:[%s6295_s1 + $0x1588] sm:$0xff] }
 0x155   :  { %v3115_v7 = vpack.c.bf16 %v718_v30, %v708_v50  ;;  %v727_v41 = vld [vmem:[%s6295_s1 + $0x1580] sm:$0xff]  ;;  %v737_v42 = vld [vmem:[%s6295_s1 + $0x15d0] sm:$0xff]  ;;  %v748_v16 = vld [vmem:[%s6295_s1 + $0x1628] sm:$0xff] }
 0x156   :  { %3086 = vmatpush1.bf16.msra.mxu0 %v3085_v63  ;;  %v765_v63 = vld [vmem:[%s6295_s1 + $0x16b0] sm:$0xff]  ;;  %v768_v28 = vld [vmem:[%s6295_s1 + $0x16c8] sm:$0xff]  ;;  %v778_v18 = vld [vmem:[%s6295_s1 + $0x1718] sm:$0xff] }
 0x157   :  { %2962 = vmatpush1.bf16.msra.mxu1 %v2961_v4  ;;  %3088 = vmatprep.subr.bf16.mxu0 %v3087_v6  ;;  %v5975_v4 = vld [vmem:[%s6296_s0 + $0x90] sm:$0xff]  ;;  %v2979_v6 = vpack.c.bf16 %v776_v11, %v766_v37  ;;  %v2981_v32 = vpack.c.bf16 %v775_v8, %v765_v63  ;;  %v3127_v36 = vpack.c.bf16 %v778_v18, %v768_v28  ;;  %v3335_v58 = vld [vmem:[%s6296_s0 + $0x98] sm:$0xff]  ;;  %v788_v11 = vld [vmem:[%s6295_s1 + $0x1768] sm:$0xff] }
 0x158   :  { %2964 = vmatprep.subr.bf16.mxu1 %v2963_v52  ;;  %v5990_v52 = vld [vmem:[%s6296_s0 + $0x88] sm:$0xff]  ;;  %v777_v49 = vld [vmem:[%s6295_s1 + $0x1710] sm:$0xff] }
 0x15a   :  { %3090 = vmatpush1.bf16.msra.mxu0 %v3089_v22  ;;  %1850 = vmatmul.mubr.f32.vlgmr.msra.gmra.mrb[20].mxu1 %v5888_v33  ;;  %v6002_v22 = vld [vmem:[%s6296_s0 + $0xb8] sm:$0xf] }
 0x15b   :  { %2966 = vmatpush1.bf16.msra.mxu1 %v2965_v23  ;;  %3092 = vmatprep.subr.bf16.mxu0 %v3091_v5  ;;  %v688_v23 = vld [vmem:[%s6295_s1 + $0x1448] sm:$0xff]  ;;  %v698_v5 = vld [vmem:[%s6295_s1 + $0x1498] sm:$0xff] }
 0x15c   :  { %2968 = vmatprep.subr.bf16.mxu1 %v2967_v62  ;;  %1855 = vmatprep.mubr.f32.mxu1 %v5903_v24  ;;  %v687_v62 = vld [vmem:[%s6295_s1 + $0x1440] sm:$0xff]  ;;  %v3111_v29 = vpack.c.bf16 %v698_v5, %v688_v23 }
 0x15e   :  { %3094 = vmatpush1.bf16.msra.mxu0 %v3093_v34  ;;  %1856 = vmatmul.mubr.f32.gmra.mrb[22].mxu1 %v5924_v27  ;;  %v3113_v34 = vpack.c.bf16 %v697_v60, %v687_v62 }
 0x15f   :  { %2970 = vmatpush1.bf16.msra.mxu1 %v2969_v59  ;;  %3096 = vmatprep.subr.bf16.mxu0 %v3095_v35  ;;  %v707_v59 = vld [vmem:[%s6295_s1 + $0x14e0] sm:$0xff]  ;;  %v717_v35 = vld [vmem:[%s6295_s1 + $0x1530] sm:$0xff] }
 0x160   :  { %2972 = vmatprep.subr.bf16.mxu1 %v2971_v15  ;;  %1861 = vmatprep.mubr.f32.mxu1 %v5939_v48  ;;  %v738_v15 = vld [vmem:[%s6295_s1 + $0x15d8] sm:$0xff]  ;;  %v3117_v38 = vpack.c.bf16 %v717_v35, %v707_v59 }
 0x161   :  { %v3119_v43 = vpack.c.bf16 %v738_v15, %v728_v10 }
 0x162   :  { %3098 = vmatpush1.bf16.msra.mxu0 %v3097_v55  ;;  %1862 = vmatmul.mubr.f32.gmra.mrb[24].mxu1 %v5960_v61  ;;  %v758_v55 = vld [vmem:[%s6295_s1 + $0x1678] sm:$0xff] }
 0x163   :  { %2974 = vmatpush1.bf16.msra.mxu1 %v2973_v44  ;;  %3100 = vmatprep.subr.bf16.mxu0 %v3099_v31  ;;  %v747_v44 = vld [vmem:[%s6295_s1 + $0x1620] sm:$0xff]  ;;  %v757_v31 = vld [vmem:[%s6295_s1 + $0x1670] sm:$0xff]  ;;  %v3123_v45 = vpack.c.bf16 %v758_v55, %v748_v16 }
 0x164   :  { %2976 = vmatprep.subr.bf16.mxu1 %v2975_v0  ;;  %1867 = vmatprep.mubr.f32.mxu1 %v5975_v4  ;;  %v767_v0 = vld [vmem:[%s6295_s1 + $0x16c0] sm:$0xff] }
 0x165   :  { %v3129_v37 = vpack.c.bf16 %v777_v49, %v767_v0 }
 0x166   :  { %3102 = vmatpush1.bf16.msra.mxu0 %v3101_v54  ;;  %1868 = vmatmul.mubr.f32.gmra.mrb[26].mxu1 %v5990_v52  ;;  %v787_v54 = vld [vmem:[%s6295_s1 + $0x1760] sm:$0xff] }
 0x167   :  { %2978 = vmatpush1.bf16.msra.mxu1 %v2977_v51  ;;  %3104 = vmatprep.subr.bf16.mxu0 %v3103_v40 }
 0x168   :  { %2980 = vmatprep.subr.bf16.mxu1 %v2979_v6  ;;  %1873 = vmatprep.mubr.f32.mxu1 %v6002_v22 }
 0x16a   :  { %3106 = vmatpush1.bf16.msra.mxu0 %v3105_v9  ;;  %1874 = vmatmul.mubr.f32.gmra.mrb[28].mxu1 %v6017_v19 }
 0x16b   :  { %2982 = vmatpush1.bf16.msra.mxu1 %v2981_v32  ;;  %3108 = vmatprep.subr.bf16.mxu0 %v3107_v53 }
 0x16c   :  { %1900 = vmatprep.subr.mxu1 %v786_v13  ;;  %1944 = vmatprep.mubr.f32.mxu1 %v3338_v39 }
 0x16e   :  { %3110 = vmatpush1.bf16.msra.mxu0 %v3109_v17 }
 0x16f   :  { %1901 = vmatpush1.msra.mxu1 %v785_v3  ;;  %3112 = vmatprep.subr.bf16.mxu0 %v3111_v29 }
 0x170   :  { %2381 = vmatmul.mubr.msk.f32.vlgmr.msra.gmra.mrb[20].mxu1 %vm819_vm0, %v6045_v20  ;;  %3131 = vmatprep.subr.bf16.mxu1 %v3111_v29 }
 0x171   :  { %2135 = vmatmul.mubr.f32.vlgmr.msra.gmra.mrb[20].mxu0 %v5888_v33  ;;  %3137 = vmatpush1.bf16.msra.mxu1 %v3113_v34  ;;  %v3333_v33 = vld [vmem:[%s6296_s0 + $0x48] sm:$0xff] }
 0x172   :  { %3114 = vmatpush1.bf16.msra.mxu0 %v3113_v34  ;;  %1950 = vmatprep.mubr.f32.mxu1 %v3338_v39 }
 0x173   :  { %2140 = vmatprep.mubr.f32.mxu0 %v5903_v24  ;;  %3116 = vmatprep.subr.bf16.mxu0 %v3115_v7  ;;  %v3121_v24 = vpack.c.bf16 %v737_v42, %v727_v41 }
 0x174   :  { %2382 = vmatmul.mubr.msk.f32.gmra.mrb[22].mxu1 %vm819_vm0, %v3333_v33  ;;  %3132 = vmatprep.subr.bf16.mxu1 %v3115_v7 }
 0x175   :  { %2141 = vmatmul.mubr.f32.gmra.mrb[22].mxu0 %v5924_v27  ;;  %3138 = vmatpush1.bf16.msra.mxu1 %v3117_v38  ;;  %v3334_v27 = vld [vmem:[%s6296_s0 + $0x70] sm:$0xff] }
 0x176   :  { %3118 = vmatpush1.bf16.msra.mxu0 %v3117_v38  ;;  %1956 = vmatprep.mubr.f32.mxu1 %v3338_v39 }
 0x177   :  { %2146 = vmatprep.mubr.f32.mxu0 %v5939_v48  ;;  %3120 = vmatprep.subr.bf16.mxu0 %v3119_v43  ;;  %v3125_v48 = vpack.c.bf16 %v757_v31, %v747_v44 }
 0x178   :  { %2383 = vmatmul.mubr.msk.f32.gmra.mrb[24].mxu1 %vm819_vm0, %v3334_v27  ;;  %3133 = vmatprep.subr.bf16.mxu1 %v3119_v43 }
 0x179   :  { %2147 = vmatmul.mubr.f32.gmra.mrb[24].mxu0 %v5960_v61  ;;  %3139 = vmatpush1.bf16.msra.mxu1 %v3121_v24  ;;  %v3336_v61 = vld [vmem:[%s6296_s0 + $0xc0] sm:$0xf] }
 0x17a   :  { %3122 = vmatpush1.bf16.msra.mxu0 %v3121_v24  ;;  %1962 = vmatprep.mubr.f32.mxu1 %v3338_v39 }
 0x17b   :  { %2152 = vmatprep.mubr.f32.mxu0 %v5975_v4  ;;  %3124 = vmatprep.subr.bf16.mxu0 %v3123_v45 }
 0x17c   :  { %2384 = vmatmul.mubr.msk.f32.gmra.mrb[26].mxu1 %vm819_vm0, %v3335_v58  ;;  %3134 = vmatprep.subr.bf16.mxu1 %v3123_v45 }
 0x17d   :  { %2153 = vmatmul.mubr.f32.gmra.mrb[26].mxu0 %v5990_v52  ;;  %3140 = vmatpush1.bf16.msra.mxu1 %v3125_v48 }
 0x17e   :  { %3126 = vmatpush1.bf16.msra.mxu0 %v3125_v48  ;;  %1968 = vmatprep.mubr.f32.mxu1 %v3338_v39 }
 0x17f   :  { %2158 = vmatprep.mubr.f32.mxu0 %v6002_v22  ;;  %3128 = vmatprep.subr.bf16.mxu0 %v3127_v36 }
 0x180   :  { %2385 = vmatmul.mubr.msk.f32.gmra.mrb[28].mxu1 %vm819_vm0, %v3336_v61  ;;  %3135 = vmatprep.subr.bf16.mxu1 %v3127_v36 }
 0x181   :  { %2159 = vmatmul.mubr.f32.gmra.mrb[28].mxu0 %v6017_v19  ;;  %3141 = vmatpush1.bf16.msra.mxu1 %v3129_v37 }
 0x182   :  { %3130 = vmatpush1.bf16.msra.mxu0 %v3129_v37  ;;  %3136 = vmatprep.subr.mxu1 %v788_v11 }
 0x183   :  { %2185 = vmatprep.subr.mxu0 %v788_v11  ;;  %2229 = vmatprep.mubr.f32.mxu0 %v3338_v39 }
 0x184   :  { %2247 = vmatprep.mubr.f32.mxu1 %v3338_v39 }
 0x185   :  { %3142 = vmatpush1.msra.mxu1 %v787_v54 }
 0x186   :  { %2186 = vmatpush1.msra.mxu0 %v787_v54  ;;  %2389 = vmatmul.mubr.msk.f32.vlgmr.msra.gmra.mrb[30].mxu1 %vm819_vm0, %v3335_v58 }
 0x187   :  { %2386 = vmatmul.mubr.msk.f32.vlgmr.msra.gmra.mrb[20].mxu0 %vm819_vm0, %v6045_v20  ;;  %2253 = vmatprep.mubr.f32.mxu1 %v3338_v39 }
 0x188   :  { %2235 = vmatprep.mubr.f32.mxu0 %v3338_v39 }
 0x18a   :  { %2390 = vmatmul.mubr.msk.f32.gmra.mrb[32].mxu1 %vm819_vm0, %v3336_v61 }
 0x18b   :  { %2387 = vmatmul.mubr.msk.f32.gmra.mrb[22].mxu0 %vm819_vm0, %v3333_v33 }
 0x18c   :  { %2241 = vmatprep.mubr.f32.mxu0 %v3338_v39 }
 0x18f   :  { %2388 = vmatmul.mubr.msk.f32.gmra.mrb[24].mxu0 %vm819_vm0, %v3334_v27 }
 0x1ad   :  { %v1376_v51 = vpop.f32.mrb[10].mxu1 }
 0x1ae   :  { %v3163_v40 = vadd.f32 %v1376_v51, %v5496_v56  ;;  %v1378_v46 = vpop.f32.mrb[11].mxu1 }
 0x1af   :  { %v3164_v1 = vadd.f32 %v1378_v46, %v5496_v56 }
 0x1b0   :  { %v2262_v63 = vmax.f32 %v3163_v40, 0.0 }
 0x1b1   :  { %v2263_v4 = vmax.f32 %v3164_v1, 0.0  ;;  %v1382_v6 = vpop.f32.mrb[12].mxu1 }
 0x1b2   :  { %2312 = vst [vmem:[%s6298_s3 + $0x10] sm:$0xff] %v2262_v63  ;;  %v3165_v8 = vadd.f32 %v1382_v6, %v5539_v14  ;;  %v1384_v47 = vpop.f32.mrb[13].mxu1 }
 0x1b3   :  { %2313 = vst [vmem:[%s6298_s3 + $0x18] sm:$0xff] %v2263_v4  ;;  %v3166_v39 = vadd.f32 %v1384_v47, %v5539_v14 }
 0x1b4   :  { %v2272_v57 = vmax.f32 %v3165_v8, 0.0 }
 0x1b5   :  { %v2273_v52 = vmax.f32 %v3166_v39, 0.0  ;;  %v1388_v9 = vpop.f32.mrb[14].mxu1 }
 0x1b6   :  { %2323 = vst [vmem:[%s6298_s3 + $0x60] sm:$0xff] %v2272_v57  ;;  %v3167_v32 = vadd.f32 %v1388_v9, %v5563_v25  ;;  %v1390_v53 = vpop.f32.mrb[15].mxu1 }
 0x1b7   :  { %2324 = vst [vmem:[%s6298_s3 + $0x68] sm:$0xff] %v2273_v52  ;;  %v3168_v12 = vadd.f32 %v1390_v53, %v5563_v25 }
 0x1b8   :  { %v2282_v21 = vmax.f32 %v3167_v32, 0.0 }
 0x1b9   :  { %v2283_v22 = vmax.f32 %v3168_v12, 0.0  ;;  %v1394_v23 = vpop.f32.mrb[16].mxu1 }
 0x1ba   :  { %2333 = vst [vmem:[%s6298_s3 + $0xb0] sm:$0xff] %v2282_v21  ;;  %v3169_v5 = vadd.f32 %v1394_v23, %v5617_v2  ;;  %v1396_v13 = vpop.f32.mrb[17].mxu1 }
 0x1bb   :  { %2334 = vst [vmem:[%s6298_s3 + $0xb8] sm:$0xff] %v2283_v22  ;;  %v3170_v19 = vadd.f32 %v1396_v13, %v5617_v2 }
 0x1bc   :  { %v2292_v17 = vmax.f32 %v3169_v5, 0.0 }
 0x1bd   :  { %v2293_v62 = vmax.f32 %v3170_v19, 0.0  ;;  %v1400_v60 = vpop.f32.mrb[18].mxu1 }
 0x1be   :  { %2343 = vst [vmem:[%s6298_s3 + $0x100] sm:$0xff] %v2292_v17  ;;  %v3171_v29 = vadd.f32 %v1400_v60, %v5653_v26  ;;  %v1402_v3 = vpop.f32.mrb[19].mxu1 }
 0x1bf   :  { %2344 = vst [vmem:[%s6298_s3 + $0x108] sm:$0xff] %v2293_v62  ;;  %v3172_v50 = vadd.f32 %v1402_v3, %v5653_v26 }
 0x1c0   :  { %v2302_v30 = vmax.f32 %v3171_v29, 0.0 }
 0x1c1   :  { %v2303_v34 = vmax.f32 %v3172_v50, 0.0 }
 0x1c2   :  { %2353 = vst [vmem:[%s6298_s3 + $0x150] sm:$0xf] %v2302_v30 }
 0x1c3   :  { %2354 = vst [vmem:[%s6298_s3 + $0x158] sm:$0xf] %v2303_v34 }
 0x1c4   :  { %v1661_v59 = vpop.f32.mrb[10].mxu0 }
 0x1c5   :  { %v3173_v35 = vadd.f32 %v1661_v59, %v5496_v56  ;;  %v1663_v7 = vpop.f32.mrb[11].mxu0 }
 0x1c6   :  { %v3174_v20 = vadd.f32 %v1663_v7, %v5496_v56 }
 0x1c7   :  { %v2264_v10 = vmax.f32 %v3173_v35, 0.0 }
 0x1c8   :  { %v2265_v15 = vmax.f32 %v3174_v20, 0.0  ;;  %v1667_v38 = vpop.f32.mrb[12].mxu0 }
 0x1c9   :  { %2314 = vst [vmem:[%s6298_s3 + $0x20] sm:$0xff] %v2264_v10  ;;  %v3175_v41 = vadd.f32 %v1667_v38, %v5539_v14  ;;  %v1669_v42 = vpop.f32.mrb[13].mxu0 }
 0x1ca   :  { %2315 = vst [vmem:[%s6298_s3 + $0x28] sm:$0xff] %v2265_v15  ;;  %v3176_v43 = vadd.f32 %v1669_v42, %v5539_v14 }
 0x1cb   :  { %v2274_v33 = vmax.f32 %v3175_v41, 0.0 }
 0x1cc   :  { %v2275_v16 = vmax.f32 %v3176_v43, 0.0  ;;  %v1673_v55 = vpop.f32.mrb[14].mxu0 }
 0x1cd   :  { %2325 = vst [vmem:[%s6298_s3 + $0x70] sm:$0xff] %v2274_v33  ;;  %v3177_v24 = vadd.f32 %v1673_v55, %v5563_v25  ;;  %v1675_v44 = vpop.f32.mrb[15].mxu0 }
 0x1ce   :  { %2326 = vst [vmem:[%s6298_s3 + $0x78] sm:$0xff] %v2275_v16  ;;  %v3178_v31 = vadd.f32 %v1675_v44, %v5563_v25 }
 0x1cf   :  { %v2284_v45 = vmax.f32 %v3177_v24, 0.0 }
 0x1d0   :  { %v2285_v27 = vmax.f32 %v3178_v31, 0.0  ;;  %v1679_v28 = vpop.f32.mrb[16].mxu0 }
 0x1d1   :  { %2335 = vst [vmem:[%s6298_s3 + $0xc0] sm:$0xff] %v2284_v45  ;;  %v3179_v18 = vadd.f32 %v1679_v28, %v5617_v2  ;;  %v1681_v48 = vpop.f32.mrb[17].mxu0 }
 0x1d2   :  { %2336 = vst [vmem:[%s6298_s3 + $0xc8] sm:$0xff] %v2285_v27  ;;  %v3180_v0 = vadd.f32 %v1681_v48, %v5617_v2 }
 0x1d3   :  { %v2294_v49 = vmax.f32 %v3179_v18, 0.0 }
 0x1d4   :  { %v2295_v36 = vmax.f32 %v3180_v0, 0.0  ;;  %v1685_v58 = vpop.f32.mrb[18].mxu0 }
 0x1d5   :  { %2345 = vst [vmem:[%s6298_s3 + $0x110] sm:$0xff] %v2294_v49  ;;  %v3181_v37 = vadd.f32 %v1685_v58, %v5653_v26  ;;  %v1687_v11 = vpop.f32.mrb[19].mxu0 }
 0x1d6   :  { %2346 = vst [vmem:[%s6298_s3 + $0x118] sm:$0xff] %v2295_v36  ;;  %v3182_v61 = vadd.f32 %v1687_v11, %v5653_v26 }
 0x1d7   :  { %v2304_v54 = vmax.f32 %v3181_v37, 0.0 }
 0x1d8   :  { %v2305_v51 = vmax.f32 %v3182_v61, 0.0 }
 0x1d9   :  { %2355 = vst [vmem:[%s6298_s3 + $0x160] sm:$0xf] %v2304_v54 }
 0x1da   :  { %2356 = vst [vmem:[%s6298_s3 + $0x168] sm:$0xf] %v2305_v51 }
 0x243   :  { %v1946_v40 = vpop.f32.mrb[20].mxu1 }
 0x244   :  { %v3183_v46 = vadd.f32 %v1946_v40, %v5496_v56  ;;  %v1948_v1 = vpop.f32.mrb[21].mxu1 }
 0x245   :  { %v3184_v63 = vadd.f32 %v1948_v1, %v5496_v56 }
 0x246   :  { %v2266_v4 = vmax.f32 %v3183_v46, 0.0 }
 0x247   :  { %v2267_v6 = vmax.f32 %v3184_v63, 0.0  ;;  %v1952_v8 = vpop.f32.mrb[22].mxu1 }
 0x248   :  { %2316 = vst [vmem:[%s6298_s3 + $0x30] sm:$0xff] %v2266_v4  ;;  %v3185_v47 = vadd.f32 %v1952_v8, %v5539_v14  ;;  %v1954_v39 = vpop.f32.mrb[23].mxu1 }
 0x249   :  { %2317 = vst [vmem:[%s6298_s3 + $0x38] sm:$0xff] %v2267_v6  ;;  %v3186_v57 = vadd.f32 %v1954_v39, %v5539_v14 }
 0x24a   :  { %v2276_v52 = vmax.f32 %v3185_v47, 0.0 }
 0x24b   :  { %v2277_v9 = vmax.f32 %v3186_v57, 0.0  ;;  %v1958_v32 = vpop.f32.mrb[24].mxu1 }
 0x24c   :  { %2327 = vst [vmem:[%s6298_s3 + $0x80] sm:$0xff] %v2276_v52  ;;  %v3187_v53 = vadd.f32 %v1958_v32, %v5563_v25  ;;  %v1960_v12 = vpop.f32.mrb[25].mxu1 }
 0x24d   :  { %2328 = vst [vmem:[%s6298_s3 + $0x88] sm:$0xff] %v2277_v9  ;;  %v3188_v21 = vadd.f32 %v1960_v12, %v5563_v25 }
 0x24e   :  { %v2286_v22 = vmax.f32 %v3187_v53, 0.0 }
 0x24f   :  { %v2287_v23 = vmax.f32 %v3188_v21, 0.0  ;;  %v1964_v5 = vpop.f32.mrb[26].mxu1 }
 0x250   :  { %2337 = vst [vmem:[%s6298_s3 + $0xd0] sm:$0xff] %v2286_v22  ;;  %v3189_v13 = vadd.f32 %v1964_v5, %v5617_v2  ;;  %v2154_v19 = vpop.f32.mrb[26].mxu0  ;;  %v1966_v17 = vpop.f32.mrb[27].mxu1 }
 0x251   :  { %2338 = vst [vmem:[%s6298_s3 + $0xd8] sm:$0xff] %v2287_v23  ;;  %v3190_v62 = vadd.f32 %v1966_v17, %v5617_v2  ;;  %v2156_v60 = vpop.f32.mrb[27].mxu0  ;;  %v3199_v15 = vadd.f32 %v2154_v19, %v5617_v2 }
 0x252   :  { %v2296_v29 = vmax.f32 %v3189_v13, 0.0  ;;  %v3201_v38 = vadd.f32 %v2156_v60, %v5617_v2 }
 0x253   :  { %v2297_v3 = vmax.f32 %v3190_v62, 0.0  ;;  %v1970_v50 = vpop.f32.mrb[28].mxu1 }
 0x254   :  { %2347 = vst [vmem:[%s6298_s3 + $0x120] sm:$0xff] %v2296_v29  ;;  %v3191_v30 = vadd.f32 %v1970_v50, %v5653_v26  ;;  %v2160_v34 = vpop.f32.mrb[28].mxu0  ;;  %v1972_v59 = vpop.f32.mrb[29].mxu1 }
 0x255   :  { %2348 = vst [vmem:[%s6298_s3 + $0x128] sm:$0xff] %v2297_v3  ;;  %v3192_v35 = vadd.f32 %v1972_v59, %v5653_v26  ;;  %v2162_v7 = vpop.f32.mrb[29].mxu0  ;;  %v3203_v44 = vadd.f32 %v2160_v34, %v5653_v26 }
 0x256   :  { %v2306_v20 = vmax.f32 %v3191_v30, 0.0  ;;  %v3205_v2 = vadd.f32 %v2162_v7, %v5653_v26 }
 0x257   :  { %v2307_v10 = vmax.f32 %v3192_v35, 0.0 }
 0x258   :  { %2357 = vst [vmem:[%s6298_s3 + $0x170] sm:$0xf] %v2306_v20 }
 0x259   :  { %2358 = vst [vmem:[%s6298_s3 + $0x178] sm:$0xf] %v2307_v10  ;;  %v2249_v41 = vpop.f32.mrb[30].mxu1 }
 0x25a   :  { %v2231_v42 = vpop.f32.mrb[20].mxu0  ;;  %v3200_v43 = vadd.f32 %v3199_v15, %v2249_v41  ;;  %v2251_v33 = vpop.f32.mrb[31].mxu1 }
 0x25b   :  { %v3193_v16 = vadd.f32 %v2231_v42, %v5496_v56  ;;  %v2233_v55 = vpop.f32.mrb[21].mxu0  ;;  %v3202_v24 = vadd.f32 %v3201_v38, %v2251_v33 }
 0x25c   :  { %v2298_v31 = vmax.f32 %v3200_v43, 0.0  ;;  %v3194_v45 = vadd.f32 %v2233_v55, %v5496_v56 }
 0x25d   :  { %v2268_v27 = vmax.f32 %v3193_v16, 0.0  ;;  %v2299_v28 = vmax.f32 %v3202_v24, 0.0  ;;  %v2255_v18 = vpop.f32.mrb[32].mxu1 }
 0x25e   :  { %2349 = vst [vmem:[%s6298_s3 + $0x130] sm:$0xff] %v2298_v31  ;;  %v2269_v48 = vmax.f32 %v3194_v45, 0.0  ;;  %v2237_v0 = vpop.f32.mrb[22].mxu0  ;;  %v3204_v49 = vadd.f32 %v3203_v44, %v2255_v18  ;;  %v2257_v36 = vpop.f32.mrb[33].mxu1 }
 0x25f   :  { %2318 = vst [vmem:[%s6298_s3 + $0x40] sm:$0xff] %v2268_v27  ;;  %2350 = vst.msk [vmem:[%s6298_s3 + $0x138] sm:$0xff] %vm2319_vm1, %v2299_v28  ;;  %v3195_v56 = vadd.f32 %v2237_v0, %v5539_v14  ;;  %v2239_v26 = vpop.f32.mrb[23].mxu0  ;;  %v3206_v58 = vadd.f32 %v3205_v2, %v2257_v36 }
 0x260   :  { %2320 = vst.msk [vmem:[%s6298_s3 + $0x48] sm:$0xff] %vm2319_vm1, %v2269_v48  ;;  %v2308_v37 = vmax.f32 %v3204_v49, 0.0  ;;  %v3196_v11 = vadd.f32 %v2239_v26, %v5539_v14 }
 0x261   :  { %v2278_v61 = vmax.f32 %v3195_v56, 0.0  ;;  %v2309_v54 = vmax.f32 %v3206_v58, 0.0 }
 0x262   :  { %2359 = vst [vmem:[%s6298_s3 + $0x180] sm:$0xf] %v2308_v37  ;;  %v2279_v51 = vmax.f32 %v3196_v11, 0.0  ;;  %v2243_v40 = vpop.f32.mrb[24].mxu0 }
 0x263   :  { %2329 = vst [vmem:[%s6298_s3 + $0x90] sm:$0xff] %v2278_v61  ;;  %2361 = vst.msk [vmem:[%s6298_s3 + $0x188] sm:$0xf] %vm2360_vm2, %v2309_v54  ;;  %v3197_v46 = vadd.f32 %v2243_v40, %v5563_v25  ;;  %v2245_v14 = vpop.f32.mrb[25].mxu0 }
 0x264   :  { %2330 = vst.msk [vmem:[%s6298_s3 + $0x98] sm:$0xff] %vm2319_vm1, %v2279_v51  ;;  %v3198_v1 = vadd.f32 %v2245_v14, %v5563_v25 }
 0x265   :  { %v2288_v63 = vmax.f32 %v3197_v46, 0.0 }
 0x266   :  { %v2289_v4 = vmax.f32 %v3198_v1, 0.0 }
 0x267   :  { %2339 = vst [vmem:[%s6298_s3 + $0xe0] sm:$0xff] %v2288_v63 }
 0x268   :  { %2340 = vst.msk [vmem:[%s6298_s3 + $0xe8] sm:$0xff] %vm2319_vm1, %v2289_v4 }

// kernel: deepknight_forward_pallas.8
= control target key start
LH: loop header
LB: loop body
LE: loop exit
PB: predicated region body
PF: predicated region fallthrough
CT: control target
= control target key end

     0   :  { %v916_v3 = vmov 0.0   ;;  %v917_v4 = vmov 0   ;;  %vm210_vm0 = vcmask 1043456   ;;  %vm191_vm1 = vcmask 556032   ;;  %s1503_s1 = inlined_call_operand.vmem [shape: f32[324,280], index: 1, kind: input, shape index: {}]   ;;  %s1504_s0 = inlined_call_operand.vmem [shape: f32[48,324], index: 0, kind: input, shape index: {}]   ;;  %s1505_s2 = inlined_call_operand.vmem [shape: f32[48,1], index: 2, kind: input, shape index: {}]   ;;  %s1506_s3 = inlined_call_operand.vmem [shape: f32[48,280], index: 3, kind: output, shape index: {}]  }
   0x1   :  { %v33_v0 = vld [vmem:[%s1503_s1 + $0x8] sm:$0xff]  ;;  %v36_v1 = vld [vmem:[%s1503_s1 + $0x20] sm:$0xff]  ;;  %385 = vmatprep.mubr.f32.mxu1 %v916_v3  ;;  %914 = vset.pattern.permute.xlu0 %v917_v4  ;;  %v35_v8 = vld [vmem:[%s1503_s1 + $0x18] sm:$0xff]  ;;  %vm632_vm2 = vcmask 195584  }
   0x2   :  { %v129_v2 = vld [vmem:[%s1503_s1 + $0x308] sm:$0xff]  ;;  %v760_v5 = vpack.c.bf16 %v36_v1, %v33_v0  ;;  %v132_v6 = vld [vmem:[%s1503_s1 + $0x320] sm:$0xff]  ;;  %915 = vset.pattern.permute.xlu1 %v917_v4  ;;  %v131_v12 = vld [vmem:[%s1503_s1 + $0x318] sm:$0xff] }
   0x3   :  { %v32_v7 = vld [vmem:[%s1503_s1] sm:$0xff]  ;;  %v824_v9 = vpack.c.bf16 %v132_v6, %v129_v2  ;;  %v39_v13 = vld [vmem:[%s1503_s1 + $0x38] sm:$0xff]  ;;  %v42_v15 = vld [vmem:[%s1503_s1 + $0x50] sm:$0xff] }
   0x4   :  { %v762_v10 = vpack.c.bf16 %v35_v8, %v32_v7  ;;  %v128_v11 = vld [vmem:[%s1503_s1 + $0x300] sm:$0xff]  ;;  %761 = vmatprep.subr.bf16.mxu0 %v760_v5  ;;  %v135_v16 = vld [vmem:[%s1503_s1 + $0x338] sm:$0xff]  ;;  %v138_v17 = vld [vmem:[%s1503_s1 + $0x350] sm:$0xff]  ;;  %v764_v18 = vpack.c.bf16 %v42_v15, %v39_v13 }
   0x5   :  { %v826_v14 = vpack.c.bf16 %v131_v12, %v128_v11  ;;  %825 = vmatprep.subr.bf16.mxu1 %v824_v9  ;;  %v828_v19 = vpack.c.bf16 %v138_v17, %v135_v16  ;;  %v38_v20 = vld [vmem:[%s1503_s1 + $0x30] sm:$0xff]  ;;  %v41_v21 = vld [vmem:[%s1503_s1 + $0x48] sm:$0xff]  ;;  %v48_v26 = vld [vmem:[%s1503_s1 + $0x80] sm:$0xff] }
   0x6   :  { %763 = vmatpush1.bf16.msra.mxu0 %v762_v10  ;;  %v134_v22 = vld [vmem:[%s1503_s1 + $0x330] sm:$0xff]  ;;  %v766_v23 = vpack.c.bf16 %v41_v21, %v38_v20  ;;  %v137_v24 = vld [vmem:[%s1503_s1 + $0x348] sm:$0xff]  ;;  %v144_v30 = vld [vmem:[%s1503_s1 + $0x380] sm:$0xff] }
   0x7   :  { %827 = vmatpush1.bf16.msra.mxu1 %v826_v14  ;;  %v45_v25 = vld [vmem:[%s1503_s1 + $0x68] sm:$0xff]  ;;  %765 = vmatprep.subr.bf16.mxu0 %v764_v18  ;;  %v830_v27 = vpack.c.bf16 %v137_v24, %v134_v22  ;;  %v44_v31 = vld [vmem:[%s1503_s1 + $0x60] sm:$0xff]  ;;  %v47_v33 = vld [vmem:[%s1503_s1 + $0x78] sm:$0xff] }
   0x8   :  { %829 = vmatprep.subr.bf16.mxu1 %v828_v19  ;;  %v768_v28 = vpack.c.bf16 %v48_v26, %v45_v25  ;;  %v141_v29 = vld [vmem:[%s1503_s1 + $0x368] sm:$0xff]  ;;  %v140_v34 = vld [vmem:[%s1503_s1 + $0x360] sm:$0xff]  ;;  %v143_v35 = vld [vmem:[%s1503_s1 + $0x378] sm:$0xff]  ;;  %v770_v36 = vpack.c.bf16 %v47_v33, %v44_v31 }
   0x9   :  { %v832_v32 = vpack.c.bf16 %v144_v30, %v141_v29  ;;  %v51_v37 = vld [vmem:[%s1503_s1 + $0x98] sm:$0xff]  ;;  %v54_v38 = vld [vmem:[%s1503_s1 + $0xb0] sm:$0xff]  ;;  %v834_v40 = vpack.c.bf16 %v143_v35, %v140_v34  ;;  %v53_v44 = vld [vmem:[%s1503_s1 + $0xa8] sm:$0xff] }
   0xa   :  { %767 = vmatpush1.bf16.msra.mxu0 %v766_v23  ;;  %v147_v39 = vld [vmem:[%s1503_s1 + $0x398] sm:$0xff]  ;;  %v772_v41 = vpack.c.bf16 %v54_v38, %v51_v37  ;;  %v150_v42 = vld [vmem:[%s1503_s1 + $0x3b0] sm:$0xff]  ;;  %v149_v47 = vld [vmem:[%s1503_s1 + $0x3a8] sm:$0xff] }
   0xb   :  { %831 = vmatpush1.bf16.msra.mxu1 %v830_v27  ;;  %769 = vmatprep.subr.bf16.mxu0 %v768_v28  ;;  %v50_v43 = vld [vmem:[%s1503_s1 + $0x90] sm:$0xff]  ;;  %v836_v45 = vpack.c.bf16 %v150_v42, %v147_v39  ;;  %v57_v48 = vld [vmem:[%s1503_s1 + $0xc8] sm:$0xff]  ;;  %v60_v49 = vld [vmem:[%s1503_s1 + $0xe0] sm:$0xff] }
   0xc   :  { %833 = vmatprep.subr.bf16.mxu1 %v832_v32  ;;  %v146_v46 = vld [vmem:[%s1503_s1 + $0x390] sm:$0xff]  ;;  %v774_v50 = vpack.c.bf16 %v53_v44, %v50_v43  ;;  %v776_v52 = vpack.c.bf16 %v60_v49, %v57_v48  ;;  %v56_v53 = vld [vmem:[%s1503_s1 + $0xc0] sm:$0xff]  ;;  %v59_v54 = vld [vmem:[%s1503_s1 + $0xd8] sm:$0xff] }
   0xd   :  { %v838_v51 = vpack.c.bf16 %v149_v47, %v146_v46  ;;  %v63_v55 = vld [vmem:[%s1503_s1 + $0xf8] sm:$0xff]  ;;  %v66_v56 = vld [vmem:[%s1503_s1 + $0x110] sm:$0xff]  ;;  %v153_v57 = vld [vmem:[%s1503_s1 + $0x3c8] sm:$0xf]  ;;  %v778_v60 = vpack.c.bf16 %v59_v54, %v56_v53 }
   0xe   :  { %771 = vmatpush1.bf16.msra.mxu0 %v770_v36  ;;  %v82_v58 = vld [vmem:[%s1503_s1 + $0x190] sm:$0xff]  ;;  %v85_v59 = vld [vmem:[%s1503_s1 + $0x1a8] sm:$0xff]  ;;  %v780_v0 = vpack.c.bf16 %v66_v56, %v63_v55  ;;  %v88_v2 = vld [vmem:[%s1503_s1 + $0x1c0] sm:$0xff] }
   0xf   :  { %835 = vmatpush1.bf16.msra.mxu1 %v834_v40  ;;  %773 = vmatprep.subr.bf16.mxu0 %v772_v41  ;;  %v34_v61 = vld [vmem:[%s1503_s1 + $0x10] sm:$0xff]  ;;  %v37_v62 = vld [vmem:[%s1503_s1 + $0x28] sm:$0xff]  ;;  %v91_v4 = vld [vmem:[%s1503_s1 + $0x1d8] sm:$0xff]  ;;  %v840_v6 = vpack.c.bf16 %v85_v59, %v82_v58 }
  0x10   :  { %837 = vmatprep.subr.bf16.mxu1 %v836_v45  ;;  %v62_v63 = vld [vmem:[%s1503_s1 + $0xf0] sm:$0xff]  ;;  %v65_v1 = vld [vmem:[%s1503_s1 + $0x108] sm:$0xff]  ;;  %v152_v5 = vld [vmem:[%s1503_s1 + $0x3c0] sm:$0xf]  ;;  %v842_v10 = vpack.c.bf16 %v37_v62, %v34_v61  ;;  %v844_v12 = vpack.c.bf16 %v91_v4, %v88_v2 }
  0x11   :  { %v69_v7 = vld [vmem:[%s1503_s1 + $0x128] sm:$0xff]  ;;  %v72_v8 = vld [vmem:[%s1503_s1 + $0x140] sm:$0xff]  ;;  %v1093_v9 = vld [vmem:[%s1504_s0 + $0x10] sm:$0xff]  ;;  %v782_v11 = vpack.c.bf16 %v65_v1, %v62_v63 }
  0x12   :  { %775 = vmatpush1.bf16.msra.mxu0 %v774_v50  ;;  %v40_v13 = vld [vmem:[%s1503_s1 + $0x40] sm:$0xff]  ;;  %v43_v14 = vld [vmem:[%s1503_s1 + $0x58] sm:$0xff]  ;;  %v784_v16 = vpack.c.bf16 %v72_v8, %v69_v7  ;;  %v94_v18 = vld [vmem:[%s1503_s1 + $0x1f0] sm:$0xff] }
  0x13   :  { %839 = vmatpush1.bf16.msra.mxu1 %v838_v51  ;;  %777 = vmatprep.subr.bf16.mxu0 %v776_v52  ;;  %v68_v15 = vld [vmem:[%s1503_s1 + $0x120] sm:$0xff]  ;;  %v71_v17 = vld [vmem:[%s1503_s1 + $0x138] sm:$0xff]  ;;  %v97_v19 = vld [vmem:[%s1503_s1 + $0x208] sm:$0xff]  ;;  %v846_v22 = vpack.c.bf16 %v43_v14, %v40_v13 }
  0x14   :  { %653 = vmatprep.subr.msk.mxu1 %vm210_vm0, %v153_v57  ;;  %v75_v20 = vld [vmem:[%s1503_s1 + $0x158] sm:$0xff]  ;;  %v78_v21 = vld [vmem:[%s1503_s1 + $0x170] sm:$0xff]  ;;  %v1126_v23 = vld [vmem:[%s1504_s0 + $0x28] sm:$0xff]  ;;  %v786_v24 = vpack.c.bf16 %v71_v17, %v68_v15  ;;  %v848_v25 = vpack.c.bf16 %v97_v19, %v94_v18 }
  0x15   :  { %v46_v26 = vld [vmem:[%s1503_s1 + $0x70] sm:$0xff]  ;;  %v49_v27 = vld [vmem:[%s1503_s1 + $0x88] sm:$0xff]  ;;  %v788_v29 = vpack.c.bf16 %v78_v21, %v75_v20  ;;  %v100_v31 = vld [vmem:[%s1503_s1 + $0x220] sm:$0xff] }
  0x16   :  { %779 = vmatpush1.bf16.msra.mxu0 %v778_v60  ;;  %v74_v28 = vld [vmem:[%s1503_s1 + $0x150] sm:$0xff]  ;;  %v77_v30 = vld [vmem:[%s1503_s1 + $0x168] sm:$0xff]  ;;  %v103_v32 = vld [vmem:[%s1503_s1 + $0x238] sm:$0xff]  ;;  %v850_v35 = vpack.c.bf16 %v49_v27, %v46_v26 }
  0x17   :  { %654 = vmatpush1.msk.msra.mxu1 %vm210_vm0, %v152_v5  ;;  %781 = vmatprep.subr.bf16.mxu0 %v780_v0  ;;  %v81_v33 = vld [vmem:[%s1503_s1 + $0x188] sm:$0xff]  ;;  %v84_v34 = vld [vmem:[%s1503_s1 + $0x1a0] sm:$0xff]  ;;  %v790_v37 = vpack.c.bf16 %v77_v30, %v74_v28  ;;  %v852_v38 = vpack.c.bf16 %v103_v32, %v100_v31  ;;  %v55_v40 = vld [vmem:[%s1503_s1 + $0xb8] sm:$0xff] }
  0x18   :  { %841 = vmatprep.subr.bf16.mxu1 %v840_v6  ;;  %655 = vmatmul.mubr.msk.f32.vlgmr.msra.gmra.mrb[0].mxu1 %vm191_vm1, %v1093_v9  ;;  %v1158_v36 = vld [vmem:[%s1504_s0 + $0x40] sm:$0xff]  ;;  %v792_v42 = vpack.c.bf16 %v84_v34, %v81_v33  ;;  %v83_v43 = vld [vmem:[%s1503_s1 + $0x198] sm:$0xff]  ;;  %v106_v44 = vld [vmem:[%s1503_s1 + $0x250] sm:$0xff] }
  0x19   :  { %843 = vmatpush3.bf16.msra.mxu1 %v842_v10  ;;  %391 = vmatprep.mubr.f32.mxu1 %v916_v3  ;;  %v52_v39 = vld [vmem:[%s1503_s1 + $0xa0] sm:$0xff]  ;;  %v109_v45 = vld [vmem:[%s1503_s1 + $0x268] sm:$0xff]  ;;  %v87_v46 = vld [vmem:[%s1503_s1 + $0x1b8] sm:$0xff] }
  0x1a   :  { %783 = vmatpush1.bf16.msra.mxu0 %v782_v11  ;;  %845 = vmatprep.subr.bf16.mxu1 %v844_v12  ;;  %v80_v41 = vld [vmem:[%s1503_s1 + $0x180] sm:$0xff]  ;;  %v90_v47 = vld [vmem:[%s1503_s1 + $0x1d0] sm:$0xff]  ;;  %v854_v48 = vpack.c.bf16 %v55_v40, %v52_v39  ;;  %v1190_v49 = vld [vmem:[%s1504_s0 + $0x58] sm:$0xff]  ;;  %v856_v51 = vpack.c.bf16 %v109_v45, %v106_v44 }
  0x1b   :  { %785 = vmatprep.subr.bf16.mxu0 %v784_v16  ;;  %v794_v50 = vpack.c.bf16 %v83_v43, %v80_v41  ;;  %v58_v52 = vld [vmem:[%s1503_s1 + $0xd0] sm:$0xff]  ;;  %v61_v53 = vld [vmem:[%s1503_s1 + $0xe8] sm:$0xff]  ;;  %v796_v55 = vpack.c.bf16 %v90_v47, %v87_v46  ;;  %v112_v57 = vld [vmem:[%s1503_s1 + $0x280] sm:$0xff] }
  0x1c   :  { %656 = vmatmul.mubr.msk.f32.gmra.mrb[2].mxu1 %vm191_vm1, %v1126_v23  ;;  %v86_v54 = vld [vmem:[%s1503_s1 + $0x1b0] sm:$0xff]  ;;  %v89_v56 = vld [vmem:[%s1503_s1 + $0x1c8] sm:$0xff]  ;;  %v115_v58 = vld [vmem:[%s1503_s1 + $0x298] sm:$0xff]  ;;  %v858_v61 = vpack.c.bf16 %v61_v53, %v58_v52 }
  0x1d   :  { %847 = vmatpush3.bf16.msra.mxu1 %v846_v22  ;;  %397 = vmatprep.mubr.f32.mxu1 %v916_v3  ;;  %v93_v59 = vld [vmem:[%s1503_s1 + $0x1e8] sm:$0xff]  ;;  %v96_v60 = vld [vmem:[%s1503_s1 + $0x200] sm:$0xff]  ;;  %v1225_v63 = vld [vmem:[%s1504_s0 + $0x70] sm:$0xff]  ;;  %v798_v0 = vpack.c.bf16 %v89_v56, %v86_v54  ;;  %v860_v1 = vpack.c.bf16 %v115_v58, %v112_v57 }
  0x1e   :  { %787 = vmatpush1.bf16.msra.mxu0 %v786_v24  ;;  %849 = vmatprep.subr.bf16.mxu1 %v848_v25  ;;  %v64_v62 = vld [vmem:[%s1503_s1 + $0x100] sm:$0xff]  ;;  %v67_v2 = vld [vmem:[%s1503_s1 + $0x118] sm:$0xff]  ;;  %v15_v5 = vld [vmem:[%s1504_s0 + $0x8] sm:$0xff]  ;;  %v800_v6 = vpack.c.bf16 %v96_v60, %v93_v59 }
  0x1f   :  { %789 = vmatprep.subr.bf16.mxu0 %v788_v29  ;;  %v92_v4 = vld [vmem:[%s1503_s1 + $0x1e0] sm:$0xff]  ;;  %v95_v7 = vld [vmem:[%s1503_s1 + $0x1f8] sm:$0xff]  ;;  %v118_v8 = vld [vmem:[%s1503_s1 + $0x2b0] sm:$0xff]  ;;  %284 = vmatprep.mubr.f32.mxu0 %v15_v5  ;;  %v862_v13 = vpack.c.bf16 %v67_v2, %v64_v62 }
  0x20   :  { %657 = vmatmul.mubr.msk.f32.gmra.mrb[4].mxu1 %vm191_vm1, %v1158_v36  ;;  %v121_v10 = vld [vmem:[%s1503_s1 + $0x2c8] sm:$0xff]  ;;  %v99_v11 = vld [vmem:[%s1503_s1 + $0x218] sm:$0xff]  ;;  %v102_v12 = vld [vmem:[%s1503_s1 + $0x230] sm:$0xff]  ;;  %v802_v15 = vpack.c.bf16 %v95_v7, %v92_v4 }
  0x21   :  { %851 = vmatpush3.bf16.msra.mxu1 %v850_v35  ;;  %403 = vmatprep.mubr.f32.mxu1 %v916_v3  ;;  %v1257_v14 = vld [vmem:[%s1504_s0 + $0x88] sm:$0xff]  ;;  %v864_v16 = vpack.c.bf16 %v121_v10, %v118_v8  ;;  %v70_v17 = vld [vmem:[%s1503_s1 + $0x130] sm:$0xff]  ;;  %v804_v19 = vpack.c.bf16 %v102_v12, %v99_v11  ;;  %v124_v21 = vld [vmem:[%s1503_s1 + $0x2e0] sm:$0xff] }
  0x22   :  { %791 = vmatpush1.bf16.msra.mxu0 %v790_v37  ;;  %853 = vmatprep.subr.bf16.mxu1 %v852_v38  ;;  %v73_v18 = vld [vmem:[%s1503_s1 + $0x148] sm:$0xff]  ;;  %v127_v22 = vld [vmem:[%s1503_s1 + $0x2f8] sm:$0xff]  ;;  %v108_v25 = vld [vmem:[%s1503_s1 + $0x260] sm:$0xff] }
  0x23   :  { %793 = vmatprep.subr.bf16.mxu0 %v792_v42  ;;  %v101_v20 = vld [vmem:[%s1503_s1 + $0x228] sm:$0xff]  ;;  %v866_v26 = vpack.c.bf16 %v73_v18, %v70_v17  ;;  %v868_v28 = vpack.c.bf16 %v127_v22, %v124_v21  ;;  %v76_v29 = vld [vmem:[%s1503_s1 + $0x160] sm:$0xff]  ;;  %v79_v30 = vld [vmem:[%s1503_s1 + $0x178] sm:$0xff] }
  0x24   :  { %658 = vmatmul.mubr.msk.f32.gmra.mrb[6].mxu1 %vm191_vm1, %v1190_v49  ;;  %v105_v24 = vld [vmem:[%s1503_s1 + $0x248] sm:$0xff]  ;;  %v104_v31 = vld [vmem:[%s1503_s1 + $0x240] sm:$0xff]  ;;  %v107_v33 = vld [vmem:[%s1503_s1 + $0x258] sm:$0xff]  ;;  %v870_v39 = vpack.c.bf16 %v79_v30, %v76_v29 }
  0x25   :  { %855 = vmatpush3.bf16.msra.mxu1 %v854_v48  ;;  %409 = vmatprep.mubr.f32.mxu1 %v916_v3  ;;  %v808_v32 = vpack.c.bf16 %v108_v25, %v105_v24  ;;  %v130_v34 = vld [vmem:[%s1503_s1 + $0x310] sm:$0xff]  ;;  %v133_v35 = vld [vmem:[%s1503_s1 + $0x328] sm:$0xff]  ;;  %v111_v37 = vld [vmem:[%s1503_s1 + $0x278] sm:$0xff]  ;;  %v810_v42 = vpack.c.bf16 %v107_v33, %v104_v31 }
  0x26   :  { %795 = vmatpush1.bf16.msra.mxu0 %v794_v50  ;;  %857 = vmatprep.subr.bf16.mxu1 %v856_v51  ;;  %v114_v38 = vld [vmem:[%s1503_s1 + $0x290] sm:$0xff]  ;;  %v155_v40 = vld [vmem:[%s1505_s2] sm:$0xff]  ;;  %v872_v44 = vpack.c.bf16 %v133_v35, %v130_v34  ;;  %v113_v46 = vld [vmem:[%s1503_s1 + $0x288] sm:$0xff] }
  0x27   :  { %797 = vmatprep.subr.bf16.mxu0 %v796_v55  ;;  %v157_v41 = vld [vmem:[%s1505_s2 + $0x10] sm:$0xff]  ;;  %v812_v45 = vpack.c.bf16 %v114_v38, %v111_v37  ;;  %v136_v47 = vld [vmem:[%s1503_s1 + $0x340] sm:$0xff]  ;;  %v139_v48 = vld [vmem:[%s1503_s1 + $0x358] sm:$0xff]  ;;  %163 = vperm.xlu0 %914, %v155_v40  }
  0x28   :  { %659 = vmatmul.mubr.msk.f32.gmra.mrb[8].mxu1 %vm191_vm1, %v1225_v63  ;;  %v110_v43 = vld [vmem:[%s1503_s1 + $0x270] sm:$0xff]  ;;  %v117_v50 = vld [vmem:[%s1503_s1 + $0x2a8] sm:$0xff]  ;;  %v120_v51 = vld [vmem:[%s1503_s1 + $0x2c0] sm:$0xff]  ;;  %173 = vperm.xlu1 %915, %v157_v41   ;;  %v876_v58 = vpack.c.bf16 %v139_v48, %v136_v47 }
  0x29   :  { %859 = vmatpush3.bf16.msra.mxu1 %v858_v61  ;;  %415 = vmatprep.mubr.f32.mxu1 %v916_v3  ;;  %v98_v3 = vld [vmem:[%s1503_s1 + $0x210] sm:$0xff]  ;;  %v156_v52 = vld [vmem:[%s1505_s2 + $0x8] sm:$0xff]  ;;  %v14_v53 = vld [vmem:[%s1504_s0] sm:$0xff]  ;;  %v814_v55 = vpack.c.bf16 %v113_v46, %v110_v43  ;;  %v816_v59 = vpack.c.bf16 %v120_v51, %v117_v50 }
  0x2a   :  { %799 = vmatpush1.bf16.msra.mxu0 %v798_v0  ;;  %861 = vmatprep.subr.bf16.mxu1 %v860_v1  ;;  %v806_v27 = vpack.c.bf16 %v101_v20, %v98_v3  ;;  %v158_v54 = vld [vmem:[%s1505_s2 + $0x18] sm:$0xff]  ;;  %v18_v56 = vld [vmem:[%s1504_s0 + $0x20] sm:$0xff]  ;;  %v142_v61 = vld [vmem:[%s1503_s1 + $0x370] sm:$0xff] }
  0x2b   :  { %801 = vmatprep.subr.bf16.mxu0 %v800_v6  ;;  %v116_v57 = vld [vmem:[%s1503_s1 + $0x2a0] sm:$0xff]  ;;  %v119_v60 = vld [vmem:[%s1503_s1 + $0x2b8] sm:$0xff]  ;;  %v145_v62 = vld [vmem:[%s1503_s1 + $0x388] sm:$0xff]  ;;  %168 = vperm.xlu0 %914, %v156_v52  }
  0x2c   :  { %660 = vmatmul.mubr.msk.f32.gmra.mrb[10].mxu1 %vm191_vm1, %v1257_v14  ;;  %v123_v0 = vld [vmem:[%s1503_s1 + $0x2d8] sm:$0xff]  ;;  %v126_v1 = vld [vmem:[%s1503_s1 + $0x2f0] sm:$0xff]  ;;  %178 = vperm.xlu1 %915, %v158_v54   ;;  %v159_v2 = vld [vmem:[%s1505_s2 + $0x20] sm:$0xff]  ;;  %v818_v6 = vpack.c.bf16 %v119_v60, %v116_v57  ;;  %v880_v10 = vpack.c.bf16 %v145_v62, %v142_v61 }
  0x2d   :  { %863 = vmatpush3.bf16.msra.mxu1 %v862_v13  ;;  %486 = vmatprep.mubr.f32.mxu1 %v15_v5  ;;  %v17_v4 = vld [vmem:[%s1504_s0 + $0x18] sm:$0xff]  ;;  %v160_v5 = vld [vmem:[%s1505_s2 + $0x28] sm:$0xff]  ;;  %v122_v8 = vld [vmem:[%s1503_s1 + $0x2d0] sm:$0xff]  ;;  %v820_v11 = vpack.c.bf16 %v126_v1, %v123_v0 }
  0x2e   :  { %803 = vmatpush1.bf16.msra.mxu0 %v802_v15  ;;  %865 = vmatprep.subr.bf16.mxu1 %v864_v16  ;;  %v21_v7 = vld [vmem:[%s1504_s0 + $0x38] sm:$0xff]  ;;  %v125_v12 = vld [vmem:[%s1503_s1 + $0x2e8] sm:$0xff]  ;;  %v148_v13 = vld [vmem:[%s1503_s1 + $0x3a0] sm:$0xff] }
  0x2f   :  { %805 = vmatprep.subr.bf16.mxu0 %v804_v19  ;;  %v151_v15 = vld [vmem:[%s1503_s1 + $0x3b8] sm:$0xff]  ;;  %183 = vperm.xlu0 %914, %v159_v2   ;;  %v20_v16 = vld [vmem:[%s1504_s0 + $0x30] sm:$0xff]  ;;  %v822_v17 = vpack.c.bf16 %v125_v12, %v122_v8  ;;  %v23_v19 = vld [vmem:[%s1504_s0 + $0x48] sm:$0xff] }
  0x30   :  { %188 = vperm.xlu1 %915, %v160_v5   ;;  %v24_v18 = vld [vmem:[%s1504_s0 + $0x50] sm:$0xff]  ;;  %v884_v3 = vpack.c.bf16 %v151_v15, %v148_v13  ;;  %v27_v20 = vld [vmem:[%s1504_s0 + $0x68] sm:$0xff]  ;;  %v26_v22 = vld [vmem:[%s1504_s0 + $0x60] sm:$0xff] }
  0x31   :  { %867 = vmatpush3.bf16.msra.mxu1 %v866_v26  ;;  %v154_v21 = vld [vmem:[%s1503_s1 + $0x3d0] sm:$0xf]  ;;  %v30_v24 = vld [vmem:[%s1504_s0 + $0x80] sm:$0xff]  ;;  %v29_v25 = vld [vmem:[%s1504_s0 + $0x78] sm:$0xff] }
  0x32   :  { %807 = vmatpush1.bf16.msra.mxu0 %v806_v27  ;;  %869 = vmatprep.subr.bf16.mxu1 %v868_v28 }
  0x33   :  { %809 = vmatprep.subr.bf16.mxu0 %v808_v32 }
  0x35   :  { %871 = vmatpush3.bf16.msra.mxu1 %v870_v39 }
  0x36   :  { %811 = vmatpush1.bf16.msra.mxu0 %v810_v42  ;;  %873 = vmatprep.subr.bf16.mxu1 %v872_v44 }
  0x37   :  { %813 = vmatprep.subr.bf16.mxu0 %v812_v45 }
  0x38   :  { %487 = vmatmul.mubr.f32.vlgmr.msra.gmra.mrb[12].mxu1 %v14_v53 }
  0x39   :  { %491 = vmatprep.mubr.f32.mxu1 %v18_v56  ;;  %875 = vmatpush3.bf16.msra.mxu1 %v872_v44 }
  0x3a   :  { %815 = vmatpush1.bf16.msra.mxu0 %v814_v55  ;;  %877 = vmatprep.subr.bf16.mxu1 %v876_v58 }
  0x3b   :  { %817 = vmatprep.subr.bf16.mxu0 %v816_v59 }
  0x3c   :  { %492 = vmatmul.mubr.f32.gmra.mrb[14].mxu1 %v17_v4 }
  0x3d   :  { %496 = vmatprep.mubr.f32.mxu1 %v21_v7  ;;  %879 = vmatpush3.bf16.msra.mxu1 %v876_v58 }
  0x3e   :  { %819 = vmatpush1.bf16.msra.mxu0 %v818_v6  ;;  %881 = vmatprep.subr.bf16.mxu1 %v880_v10 }
  0x3f   :  { %821 = vmatprep.subr.bf16.mxu0 %v820_v11 }
  0x40   :  { %497 = vmatmul.mubr.f32.gmra.mrb[16].mxu1 %v20_v16 }
  0x41   :  { %501 = vmatprep.mubr.f32.mxu1 %v24_v18  ;;  %883 = vmatpush3.bf16.msra.mxu1 %v880_v10 }
  0x42   :  { %823 = vmatpush1.bf16.msra.mxu0 %v822_v17  ;;  %885 = vmatprep.subr.bf16.mxu1 %v884_v3 }
  0x44   :  { %502 = vmatmul.mubr.f32.gmra.mrb[18].mxu1 %v23_v19 }
  0x45   :  { %285 = vmatmul.mubr.f32.vlgmr.msra.gmra.mrb[0].mxu0 %v14_v53  ;;  %506 = vmatprep.mubr.f32.mxu1 %v27_v20 }
  0x46   :  { %290 = vmatprep.mubr.f32.mxu0 %v18_v56  ;;  %887 = vmatpush3.bf16.msra.mxu1 %v884_v3 }
  0x47   :  { %749 = vmatprep.subr.msk.mxu1 %vm210_vm0, %v154_v21 }
  0x48   :  { %507 = vmatmul.mubr.f32.gmra.mrb[20].mxu1 %v26_v22 }
  0x49   :  { %291 = vmatmul.mubr.f32.gmra.mrb[2].mxu0 %v17_v4  ;;  %511 = vmatprep.mubr.f32.mxu1 %v30_v24 }
  0x4a   :  { %296 = vmatprep.mubr.f32.mxu0 %v21_v7  ;;  %750 = vmatpush3.msk.msra.mxu1 %vm210_vm0, %v154_v21 }
  0x4c   :  { %512 = vmatmul.mubr.f32.gmra.mrb[22].mxu1 %v29_v25 }
  0x4d   :  { %297 = vmatmul.mubr.f32.gmra.mrb[4].mxu0 %v20_v16  ;;  %751 = vmatprep.mubr.msk.f32.mxu1 %vm191_vm1, %v1093_v9 }
  0x4e   :  { %302 = vmatprep.mubr.f32.mxu0 %v24_v18 }
  0x50   :  { %752 = vmatmul.mubr.msk.f32.vlgmr.msra.gmra.mrb[24].mxu1 %vm191_vm1, %v1126_v23 }
  0x51   :  { %303 = vmatmul.mubr.f32.gmra.mrb[6].mxu0 %v23_v19  ;;  %754 = vmatprep.mubr.msk.f32.mxu1 %vm191_vm1, %v1158_v36 }
  0x52   :  { %308 = vmatprep.mubr.f32.mxu0 %v27_v20 }
  0x54   :  { %755 = vmatmul.mubr.msk.f32.gmra.mrb[26].mxu1 %vm191_vm1, %v1190_v49 }
  0x55   :  { %309 = vmatmul.mubr.f32.gmra.mrb[8].mxu0 %v26_v22  ;;  %757 = vmatprep.mubr.msk.f32.mxu1 %vm191_vm1, %v1225_v63 }
  0x56   :  { %314 = vmatprep.mubr.f32.mxu0 %v30_v24 }
  0x58   :  { %758 = vmatmul.mubr.msk.f32.gmra.mrb[28].mxu1 %vm191_vm1, %v1257_v14 }
  0x59   :  { %315 = vmatmul.mubr.f32.gmra.mrb[10].mxu0 %v29_v25 }
  0xa6   :  { %v164_v41 = vpop.permute.xlu0 %163 }
  0xa7   :  { %v174_v57 = vpop.permute.xlu1 %173 }
  0xaa   :  { %v169_v51 = vpop.permute.xlu0 %168 }
  0xab   :  { %v179_v16 = vpop.permute.xlu1 %178 }
  0xeb   :  { %v387_v9 = vpop.f32.mrb[0].mxu1 }
  0xec   :  { %v389_v26 = vpop.f32.mrb[1].mxu1 }
  0xef   :  { %v393_v23 = vpop.f32.mrb[2].mxu1 }
  0xf0   :  { %v395_v27 = vpop.f32.mrb[3].mxu1 }
  0xf3   :  { %v399_v28 = vpop.f32.mrb[4].mxu1 }
  0xf4   :  { %v401_v29 = vpop.f32.mrb[5].mxu1 }
  0xf7   :  { %v1425_v36 = vpop.f32.mrb[6].mxu1 }
  0xf8   :  { %v1427_v30 = vpop.f32.mrb[7].mxu1 }
  0xfb   :  { %v1429_v49 = vpop.f32.mrb[8].mxu1 }
  0xfc   :  { %v1431_v31 = vpop.f32.mrb[9].mxu1 }
  0xff   :  { %v1433_v63 = vpop.f32.mrb[10].mxu1 }
 0x100   :  { %v1435_v32 = vpop.f32.mrb[11].mxu1 }
 0x10b   :  { %v700_v14 = vpop.f32.mrb[12].mxu1 }
 0x10c   :  { %v701_v33 = vpop.f32.mrb[13].mxu1 }
 0x10d   :  { %v702_v34 = vadd.f32 %v701_v33, %v700_v14 }
 0x10f   :  { %v703_v35 = vpop.f32.mrb[14].mxu1  ;;  %v489_v3 = vadd.f32 %v702_v34, %v164_v41 }
 0x110   :  { %v704_v37 = vpop.f32.mrb[15].mxu1 }
 0x111   :  { %v705_v38 = vadd.f32 %v704_v37, %v703_v35  ;;  %v189_v35 = vpop.permute.xlu1 %188 }
 0x113   :  { %v706_v39 = vpop.f32.mrb[16].mxu1  ;;  %v494_v15 = vadd.f32 %v705_v38, %v169_v51 }
 0x114   :  { %v707_v40 = vpop.f32.mrb[17].mxu1 }
 0x115   :  { %v708_v42 = vadd.f32 %v707_v40, %v706_v39 }
 0x117   :  { %v709_v43 = vpop.f32.mrb[18].mxu1  ;;  %v499_v38 = vadd.f32 %v708_v42, %v174_v57 }
 0x118   :  { %v286_v44 = vpop.f32.mrb[0].mxu0  ;;  %v710_v45 = vpop.f32.mrb[19].mxu1 }
 0x119   :  { %v287_v46 = vadd.f32 %v286_v44, %v164_v41  ;;  %v288_v47 = vpop.f32.mrb[1].mxu0  ;;  %v711_v48 = vadd.f32 %v710_v45, %v709_v43 }
 0x11a   :  { %v289_v50 = vadd.f32 %v288_v47, %v164_v41 }
 0x11b   :  { %v388_v52 = vadd.f32 %v387_v9, %v287_v46  ;;  %v712_v53 = vpop.f32.mrb[20].mxu1 }
 0x11c   :  { %v390_v54 = vadd.f32 %v389_v26, %v289_v50  ;;  %v292_v55 = vpop.f32.mrb[2].mxu0  ;;  %v713_v56 = vpop.f32.mrb[21].mxu1 }
 0x11d   :  { %v612_v58 = vmax.f32 %v388_v52, 0.0  ;;  %v293_v59 = vadd.f32 %v292_v55, %v169_v51  ;;  %v294_v60 = vpop.f32.mrb[3].mxu0  ;;  %v714_v61 = vadd.f32 %v713_v56, %v712_v53 }
 0x11e   :  { %v613_v62 = vmax.f32 %v390_v54, 0.0  ;;  %v295_v0 = vadd.f32 %v294_v60, %v169_v51 }
 0x11f   :  { %630 = vst [vmem:[%s1506_s3] sm:$0xff] %v612_v58  ;;  %v394_v1 = vadd.f32 %v393_v23, %v293_v59  ;;  %v715_v2 = vpop.f32.mrb[22].mxu1  ;;  %v184_v23 = vpop.permute.xlu0 %183 }
 0x120   :  { %631 = vst [vmem:[%s1506_s3 + $0x8] sm:$0xff] %v613_v62  ;;  %v396_v4 = vadd.f32 %v395_v27, %v295_v0  ;;  %v298_v5 = vpop.f32.mrb[4].mxu0  ;;  %v716_v6 = vpop.f32.mrb[23].mxu1  ;;  %v509_v51 = vadd.f32 %v714_v61, %v184_v23 }
 0x121   :  { %v615_v7 = vmax.f32 %v394_v1, 0.0  ;;  %v299_v8 = vadd.f32 %v298_v5, %v174_v57  ;;  %v300_v10 = vpop.f32.mrb[5].mxu0  ;;  %v717_v11 = vadd.f32 %v716_v6, %v715_v2 }
 0x122   :  { %v616_v12 = vmax.f32 %v396_v4, 0.0  ;;  %v301_v13 = vadd.f32 %v300_v10, %v174_v57 }
 0x123   :  { %634 = vst [vmem:[%s1506_s3 + $0x18] sm:$0xff] %v615_v7  ;;  %v400_v17 = vadd.f32 %v399_v28, %v299_v8  ;;  %v753_v18 = vpop.f32.mrb[24].mxu1  ;;  %v504_v28 = vadd.f32 %v711_v48, %v179_v16  ;;  %v514_v46 = vadd.f32 %v717_v11, %v189_v35 }
 0x124   :  { %635 = vst [vmem:[%s1506_s3 + $0x20] sm:$0xff] %v616_v12  ;;  %v402_v19 = vadd.f32 %v401_v29, %v301_v13  ;;  %v589_v20 = vadd.f32 %v753_v18, %v494_v15  ;;  %v583_v21 = vpop.f32.mrb[25].mxu1  ;;  %v304_v22 = vpop.f32.mrb[6].mxu0 }
 0x125   :  { %v618_v24 = vmax.f32 %v400_v17, 0.0  ;;  %v584_v25 = vadd.f32 %v583_v21, %v489_v3  ;;  %v305_v9 = vadd.f32 %v304_v22, %v179_v16  ;;  %v306_v26 = vpop.f32.mrb[7].mxu0 }
 0x126   :  { %v619_v27 = vmax.f32 %v402_v19, 0.0  ;;  %v617_v14 = vmax.f32 %v589_v20, 0.0  ;;  %v307_v33 = vadd.f32 %v306_v26, %v179_v16 }
 0x127   :  { %637 = vst [vmem:[%s1506_s3 + $0x30] sm:$0xff] %v618_v24  ;;  %v614_v34 = vmax.f32 %v584_v25, 0.0  ;;  %v406_v29 = vadd.f32 %v1425_v36, %v305_v9  ;;  %v756_v37 = vpop.f32.mrb[26].mxu1 }
 0x128   :  { %638 = vst [vmem:[%s1506_s3 + $0x38] sm:$0xff] %v619_v27  ;;  %636 = vst.msk [vmem:[%s1506_s3 + $0x28] sm:$0xff] %vm632_vm2, %v617_v14  ;;  %v408_v39 = vadd.f32 %v1427_v30, %v307_v33  ;;  %v599_v40 = vadd.f32 %v756_v37, %v504_v28  ;;  %v593_v41 = vpop.f32.mrb[27].mxu1  ;;  %v310_v43 = vpop.f32.mrb[8].mxu0 }
 0x129   :  { %633 = vst.msk [vmem:[%s1506_s3 + $0x10] sm:$0xff] %vm632_vm2, %v614_v34  ;;  %v621_v36 = vmax.f32 %v406_v29, 0.0  ;;  %v594_v42 = vadd.f32 %v593_v41, %v499_v38  ;;  %v311_v44 = vadd.f32 %v310_v43, %v184_v23  ;;  %v312_v45 = vpop.f32.mrb[9].mxu0 }
 0x12a   :  { %v622_v47 = vmax.f32 %v408_v39, 0.0  ;;  %v623_v48 = vmax.f32 %v599_v40, 0.0  ;;  %v313_v50 = vadd.f32 %v312_v45, %v184_v23 }
 0x12b   :  { %640 = vst [vmem:[%s1506_s3 + $0x48] sm:$0xff] %v621_v36  ;;  %v620_v30 = vmax.f32 %v594_v42, 0.0  ;;  %v412_v52 = vadd.f32 %v1429_v49, %v311_v44  ;;  %v759_v53 = vpop.f32.mrb[28].mxu1 }
 0x12c   :  { %641 = vst [vmem:[%s1506_s3 + $0x50] sm:$0xff] %v622_v47  ;;  %642 = vst.msk [vmem:[%s1506_s3 + $0x58] sm:$0xff] %vm632_vm2, %v623_v48  ;;  %v414_v54 = vadd.f32 %v1431_v31, %v313_v50  ;;  %v609_v55 = vadd.f32 %v759_v53, %v514_v46  ;;  %v603_v56 = vpop.f32.mrb[29].mxu1  ;;  %v316_v57 = vpop.f32.mrb[10].mxu0 }
 0x12d   :  { %639 = vst.msk [vmem:[%s1506_s3 + $0x40] sm:$0xff] %vm632_vm2, %v620_v30  ;;  %v624_v49 = vmax.f32 %v412_v52, 0.0  ;;  %v604_v58 = vadd.f32 %v603_v56, %v509_v51  ;;  %v317_v59 = vadd.f32 %v316_v57, %v189_v35  ;;  %v318_v60 = vpop.f32.mrb[11].mxu0 }
 0x12e   :  { %v625_v61 = vmax.f32 %v414_v54, 0.0  ;;  %v629_v62 = vmax.f32 %v609_v55, 0.0  ;;  %v319_v0 = vadd.f32 %v318_v60, %v189_v35 }
 0x12f   :  { %643 = vst [vmem:[%s1506_s3 + $0x60] sm:$0xff] %v624_v49  ;;  %v626_v31 = vmax.f32 %v604_v58, 0.0  ;;  %v418_v1 = vadd.f32 %v1433_v63, %v317_v59 }
 0x130   :  { %644 = vst [vmem:[%s1506_s3 + $0x68] sm:$0xff] %v625_v61  ;;  %648 = vst.msk [vmem:[%s1506_s3 + $0x88] sm:$0xff] %vm632_vm2, %v629_v62  ;;  %v420_v2 = vadd.f32 %v1435_v32, %v319_v0 }
 0x131   :  { %645 = vst.msk [vmem:[%s1506_s3 + $0x70] sm:$0xff] %vm632_vm2, %v626_v31  ;;  %v627_v4 = vmax.f32 %v418_v1, 0.0 }
 0x132   :  { %v628_v5 = vmax.f32 %v420_v2, 0.0 }
 0x133   :  { %646 = vst [vmem:[%s1506_s3 + $0x78] sm:$0xff] %v627_v4 }
 0x134   :  { %647 = vst [vmem:[%s1506_s3 + $0x80] sm:$0xff] %v628_v5 }

// kernel: deepknight_forward_pallas.9
= control target key start
LH: loop header
LB: loop body
LE: loop exit
PB: predicated region body
PF: predicated region fallthrough
CT: control target
= control target key end

     0   :  { %v641_v3 = vmov 0   ;;  %vm202_vm0 = vcmask 392192   ;;  %vm470_vm1 = vcmask 228352   ;;  %s1170_s1 = inlined_call_operand.vmem [shape: f32[432,156], index: 1, kind: input, shape index: {}]   ;;  %s1171_s0 = inlined_call_operand.vmem [shape: f32[64,432], index: 0, kind: input, shape index: {}]   ;;  %s1172_s2 = inlined_call_operand.vmem [shape: f32[64,1], index: 2, kind: input, shape index: {}]   ;;  %s1173_s3 = inlined_call_operand.vmem [shape: f32[64,156], index: 3, kind: output, shape index: {}]  }
   0x1   :  { %v47_v0 = vld [vmem:[%s1170_s1 + $0x8] sm:$0xff]  ;;  %v49_v1 = vld [vmem:[%s1170_s1 + $0x18] sm:$0xff]  ;;  %v46_v2 = vld [vmem:[%s1170_s1] sm:$0xff]  ;;  %639 = vset.pattern.permute.xlu0 %v641_v3  ;;  %640 = vset.pattern.permute.xlu1 %v641_v3 }
   0x2   :  { %v498_v4 = vpack.c.bf16 %v49_v1, %v47_v0  ;;  %v48_v5 = vld [vmem:[%s1170_s1 + $0x10] sm:$0xff]  ;;  %v51_v6 = vld [vmem:[%s1170_s1 + $0x28] sm:$0xff]  ;;  %v53_v7 = vld [vmem:[%s1170_s1 + $0x38] sm:$0xff] }
   0x3   :  { %v500_v8 = vpack.c.bf16 %v48_v5, %v46_v2  ;;  %v502_v9 = vpack.c.bf16 %v53_v7, %v51_v6  ;;  %v50_v10 = vld [vmem:[%s1170_s1 + $0x20] sm:$0xff]  ;;  %v52_v11 = vld [vmem:[%s1170_s1 + $0x30] sm:$0xff]  ;;  %v55_v12 = vld [vmem:[%s1170_s1 + $0x48] sm:$0xff] }
   0x4   :  { %499 = vmatprep.subr.bf16.mxu1 %v498_v4  ;;  %v57_v13 = vld [vmem:[%s1170_s1 + $0x58] sm:$0xff]  ;;  %v504_v14 = vpack.c.bf16 %v52_v11, %v50_v10  ;;  %v54_v16 = vld [vmem:[%s1170_s1 + $0x40] sm:$0xff]  ;;  %v56_v17 = vld [vmem:[%s1170_s1 + $0x50] sm:$0xff] }
   0x5   :  { %501 = vmatpush1.bf16.msra.mxu1 %v500_v8  ;;  %v506_v15 = vpack.c.bf16 %v57_v13, %v55_v12  ;;  %v59_v18 = vld [vmem:[%s1170_s1 + $0x68] sm:$0xff]  ;;  %v61_v19 = vld [vmem:[%s1170_s1 + $0x78] sm:$0xff]  ;;  %v508_v20 = vpack.c.bf16 %v56_v17, %v54_v16  ;;  %v110_v23 = vld [vmem:[%s1170_s1 + $0x200] sm:$0xff] }
   0x6   :  { %503 = vmatprep.subr.bf16.mxu1 %v502_v9  ;;  %v111_v21 = vld [vmem:[%s1170_s1 + $0x208] sm:$0xff]  ;;  %v113_v22 = vld [vmem:[%s1170_s1 + $0x218] sm:$0xff]  ;;  %v510_v24 = vpack.c.bf16 %v61_v19, %v59_v18  ;;  %v58_v25 = vld [vmem:[%s1170_s1 + $0x60] sm:$0xff] }
   0x7   :  { %v60_v26 = vld [vmem:[%s1170_s1 + $0x70] sm:$0xff]  ;;  %v562_v27 = vpack.c.bf16 %v113_v22, %v111_v21  ;;  %v63_v29 = vld [vmem:[%s1170_s1 + $0x88] sm:$0xff]  ;;  %v65_v30 = vld [vmem:[%s1170_s1 + $0x98] sm:$0xff] }
   0x8   :  { %v112_v28 = vld [vmem:[%s1170_s1 + $0x210] sm:$0xff]  ;;  %v115_v32 = vld [vmem:[%s1170_s1 + $0x228] sm:$0xff]  ;;  %v117_v33 = vld [vmem:[%s1170_s1 + $0x238] sm:$0xff]  ;;  %v512_v36 = vpack.c.bf16 %v60_v26, %v58_v25  ;;  %v514_v41 = vpack.c.bf16 %v65_v30, %v63_v29 }
   0x9   :  { %505 = vmatpush1.bf16.msra.mxu1 %v504_v14  ;;  %v564_v31 = vpack.c.bf16 %v112_v28, %v110_v23  ;;  %563 = vmatprep.subr.bf16.mxu0 %v562_v27  ;;  %v114_v34 = vld [vmem:[%s1170_s1 + $0x220] sm:$0xff]  ;;  %v116_v35 = vld [vmem:[%s1170_s1 + $0x230] sm:$0xff]  ;;  %v566_v39 = vpack.c.bf16 %v117_v33, %v115_v32  ;;  %v67_v42 = vld [vmem:[%s1170_s1 + $0xa8] sm:$0xff] }
   0xa   :  { %507 = vmatprep.subr.bf16.mxu1 %v506_v15  ;;  %v62_v37 = vld [vmem:[%s1170_s1 + $0x80] sm:$0xff]  ;;  %v64_v38 = vld [vmem:[%s1170_s1 + $0x90] sm:$0xff]  ;;  %v568_v40 = vpack.c.bf16 %v116_v35, %v114_v34  ;;  %v119_v43 = vld [vmem:[%s1170_s1 + $0x248] sm:$0xff] }
   0xb   :  { %565 = vmatpush1.bf16.msra.mxu0 %v564_v31  ;;  %v121_v44 = vld [vmem:[%s1170_s1 + $0x258] sm:$0xff]  ;;  %v118_v47 = vld [vmem:[%s1170_s1 + $0x240] sm:$0xff]  ;;  %v120_v48 = vld [vmem:[%s1170_s1 + $0x250] sm:$0xff]  ;;  %v516_v49 = vpack.c.bf16 %v64_v38, %v62_v37 }
   0xc   :  { %v69_v45 = vld [vmem:[%s1170_s1 + $0xb8] sm:$0xff]  ;;  %567 = vmatprep.subr.bf16.mxu0 %v566_v39  ;;  %v570_v46 = vpack.c.bf16 %v121_v44, %v119_v43  ;;  %v66_v50 = vld [vmem:[%s1170_s1 + $0xa0] sm:$0xff]  ;;  %v572_v51 = vpack.c.bf16 %v120_v48, %v118_v47  ;;  %v123_v52 = vld [vmem:[%s1170_s1 + $0x268] sm:$0xff] }
   0xd   :  { %509 = vmatpush1.bf16.msra.mxu1 %v508_v20  ;;  %v125_v53 = vld [vmem:[%s1170_s1 + $0x278] sm:$0xff]  ;;  %v518_v54 = vpack.c.bf16 %v69_v45, %v67_v42  ;;  %v68_v55 = vld [vmem:[%s1170_s1 + $0xb0] sm:$0xff]  ;;  %v122_v57 = vld [vmem:[%s1170_s1 + $0x260] sm:$0xff] }
   0xe   :  { %511 = vmatprep.subr.bf16.mxu1 %v510_v24  ;;  %v574_v56 = vpack.c.bf16 %v125_v53, %v123_v52  ;;  %v124_v58 = vld [vmem:[%s1170_s1 + $0x270] sm:$0xff]  ;;  %v71_v59 = vld [vmem:[%s1170_s1 + $0xc8] sm:$0xff]  ;;  %v73_v60 = vld [vmem:[%s1170_s1 + $0xd8] sm:$0xff]  ;;  %v520_v63 = vpack.c.bf16 %v68_v55, %v66_v50 }
   0xf   :  { %569 = vmatpush1.bf16.msra.mxu0 %v568_v40  ;;  %v127_v61 = vld [vmem:[%s1170_s1 + $0x288] sm:$0xff]  ;;  %v129_v62 = vld [vmem:[%s1170_s1 + $0x298] sm:$0xff]  ;;  %v70_v0 = vld [vmem:[%s1170_s1 + $0xc0] sm:$0xff]  ;;  %v576_v2 = vpack.c.bf16 %v124_v58, %v122_v57  ;;  %v522_v3 = vpack.c.bf16 %v73_v60, %v71_v59 }
  0x10   :  { %571 = vmatprep.subr.bf16.mxu0 %v570_v46  ;;  %v72_v1 = vld [vmem:[%s1170_s1 + $0xd0] sm:$0xff]  ;;  %v75_v4 = vld [vmem:[%s1170_s1 + $0xe8] sm:$0xff]  ;;  %v578_v5 = vpack.c.bf16 %v129_v62, %v127_v61  ;;  %v126_v6 = vld [vmem:[%s1170_s1 + $0x280] sm:$0xff] }
  0x11   :  { %513 = vmatpush1.bf16.msra.mxu1 %v512_v36  ;;  %v128_v7 = vld [vmem:[%s1170_s1 + $0x290] sm:$0xff]  ;;  %v77_v8 = vld [vmem:[%s1170_s1 + $0xf8] sm:$0xff]  ;;  %v131_v9 = vld [vmem:[%s1170_s1 + $0x2a8] sm:$0xff]  ;;  %v524_v11 = vpack.c.bf16 %v72_v1, %v70_v0 }
  0x12   :  { %515 = vmatprep.subr.bf16.mxu1 %v514_v41  ;;  %v133_v10 = vld [vmem:[%s1170_s1 + $0x2b8] sm:$0xff]  ;;  %v74_v12 = vld [vmem:[%s1170_s1 + $0xe0] sm:$0xff]  ;;  %v76_v13 = vld [vmem:[%s1170_s1 + $0xf0] sm:$0xff]  ;;  %v580_v14 = vpack.c.bf16 %v128_v7, %v126_v6  ;;  %v526_v15 = vpack.c.bf16 %v77_v8, %v75_v4 }
  0x13   :  { %573 = vmatpush1.bf16.msra.mxu0 %v572_v51  ;;  %v79_v16 = vld [vmem:[%s1170_s1 + $0x108] sm:$0xff]  ;;  %v582_v17 = vpack.c.bf16 %v133_v10, %v131_v9  ;;  %v130_v18 = vld [vmem:[%s1170_s1 + $0x2a0] sm:$0xff]  ;;  %v132_v19 = vld [vmem:[%s1170_s1 + $0x2b0] sm:$0xff]  ;;  %v528_v23 = vpack.c.bf16 %v76_v13, %v74_v12 }
  0x14   :  { %575 = vmatprep.subr.bf16.mxu0 %v574_v56  ;;  %v81_v20 = vld [vmem:[%s1170_s1 + $0x118] sm:$0xff]  ;;  %v135_v21 = vld [vmem:[%s1170_s1 + $0x2c8] sm:$0xff]  ;;  %v78_v24 = vld [vmem:[%s1170_s1 + $0x100] sm:$0xff]  ;;  %v584_v26 = vpack.c.bf16 %v132_v19, %v130_v18 }
  0x15   :  { %517 = vmatpush1.bf16.msra.mxu1 %v516_v49  ;;  %v137_v22 = vld [vmem:[%s1170_s1 + $0x2d8] sm:$0xff]  ;;  %v80_v25 = vld [vmem:[%s1170_s1 + $0x110] sm:$0xff]  ;;  %v530_v27 = vpack.c.bf16 %v81_v20, %v79_v16  ;;  %v83_v28 = vld [vmem:[%s1170_s1 + $0x128] sm:$0xff] }
  0x16   :  { %519 = vmatprep.subr.bf16.mxu1 %v518_v54  ;;  %v586_v29 = vpack.c.bf16 %v137_v22, %v135_v21  ;;  %v134_v30 = vld [vmem:[%s1170_s1 + $0x2c0] sm:$0xff]  ;;  %v136_v31 = vld [vmem:[%s1170_s1 + $0x2d0] sm:$0xff]  ;;  %v85_v32 = vld [vmem:[%s1170_s1 + $0x138] sm:$0xff]  ;;  %v532_v35 = vpack.c.bf16 %v80_v25, %v78_v24 }
  0x17   :  { %577 = vmatpush1.bf16.msra.mxu0 %v576_v2  ;;  %v139_v33 = vld [vmem:[%s1170_s1 + $0x2e8] sm:$0xff]  ;;  %v141_v34 = vld [vmem:[%s1170_s1 + $0x2f8] sm:$0xff]  ;;  %v82_v36 = vld [vmem:[%s1170_s1 + $0x120] sm:$0xff]  ;;  %v588_v38 = vpack.c.bf16 %v136_v31, %v134_v30  ;;  %v534_v39 = vpack.c.bf16 %v85_v32, %v83_v28 }
  0x18   :  { %579 = vmatprep.subr.bf16.mxu0 %v578_v5  ;;  %v84_v37 = vld [vmem:[%s1170_s1 + $0x130] sm:$0xff]  ;;  %v87_v40 = vld [vmem:[%s1170_s1 + $0x148] sm:$0xff]  ;;  %v590_v41 = vpack.c.bf16 %v141_v34, %v139_v33  ;;  %v138_v42 = vld [vmem:[%s1170_s1 + $0x2e0] sm:$0xff] }
  0x19   :  { %521 = vmatpush1.bf16.msra.mxu1 %v520_v63  ;;  %v140_v43 = vld [vmem:[%s1170_s1 + $0x2f0] sm:$0xff]  ;;  %v89_v44 = vld [vmem:[%s1170_s1 + $0x158] sm:$0xff]  ;;  %v143_v45 = vld [vmem:[%s1170_s1 + $0x308] sm:$0xff]  ;;  %v536_v48 = vpack.c.bf16 %v84_v37, %v82_v36 }
  0x1a   :  { %523 = vmatprep.subr.bf16.mxu1 %v522_v3  ;;  %v145_v46 = vld [vmem:[%s1170_s1 + $0x318] sm:$0xff]  ;;  %v86_v47 = vld [vmem:[%s1170_s1 + $0x140] sm:$0xff]  ;;  %v88_v49 = vld [vmem:[%s1170_s1 + $0x150] sm:$0xff]  ;;  %v592_v50 = vpack.c.bf16 %v140_v43, %v138_v42  ;;  %v538_v53 = vpack.c.bf16 %v89_v44, %v87_v40 }
  0x1b   :  { %581 = vmatpush1.bf16.msra.mxu0 %v580_v14  ;;  %v15_v51 = vld [vmem:[%s1171_s0 + $0x8] sm:$0xff]  ;;  %v17_v52 = vld [vmem:[%s1171_s0 + $0x18] sm:$0xff]  ;;  %v594_v55 = vpack.c.bf16 %v145_v46, %v143_v45  ;;  %v142_v56 = vld [vmem:[%s1170_s1 + $0x300] sm:$0xff]  ;;  %v540_v61 = vpack.c.bf16 %v88_v49, %v86_v47 }
  0x1c   :  { %583 = vmatprep.subr.bf16.mxu0 %v582_v17  ;;  %v91_v54 = vld [vmem:[%s1170_s1 + $0x168] sm:$0xff]  ;;  %v144_v57 = vld [vmem:[%s1170_s1 + $0x310] sm:$0xff]  ;;  %v93_v58 = vld [vmem:[%s1170_s1 + $0x178] sm:$0xff]  ;;  %291 = vmatprep.mubr.f32.mxu1 %v15_v51 }
  0x1d   :  { %525 = vmatpush1.bf16.msra.mxu1 %v524_v11  ;;  %v147_v59 = vld [vmem:[%s1170_s1 + $0x328] sm:$0xff]  ;;  %v149_v60 = vld [vmem:[%s1170_s1 + $0x338] sm:$0xff]  ;;  %490 = vmatprep.mubr.msk.f32.mxu0 %vm202_vm0, %v17_v52  ;;  %v90_v62 = vld [vmem:[%s1170_s1 + $0x160] sm:$0xff]  ;;  %v596_v0 = vpack.c.bf16 %v144_v57, %v142_v56  ;;  %v542_v1 = vpack.c.bf16 %v93_v58, %v91_v54 }
  0x1e   :  { %527 = vmatprep.subr.bf16.mxu1 %v526_v15  ;;  %v92_v63 = vld [vmem:[%s1170_s1 + $0x170] sm:$0xff]  ;;  %v95_v2 = vld [vmem:[%s1170_s1 + $0x188] sm:$0xff]  ;;  %v598_v3 = vpack.c.bf16 %v149_v60, %v147_v59  ;;  %v146_v4 = vld [vmem:[%s1170_s1 + $0x320] sm:$0xff] }
  0x1f   :  { %585 = vmatpush1.bf16.msra.mxu0 %v584_v26  ;;  %v148_v5 = vld [vmem:[%s1170_s1 + $0x330] sm:$0xff]  ;;  %v97_v6 = vld [vmem:[%s1170_s1 + $0x198] sm:$0xff]  ;;  %v151_v7 = vld [vmem:[%s1170_s1 + $0x348] sm:$0xff]  ;;  %v544_v9 = vpack.c.bf16 %v92_v63, %v90_v62 }
  0x20   :  { %587 = vmatprep.subr.bf16.mxu0 %v586_v29  ;;  %v153_v8 = vld [vmem:[%s1170_s1 + $0x358] sm:$0xff]  ;;  %v94_v10 = vld [vmem:[%s1170_s1 + $0x180] sm:$0xff]  ;;  %v600_v11 = vpack.c.bf16 %v148_v5, %v146_v4  ;;  %v546_v12 = vpack.c.bf16 %v97_v6, %v95_v2  ;;  %v96_v13 = vld [vmem:[%s1170_s1 + $0x190] sm:$0xff] }
  0x21   :  { %529 = vmatpush1.bf16.msra.mxu1 %v528_v23  ;;  %v602_v14 = vpack.c.bf16 %v153_v8, %v151_v7  ;;  %v150_v15 = vld [vmem:[%s1170_s1 + $0x340] sm:$0xff]  ;;  %v152_v16 = vld [vmem:[%s1170_s1 + $0x350] sm:$0xff]  ;;  %v99_v17 = vld [vmem:[%s1170_s1 + $0x1a8] sm:$0xff]  ;;  %v548_v21 = vpack.c.bf16 %v96_v13, %v94_v10 }
  0x22   :  { %531 = vmatprep.subr.bf16.mxu1 %v530_v27  ;;  %v101_v18 = vld [vmem:[%s1170_s1 + $0x1b8] sm:$0xff]  ;;  %v154_v19 = vld [vmem:[%s1172_s2] sm:$0xff]  ;;  %v156_v20 = vld [vmem:[%s1172_s2 + $0x10] sm:$0xff]  ;;  %v604_v22 = vpack.c.bf16 %v152_v16, %v150_v15 }
  0x23   :  { %589 = vmatpush1.bf16.msra.mxu0 %v588_v38  ;;  %164 = vperm.xlu0 %639, %v154_v19   ;;  %v155_v23 = vld [vmem:[%s1172_s2 + $0x8] sm:$0xff]  ;;  %v550_v24 = vpack.c.bf16 %v101_v18, %v99_v17  ;;  %v98_v25 = vld [vmem:[%s1170_s1 + $0x1a0] sm:$0xff]  ;;  %v100_v26 = vld [vmem:[%s1170_s1 + $0x1b0] sm:$0xff] }
  0x24   :  { %591 = vmatprep.subr.bf16.mxu0 %v590_v41  ;;  %v103_v27 = vld [vmem:[%s1170_s1 + $0x1c8] sm:$0xff]  ;;  %v105_v28 = vld [vmem:[%s1170_s1 + $0x1d8] sm:$0xff]  ;;  %174 = vperm.xlu1 %640, %v156_v20   ;;  %v552_v30 = vpack.c.bf16 %v100_v26, %v98_v25  ;;  %v16_v31 = vld [vmem:[%s1171_s0 + $0x10] sm:$0xff] }
  0x25   :  { %533 = vmatpush1.bf16.msra.mxu1 %v532_v35  ;;  %v157_v29 = vld [vmem:[%s1172_s2 + $0x18] sm:$0xff]  ;;  %v158_v32 = vld [vmem:[%s1172_s2 + $0x20] sm:$0xff]  ;;  %v554_v33 = vpack.c.bf16 %v105_v28, %v103_v27  ;;  %v104_v35 = vld [vmem:[%s1170_s1 + $0x1d0] sm:$0xff] }
  0x26   :  { %535 = vmatprep.subr.bf16.mxu1 %v534_v39  ;;  %v102_v34 = vld [vmem:[%s1170_s1 + $0x1c0] sm:$0xff]  ;;  %v21_v36 = vld [vmem:[%s1171_s0 + $0x38] sm:$0xff]  ;;  %v107_v37 = vld [vmem:[%s1170_s1 + $0x1e8] sm:$0xff] }
  0x27   :  { %593 = vmatpush1.bf16.msra.mxu0 %v592_v50  ;;  %169 = vperm.xlu0 %639, %v155_v23   ;;  %v109_v38 = vld [vmem:[%s1170_s1 + $0x1f8] sm:$0xff]  ;;  %v159_v39 = vld [vmem:[%s1172_s2 + $0x28] sm:$0xff]  ;;  %v556_v40 = vpack.c.bf16 %v104_v35, %v102_v34  ;;  %v20_v41 = vld [vmem:[%s1171_s0 + $0x30] sm:$0xff] }
  0x28   :  { %595 = vmatprep.subr.bf16.mxu0 %v594_v55  ;;  %179 = vperm.xlu1 %640, %v157_v29   ;;  %v160_v42 = vld [vmem:[%s1172_s2 + $0x30] sm:$0xff]  ;;  %v558_v43 = vpack.c.bf16 %v109_v38, %v107_v37  ;;  %v106_v44 = vld [vmem:[%s1170_s1 + $0x1e0] sm:$0xff]  ;;  %v25_v46 = vld [vmem:[%s1171_s0 + $0x58] sm:$0xff] }
  0x29   :  { %537 = vmatpush1.bf16.msra.mxu1 %v536_v48  ;;  %v108_v45 = vld [vmem:[%s1170_s1 + $0x1f0] sm:$0xff]  ;;  %v161_v47 = vld [vmem:[%s1172_s2 + $0x38] sm:$0xff]  ;;  %v14_v51 = vld [vmem:[%s1171_s0] sm:$0xff] }
  0x2a   :  { %539 = vmatprep.subr.bf16.mxu1 %v538_v53  ;;  %v560_v48 = vpack.c.bf16 %v108_v45, %v106_v44  ;;  %v24_v49 = vld [vmem:[%s1171_s0 + $0x50] sm:$0xff]  ;;  %v29_v50 = vld [vmem:[%s1171_s0 + $0x78] sm:$0xff]  ;;  %v19_v53 = vld [vmem:[%s1171_s0 + $0x28] sm:$0xff] }
  0x2b   :  { %597 = vmatpush1.bf16.msra.mxu0 %v596_v0  ;;  %184 = vperm.xlu0 %639, %v158_v32   ;;  %v28_v52 = vld [vmem:[%s1171_s0 + $0x70] sm:$0xff]  ;;  %v33_v54 = vld [vmem:[%s1171_s0 + $0x98] sm:$0xff]  ;;  %v18_v55 = vld [vmem:[%s1171_s0 + $0x20] sm:$0xff] }
  0x2c   :  { %599 = vmatprep.subr.bf16.mxu0 %v598_v3  ;;  %189 = vperm.xlu1 %640, %v159_v39   ;;  %v32_v56 = vld [vmem:[%s1171_s0 + $0x90] sm:$0xff]  ;;  %v23_v57 = vld [vmem:[%s1171_s0 + $0x48] sm:$0xff]  ;;  %v37_v58 = vld [vmem:[%s1171_s0 + $0xb8] sm:$0xff] }
  0x2d   :  { %541 = vmatpush1.bf16.msra.mxu1 %v540_v61  ;;  %v22_v59 = vld [vmem:[%s1171_s0 + $0x40] sm:$0xff]  ;;  %v36_v60 = vld [vmem:[%s1171_s0 + $0xb0] sm:$0xff]  ;;  %v27_v61 = vld [vmem:[%s1171_s0 + $0x68] sm:$0xff] }
  0x2e   :  { %543 = vmatprep.subr.bf16.mxu1 %v542_v1  ;;  %v41_v62 = vld [vmem:[%s1171_s0 + $0xd8] sm:$0xff]  ;;  %v26_v63 = vld [vmem:[%s1171_s0 + $0x60] sm:$0xff]  ;;  %v40_v0 = vld [vmem:[%s1171_s0 + $0xd0] sm:$0xff] }
  0x2f   :  { %601 = vmatpush1.bf16.msra.mxu0 %v600_v11  ;;  %194 = vperm.xlu0 %639, %v160_v42   ;;  %v31_v1 = vld [vmem:[%s1171_s0 + $0x88] sm:$0xff]  ;;  %v45_v2 = vld [vmem:[%s1171_s0 + $0xf8] sm:$0xff]  ;;  %v30_v3 = vld [vmem:[%s1171_s0 + $0x80] sm:$0xff] }
  0x30   :  { %603 = vmatprep.subr.bf16.mxu0 %v602_v14  ;;  %199 = vperm.xlu1 %640, %v161_v47   ;;  %v44_v4 = vld [vmem:[%s1171_s0 + $0xf0] sm:$0xff]  ;;  %v35_v5 = vld [vmem:[%s1171_s0 + $0xa8] sm:$0xff]  ;;  %v34_v6 = vld [vmem:[%s1171_s0 + $0xa0] sm:$0xff] }
  0x31   :  { %545 = vmatpush1.bf16.msra.mxu1 %v544_v9  ;;  %v39_v7 = vld [vmem:[%s1171_s0 + $0xc8] sm:$0xff]  ;;  %v38_v8 = vld [vmem:[%s1171_s0 + $0xc0] sm:$0xff] }
  0x32   :  { %547 = vmatprep.subr.bf16.mxu1 %v546_v12  ;;  %v43_v9 = vld [vmem:[%s1171_s0 + $0xe8] sm:$0xff]  ;;  %v42_v10 = vld [vmem:[%s1171_s0 + $0xe0] sm:$0xff] }
  0x33   :  { %605 = vmatpush1.bf16.msra.mxu0 %v604_v22 }
  0x35   :  { %549 = vmatpush1.bf16.msra.mxu1 %v548_v21 }
  0x36   :  { %551 = vmatprep.subr.bf16.mxu1 %v550_v24  ;;  %405 = vmatmul.mubr.f32.vlgmr.msra.gmra.mrb[0].mxu0 %v16_v31 }
  0x37   :  { %491 = vmatprep.mubr.msk.f32.mxu0 %vm202_vm0, %v21_v36 }
  0x39   :  { %553 = vmatpush1.bf16.msra.mxu1 %v552_v30 }
  0x3a   :  { %555 = vmatprep.subr.bf16.mxu1 %v554_v33  ;;  %411 = vmatmul.mubr.f32.gmra.mrb[2].mxu0 %v20_v41 }
  0x3b   :  { %492 = vmatprep.mubr.msk.f32.mxu0 %vm202_vm0, %v25_v46 }
  0x3d   :  { %557 = vmatpush1.bf16.msra.mxu1 %v556_v40 }
  0x3e   :  { %559 = vmatprep.subr.bf16.mxu1 %v558_v43  ;;  %417 = vmatmul.mubr.f32.gmra.mrb[4].mxu0 %v24_v49 }
  0x3f   :  { %493 = vmatprep.mubr.msk.f32.mxu0 %vm202_vm0, %v29_v50 }
  0x41   :  { %561 = vmatpush1.bf16.msra.mxu1 %v560_v48 }
  0x42   :  { %423 = vmatmul.mubr.f32.gmra.mrb[6].mxu0 %v28_v52 }
  0x43   :  { %494 = vmatprep.mubr.msk.f32.mxu0 %vm202_vm0, %v33_v54 }
  0x44   :  { %292 = vmatmul.mubr.f32.vlgmr.msra.gmra.mrb[0].mxu1 %v14_v51 }
  0x45   :  { %297 = vmatprep.mubr.f32.mxu1 %v19_v53 }
  0x46   :  { %429 = vmatmul.mubr.f32.gmra.mrb[8].mxu0 %v32_v56 }
  0x47   :  { %495 = vmatprep.mubr.msk.f32.mxu0 %vm202_vm0, %v37_v58 }
  0x48   :  { %298 = vmatmul.mubr.f32.gmra.mrb[2].mxu1 %v18_v55 }
  0x49   :  { %303 = vmatprep.mubr.f32.mxu1 %v23_v57 }
  0x4a   :  { %435 = vmatmul.mubr.f32.gmra.mrb[10].mxu0 %v36_v60 }
  0x4b   :  { %496 = vmatprep.mubr.msk.f32.mxu0 %vm202_vm0, %v41_v62 }
  0x4c   :  { %304 = vmatmul.mubr.f32.gmra.mrb[4].mxu1 %v22_v59 }
  0x4d   :  { %309 = vmatprep.mubr.f32.mxu1 %v27_v61 }
  0x4e   :  { %441 = vmatmul.mubr.f32.gmra.mrb[12].mxu0 %v40_v0 }
  0x4f   :  { %497 = vmatprep.mubr.msk.f32.mxu0 %vm202_vm0, %v45_v2 }
  0x50   :  { %310 = vmatmul.mubr.f32.gmra.mrb[6].mxu1 %v26_v63 }
  0x51   :  { %315 = vmatprep.mubr.f32.mxu1 %v31_v1 }
  0x52   :  { %447 = vmatmul.mubr.f32.gmra.mrb[14].mxu0 %v44_v4 }
  0x54   :  { %316 = vmatmul.mubr.f32.gmra.mrb[8].mxu1 %v30_v3 }
  0x55   :  { %321 = vmatprep.mubr.f32.mxu1 %v35_v5 }
  0x58   :  { %322 = vmatmul.mubr.f32.gmra.mrb[10].mxu1 %v34_v6 }
  0x59   :  { %327 = vmatprep.mubr.f32.mxu1 %v39_v7 }
  0x5c   :  { %328 = vmatmul.mubr.f32.gmra.mrb[12].mxu1 %v38_v8 }
  0x5d   :  { %333 = vmatprep.mubr.f32.mxu1 %v43_v9 }
  0x60   :  { %334 = vmatmul.mubr.f32.gmra.mrb[14].mxu1 %v42_v10 }
  0xa2   :  { %v165_v15 = vpop.permute.xlu0 %164 }
  0xa3   :  { %v175_v26 = vpop.permute.xlu1 %174 }
  0xa6   :  { %v170_v24 = vpop.permute.xlu0 %169 }
  0xa7   :  { %v180_v46 = vpop.permute.xlu1 %179 }
  0xaa   :  { %v185_v57 = vpop.permute.xlu0 %184 }
  0xab   :  { %v190_v5 = vpop.permute.xlu1 %189 }
 0x109   :  { %v406_v11 = vpop.f32.mrb[0].mxu0 }
 0x10a   :  { %v408_v12 = vpop.f32.mrb[1].mxu0 }
 0x10d   :  { %v412_v13 = vpop.f32.mrb[2].mxu0 }
 0x10e   :  { %v414_v14 = vpop.f32.mrb[3].mxu0 }
 0x111   :  { %v418_v16 = vpop.f32.mrb[4].mxu0 }
 0x112   :  { %v420_v17 = vpop.f32.mrb[5].mxu0 }
 0x115   :  { %v424_v19 = vpop.f32.mrb[6].mxu0 }
 0x116   :  { %v426_v22 = vpop.f32.mrb[7].mxu0 }
 0x117   :  { %v293_v18 = vpop.f32.mrb[0].mxu1 }
 0x118   :  { %v294_v20 = vadd.f32 %v293_v18, %v165_v15  ;;  %v295_v21 = vpop.f32.mrb[1].mxu1 }
 0x119   :  { %v296_v23 = vadd.f32 %v295_v21, %v165_v15  ;;  %v430_v29 = vpop.f32.mrb[8].mxu0 }
 0x11a   :  { %v407_v25 = vadd.f32 %v406_v11, %v294_v20  ;;  %v432_v33 = vpop.f32.mrb[9].mxu0 }
 0x11b   :  { %v409_v27 = vadd.f32 %v408_v12, %v296_v23  ;;  %v299_v28 = vpop.f32.mrb[2].mxu1  ;;  %v200_v23 = vpop.permute.xlu1 %199 }
 0x11c   :  { %v453_v30 = vmax.f32 %v407_v25, 0.0  ;;  %v300_v31 = vadd.f32 %v299_v28, %v170_v24  ;;  %v301_v32 = vpop.f32.mrb[3].mxu1 }
 0x11d   :  { %v454_v34 = vmax.f32 %v409_v27, 0.0  ;;  %v302_v35 = vadd.f32 %v301_v32, %v170_v24  ;;  %v436_v39 = vpop.f32.mrb[10].mxu0 }
 0x11e   :  { %469 = vst [vmem:[%s1173_s3] sm:$0xff] %v453_v30  ;;  %v413_v36 = vadd.f32 %v412_v13, %v300_v31  ;;  %v438_v43 = vpop.f32.mrb[11].mxu0 }
 0x11f   :  { %471 = vst.msk [vmem:[%s1173_s3 + $0x8] sm:$0xff] %vm470_vm1, %v454_v34  ;;  %v415_v37 = vadd.f32 %v414_v14, %v302_v35  ;;  %v305_v38 = vpop.f32.mrb[4].mxu1  ;;  %v195_v14 = vpop.permute.xlu0 %194 }
 0x120   :  { %v455_v40 = vmax.f32 %v413_v36, 0.0  ;;  %v306_v41 = vadd.f32 %v305_v38, %v175_v26  ;;  %v307_v42 = vpop.f32.mrb[5].mxu1 }
 0x121   :  { %v456_v44 = vmax.f32 %v415_v37, 0.0  ;;  %v308_v45 = vadd.f32 %v307_v42, %v175_v26  ;;  %v442_v50 = vpop.f32.mrb[12].mxu0 }
 0x122   :  { %472 = vst [vmem:[%s1173_s3 + $0x10] sm:$0xff] %v455_v40  ;;  %v419_v47 = vadd.f32 %v418_v16, %v306_v41  ;;  %v444_v54 = vpop.f32.mrb[13].mxu0 }
 0x123   :  { %473 = vst.msk [vmem:[%s1173_s3 + $0x18] sm:$0xff] %vm470_vm1, %v456_v44  ;;  %v421_v48 = vadd.f32 %v420_v17, %v308_v45  ;;  %v311_v49 = vpop.f32.mrb[6].mxu1 }
 0x124   :  { %v457_v51 = vmax.f32 %v419_v47, 0.0  ;;  %v312_v52 = vadd.f32 %v311_v49, %v180_v46  ;;  %v313_v53 = vpop.f32.mrb[7].mxu1 }
 0x125   :  { %v458_v55 = vmax.f32 %v421_v48, 0.0  ;;  %v314_v56 = vadd.f32 %v313_v53, %v180_v46  ;;  %v448_v61 = vpop.f32.mrb[14].mxu0 }
 0x126   :  { %474 = vst [vmem:[%s1173_s3 + $0x20] sm:$0xff] %v457_v51  ;;  %v425_v58 = vadd.f32 %v424_v19, %v312_v52  ;;  %v450_v1 = vpop.f32.mrb[15].mxu0 }
 0x127   :  { %475 = vst.msk [vmem:[%s1173_s3 + $0x28] sm:$0xff] %vm470_vm1, %v458_v55  ;;  %v427_v59 = vadd.f32 %v426_v22, %v314_v56  ;;  %v317_v60 = vpop.f32.mrb[8].mxu1 }
 0x128   :  { %v459_v62 = vmax.f32 %v425_v58, 0.0  ;;  %v318_v63 = vadd.f32 %v317_v60, %v185_v57  ;;  %v319_v0 = vpop.f32.mrb[9].mxu1 }
 0x129   :  { %v460_v2 = vmax.f32 %v427_v59, 0.0  ;;  %v320_v3 = vadd.f32 %v319_v0, %v185_v57 }
 0x12a   :  { %476 = vst [vmem:[%s1173_s3 + $0x30] sm:$0xff] %v459_v62  ;;  %v431_v4 = vadd.f32 %v430_v29, %v318_v63 }
 0x12b   :  { %477 = vst.msk [vmem:[%s1173_s3 + $0x38] sm:$0xff] %vm470_vm1, %v460_v2  ;;  %v433_v6 = vadd.f32 %v432_v33, %v320_v3  ;;  %v323_v7 = vpop.f32.mrb[10].mxu1 }
 0x12c   :  { %v461_v8 = vmax.f32 %v431_v4, 0.0  ;;  %v324_v9 = vadd.f32 %v323_v7, %v190_v5  ;;  %v325_v10 = vpop.f32.mrb[11].mxu1 }
 0x12d   :  { %v462_v11 = vmax.f32 %v433_v6, 0.0  ;;  %v326_v12 = vadd.f32 %v325_v10, %v190_v5 }
 0x12e   :  { %478 = vst [vmem:[%s1173_s3 + $0x40] sm:$0xff] %v461_v8  ;;  %v437_v13 = vadd.f32 %v436_v39, %v324_v9 }
 0x12f   :  { %479 = vst.msk [vmem:[%s1173_s3 + $0x48] sm:$0xff] %vm470_vm1, %v462_v11  ;;  %v439_v15 = vadd.f32 %v438_v43, %v326_v12  ;;  %v329_v16 = vpop.f32.mrb[12].mxu1 }
 0x130   :  { %v463_v17 = vmax.f32 %v437_v13, 0.0  ;;  %v330_v18 = vadd.f32 %v329_v16, %v195_v14  ;;  %v331_v19 = vpop.f32.mrb[13].mxu1 }
 0x131   :  { %v464_v20 = vmax.f32 %v439_v15, 0.0  ;;  %v332_v21 = vadd.f32 %v331_v19, %v195_v14 }
 0x132   :  { %480 = vst [vmem:[%s1173_s3 + $0x50] sm:$0xff] %v463_v17  ;;  %v443_v22 = vadd.f32 %v442_v50, %v330_v18 }
 0x133   :  { %481 = vst.msk [vmem:[%s1173_s3 + $0x58] sm:$0xff] %vm470_vm1, %v464_v20  ;;  %v445_v24 = vadd.f32 %v444_v54, %v332_v21  ;;  %v335_v25 = vpop.f32.mrb[14].mxu1 }
 0x134   :  { %v465_v26 = vmax.f32 %v443_v22, 0.0  ;;  %v336_v27 = vadd.f32 %v335_v25, %v200_v23  ;;  %v337_v28 = vpop.f32.mrb[15].mxu1 }
 0x135   :  { %v466_v29 = vmax.f32 %v445_v24, 0.0  ;;  %v338_v30 = vadd.f32 %v337_v28, %v200_v23 }
 0x136   :  { %482 = vst [vmem:[%s1173_s3 + $0x60] sm:$0xff] %v465_v26  ;;  %v449_v31 = vadd.f32 %v448_v61, %v336_v27 }
 0x137   :  { %483 = vst.msk [vmem:[%s1173_s3 + $0x68] sm:$0xff] %vm470_vm1, %v466_v29  ;;  %v451_v32 = vadd.f32 %v450_v1, %v338_v30 }
 0x138   :  { %v467_v33 = vmax.f32 %v449_v31, 0.0 }
 0x139   :  { %v468_v34 = vmax.f32 %v451_v32, 0.0 }
 0x13a   :  { %484 = vst [vmem:[%s1173_s3 + $0x70] sm:$0xff] %v467_v33 }
 0x13b   :  { %485 = vst.msk [vmem:[%s1173_s3 + $0x78] sm:$0xff] %vm470_vm1, %v468_v34 }

// kernel: deepknight_forward_pallas.10
= control target key start
LH: loop header
LB: loop body
LE: loop exit
PB: predicated region body
PF: predicated region fallthrough
CT: control target
= control target key end

     0   :  { %v790_v3 = vmov 0   ;;  %vm174_vm0 = vcmask 523264   ;;  %vm522_vm1 = vcmask 392192   ;;  %s1217_s1 = inlined_call_operand.vmem [shape: f32[576,48], index: 1, kind: input, shape index: {}]   ;;  %s1218_s0 = inlined_call_operand.vmem [shape: f32[64,576], index: 0, kind: input, shape index: {}]   ;;  %s1219_s2 = inlined_call_operand.vmem [shape: f32[64,1], index: 2, kind: input, shape index: {}]   ;;  %s1220_s3 = inlined_call_operand.vmem [shape: f32[64,48], index: 3, kind: output, shape index: {}]  }
   0x1   :  { %v70_v0 = vld [vmem:[%s1217_s1 + $0x80] sm:$0xff]  ;;  %v71_v1 = vld [vmem:[%s1217_s1 + $0x88] sm:$0xff]  ;;  %788 = vset.pattern.permute.xlu0 %v790_v3  ;;  %789 = vset.pattern.permute.xlu1 %v790_v3  ;;  %v72_v12 = vld [vmem:[%s1217_s1 + $0x90] sm:$0xff] }
   0x2   :  { %v102_v2 = vld [vmem:[%s1217_s1 + $0x180] sm:$0xff]  ;;  %v699_v4 = vpack.c.bf16 %v71_v1, %v70_v0  ;;  %v103_v5 = vld [vmem:[%s1217_s1 + $0x188] sm:$0xff]  ;;  %v73_v14 = vld [vmem:[%s1217_s1 + $0x98] sm:$0xff] }
   0x3   :  { %v54_v6 = vld [vmem:[%s1217_s1] sm:$0xff]  ;;  %v55_v7 = vld [vmem:[%s1217_s1 + $0x8] sm:$0xff]  ;;  %v731_v8 = vpack.c.bf16 %v103_v5, %v102_v2  ;;  %v104_v15 = vld [vmem:[%s1217_s1 + $0x190] sm:$0xff]  ;;  %v703_v17 = vpack.c.bf16 %v73_v14, %v72_v12 }
   0x4   :  { %v701_v9 = vpack.c.bf16 %v55_v7, %v54_v6  ;;  %v86_v10 = vld [vmem:[%s1217_s1 + $0x100] sm:$0xff]  ;;  %v87_v11 = vld [vmem:[%s1217_s1 + $0x108] sm:$0xff]  ;;  %700 = vmatprep.subr.bf16.mxu0 %v699_v4  ;;  %v105_v16 = vld [vmem:[%s1217_s1 + $0x198] sm:$0xff] }
   0x5   :  { %v733_v13 = vpack.c.bf16 %v87_v11, %v86_v10  ;;  %732 = vmatprep.subr.bf16.mxu1 %v731_v8  ;;  %v735_v18 = vpack.c.bf16 %v105_v16, %v104_v15  ;;  %v56_v19 = vld [vmem:[%s1217_s1 + $0x10] sm:$0xff]  ;;  %v57_v20 = vld [vmem:[%s1217_s1 + $0x18] sm:$0xff]  ;;  %v74_v24 = vld [vmem:[%s1217_s1 + $0xa0] sm:$0xff] }
   0x6   :  { %702 = vmatpush3.bf16.msra.mxu0 %v701_v9  ;;  %v88_v21 = vld [vmem:[%s1217_s1 + $0x110] sm:$0xff]  ;;  %v705_v22 = vpack.c.bf16 %v57_v20, %v56_v19  ;;  %v89_v23 = vld [vmem:[%s1217_s1 + $0x118] sm:$0xff]  ;;  %v75_v25 = vld [vmem:[%s1217_s1 + $0xa8] sm:$0xff] }
   0x7   :  { %734 = vmatpush3.bf16.msra.mxu1 %v733_v13  ;;  %704 = vmatprep.subr.bf16.mxu0 %v703_v17  ;;  %v737_v26 = vpack.c.bf16 %v89_v23, %v88_v21  ;;  %v707_v27 = vpack.c.bf16 %v75_v25, %v74_v24  ;;  %v106_v28 = vld [vmem:[%s1217_s1 + $0x1a0] sm:$0xff]  ;;  %v107_v29 = vld [vmem:[%s1217_s1 + $0x1a8] sm:$0xff]  ;;  %v76_v36 = vld [vmem:[%s1217_s1 + $0xb0] sm:$0xff] }
   0x8   :  { %736 = vmatprep.subr.bf16.mxu1 %v735_v18  ;;  %v58_v30 = vld [vmem:[%s1217_s1 + $0x20] sm:$0xff]  ;;  %v739_v31 = vpack.c.bf16 %v107_v29, %v106_v28  ;;  %v59_v32 = vld [vmem:[%s1217_s1 + $0x28] sm:$0xff]  ;;  %v77_v37 = vld [vmem:[%s1217_s1 + $0xb8] sm:$0xff] }
   0x9   :  { %v90_v33 = vld [vmem:[%s1217_s1 + $0x120] sm:$0xff]  ;;  %v91_v34 = vld [vmem:[%s1217_s1 + $0x128] sm:$0xff]  ;;  %v709_v35 = vpack.c.bf16 %v59_v32, %v58_v30  ;;  %v108_v38 = vld [vmem:[%s1217_s1 + $0x1b0] sm:$0xff]  ;;  %v711_v40 = vpack.c.bf16 %v77_v37, %v76_v36 }
   0xa   :  { %706 = vmatpush3.bf16.msra.mxu0 %v705_v22  ;;  %v741_v39 = vpack.c.bf16 %v91_v34, %v90_v33  ;;  %v109_v41 = vld [vmem:[%s1217_s1 + $0x1b8] sm:$0xff]  ;;  %v60_v42 = vld [vmem:[%s1217_s1 + $0x30] sm:$0xff]  ;;  %v78_v47 = vld [vmem:[%s1217_s1 + $0xc0] sm:$0xff] }
   0xb   :  { %738 = vmatpush3.bf16.msra.mxu1 %v737_v26  ;;  %708 = vmatprep.subr.bf16.mxu0 %v707_v27  ;;  %v61_v43 = vld [vmem:[%s1217_s1 + $0x38] sm:$0xff]  ;;  %v743_v44 = vpack.c.bf16 %v109_v41, %v108_v38  ;;  %v92_v45 = vld [vmem:[%s1217_s1 + $0x130] sm:$0xff]  ;;  %v79_v48 = vld [vmem:[%s1217_s1 + $0xc8] sm:$0xff] }
   0xc   :  { %740 = vmatprep.subr.bf16.mxu1 %v739_v31  ;;  %v93_v46 = vld [vmem:[%s1217_s1 + $0x138] sm:$0xff]  ;;  %v110_v49 = vld [vmem:[%s1217_s1 + $0x1c0] sm:$0xff]  ;;  %v111_v50 = vld [vmem:[%s1217_s1 + $0x1c8] sm:$0xff]  ;;  %v713_v51 = vpack.c.bf16 %v61_v43, %v60_v42  ;;  %v715_v53 = vpack.c.bf16 %v79_v48, %v78_v47 }
   0xd   :  { %v745_v52 = vpack.c.bf16 %v93_v46, %v92_v45  ;;  %v62_v54 = vld [vmem:[%s1217_s1 + $0x40] sm:$0xff]  ;;  %v63_v55 = vld [vmem:[%s1217_s1 + $0x48] sm:$0xff]  ;;  %v747_v57 = vpack.c.bf16 %v111_v50, %v110_v49  ;;  %v80_v59 = vld [vmem:[%s1217_s1 + $0xd0] sm:$0xff] }
   0xe   :  { %710 = vmatpush3.bf16.msra.mxu0 %v709_v35  ;;  %v94_v56 = vld [vmem:[%s1217_s1 + $0x140] sm:$0xff]  ;;  %v95_v58 = vld [vmem:[%s1217_s1 + $0x148] sm:$0xff]  ;;  %v81_v60 = vld [vmem:[%s1217_s1 + $0xd8] sm:$0xff]  ;;  %v717_v63 = vpack.c.bf16 %v63_v55, %v62_v54 }
   0xf   :  { %742 = vmatpush3.bf16.msra.mxu1 %v741_v39  ;;  %712 = vmatprep.subr.bf16.mxu0 %v711_v40  ;;  %v112_v61 = vld [vmem:[%s1217_s1 + $0x1d0] sm:$0xff]  ;;  %v113_v62 = vld [vmem:[%s1217_s1 + $0x1d8] sm:$0xff]  ;;  %v749_v0 = vpack.c.bf16 %v95_v58, %v94_v56  ;;  %v719_v1 = vpack.c.bf16 %v81_v60, %v80_v59  ;;  %v82_v7 = vld [vmem:[%s1217_s1 + $0xe0] sm:$0xff] }
  0x10   :  { %744 = vmatprep.subr.bf16.mxu1 %v743_v44  ;;  %v64_v2 = vld [vmem:[%s1217_s1 + $0x50] sm:$0xff]  ;;  %v65_v3 = vld [vmem:[%s1217_s1 + $0x58] sm:$0xff]  ;;  %v751_v5 = vpack.c.bf16 %v113_v62, %v112_v61  ;;  %v83_v8 = vld [vmem:[%s1217_s1 + $0xe8] sm:$0xff] }
  0x11   :  { %v96_v4 = vld [vmem:[%s1217_s1 + $0x150] sm:$0xff]  ;;  %v97_v6 = vld [vmem:[%s1217_s1 + $0x158] sm:$0xff]  ;;  %v114_v9 = vld [vmem:[%s1217_s1 + $0x1e0] sm:$0xff]  ;;  %v721_v11 = vpack.c.bf16 %v65_v3, %v64_v2  ;;  %v723_v15 = vpack.c.bf16 %v83_v8, %v82_v7 }
  0x12   :  { %714 = vmatpush3.bf16.msra.mxu0 %v713_v51  ;;  %v115_v10 = vld [vmem:[%s1217_s1 + $0x1e8] sm:$0xff]  ;;  %v66_v12 = vld [vmem:[%s1217_s1 + $0x60] sm:$0xff]  ;;  %v753_v14 = vpack.c.bf16 %v97_v6, %v96_v4  ;;  %v17_v18 = vld [vmem:[%s1218_s0 + $0x18] sm:$0xff] }
  0x13   :  { %746 = vmatpush3.bf16.msra.mxu1 %v745_v52  ;;  %716 = vmatprep.subr.bf16.mxu0 %v715_v53  ;;  %v67_v13 = vld [vmem:[%s1217_s1 + $0x68] sm:$0xff]  ;;  %v98_v16 = vld [vmem:[%s1217_s1 + $0x160] sm:$0xff]  ;;  %v755_v19 = vpack.c.bf16 %v115_v10, %v114_v9  ;;  %v84_v21 = vld [vmem:[%s1217_s1 + $0xf0] sm:$0xff] }
  0x14   :  { %748 = vmatprep.subr.bf16.mxu1 %v747_v57  ;;  %v15_v17 = vld [vmem:[%s1218_s0 + $0x8] sm:$0xff]  ;;  %v85_v22 = vld [vmem:[%s1217_s1 + $0xf8] sm:$0xff]  ;;  %v116_v23 = vld [vmem:[%s1217_s1 + $0x1f0] sm:$0xff]  ;;  %368 = vmatprep.mubr.f32.mxu1 %v17_v18  ;;  %v725_v25 = vpack.c.bf16 %v67_v13, %v66_v12 }
  0x15   :  { %v99_v20 = vld [vmem:[%s1217_s1 + $0x168] sm:$0xff]  ;;  %263 = vmatprep.mubr.f32.mxu0 %v15_v17  ;;  %v117_v24 = vld [vmem:[%s1217_s1 + $0x1f8] sm:$0xff]  ;;  %v727_v27 = vpack.c.bf16 %v85_v22, %v84_v21  ;;  %v68_v28 = vld [vmem:[%s1217_s1 + $0x70] sm:$0xff] }
  0x16   :  { %718 = vmatpush3.bf16.msra.mxu0 %v717_v63  ;;  %v757_v26 = vpack.c.bf16 %v99_v20, %v98_v16  ;;  %v69_v29 = vld [vmem:[%s1217_s1 + $0x78] sm:$0xff]  ;;  %v100_v30 = vld [vmem:[%s1217_s1 + $0x170] sm:$0xff]  ;;  %v759_v31 = vpack.c.bf16 %v117_v24, %v116_v23  ;;  %v118_v33 = vld [vmem:[%s1217_s1 + $0x200] sm:$0xff] }
  0x17   :  { %750 = vmatpush3.bf16.msra.mxu1 %v749_v0  ;;  %720 = vmatprep.subr.bf16.mxu0 %v719_v1  ;;  %v101_v32 = vld [vmem:[%s1217_s1 + $0x178] sm:$0xff]  ;;  %v119_v34 = vld [vmem:[%s1217_s1 + $0x208] sm:$0xff]  ;;  %v729_v35 = vpack.c.bf16 %v69_v29, %v68_v28  ;;  %v120_v38 = vld [vmem:[%s1217_s1 + $0x210] sm:$0xff] }
  0x18   :  { %752 = vmatprep.subr.bf16.mxu1 %v751_v5  ;;  %v761_v36 = vpack.c.bf16 %v101_v32, %v100_v30  ;;  %v763_v37 = vpack.c.bf16 %v119_v34, %v118_v33  ;;  %v121_v39 = vld [vmem:[%s1217_s1 + $0x218] sm:$0xff]  ;;  %v14_v40 = vld [vmem:[%s1218_s0] sm:$0xff]  ;;  %v16_v41 = vld [vmem:[%s1218_s0 + $0x10] sm:$0xff] }
  0x19   :  { %v20_v42 = vld [vmem:[%s1218_s0 + $0x30] sm:$0xff]  ;;  %v767_v43 = vpack.c.bf16 %v121_v39, %v120_v38  ;;  %v22_v44 = vld [vmem:[%s1218_s0 + $0x40] sm:$0xff]  ;;  %v123_v46 = vld [vmem:[%s1217_s1 + $0x228] sm:$0xff] }
  0x1a   :  { %722 = vmatpush3.bf16.msra.mxu0 %v721_v11  ;;  %v122_v45 = vld [vmem:[%s1217_s1 + $0x220] sm:$0xff]  ;;  %v19_v47 = vld [vmem:[%s1218_s0 + $0x28] sm:$0xff]  ;;  %v21_v48 = vld [vmem:[%s1218_s0 + $0x38] sm:$0xff] }
  0x1b   :  { %754 = vmatpush3.bf16.msra.mxu1 %v753_v14  ;;  %724 = vmatprep.subr.bf16.mxu0 %v723_v15  ;;  %v25_v49 = vld [vmem:[%s1218_s0 + $0x58] sm:$0xff]  ;;  %v27_v50 = vld [vmem:[%s1218_s0 + $0x68] sm:$0xff]  ;;  %v771_v51 = vpack.c.bf16 %v123_v46, %v122_v45  ;;  %v124_v52 = vld [vmem:[%s1217_s1 + $0x230] sm:$0xff] }
  0x1c   :  { %756 = vmatprep.subr.bf16.mxu1 %v755_v19  ;;  %v125_v53 = vld [vmem:[%s1217_s1 + $0x238] sm:$0xff]  ;;  %v24_v54 = vld [vmem:[%s1218_s0 + $0x50] sm:$0xff]  ;;  %v26_v55 = vld [vmem:[%s1218_s0 + $0x60] sm:$0xff] }
  0x1d   :  { %v30_v56 = vld [vmem:[%s1218_s0 + $0x80] sm:$0xff]  ;;  %v32_v57 = vld [vmem:[%s1218_s0 + $0x90] sm:$0xff]  ;;  %v775_v58 = vpack.c.bf16 %v125_v53, %v124_v52  ;;  %v29_v59 = vld [vmem:[%s1218_s0 + $0x78] sm:$0xff] }
  0x1e   :  { %726 = vmatpush3.bf16.msra.mxu0 %v725_v25  ;;  %v31_v60 = vld [vmem:[%s1218_s0 + $0x88] sm:$0xff]  ;;  %v37_v62 = vld [vmem:[%s1218_s0 + $0xb8] sm:$0xff]  ;;  %v126_v63 = vld [vmem:[%s1219_s2] sm:$0xff] }
  0x1f   :  { %758 = vmatpush3.bf16.msra.mxu1 %v757_v26  ;;  %728 = vmatprep.subr.bf16.mxu0 %v727_v27  ;;  %v35_v61 = vld [vmem:[%s1218_s0 + $0xa8] sm:$0xff]  ;;  %v34_v0 = vld [vmem:[%s1218_s0 + $0xa0] sm:$0xff]  ;;  %v128_v1 = vld [vmem:[%s1219_s2 + $0x10] sm:$0xff] }
  0x20   :  { %760 = vmatprep.subr.bf16.mxu1 %v759_v31  ;;  %v36_v2 = vld [vmem:[%s1218_s0 + $0xb0] sm:$0xff]  ;;  %v42_v4 = vld [vmem:[%s1218_s0 + $0xe0] sm:$0xff]  ;;  %136 = vperm.xlu0 %788, %v126_v63   ;;  %v127_v5 = vld [vmem:[%s1219_s2 + $0x8] sm:$0xff] }
  0x21   :  { %v40_v3 = vld [vmem:[%s1218_s0 + $0xd0] sm:$0xff]  ;;  %146 = vperm.xlu1 %789, %v128_v1   ;;  %v39_v6 = vld [vmem:[%s1218_s0 + $0xc8] sm:$0xff]  ;;  %v129_v7 = vld [vmem:[%s1219_s2 + $0x18] sm:$0xff] }
  0x22   :  { %730 = vmatpush3.bf16.msra.mxu0 %v729_v35  ;;  %v41_v8 = vld [vmem:[%s1218_s0 + $0xd8] sm:$0xff]  ;;  %v47_v10 = vld [vmem:[%s1218_s0 + $0x108] sm:$0xff]  ;;  %v130_v11 = vld [vmem:[%s1219_s2 + $0x20] sm:$0xff] }
  0x23   :  { %762 = vmatpush3.bf16.msra.mxu1 %v761_v36  ;;  %764 = vmatprep.subr.bf16.mxu0 %v763_v37  ;;  %v45_v9 = vld [vmem:[%s1218_s0 + $0xf8] sm:$0xff]  ;;  %v44_v12 = vld [vmem:[%s1218_s0 + $0xf0] sm:$0xff]  ;;  %v131_v13 = vld [vmem:[%s1219_s2 + $0x28] sm:$0xff] }
  0x24   :  { %779 = vmatprep.subr.bf16.mxu1 %v763_v37  ;;  %141 = vperm.xlu0 %788, %v127_v5   ;;  %v46_v14 = vld [vmem:[%s1218_s0 + $0x100] sm:$0xff]  ;;  %v52_v16 = vld [vmem:[%s1218_s0 + $0x130] sm:$0xff]  ;;  %v49_v18 = vld [vmem:[%s1218_s0 + $0x118] sm:$0xff] }
  0x25   :  { %264 = vmatmul.mubr.f32.vlgmr.msra.gmra.mrb[0].mxu0 %v14_v40  ;;  %151 = vperm.xlu1 %789, %v129_v7   ;;  %v50_v15 = vld [vmem:[%s1218_s0 + $0x120] sm:$0xff]  ;;  %v132_v17 = vld [vmem:[%s1219_s2 + $0x30] sm:$0xff]  ;;  %v133_v19 = vld [vmem:[%s1219_s2 + $0x38] sm:$0xff] }
  0x26   :  { %369 = vmatmul.mubr.f32.vlgmr.msra.gmra.mrb[0].mxu1 %v16_v41  ;;  %766 = vmatpush3.bf16.msra.mxu0 %v763_v37  ;;  %v51_v20 = vld [vmem:[%s1218_s0 + $0x128] sm:$0xff]  ;;  %v18_v21 = vld [vmem:[%s1218_s0 + $0x20] sm:$0xff]  ;;  %v28_v25 = vld [vmem:[%s1218_s0 + $0x70] sm:$0xff] }
  0x27   :  { %783 = vmatpush3.bf16.msra.mxu1 %v763_v37  ;;  %268 = vmatprep.mubr.f32.mxu0 %v20_v42  ;;  %v38_v22 = vld [vmem:[%s1218_s0 + $0xc0] sm:$0xff]  ;;  %v23_v23 = vld [vmem:[%s1218_s0 + $0x48] sm:$0xff]  ;;  %v48_v26 = vld [vmem:[%s1218_s0 + $0x110] sm:$0xff] }
  0x28   :  { %373 = vmatprep.mubr.f32.mxu1 %v22_v44  ;;  %768 = vmatprep.subr.bf16.mxu0 %v767_v43  ;;  %v43_v24 = vld [vmem:[%s1218_s0 + $0xe8] sm:$0xff]  ;;  %v33_v27 = vld [vmem:[%s1218_s0 + $0x98] sm:$0xff] }
  0x29   :  { %269 = vmatmul.mubr.f32.gmra.mrb[2].mxu0 %v19_v47  ;;  %780 = vmatprep.subr.bf16.mxu1 %v767_v43  ;;  %v53_v28 = vld [vmem:[%s1218_s0 + $0x138] sm:$0xff] }
  0x2a   :  { %374 = vmatmul.mubr.f32.gmra.mrb[2].mxu1 %v21_v48  ;;  %273 = vmatprep.mubr.f32.mxu0 %v25_v49 }
  0x2b   :  { %378 = vmatprep.mubr.f32.mxu1 %v27_v50  ;;  %770 = vmatpush3.bf16.msra.mxu0 %v767_v43 }
  0x2c   :  { %784 = vmatpush3.bf16.msra.mxu1 %v767_v43  ;;  %772 = vmatprep.subr.bf16.mxu0 %v771_v51 }
  0x2d   :  { %274 = vmatmul.mubr.f32.gmra.mrb[4].mxu0 %v24_v54  ;;  %781 = vmatprep.subr.bf16.mxu1 %v771_v51 }
  0x2e   :  { %379 = vmatmul.mubr.f32.gmra.mrb[4].mxu1 %v26_v55  ;;  %278 = vmatprep.mubr.f32.mxu0 %v30_v56 }
  0x2f   :  { %383 = vmatprep.mubr.f32.mxu1 %v32_v57  ;;  %774 = vmatpush3.bf16.msra.mxu0 %v771_v51 }
  0x30   :  { %785 = vmatpush3.bf16.msra.mxu1 %v771_v51  ;;  %776 = vmatprep.subr.bf16.mxu0 %v775_v58 }
  0x31   :  { %279 = vmatmul.mubr.f32.gmra.mrb[6].mxu0 %v29_v59  ;;  %782 = vmatprep.subr.bf16.mxu1 %v775_v58 }
  0x32   :  { %384 = vmatmul.mubr.f32.gmra.mrb[6].mxu1 %v31_v60  ;;  %283 = vmatprep.mubr.f32.mxu0 %v35_v61 }
  0x33   :  { %388 = vmatprep.mubr.f32.mxu1 %v37_v62  ;;  %778 = vmatpush3.bf16.msra.mxu0 %v775_v58 }
  0x34   :  { %786 = vmatpush3.bf16.msra.mxu1 %v775_v58  ;;  %156 = vperm.xlu0 %788, %v130_v11  }
  0x35   :  { %284 = vmatmul.mubr.f32.gmra.mrb[8].mxu0 %v34_v0  ;;  %161 = vperm.xlu1 %789, %v131_v13  }
  0x36   :  { %389 = vmatmul.mubr.f32.gmra.mrb[8].mxu1 %v36_v2  ;;  %288 = vmatprep.mubr.f32.mxu0 %v40_v3 }
  0x37   :  { %393 = vmatprep.mubr.f32.mxu1 %v42_v4 }
  0x38   :  { %166 = vperm.xlu0 %788, %v132_v17  }
  0x39   :  { %289 = vmatmul.mubr.f32.gmra.mrb[10].mxu0 %v39_v6  ;;  %171 = vperm.xlu1 %789, %v133_v19  }
  0x3a   :  { %394 = vmatmul.mubr.f32.gmra.mrb[10].mxu1 %v41_v8  ;;  %293 = vmatprep.mubr.f32.mxu0 %v45_v9 }
  0x3b   :  { %398 = vmatprep.mubr.f32.mxu1 %v47_v10 }
  0x3d   :  { %294 = vmatmul.mubr.f32.gmra.mrb[12].mxu0 %v44_v12 }
  0x3e   :  { %399 = vmatmul.mubr.f32.gmra.mrb[12].mxu1 %v46_v14  ;;  %298 = vmatprep.mubr.f32.mxu0 %v50_v15 }
  0x3f   :  { %403 = vmatprep.mubr.f32.mxu1 %v52_v16 }
  0x41   :  { %299 = vmatmul.mubr.f32.gmra.mrb[14].mxu0 %v49_v18 }
  0x42   :  { %404 = vmatmul.mubr.f32.gmra.mrb[14].mxu1 %v51_v20  ;;  %687 = vmatprep.mubr.msk.f32.mxu0 %vm174_vm0, %v18_v21 }
  0x43   :  { %693 = vmatprep.mubr.msk.f32.mxu1 %vm174_vm0, %v38_v22 }
  0x45   :  { %688 = vmatmul.mubr.msk.f32.vlgmr.msra.gmra.mrb[16].mxu0 %vm174_vm0, %v23_v23 }
  0x46   :  { %694 = vmatmul.mubr.msk.f32.vlgmr.msra.gmra.mrb[16].mxu1 %vm174_vm0, %v43_v24  ;;  %690 = vmatprep.mubr.msk.f32.mxu0 %vm174_vm0, %v28_v25 }
  0x47   :  { %696 = vmatprep.mubr.msk.f32.mxu1 %vm174_vm0, %v48_v26 }
  0x49   :  { %691 = vmatmul.mubr.msk.f32.gmra.mrb[18].mxu0 %vm174_vm0, %v33_v27 }
  0x4a   :  { %697 = vmatmul.mubr.msk.f32.gmra.mrb[18].mxu1 %vm174_vm0, %v53_v28 }
  0x9f   :  { %v137_v29 = vpop.permute.xlu0 %136 }
  0xa0   :  { %v147_v47 = vpop.permute.xlu1 %146 }
  0xa3   :  { %v142_v38 = vpop.permute.xlu0 %141 }
  0xa4   :  { %v152_v62 = vpop.permute.xlu1 %151 }
  0xb3   :  { %v157_v7 = vpop.permute.xlu0 %156 }
  0xb4   :  { %v162_v15 = vpop.permute.xlu1 %161 }
  0xb7   :  { %v167_v24 = vpop.permute.xlu0 %166 }
  0xf8   :  { %v575_v30 = vpop.f32.mrb[0].mxu0 }
  0xf9   :  { %v631_v31 = vpop.f32.mrb[0].mxu1  ;;  %v576_v32 = vpop.f32.mrb[1].mxu0 }
  0xfa   :  { %v577_v33 = vadd.f32 %v576_v32, %v575_v30  ;;  %v632_v34 = vpop.f32.mrb[1].mxu1 }
  0xfb   :  { %v633_v35 = vadd.f32 %v632_v34, %v631_v31 }
  0xfc   :  { %v266_v36 = vadd.f32 %v577_v33, %v137_v29  ;;  %v578_v37 = vpop.f32.mrb[2].mxu0  ;;  %v172_v33 = vpop.permute.xlu1 %171 }
  0xfd   :  { %v634_v39 = vpop.f32.mrb[2].mxu1  ;;  %v579_v40 = vpop.f32.mrb[3].mxu0 }
  0xfe   :  { %v580_v41 = vadd.f32 %v579_v40, %v578_v37  ;;  %v635_v42 = vpop.f32.mrb[3].mxu1  ;;  %v1179_v43 = vadd.f32 %v633_v35, %v266_v36 }
  0xff   :  { %v636_v44 = vadd.f32 %v635_v42, %v634_v39 }
 0x100   :  { %v271_v45 = vadd.f32 %v580_v41, %v142_v38  ;;  %v581_v46 = vpop.f32.mrb[4].mxu0 }
 0x101   :  { %v637_v48 = vpop.f32.mrb[4].mxu1  ;;  %v582_v49 = vpop.f32.mrb[5].mxu0 }
 0x102   :  { %v583_v50 = vadd.f32 %v582_v49, %v581_v46  ;;  %v638_v51 = vpop.f32.mrb[5].mxu1  ;;  %v376_v52 = vadd.f32 %v636_v44, %v271_v45 }
 0x103   :  { %v639_v53 = vadd.f32 %v638_v51, %v637_v48 }
 0x104   :  { %v276_v54 = vadd.f32 %v583_v50, %v147_v47  ;;  %v584_v55 = vpop.f32.mrb[6].mxu0 }
 0x105   :  { %v640_v56 = vpop.f32.mrb[6].mxu1  ;;  %v585_v57 = vpop.f32.mrb[7].mxu0 }
 0x106   :  { %v586_v58 = vadd.f32 %v585_v57, %v584_v55  ;;  %v641_v59 = vpop.f32.mrb[7].mxu1  ;;  %v1181_v60 = vadd.f32 %v639_v53, %v276_v54 }
 0x107   :  { %v642_v61 = vadd.f32 %v641_v59, %v640_v56 }
 0x108   :  { %v281_v63 = vadd.f32 %v586_v58, %v152_v62  ;;  %v587_v0 = vpop.f32.mrb[8].mxu0 }
 0x109   :  { %v643_v1 = vpop.f32.mrb[8].mxu1  ;;  %v588_v2 = vpop.f32.mrb[9].mxu0 }
 0x10a   :  { %v589_v3 = vadd.f32 %v588_v2, %v587_v0  ;;  %v644_v4 = vpop.f32.mrb[9].mxu1  ;;  %v386_v5 = vadd.f32 %v642_v61, %v281_v63 }
 0x10b   :  { %v645_v6 = vadd.f32 %v644_v4, %v643_v1 }
 0x10c   :  { %v286_v8 = vadd.f32 %v589_v3, %v157_v7  ;;  %v590_v9 = vpop.f32.mrb[10].mxu0 }
 0x10d   :  { %v646_v10 = vpop.f32.mrb[10].mxu1  ;;  %v591_v11 = vpop.f32.mrb[11].mxu0 }
 0x10e   :  { %v592_v12 = vadd.f32 %v591_v11, %v590_v9  ;;  %v647_v13 = vpop.f32.mrb[11].mxu1  ;;  %v391_v14 = vadd.f32 %v645_v6, %v286_v8 }
 0x10f   :  { %v648_v16 = vadd.f32 %v647_v13, %v646_v10 }
 0x110   :  { %v291_v17 = vadd.f32 %v592_v12, %v162_v15  ;;  %v593_v18 = vpop.f32.mrb[12].mxu0 }
 0x111   :  { %v649_v19 = vpop.f32.mrb[12].mxu1  ;;  %v594_v20 = vpop.f32.mrb[13].mxu0 }
 0x112   :  { %v595_v21 = vadd.f32 %v594_v20, %v593_v18  ;;  %v650_v22 = vpop.f32.mrb[13].mxu1  ;;  %v396_v23 = vadd.f32 %v648_v16, %v291_v17 }
 0x113   :  { %v651_v25 = vadd.f32 %v650_v22, %v649_v19 }
 0x114   :  { %v296_v26 = vadd.f32 %v595_v21, %v167_v24  ;;  %v596_v27 = vpop.f32.mrb[14].mxu0 }
 0x115   :  { %v652_v28 = vpop.f32.mrb[14].mxu1  ;;  %v597_v29 = vpop.f32.mrb[15].mxu0 }
 0x116   :  { %v598_v30 = vadd.f32 %v597_v29, %v596_v27  ;;  %v653_v31 = vpop.f32.mrb[15].mxu1  ;;  %v401_v32 = vadd.f32 %v651_v25, %v296_v26 }
 0x117   :  { %v654_v34 = vadd.f32 %v653_v31, %v652_v28 }
 0x118   :  { %v301_v35 = vadd.f32 %v598_v30, %v172_v33  ;;  %v689_v36 = vpop.f32.mrb[16].mxu0 }
 0x119   :  { %v481_v37 = vadd.f32 %v689_v36, %v376_v52  ;;  %v695_v38 = vpop.f32.mrb[16].mxu1  ;;  %v475_v39 = vpop.f32.mrb[17].mxu0 }
 0x11a   :  { %v501_v40 = vadd.f32 %v695_v38, %v396_v23  ;;  %v476_v41 = vadd.f32 %v475_v39, %v1179_v43  ;;  %v495_v42 = vpop.f32.mrb[17].mxu1  ;;  %v406_v44 = vadd.f32 %v654_v34, %v301_v35 }
 0x11b   :  { %v515_v45 = vmax.f32 %v481_v37, 0.0  ;;  %v496_v46 = vadd.f32 %v495_v42, %v391_v14 }
 0x11c   :  { %v519_v47 = vmax.f32 %v501_v40, 0.0  ;;  %v514_v48 = vmax.f32 %v476_v41, 0.0  ;;  %v692_v49 = vpop.f32.mrb[18].mxu0 }
 0x11d   :  { %524 = vst.msk [vmem:[%s1220_s3 + $0x8] sm:$0xff] %vm522_vm1, %v515_v45  ;;  %v518_v50 = vmax.f32 %v496_v46, 0.0  ;;  %v491_v51 = vadd.f32 %v692_v49, %v386_v5  ;;  %v698_v52 = vpop.f32.mrb[18].mxu1  ;;  %v485_v53 = vpop.f32.mrb[19].mxu0 }
 0x11e   :  { %528 = vst.msk [vmem:[%s1220_s3 + $0x28] sm:$0xff] %vm522_vm1, %v519_v47  ;;  %523 = vst.msk [vmem:[%s1220_s3] sm:$0xff] %vm522_vm1, %v514_v48  ;;  %v511_v43 = vadd.f32 %v698_v52, %v406_v44  ;;  %v486_v54 = vadd.f32 %v485_v53, %v1181_v60  ;;  %v505_v55 = vpop.f32.mrb[19].mxu1 }
 0x11f   :  { %527 = vst.msk [vmem:[%s1220_s3 + $0x20] sm:$0xff] %vm522_vm1, %v518_v50  ;;  %v517_v56 = vmax.f32 %v491_v51, 0.0  ;;  %v506_v57 = vadd.f32 %v505_v55, %v401_v32 }
 0x120   :  { %v521_v58 = vmax.f32 %v511_v43, 0.0  ;;  %v516_v59 = vmax.f32 %v486_v54, 0.0 }
 0x121   :  { %526 = vst.msk [vmem:[%s1220_s3 + $0x18] sm:$0xff] %vm522_vm1, %v517_v56  ;;  %v520_v61 = vmax.f32 %v506_v57, 0.0 }
 0x122   :  { %530 = vst.msk [vmem:[%s1220_s3 + $0x38] sm:$0xff] %vm522_vm1, %v521_v58  ;;  %525 = vst.msk [vmem:[%s1220_s3 + $0x10] sm:$0xff] %vm522_vm1, %v516_v59 }
 0x123   :  { %529 = vst.msk [vmem:[%s1220_s3 + $0x30] sm:$0xff] %vm522_vm1, %v520_v61 }

// kernel: deepknight_forward_pallas.11
= control target key start
LH: loop header
LB: loop body
LE: loop exit
PB: predicated region body
PF: predicated region fallthrough
CT: control target
= control target key end

     0   :  { %s2910_s24 = smov 0   ;;  %s2912_s25 = smov 0   ;;  %s4284_s0 = inlined_call_operand.vmem [shape: f32[2,1536], index: 0, kind: input, shape index: {}]   ;;  %s4285_s1 = inlined_call_operand.vmem [shape: f32[1536,1024], index: 1, kind: input, shape index: {}]   ;;  %s4286_s2 = inlined_call_operand.vmem [shape: f32[1,1024], index: 2, kind: input, shape index: {}]   ;;  %s4287_s3 = inlined_call_operand.vmem [shape: f32[1024,100], index: 3, kind: input, shape index: {}]   ;;  %s4288_s4 = inlined_call_operand.vmem [shape: f32[1,100], index: 4, kind: input, shape index: {}]   ;;  %s4289_s5 = inlined_call_operand.vmem [shape: f32[100,128], index: 5, kind: input, shape index: {}]   ;;  %s4290_s6 = inlined_call_operand.vmem [shape: f32[1,128], index: 6, kind: input, shape index: {}]   ;;  %s4291_s7 = inlined_call_operand.vmem [shape: f32[2,128], index: 7, kind: output, shape index: {}]  }
   0x1   :  { %s2914_s26 = smov 0  }
   0x2 LB: > { %s2926_s27 = sadd.s32 4294967295, %s2863_s26   ;;  %s2929_s28 = sadd.s32 1, %s2863_s26   ;;  %s2863_s26 = sphi %s2914_s26, %s4294_s26   ;;  %s2859_s25 = sphi %s2912_s25, %s4293_s25   ;;  %s2855_s24 = sphi %s2910_s24, %s4292_s24  }
   0x3   : > { %s42_s29 = ssub.s32 %s2863_s26, %s2929_s28  ;;  %s45_s30 = sadd.s32 1, %s2859_s25 }
   0x4   : > { %p43_p0 = scmp.eq.s32.totalorder %s42_s29, 0  ;;  %p52_p1 = scmp.ne.s32.totalorder %s2859_s25, %s2855_s24 }
   0x5   : > { %p53_p2 = scmp.eq.s32.totalorder %s2863_s26, 0  ;;  %p2267_p4 = scmp.ge.s32.totalorder %s2863_s26, 4 }
   0x6   : > { %s2938_s8 = scalar_select %p43_p0, %s2859_s25, %s45_s30  }
   0x7   : > { %p54_p3 = por %p53_p2, %p52_p1  ;;  %226 = sbr.rel (%p2267_p4) target bundleno = 210 (0xd2), region = 32 }
   0xe   : > { %229 = sbr.rel (!%p54_p3) target bundleno = 210 (0xd2), region = 36  ;;  %s231_s9 = sand.u32 (%p54_p3), 1, %s2859_s25  }
   0xf   : > { %s2282_s10 = sshll.u32 (%p54_p3), %s2863_s26, 4  ;;  %s2807_s11 = smul.u32 (%p54_p3), 3072, %s231_s9 }
  0x10   : > { %s2946_s14 = scalar_lea.vmem (%p54_p3), %s4285_s1, %s2282_s10 }
  0x11   : > { %v249_v0 = vld [vmem:[%s2946_s14] sm:$0xff] (%p54_p3)  ;;  %v251_v1 = vld [vmem:[%s2946_s14 + $0x8] sm:$0xff] (%p54_p3)  ;;  %s2954_s15 = scalar_lea.vmem (%p54_p3), [#allocation3], %s2807_s11 }
  0x12   : > { %v253_v2 = vld [vmem:[%s2946_s14 + $0x40] sm:$0xff] (%p54_p3)  ;;  %v255_v3 = vld [vmem:[%s2946_s14 + $0x48] sm:$0xff] (%p54_p3)  ;;  %250 = vst [vmem:[%s2954_s15] sm:$0xff] (%p54_p3), %v249_v0  ;;  %252 = vst [vmem:[%s2954_s15 + $0x8] sm:$0xff] (%p54_p3), %v251_v1 }
  0x13   : > { %v257_v4 = vld [vmem:[%s2946_s14 + $0x80] sm:$0xff] (%p54_p3)  ;;  %v259_v5 = vld [vmem:[%s2946_s14 + $0x88] sm:$0xff] (%p54_p3)  ;;  %254 = vst [vmem:[%s2954_s15 + $0x10] sm:$0xff] (%p54_p3), %v253_v2  ;;  %256 = vst [vmem:[%s2954_s15 + $0x18] sm:$0xff] (%p54_p3), %v255_v3 }
  0x14   : > { %258 = vst [vmem:[%s2954_s15 + $0x20] sm:$0xff] (%p54_p3), %v257_v4  ;;  %260 = vst [vmem:[%s2954_s15 + $0x28] sm:$0xff] (%p54_p3), %v259_v5  ;;  %v261_v6 = vld [vmem:[%s2946_s14 + $0xc0] sm:$0xff] (%p54_p3)  ;;  %v263_v7 = vld [vmem:[%s2946_s14 + $0xc8] sm:$0xff] (%p54_p3) }
  0x15   : > { %v265_v8 = vld [vmem:[%s2946_s14 + $0x100] sm:$0xff]  ;;  %262 = vst [vmem:[%s2954_s15 + $0x30] sm:$0xff] %v261_v6  ;;  %264 = vst [vmem:[%s2954_s15 + $0x38] sm:$0xff] %v263_v7  ;;  %v267_v9 = vld [vmem:[%s2946_s14 + $0x108] sm:$0xff] }
  0x16   : > { %266 = vst [vmem:[%s2954_s15 + $0x40] sm:$0xff] %v265_v8  ;;  %v269_v10 = vld [vmem:[%s2946_s14 + $0x140] sm:$0xff]  ;;  %v271_v11 = vld [vmem:[%s2946_s14 + $0x148] sm:$0xff]  ;;  %268 = vst [vmem:[%s2954_s15 + $0x48] sm:$0xff] %v267_v9 }
  0x17   : > { %270 = vst [vmem:[%s2954_s15 + $0x50] sm:$0xff] %v269_v10  ;;  %272 = vst [vmem:[%s2954_s15 + $0x58] sm:$0xff] %v271_v11  ;;  %v273_v12 = vld [vmem:[%s2946_s14 + $0x180] sm:$0xff]  ;;  %v275_v13 = vld [vmem:[%s2946_s14 + $0x188] sm:$0xff] }
  0x18   : > { %v277_v14 = vld [vmem:[%s2946_s14 + $0x1c0] sm:$0xff]  ;;  %274 = vst [vmem:[%s2954_s15 + $0x60] sm:$0xff] %v273_v12  ;;  %276 = vst [vmem:[%s2954_s15 + $0x68] sm:$0xff] %v275_v13  ;;  %v279_v15 = vld [vmem:[%s2946_s14 + $0x1c8] sm:$0xff] }
  0x19   : > { %278 = vst [vmem:[%s2954_s15 + $0x70] sm:$0xff] %v277_v14  ;;  %v281_v16 = vld [vmem:[%s2946_s14 + $0x200] sm:$0xff]  ;;  %v283_v17 = vld [vmem:[%s2946_s14 + $0x208] sm:$0xff]  ;;  %280 = vst [vmem:[%s2954_s15 + $0x78] sm:$0xff] %v279_v15 }
  0x1a   : > { %282 = vst [vmem:[%s2954_s15 + $0x80] sm:$0xff] %v281_v16  ;;  %284 = vst [vmem:[%s2954_s15 + $0x88] sm:$0xff] %v283_v17  ;;  %v285_v18 = vld [vmem:[%s2946_s14 + $0x240] sm:$0xff]  ;;  %v287_v19 = vld [vmem:[%s2946_s14 + $0x248] sm:$0xff] }
  0x1b   : > { %v289_v20 = vld [vmem:[%s2946_s14 + $0x280] sm:$0xff]  ;;  %286 = vst [vmem:[%s2954_s15 + $0x90] sm:$0xff] %v285_v18  ;;  %288 = vst [vmem:[%s2954_s15 + $0x98] sm:$0xff] %v287_v19  ;;  %v291_v21 = vld [vmem:[%s2946_s14 + $0x288] sm:$0xff] }
  0x1c   : > { %290 = vst [vmem:[%s2954_s15 + $0xa0] sm:$0xff] %v289_v20  ;;  %v293_v22 = vld [vmem:[%s2946_s14 + $0x2c0] sm:$0xff]  ;;  %v295_v23 = vld [vmem:[%s2946_s14 + $0x2c8] sm:$0xff]  ;;  %292 = vst [vmem:[%s2954_s15 + $0xa8] sm:$0xff] %v291_v21 }
  0x1d   : > { %294 = vst [vmem:[%s2954_s15 + $0xb0] sm:$0xff] %v293_v22  ;;  %296 = vst [vmem:[%s2954_s15 + $0xb8] sm:$0xff] %v295_v23  ;;  %v297_v24 = vld [vmem:[%s2946_s14 + $0x300] sm:$0xff]  ;;  %v299_v25 = vld [vmem:[%s2946_s14 + $0x308] sm:$0xff] }
  0x1e   : > { %v301_v26 = vld [vmem:[%s2946_s14 + $0x340] sm:$0xff]  ;;  %298 = vst [vmem:[%s2954_s15 + $0xc0] sm:$0xff] %v297_v24  ;;  %300 = vst [vmem:[%s2954_s15 + $0xc8] sm:$0xff] %v299_v25  ;;  %v303_v27 = vld [vmem:[%s2946_s14 + $0x348] sm:$0xff] }
  0x1f   : > { %302 = vst [vmem:[%s2954_s15 + $0xd0] sm:$0xff] %v301_v26  ;;  %v305_v28 = vld [vmem:[%s2946_s14 + $0x380] sm:$0xff]  ;;  %v307_v29 = vld [vmem:[%s2946_s14 + $0x388] sm:$0xff]  ;;  %304 = vst [vmem:[%s2954_s15 + $0xd8] sm:$0xff] %v303_v27 }
  0x20   : > { %306 = vst [vmem:[%s2954_s15 + $0xe0] sm:$0xff] %v305_v28  ;;  %308 = vst [vmem:[%s2954_s15 + $0xe8] sm:$0xff] %v307_v29  ;;  %v309_v30 = vld [vmem:[%s2946_s14 + $0x3c0] sm:$0xff]  ;;  %v311_v31 = vld [vmem:[%s2946_s14 + $0x3c8] sm:$0xff] }
  0x21   : > { %v313_v32 = vld [vmem:[%s2946_s14 + $0x400] sm:$0xff]  ;;  %310 = vst [vmem:[%s2954_s15 + $0xf0] sm:$0xff] %v309_v30  ;;  %312 = vst [vmem:[%s2954_s15 + $0xf8] sm:$0xff] %v311_v31  ;;  %v315_v33 = vld [vmem:[%s2946_s14 + $0x408] sm:$0xff] }
  0x22   : > { %314 = vst [vmem:[%s2954_s15 + $0x100] sm:$0xff] %v313_v32  ;;  %v317_v34 = vld [vmem:[%s2946_s14 + $0x440] sm:$0xff]  ;;  %v319_v35 = vld [vmem:[%s2946_s14 + $0x448] sm:$0xff]  ;;  %316 = vst [vmem:[%s2954_s15 + $0x108] sm:$0xff] %v315_v33 }
  0x23   : > { %318 = vst [vmem:[%s2954_s15 + $0x110] sm:$0xff] %v317_v34  ;;  %320 = vst [vmem:[%s2954_s15 + $0x118] sm:$0xff] %v319_v35  ;;  %v321_v36 = vld [vmem:[%s2946_s14 + $0x480] sm:$0xff]  ;;  %v323_v37 = vld [vmem:[%s2946_s14 + $0x488] sm:$0xff] }
  0x24   : > { %v325_v38 = vld [vmem:[%s2946_s14 + $0x4c0] sm:$0xff]  ;;  %322 = vst [vmem:[%s2954_s15 + $0x120] sm:$0xff] %v321_v36  ;;  %324 = vst [vmem:[%s2954_s15 + $0x128] sm:$0xff] %v323_v37  ;;  %v327_v39 = vld [vmem:[%s2946_s14 + $0x4c8] sm:$0xff] }
  0x25   : > { %326 = vst [vmem:[%s2954_s15 + $0x130] sm:$0xff] %v325_v38  ;;  %v329_v40 = vld [vmem:[%s2946_s14 + $0x500] sm:$0xff]  ;;  %v331_v41 = vld [vmem:[%s2946_s14 + $0x508] sm:$0xff]  ;;  %328 = vst [vmem:[%s2954_s15 + $0x138] sm:$0xff] %v327_v39 }
  0x26   : > { %330 = vst [vmem:[%s2954_s15 + $0x140] sm:$0xff] %v329_v40  ;;  %332 = vst [vmem:[%s2954_s15 + $0x148] sm:$0xff] %v331_v41  ;;  %v333_v42 = vld [vmem:[%s2946_s14 + $0x540] sm:$0xff]  ;;  %v335_v43 = vld [vmem:[%s2946_s14 + $0x548] sm:$0xff] }
  0x27   : > { %v337_v44 = vld [vmem:[%s2946_s14 + $0x580] sm:$0xff]  ;;  %334 = vst [vmem:[%s2954_s15 + $0x150] sm:$0xff] %v333_v42  ;;  %336 = vst [vmem:[%s2954_s15 + $0x158] sm:$0xff] %v335_v43  ;;  %v339_v45 = vld [vmem:[%s2946_s14 + $0x588] sm:$0xff] }
  0x28   : > { %338 = vst [vmem:[%s2954_s15 + $0x160] sm:$0xff] %v337_v44  ;;  %v341_v46 = vld [vmem:[%s2946_s14 + $0x5c0] sm:$0xff]  ;;  %v343_v47 = vld [vmem:[%s2946_s14 + $0x5c8] sm:$0xff]  ;;  %340 = vst [vmem:[%s2954_s15 + $0x168] sm:$0xff] %v339_v45 }
  0x29   : > { %342 = vst [vmem:[%s2954_s15 + $0x170] sm:$0xff] %v341_v46  ;;  %344 = vst [vmem:[%s2954_s15 + $0x178] sm:$0xff] %v343_v47  ;;  %v345_v48 = vld [vmem:[%s2946_s14 + $0x600] sm:$0xff]  ;;  %v347_v49 = vld [vmem:[%s2946_s14 + $0x608] sm:$0xff] }
  0x2a   : > { %v349_v50 = vld [vmem:[%s2946_s14 + $0x640] sm:$0xff]  ;;  %346 = vst [vmem:[%s2954_s15 + $0x180] sm:$0xff] %v345_v48  ;;  %348 = vst [vmem:[%s2954_s15 + $0x188] sm:$0xff] %v347_v49  ;;  %v351_v51 = vld [vmem:[%s2946_s14 + $0x648] sm:$0xff] }
  0x2b   : > { %350 = vst [vmem:[%s2954_s15 + $0x190] sm:$0xff] %v349_v50  ;;  %v353_v52 = vld [vmem:[%s2946_s14 + $0x680] sm:$0xff]  ;;  %v355_v53 = vld [vmem:[%s2946_s14 + $0x688] sm:$0xff]  ;;  %352 = vst [vmem:[%s2954_s15 + $0x198] sm:$0xff] %v351_v51 }
  0x2c   : > { %354 = vst [vmem:[%s2954_s15 + $0x1a0] sm:$0xff] %v353_v52  ;;  %356 = vst [vmem:[%s2954_s15 + $0x1a8] sm:$0xff] %v355_v53  ;;  %v357_v54 = vld [vmem:[%s2946_s14 + $0x6c0] sm:$0xff]  ;;  %v359_v55 = vld [vmem:[%s2946_s14 + $0x6c8] sm:$0xff] }
  0x2d   : > { %v361_v56 = vld [vmem:[%s2946_s14 + $0x700] sm:$0xff]  ;;  %358 = vst [vmem:[%s2954_s15 + $0x1b0] sm:$0xff] %v357_v54  ;;  %360 = vst [vmem:[%s2954_s15 + $0x1b8] sm:$0xff] %v359_v55  ;;  %v363_v57 = vld [vmem:[%s2946_s14 + $0x708] sm:$0xff] }
  0x2e   : > { %362 = vst [vmem:[%s2954_s15 + $0x1c0] sm:$0xff] %v361_v56  ;;  %v365_v58 = vld [vmem:[%s2946_s14 + $0x740] sm:$0xff]  ;;  %v367_v59 = vld [vmem:[%s2946_s14 + $0x748] sm:$0xff]  ;;  %364 = vst [vmem:[%s2954_s15 + $0x1c8] sm:$0xff] %v363_v57 }
  0x2f   : > { %366 = vst [vmem:[%s2954_s15 + $0x1d0] sm:$0xff] %v365_v58  ;;  %368 = vst [vmem:[%s2954_s15 + $0x1d8] sm:$0xff] %v367_v59  ;;  %v369_v60 = vld [vmem:[%s2946_s14 + $0x780] sm:$0xff]  ;;  %v371_v61 = vld [vmem:[%s2946_s14 + $0x788] sm:$0xff] }
  0x30   : > { %v373_v62 = vld [vmem:[%s2946_s14 + $0x7c0] sm:$0xff]  ;;  %370 = vst [vmem:[%s2954_s15 + $0x1e0] sm:$0xff] %v369_v60  ;;  %372 = vst [vmem:[%s2954_s15 + $0x1e8] sm:$0xff] %v371_v61  ;;  %v375_v63 = vld [vmem:[%s2946_s14 + $0x7c8] sm:$0xff] }
  0x31   : > { %374 = vst [vmem:[%s2954_s15 + $0x1f0] sm:$0xff] %v373_v62  ;;  %v377_v0 = vld [vmem:[%s2946_s14 + $0x800] sm:$0xff]  ;;  %v379_v1 = vld [vmem:[%s2946_s14 + $0x808] sm:$0xff]  ;;  %376 = vst [vmem:[%s2954_s15 + $0x1f8] sm:$0xff] %v375_v63 }
  0x32   : > { %378 = vst [vmem:[%s2954_s15 + $0x200] sm:$0xff] %v377_v0  ;;  %380 = vst [vmem:[%s2954_s15 + $0x208] sm:$0xff] %v379_v1  ;;  %v381_v2 = vld [vmem:[%s2946_s14 + $0x840] sm:$0xff]  ;;  %v383_v3 = vld [vmem:[%s2946_s14 + $0x848] sm:$0xff] }
  0x33   : > { %v385_v4 = vld [vmem:[%s2946_s14 + $0x880] sm:$0xff]  ;;  %382 = vst [vmem:[%s2954_s15 + $0x210] sm:$0xff] %v381_v2  ;;  %384 = vst [vmem:[%s2954_s15 + $0x218] sm:$0xff] %v383_v3  ;;  %v387_v5 = vld [vmem:[%s2946_s14 + $0x888] sm:$0xff] }
  0x34   : > { %386 = vst [vmem:[%s2954_s15 + $0x220] sm:$0xff] %v385_v4  ;;  %v389_v6 = vld [vmem:[%s2946_s14 + $0x8c0] sm:$0xff]  ;;  %v391_v7 = vld [vmem:[%s2946_s14 + $0x8c8] sm:$0xff]  ;;  %388 = vst [vmem:[%s2954_s15 + $0x228] sm:$0xff] %v387_v5 }
  0x35   : > { %390 = vst [vmem:[%s2954_s15 + $0x230] sm:$0xff] %v389_v6  ;;  %392 = vst [vmem:[%s2954_s15 + $0x238] sm:$0xff] %v391_v7  ;;  %v393_v8 = vld [vmem:[%s2946_s14 + $0x900] sm:$0xff]  ;;  %v395_v9 = vld [vmem:[%s2946_s14 + $0x908] sm:$0xff] }
  0x36   : > { %v397_v10 = vld [vmem:[%s2946_s14 + $0x940] sm:$0xff]  ;;  %394 = vst [vmem:[%s2954_s15 + $0x240] sm:$0xff] %v393_v8  ;;  %396 = vst [vmem:[%s2954_s15 + $0x248] sm:$0xff] %v395_v9  ;;  %v399_v11 = vld [vmem:[%s2946_s14 + $0x948] sm:$0xff] }
  0x37   : > { %398 = vst [vmem:[%s2954_s15 + $0x250] sm:$0xff] %v397_v10  ;;  %v401_v12 = vld [vmem:[%s2946_s14 + $0x980] sm:$0xff]  ;;  %v403_v13 = vld [vmem:[%s2946_s14 + $0x988] sm:$0xff]  ;;  %400 = vst [vmem:[%s2954_s15 + $0x258] sm:$0xff] %v399_v11 }
  0x38   : > { %402 = vst [vmem:[%s2954_s15 + $0x260] sm:$0xff] %v401_v12  ;;  %404 = vst [vmem:[%s2954_s15 + $0x268] sm:$0xff] %v403_v13  ;;  %v405_v14 = vld [vmem:[%s2946_s14 + $0x9c0] sm:$0xff]  ;;  %v407_v15 = vld [vmem:[%s2946_s14 + $0x9c8] sm:$0xff] }
  0x39   : > { %v409_v16 = vld [vmem:[%s2946_s14 + $0xa00] sm:$0xff]  ;;  %406 = vst [vmem:[%s2954_s15 + $0x270] sm:$0xff] %v405_v14  ;;  %408 = vst [vmem:[%s2954_s15 + $0x278] sm:$0xff] %v407_v15  ;;  %v411_v17 = vld [vmem:[%s2946_s14 + $0xa08] sm:$0xff] }
  0x3a   : > { %410 = vst [vmem:[%s2954_s15 + $0x280] sm:$0xff] %v409_v16  ;;  %v413_v18 = vld [vmem:[%s2946_s14 + $0xa40] sm:$0xff]  ;;  %v415_v19 = vld [vmem:[%s2946_s14 + $0xa48] sm:$0xff]  ;;  %412 = vst [vmem:[%s2954_s15 + $0x288] sm:$0xff] %v411_v17 }
  0x3b   : > { %414 = vst [vmem:[%s2954_s15 + $0x290] sm:$0xff] %v413_v18  ;;  %416 = vst [vmem:[%s2954_s15 + $0x298] sm:$0xff] %v415_v19  ;;  %v417_v20 = vld [vmem:[%s2946_s14 + $0xa80] sm:$0xff]  ;;  %v419_v21 = vld [vmem:[%s2946_s14 + $0xa88] sm:$0xff] }
  0x3c   : > { %v421_v22 = vld [vmem:[%s2946_s14 + $0xac0] sm:$0xff]  ;;  %418 = vst [vmem:[%s2954_s15 + $0x2a0] sm:$0xff] %v417_v20  ;;  %420 = vst [vmem:[%s2954_s15 + $0x2a8] sm:$0xff] %v419_v21  ;;  %v423_v23 = vld [vmem:[%s2946_s14 + $0xac8] sm:$0xff] }
  0x3d   : > { %422 = vst [vmem:[%s2954_s15 + $0x2b0] sm:$0xff] %v421_v22  ;;  %v425_v24 = vld [vmem:[%s2946_s14 + $0xb00] sm:$0xff]  ;;  %v427_v25 = vld [vmem:[%s2946_s14 + $0xb08] sm:$0xff]  ;;  %424 = vst [vmem:[%s2954_s15 + $0x2b8] sm:$0xff] %v423_v23 }
  0x3e   : > { %426 = vst [vmem:[%s2954_s15 + $0x2c0] sm:$0xff] %v425_v24  ;;  %428 = vst [vmem:[%s2954_s15 + $0x2c8] sm:$0xff] %v427_v25  ;;  %v429_v26 = vld [vmem:[%s2946_s14 + $0xb40] sm:$0xff]  ;;  %v431_v27 = vld [vmem:[%s2946_s14 + $0xb48] sm:$0xff] }
  0x3f   : > { %v433_v28 = vld [vmem:[%s2946_s14 + $0xb80] sm:$0xff]  ;;  %430 = vst [vmem:[%s2954_s15 + $0x2d0] sm:$0xff] %v429_v26  ;;  %432 = vst [vmem:[%s2954_s15 + $0x2d8] sm:$0xff] %v431_v27  ;;  %v435_v29 = vld [vmem:[%s2946_s14 + $0xb88] sm:$0xff] }
  0x40   : > { %434 = vst [vmem:[%s2954_s15 + $0x2e0] sm:$0xff] %v433_v28  ;;  %v437_v30 = vld [vmem:[%s2946_s14 + $0xbc0] sm:$0xff]  ;;  %v439_v31 = vld [vmem:[%s2946_s14 + $0xbc8] sm:$0xff]  ;;  %436 = vst [vmem:[%s2954_s15 + $0x2e8] sm:$0xff] %v435_v29 }
  0x41   : > { %438 = vst [vmem:[%s2954_s15 + $0x2f0] sm:$0xff] %v437_v30  ;;  %440 = vst [vmem:[%s2954_s15 + $0x2f8] sm:$0xff] %v439_v31  ;;  %v441_v32 = vld [vmem:[%s2946_s14 + $0xc00] sm:$0xff]  ;;  %v443_v33 = vld [vmem:[%s2946_s14 + $0xc08] sm:$0xff] }
  0x42   : > { %v445_v34 = vld [vmem:[%s2946_s14 + $0xc40] sm:$0xff]  ;;  %442 = vst [vmem:[%s2954_s15 + $0x300] sm:$0xff] %v441_v32  ;;  %444 = vst [vmem:[%s2954_s15 + $0x308] sm:$0xff] %v443_v33  ;;  %v447_v35 = vld [vmem:[%s2946_s14 + $0xc48] sm:$0xff] }
  0x43   : > { %446 = vst [vmem:[%s2954_s15 + $0x310] sm:$0xff] %v445_v34  ;;  %v449_v36 = vld [vmem:[%s2946_s14 + $0xc80] sm:$0xff]  ;;  %v451_v37 = vld [vmem:[%s2946_s14 + $0xc88] sm:$0xff]  ;;  %448 = vst [vmem:[%s2954_s15 + $0x318] sm:$0xff] %v447_v35 }
  0x44   : > { %450 = vst [vmem:[%s2954_s15 + $0x320] sm:$0xff] %v449_v36  ;;  %452 = vst [vmem:[%s2954_s15 + $0x328] sm:$0xff] %v451_v37  ;;  %v453_v38 = vld [vmem:[%s2946_s14 + $0xcc0] sm:$0xff]  ;;  %v455_v39 = vld [vmem:[%s2946_s14 + $0xcc8] sm:$0xff] }
  0x45   : > { %v457_v40 = vld [vmem:[%s2946_s14 + $0xd00] sm:$0xff]  ;;  %454 = vst [vmem:[%s2954_s15 + $0x330] sm:$0xff] %v453_v38  ;;  %456 = vst [vmem:[%s2954_s15 + $0x338] sm:$0xff] %v455_v39  ;;  %v459_v41 = vld [vmem:[%s2946_s14 + $0xd08] sm:$0xff] }
  0x46   : > { %458 = vst [vmem:[%s2954_s15 + $0x340] sm:$0xff] %v457_v40  ;;  %v461_v42 = vld [vmem:[%s2946_s14 + $0xd40] sm:$0xff]  ;;  %v463_v43 = vld [vmem:[%s2946_s14 + $0xd48] sm:$0xff]  ;;  %460 = vst [vmem:[%s2954_s15 + $0x348] sm:$0xff] %v459_v41 }
  0x47   : > { %462 = vst [vmem:[%s2954_s15 + $0x350] sm:$0xff] %v461_v42  ;;  %464 = vst [vmem:[%s2954_s15 + $0x358] sm:$0xff] %v463_v43  ;;  %v465_v44 = vld [vmem:[%s2946_s14 + $0xd80] sm:$0xff]  ;;  %v467_v45 = vld [vmem:[%s2946_s14 + $0xd88] sm:$0xff] }
  0x48   : > { %v469_v46 = vld [vmem:[%s2946_s14 + $0xdc0] sm:$0xff]  ;;  %466 = vst [vmem:[%s2954_s15 + $0x360] sm:$0xff] %v465_v44  ;;  %468 = vst [vmem:[%s2954_s15 + $0x368] sm:$0xff] %v467_v45  ;;  %v471_v47 = vld [vmem:[%s2946_s14 + $0xdc8] sm:$0xff] }
  0x49   : > { %470 = vst [vmem:[%s2954_s15 + $0x370] sm:$0xff] %v469_v46  ;;  %v473_v48 = vld [vmem:[%s2946_s14 + $0xe00] sm:$0xff]  ;;  %v475_v49 = vld [vmem:[%s2946_s14 + $0xe08] sm:$0xff]  ;;  %472 = vst [vmem:[%s2954_s15 + $0x378] sm:$0xff] %v471_v47 }
  0x4a   : > { %474 = vst [vmem:[%s2954_s15 + $0x380] sm:$0xff] %v473_v48  ;;  %476 = vst [vmem:[%s2954_s15 + $0x388] sm:$0xff] %v475_v49  ;;  %v477_v50 = vld [vmem:[%s2946_s14 + $0xe40] sm:$0xff]  ;;  %v479_v51 = vld [vmem:[%s2946_s14 + $0xe48] sm:$0xff] }
  0x4b   : > { %v481_v52 = vld [vmem:[%s2946_s14 + $0xe80] sm:$0xff]  ;;  %478 = vst [vmem:[%s2954_s15 + $0x390] sm:$0xff] %v477_v50  ;;  %480 = vst [vmem:[%s2954_s15 + $0x398] sm:$0xff] %v479_v51  ;;  %v483_v53 = vld [vmem:[%s2946_s14 + $0xe88] sm:$0xff] }
  0x4c   : > { %482 = vst [vmem:[%s2954_s15 + $0x3a0] sm:$0xff] %v481_v52  ;;  %v485_v54 = vld [vmem:[%s2946_s14 + $0xec0] sm:$0xff]  ;;  %v487_v55 = vld [vmem:[%s2946_s14 + $0xec8] sm:$0xff]  ;;  %484 = vst [vmem:[%s2954_s15 + $0x3a8] sm:$0xff] %v483_v53 }
  0x4d   : > { %486 = vst [vmem:[%s2954_s15 + $0x3b0] sm:$0xff] %v485_v54  ;;  %488 = vst [vmem:[%s2954_s15 + $0x3b8] sm:$0xff] %v487_v55  ;;  %v489_v56 = vld [vmem:[%s2946_s14 + $0xf00] sm:$0xff]  ;;  %v491_v57 = vld [vmem:[%s2946_s14 + $0xf08] sm:$0xff] }
  0x4e   : > { %v493_v58 = vld [vmem:[%s2946_s14 + $0xf40] sm:$0xff]  ;;  %490 = vst [vmem:[%s2954_s15 + $0x3c0] sm:$0xff] %v489_v56  ;;  %492 = vst [vmem:[%s2954_s15 + $0x3c8] sm:$0xff] %v491_v57  ;;  %v495_v59 = vld [vmem:[%s2946_s14 + $0xf48] sm:$0xff] }
  0x4f   : > { %494 = vst [vmem:[%s2954_s15 + $0x3d0] sm:$0xff] %v493_v58  ;;  %v497_v60 = vld [vmem:[%s2946_s14 + $0xf80] sm:$0xff]  ;;  %v499_v61 = vld [vmem:[%s2946_s14 + $0xf88] sm:$0xff]  ;;  %496 = vst [vmem:[%s2954_s15 + $0x3d8] sm:$0xff] %v495_v59 }
  0x50   : > { %498 = vst [vmem:[%s2954_s15 + $0x3e0] sm:$0xff] %v497_v60  ;;  %500 = vst [vmem:[%s2954_s15 + $0x3e8] sm:$0xff] %v499_v61  ;;  %v501_v62 = vld [vmem:[%s2946_s14 + $0xfc0] sm:$0xff]  ;;  %v503_v63 = vld [vmem:[%s2946_s14 + $0xfc8] sm:$0xff] }
  0x51   : > { %v505_v0 = vld [vmem:[%s2946_s14 + $0x1000] sm:$0xff]  ;;  %502 = vst [vmem:[%s2954_s15 + $0x3f0] sm:$0xff] %v501_v62  ;;  %504 = vst [vmem:[%s2954_s15 + $0x3f8] sm:$0xff] %v503_v63  ;;  %v507_v1 = vld [vmem:[%s2946_s14 + $0x1008] sm:$0xff] }
  0x52   : > { %506 = vst [vmem:[%s2954_s15 + $0x400] sm:$0xff] %v505_v0  ;;  %v509_v2 = vld [vmem:[%s2946_s14 + $0x1040] sm:$0xff]  ;;  %v511_v3 = vld [vmem:[%s2946_s14 + $0x1048] sm:$0xff]  ;;  %508 = vst [vmem:[%s2954_s15 + $0x408] sm:$0xff] %v507_v1 }
  0x53   : > { %510 = vst [vmem:[%s2954_s15 + $0x410] sm:$0xff] %v509_v2  ;;  %512 = vst [vmem:[%s2954_s15 + $0x418] sm:$0xff] %v511_v3  ;;  %v513_v4 = vld [vmem:[%s2946_s14 + $0x1080] sm:$0xff]  ;;  %v515_v5 = vld [vmem:[%s2946_s14 + $0x1088] sm:$0xff] }
  0x54   : > { %v517_v6 = vld [vmem:[%s2946_s14 + $0x10c0] sm:$0xff]  ;;  %514 = vst [vmem:[%s2954_s15 + $0x420] sm:$0xff] %v513_v4  ;;  %516 = vst [vmem:[%s2954_s15 + $0x428] sm:$0xff] %v515_v5  ;;  %v519_v7 = vld [vmem:[%s2946_s14 + $0x10c8] sm:$0xff] }
  0x55   : > { %518 = vst [vmem:[%s2954_s15 + $0x430] sm:$0xff] %v517_v6  ;;  %v521_v8 = vld [vmem:[%s2946_s14 + $0x1100] sm:$0xff]  ;;  %v523_v9 = vld [vmem:[%s2946_s14 + $0x1108] sm:$0xff]  ;;  %520 = vst [vmem:[%s2954_s15 + $0x438] sm:$0xff] %v519_v7 }
  0x56   : > { %522 = vst [vmem:[%s2954_s15 + $0x440] sm:$0xff] %v521_v8  ;;  %524 = vst [vmem:[%s2954_s15 + $0x448] sm:$0xff] %v523_v9  ;;  %v525_v10 = vld [vmem:[%s2946_s14 + $0x1140] sm:$0xff]  ;;  %v527_v11 = vld [vmem:[%s2946_s14 + $0x1148] sm:$0xff] }
  0x57   : > { %v529_v12 = vld [vmem:[%s2946_s14 + $0x1180] sm:$0xff]  ;;  %526 = vst [vmem:[%s2954_s15 + $0x450] sm:$0xff] %v525_v10  ;;  %528 = vst [vmem:[%s2954_s15 + $0x458] sm:$0xff] %v527_v11  ;;  %v531_v13 = vld [vmem:[%s2946_s14 + $0x1188] sm:$0xff] }
  0x58   : > { %530 = vst [vmem:[%s2954_s15 + $0x460] sm:$0xff] %v529_v12  ;;  %v533_v14 = vld [vmem:[%s2946_s14 + $0x11c0] sm:$0xff]  ;;  %v535_v15 = vld [vmem:[%s2946_s14 + $0x11c8] sm:$0xff]  ;;  %532 = vst [vmem:[%s2954_s15 + $0x468] sm:$0xff] %v531_v13 }
  0x59   : > { %534 = vst [vmem:[%s2954_s15 + $0x470] sm:$0xff] %v533_v14  ;;  %536 = vst [vmem:[%s2954_s15 + $0x478] sm:$0xff] %v535_v15  ;;  %v537_v16 = vld [vmem:[%s2946_s14 + $0x1200] sm:$0xff]  ;;  %v539_v17 = vld [vmem:[%s2946_s14 + $0x1208] sm:$0xff] }
  0x5a   : > { %v541_v18 = vld [vmem:[%s2946_s14 + $0x1240] sm:$0xff]  ;;  %538 = vst [vmem:[%s2954_s15 + $0x480] sm:$0xff] %v537_v16  ;;  %540 = vst [vmem:[%s2954_s15 + $0x488] sm:$0xff] %v539_v17  ;;  %v543_v19 = vld [vmem:[%s2946_s14 + $0x1248] sm:$0xff] }
  0x5b   : > { %542 = vst [vmem:[%s2954_s15 + $0x490] sm:$0xff] %v541_v18  ;;  %v545_v20 = vld [vmem:[%s2946_s14 + $0x1280] sm:$0xff]  ;;  %v547_v21 = vld [vmem:[%s2946_s14 + $0x1288] sm:$0xff]  ;;  %544 = vst [vmem:[%s2954_s15 + $0x498] sm:$0xff] %v543_v19 }
  0x5c   : > { %546 = vst [vmem:[%s2954_s15 + $0x4a0] sm:$0xff] %v545_v20  ;;  %548 = vst [vmem:[%s2954_s15 + $0x4a8] sm:$0xff] %v547_v21  ;;  %v549_v22 = vld [vmem:[%s2946_s14 + $0x12c0] sm:$0xff]  ;;  %v551_v23 = vld [vmem:[%s2946_s14 + $0x12c8] sm:$0xff] }
  0x5d   : > { %v553_v24 = vld [vmem:[%s2946_s14 + $0x1300] sm:$0xff]  ;;  %550 = vst [vmem:[%s2954_s15 + $0x4b0] sm:$0xff] %v549_v22  ;;  %552 = vst [vmem:[%s2954_s15 + $0x4b8] sm:$0xff] %v551_v23  ;;  %v555_v25 = vld [vmem:[%s2946_s14 + $0x1308] sm:$0xff] }
  0x5e   : > { %554 = vst [vmem:[%s2954_s15 + $0x4c0] sm:$0xff] %v553_v24  ;;  %v557_v26 = vld [vmem:[%s2946_s14 + $0x1340] sm:$0xff]  ;;  %v559_v27 = vld [vmem:[%s2946_s14 + $0x1348] sm:$0xff]  ;;  %556 = vst [vmem:[%s2954_s15 + $0x4c8] sm:$0xff] %v555_v25 }
  0x5f   : > { %558 = vst [vmem:[%s2954_s15 + $0x4d0] sm:$0xff] %v557_v26  ;;  %560 = vst [vmem:[%s2954_s15 + $0x4d8] sm:$0xff] %v559_v27  ;;  %v561_v28 = vld [vmem:[%s2946_s14 + $0x1380] sm:$0xff]  ;;  %v563_v29 = vld [vmem:[%s2946_s14 + $0x1388] sm:$0xff] }
  0x60   : > { %v565_v30 = vld [vmem:[%s2946_s14 + $0x13c0] sm:$0xff]  ;;  %562 = vst [vmem:[%s2954_s15 + $0x4e0] sm:$0xff] %v561_v28  ;;  %564 = vst [vmem:[%s2954_s15 + $0x4e8] sm:$0xff] %v563_v29  ;;  %v567_v31 = vld [vmem:[%s2946_s14 + $0x13c8] sm:$0xff] }
  0x61   : > { %566 = vst [vmem:[%s2954_s15 + $0x4f0] sm:$0xff] %v565_v30  ;;  %v569_v32 = vld [vmem:[%s2946_s14 + $0x1400] sm:$0xff]  ;;  %v571_v33 = vld [vmem:[%s2946_s14 + $0x1408] sm:$0xff]  ;;  %568 = vst [vmem:[%s2954_s15 + $0x4f8] sm:$0xff] %v567_v31 }
  0x62   : > { %570 = vst [vmem:[%s2954_s15 + $0x500] sm:$0xff] %v569_v32  ;;  %572 = vst [vmem:[%s2954_s15 + $0x508] sm:$0xff] %v571_v33  ;;  %v573_v34 = vld [vmem:[%s2946_s14 + $0x1440] sm:$0xff]  ;;  %v575_v35 = vld [vmem:[%s2946_s14 + $0x1448] sm:$0xff] }
  0x63   : > { %v577_v36 = vld [vmem:[%s2946_s14 + $0x1480] sm:$0xff]  ;;  %574 = vst [vmem:[%s2954_s15 + $0x510] sm:$0xff] %v573_v34  ;;  %576 = vst [vmem:[%s2954_s15 + $0x518] sm:$0xff] %v575_v35  ;;  %v579_v37 = vld [vmem:[%s2946_s14 + $0x1488] sm:$0xff] }
  0x64   : > { %578 = vst [vmem:[%s2954_s15 + $0x520] sm:$0xff] %v577_v36  ;;  %v581_v38 = vld [vmem:[%s2946_s14 + $0x14c0] sm:$0xff]  ;;  %v583_v39 = vld [vmem:[%s2946_s14 + $0x14c8] sm:$0xff]  ;;  %580 = vst [vmem:[%s2954_s15 + $0x528] sm:$0xff] %v579_v37 }
  0x65   : > { %582 = vst [vmem:[%s2954_s15 + $0x530] sm:$0xff] %v581_v38  ;;  %584 = vst [vmem:[%s2954_s15 + $0x538] sm:$0xff] %v583_v39  ;;  %v585_v40 = vld [vmem:[%s2946_s14 + $0x1500] sm:$0xff]  ;;  %v587_v41 = vld [vmem:[%s2946_s14 + $0x1508] sm:$0xff] }
  0x66   : > { %v589_v42 = vld [vmem:[%s2946_s14 + $0x1540] sm:$0xff]  ;;  %586 = vst [vmem:[%s2954_s15 + $0x540] sm:$0xff] %v585_v40  ;;  %588 = vst [vmem:[%s2954_s15 + $0x548] sm:$0xff] %v587_v41  ;;  %v591_v43 = vld [vmem:[%s2946_s14 + $0x1548] sm:$0xff] }
  0x67   : > { %590 = vst [vmem:[%s2954_s15 + $0x550] sm:$0xff] %v589_v42  ;;  %v593_v44 = vld [vmem:[%s2946_s14 + $0x1580] sm:$0xff]  ;;  %v595_v45 = vld [vmem:[%s2946_s14 + $0x1588] sm:$0xff]  ;;  %592 = vst [vmem:[%s2954_s15 + $0x558] sm:$0xff] %v591_v43 }
  0x68   : > { %594 = vst [vmem:[%s2954_s15 + $0x560] sm:$0xff] %v593_v44  ;;  %596 = vst [vmem:[%s2954_s15 + $0x568] sm:$0xff] %v595_v45  ;;  %v597_v46 = vld [vmem:[%s2946_s14 + $0x15c0] sm:$0xff]  ;;  %v599_v47 = vld [vmem:[%s2946_s14 + $0x15c8] sm:$0xff] }
  0x69   : > { %v601_v48 = vld [vmem:[%s2946_s14 + $0x1600] sm:$0xff]  ;;  %598 = vst [vmem:[%s2954_s15 + $0x570] sm:$0xff] %v597_v46  ;;  %600 = vst [vmem:[%s2954_s15 + $0x578] sm:$0xff] %v599_v47  ;;  %v603_v49 = vld [vmem:[%s2946_s14 + $0x1608] sm:$0xff] }
  0x6a   : > { %602 = vst [vmem:[%s2954_s15 + $0x580] sm:$0xff] %v601_v48  ;;  %v605_v50 = vld [vmem:[%s2946_s14 + $0x1640] sm:$0xff]  ;;  %v607_v51 = vld [vmem:[%s2946_s14 + $0x1648] sm:$0xff]  ;;  %604 = vst [vmem:[%s2954_s15 + $0x588] sm:$0xff] %v603_v49 }
  0x6b   : > { %606 = vst [vmem:[%s2954_s15 + $0x590] sm:$0xff] %v605_v50  ;;  %608 = vst [vmem:[%s2954_s15 + $0x598] sm:$0xff] %v607_v51  ;;  %v609_v52 = vld [vmem:[%s2946_s14 + $0x1680] sm:$0xff]  ;;  %v611_v53 = vld [vmem:[%s2946_s14 + $0x1688] sm:$0xff] }
  0x6c   : > { %v613_v54 = vld [vmem:[%s2946_s14 + $0x16c0] sm:$0xff]  ;;  %610 = vst [vmem:[%s2954_s15 + $0x5a0] sm:$0xff] %v609_v52  ;;  %612 = vst [vmem:[%s2954_s15 + $0x5a8] sm:$0xff] %v611_v53  ;;  %v615_v55 = vld [vmem:[%s2946_s14 + $0x16c8] sm:$0xff] }
  0x6d   : > { %614 = vst [vmem:[%s2954_s15 + $0x5b0] sm:$0xff] %v613_v54  ;;  %v617_v56 = vld [vmem:[%s2946_s14 + $0x1700] sm:$0xff]  ;;  %v619_v57 = vld [vmem:[%s2946_s14 + $0x1708] sm:$0xff]  ;;  %616 = vst [vmem:[%s2954_s15 + $0x5b8] sm:$0xff] %v615_v55 }
  0x6e   : > { %618 = vst [vmem:[%s2954_s15 + $0x5c0] sm:$0xff] %v617_v56  ;;  %620 = vst [vmem:[%s2954_s15 + $0x5c8] sm:$0xff] %v619_v57  ;;  %v621_v58 = vld [vmem:[%s2946_s14 + $0x1740] sm:$0xff]  ;;  %v623_v59 = vld [vmem:[%s2946_s14 + $0x1748] sm:$0xff] }
  0x6f   : > { %v625_v60 = vld [vmem:[%s2946_s14 + $0x1780] sm:$0xff]  ;;  %622 = vst [vmem:[%s2954_s15 + $0x5d0] sm:$0xff] %v621_v58  ;;  %624 = vst [vmem:[%s2954_s15 + $0x5d8] sm:$0xff] %v623_v59  ;;  %v627_v61 = vld [vmem:[%s2946_s14 + $0x1788] sm:$0xff] }
  0x70   : > { %626 = vst [vmem:[%s2954_s15 + $0x5e0] sm:$0xff] %v625_v60  ;;  %v629_v62 = vld [vmem:[%s2946_s14 + $0x17c0] sm:$0xff]  ;;  %v631_v63 = vld [vmem:[%s2946_s14 + $0x17c8] sm:$0xff]  ;;  %628 = vst [vmem:[%s2954_s15 + $0x5e8] sm:$0xff] %v627_v61 }
  0x71   : > { %630 = vst [vmem:[%s2954_s15 + $0x5f0] sm:$0xff] %v629_v62  ;;  %632 = vst [vmem:[%s2954_s15 + $0x5f8] sm:$0xff] %v631_v63  ;;  %v633_v0 = vld [vmem:[%s2946_s14 + $0x1800] sm:$0xff]  ;;  %v635_v1 = vld [vmem:[%s2946_s14 + $0x1808] sm:$0xff] }
  0x72   : > { %v637_v2 = vld [vmem:[%s2946_s14 + $0x1840] sm:$0xff]  ;;  %634 = vst [vmem:[%s2954_s15 + $0x600] sm:$0xff] %v633_v0  ;;  %636 = vst [vmem:[%s2954_s15 + $0x608] sm:$0xff] %v635_v1  ;;  %v639_v3 = vld [vmem:[%s2946_s14 + $0x1848] sm:$0xff] }
  0x73   : > { %638 = vst [vmem:[%s2954_s15 + $0x610] sm:$0xff] %v637_v2  ;;  %v641_v4 = vld [vmem:[%s2946_s14 + $0x1880] sm:$0xff]  ;;  %v643_v5 = vld [vmem:[%s2946_s14 + $0x1888] sm:$0xff]  ;;  %640 = vst [vmem:[%s2954_s15 + $0x618] sm:$0xff] %v639_v3 }
  0x74   : > { %642 = vst [vmem:[%s2954_s15 + $0x620] sm:$0xff] %v641_v4  ;;  %644 = vst [vmem:[%s2954_s15 + $0x628] sm:$0xff] %v643_v5  ;;  %v645_v6 = vld [vmem:[%s2946_s14 + $0x18c0] sm:$0xff]  ;;  %v647_v7 = vld [vmem:[%s2946_s14 + $0x18c8] sm:$0xff] }
  0x75   : > { %v649_v8 = vld [vmem:[%s2946_s14 + $0x1900] sm:$0xff]  ;;  %646 = vst [vmem:[%s2954_s15 + $0x630] sm:$0xff] %v645_v6  ;;  %648 = vst [vmem:[%s2954_s15 + $0x638] sm:$0xff] %v647_v7  ;;  %v651_v9 = vld [vmem:[%s2946_s14 + $0x1908] sm:$0xff] }
  0x76   : > { %650 = vst [vmem:[%s2954_s15 + $0x640] sm:$0xff] %v649_v8  ;;  %v653_v10 = vld [vmem:[%s2946_s14 + $0x1940] sm:$0xff]  ;;  %v655_v11 = vld [vmem:[%s2946_s14 + $0x1948] sm:$0xff]  ;;  %652 = vst [vmem:[%s2954_s15 + $0x648] sm:$0xff] %v651_v9 }
  0x77   : > { %654 = vst [vmem:[%s2954_s15 + $0x650] sm:$0xff] %v653_v10  ;;  %656 = vst [vmem:[%s2954_s15 + $0x658] sm:$0xff] %v655_v11  ;;  %v657_v12 = vld [vmem:[%s2946_s14 + $0x1980] sm:$0xff]  ;;  %v659_v13 = vld [vmem:[%s2946_s14 + $0x1988] sm:$0xff] }
  0x78   : > { %v661_v14 = vld [vmem:[%s2946_s14 + $0x19c0] sm:$0xff]  ;;  %658 = vst [vmem:[%s2954_s15 + $0x660] sm:$0xff] %v657_v12  ;;  %660 = vst [vmem:[%s2954_s15 + $0x668] sm:$0xff] %v659_v13  ;;  %v663_v15 = vld [vmem:[%s2946_s14 + $0x19c8] sm:$0xff] }
  0x79   : > { %662 = vst [vmem:[%s2954_s15 + $0x670] sm:$0xff] %v661_v14  ;;  %v665_v16 = vld [vmem:[%s2946_s14 + $0x1a00] sm:$0xff]  ;;  %v667_v17 = vld [vmem:[%s2946_s14 + $0x1a08] sm:$0xff]  ;;  %664 = vst [vmem:[%s2954_s15 + $0x678] sm:$0xff] %v663_v15 }
  0x7a   : > { %666 = vst [vmem:[%s2954_s15 + $0x680] sm:$0xff] %v665_v16  ;;  %668 = vst [vmem:[%s2954_s15 + $0x688] sm:$0xff] %v667_v17  ;;  %v669_v18 = vld [vmem:[%s2946_s14 + $0x1a40] sm:$0xff]  ;;  %v671_v19 = vld [vmem:[%s2946_s14 + $0x1a48] sm:$0xff] }
  0x7b   : > { %v673_v20 = vld [vmem:[%s2946_s14 + $0x1a80] sm:$0xff]  ;;  %670 = vst [vmem:[%s2954_s15 + $0x690] sm:$0xff] %v669_v18  ;;  %672 = vst [vmem:[%s2954_s15 + $0x698] sm:$0xff] %v671_v19  ;;  %v675_v21 = vld [vmem:[%s2946_s14 + $0x1a88] sm:$0xff] }
  0x7c   : > { %674 = vst [vmem:[%s2954_s15 + $0x6a0] sm:$0xff] %v673_v20  ;;  %v677_v22 = vld [vmem:[%s2946_s14 + $0x1ac0] sm:$0xff]  ;;  %v679_v23 = vld [vmem:[%s2946_s14 + $0x1ac8] sm:$0xff]  ;;  %676 = vst [vmem:[%s2954_s15 + $0x6a8] sm:$0xff] %v675_v21 }
  0x7d   : > { %678 = vst [vmem:[%s2954_s15 + $0x6b0] sm:$0xff] %v677_v22  ;;  %680 = vst [vmem:[%s2954_s15 + $0x6b8] sm:$0xff] %v679_v23  ;;  %v681_v24 = vld [vmem:[%s2946_s14 + $0x1b00] sm:$0xff]  ;;  %v683_v25 = vld [vmem:[%s2946_s14 + $0x1b08] sm:$0xff] }
  0x7e   : > { %v685_v26 = vld [vmem:[%s2946_s14 + $0x1b40] sm:$0xff]  ;;  %682 = vst [vmem:[%s2954_s15 + $0x6c0] sm:$0xff] %v681_v24  ;;  %684 = vst [vmem:[%s2954_s15 + $0x6c8] sm:$0xff] %v683_v25  ;;  %v687_v27 = vld [vmem:[%s2946_s14 + $0x1b48] sm:$0xff] }
  0x7f   : > { %686 = vst [vmem:[%s2954_s15 + $0x6d0] sm:$0xff] %v685_v26  ;;  %v689_v28 = vld [vmem:[%s2946_s14 + $0x1b80] sm:$0xff]  ;;  %v691_v29 = vld [vmem:[%s2946_s14 + $0x1b88] sm:$0xff]  ;;  %688 = vst [vmem:[%s2954_s15 + $0x6d8] sm:$0xff] %v687_v27 }
  0x80   : > { %690 = vst [vmem:[%s2954_s15 + $0x6e0] sm:$0xff] %v689_v28  ;;  %692 = vst [vmem:[%s2954_s15 + $0x6e8] sm:$0xff] %v691_v29  ;;  %v693_v30 = vld [vmem:[%s2946_s14 + $0x1bc0] sm:$0xff]  ;;  %v695_v31 = vld [vmem:[%s2946_s14 + $0x1bc8] sm:$0xff] }
  0x81   : > { %v697_v32 = vld [vmem:[%s2946_s14 + $0x1c00] sm:$0xff]  ;;  %694 = vst [vmem:[%s2954_s15 + $0x6f0] sm:$0xff] %v693_v30  ;;  %696 = vst [vmem:[%s2954_s15 + $0x6f8] sm:$0xff] %v695_v31  ;;  %v699_v33 = vld [vmem:[%s2946_s14 + $0x1c08] sm:$0xff] }
  0x82   : > { %698 = vst [vmem:[%s2954_s15 + $0x700] sm:$0xff] %v697_v32  ;;  %v701_v34 = vld [vmem:[%s2946_s14 + $0x1c40] sm:$0xff]  ;;  %v703_v35 = vld [vmem:[%s2946_s14 + $0x1c48] sm:$0xff]  ;;  %700 = vst [vmem:[%s2954_s15 + $0x708] sm:$0xff] %v699_v33 }
  0x83   : > { %702 = vst [vmem:[%s2954_s15 + $0x710] sm:$0xff] %v701_v34  ;;  %704 = vst [vmem:[%s2954_s15 + $0x718] sm:$0xff] %v703_v35  ;;  %v705_v36 = vld [vmem:[%s2946_s14 + $0x1c80] sm:$0xff]  ;;  %v707_v37 = vld [vmem:[%s2946_s14 + $0x1c88] sm:$0xff] }
  0x84   : > { %v709_v38 = vld [vmem:[%s2946_s14 + $0x1cc0] sm:$0xff]  ;;  %706 = vst [vmem:[%s2954_s15 + $0x720] sm:$0xff] %v705_v36  ;;  %708 = vst [vmem:[%s2954_s15 + $0x728] sm:$0xff] %v707_v37  ;;  %v711_v39 = vld [vmem:[%s2946_s14 + $0x1cc8] sm:$0xff] }
  0x85   : > { %710 = vst [vmem:[%s2954_s15 + $0x730] sm:$0xff] %v709_v38  ;;  %v713_v40 = vld [vmem:[%s2946_s14 + $0x1d00] sm:$0xff]  ;;  %v715_v41 = vld [vmem:[%s2946_s14 + $0x1d08] sm:$0xff]  ;;  %712 = vst [vmem:[%s2954_s15 + $0x738] sm:$0xff] %v711_v39 }
  0x86   : > { %714 = vst [vmem:[%s2954_s15 + $0x740] sm:$0xff] %v713_v40  ;;  %716 = vst [vmem:[%s2954_s15 + $0x748] sm:$0xff] %v715_v41  ;;  %v717_v42 = vld [vmem:[%s2946_s14 + $0x1d40] sm:$0xff]  ;;  %v719_v43 = vld [vmem:[%s2946_s14 + $0x1d48] sm:$0xff] }
  0x87   : > { %v721_v44 = vld [vmem:[%s2946_s14 + $0x1d80] sm:$0xff]  ;;  %718 = vst [vmem:[%s2954_s15 + $0x750] sm:$0xff] %v717_v42  ;;  %720 = vst [vmem:[%s2954_s15 + $0x758] sm:$0xff] %v719_v43  ;;  %v723_v45 = vld [vmem:[%s2946_s14 + $0x1d88] sm:$0xff] }
  0x88   : > { %722 = vst [vmem:[%s2954_s15 + $0x760] sm:$0xff] %v721_v44  ;;  %v725_v46 = vld [vmem:[%s2946_s14 + $0x1dc0] sm:$0xff]  ;;  %v727_v47 = vld [vmem:[%s2946_s14 + $0x1dc8] sm:$0xff]  ;;  %724 = vst [vmem:[%s2954_s15 + $0x768] sm:$0xff] %v723_v45 }
  0x89   : > { %726 = vst [vmem:[%s2954_s15 + $0x770] sm:$0xff] %v725_v46  ;;  %728 = vst [vmem:[%s2954_s15 + $0x778] sm:$0xff] %v727_v47  ;;  %v729_v48 = vld [vmem:[%s2946_s14 + $0x1e00] sm:$0xff]  ;;  %v731_v49 = vld [vmem:[%s2946_s14 + $0x1e08] sm:$0xff] }
  0x8a   : > { %v733_v50 = vld [vmem:[%s2946_s14 + $0x1e40] sm:$0xff]  ;;  %730 = vst [vmem:[%s2954_s15 + $0x780] sm:$0xff] %v729_v48  ;;  %732 = vst [vmem:[%s2954_s15 + $0x788] sm:$0xff] %v731_v49  ;;  %v735_v51 = vld [vmem:[%s2946_s14 + $0x1e48] sm:$0xff] }
  0x8b   : > { %734 = vst [vmem:[%s2954_s15 + $0x790] sm:$0xff] %v733_v50  ;;  %v737_v52 = vld [vmem:[%s2946_s14 + $0x1e80] sm:$0xff]  ;;  %v739_v53 = vld [vmem:[%s2946_s14 + $0x1e88] sm:$0xff]  ;;  %736 = vst [vmem:[%s2954_s15 + $0x798] sm:$0xff] %v735_v51 }
  0x8c   : > { %738 = vst [vmem:[%s2954_s15 + $0x7a0] sm:$0xff] %v737_v52  ;;  %740 = vst [vmem:[%s2954_s15 + $0x7a8] sm:$0xff] %v739_v53  ;;  %v741_v54 = vld [vmem:[%s2946_s14 + $0x1ec0] sm:$0xff]  ;;  %v743_v55 = vld [vmem:[%s2946_s14 + $0x1ec8] sm:$0xff] }
  0x8d   : > { %v745_v56 = vld [vmem:[%s2946_s14 + $0x1f00] sm:$0xff]  ;;  %742 = vst [vmem:[%s2954_s15 + $0x7b0] sm:$0xff] %v741_v54  ;;  %744 = vst [vmem:[%s2954_s15 + $0x7b8] sm:$0xff] %v743_v55  ;;  %v747_v57 = vld [vmem:[%s2946_s14 + $0x1f08] sm:$0xff] }
  0x8e   : > { %746 = vst [vmem:[%s2954_s15 + $0x7c0] sm:$0xff] %v745_v56  ;;  %v749_v58 = vld [vmem:[%s2946_s14 + $0x1f40] sm:$0xff]  ;;  %v751_v59 = vld [vmem:[%s2946_s14 + $0x1f48] sm:$0xff]  ;;  %748 = vst [vmem:[%s2954_s15 + $0x7c8] sm:$0xff] %v747_v57 }
  0x8f   : > { %750 = vst [vmem:[%s2954_s15 + $0x7d0] sm:$0xff] %v749_v58  ;;  %752 = vst [vmem:[%s2954_s15 + $0x7d8] sm:$0xff] %v751_v59  ;;  %v753_v60 = vld [vmem:[%s2946_s14 + $0x1f80] sm:$0xff]  ;;  %v755_v61 = vld [vmem:[%s2946_s14 + $0x1f88] sm:$0xff] }
  0x90   : > { %v757_v62 = vld [vmem:[%s2946_s14 + $0x1fc0] sm:$0xff]  ;;  %754 = vst [vmem:[%s2954_s15 + $0x7e0] sm:$0xff] %v753_v60  ;;  %756 = vst [vmem:[%s2954_s15 + $0x7e8] sm:$0xff] %v755_v61  ;;  %v759_v63 = vld [vmem:[%s2946_s14 + $0x1fc8] sm:$0xff] }
  0x91   : > { %758 = vst [vmem:[%s2954_s15 + $0x7f0] sm:$0xff] %v757_v62  ;;  %v761_v0 = vld [vmem:[%s2946_s14 + $0x2000] sm:$0xff]  ;;  %v763_v1 = vld [vmem:[%s2946_s14 + $0x2008] sm:$0xff]  ;;  %760 = vst [vmem:[%s2954_s15 + $0x7f8] sm:$0xff] %v759_v63 }
  0x92   : > { %762 = vst [vmem:[%s2954_s15 + $0x800] sm:$0xff] %v761_v0  ;;  %764 = vst [vmem:[%s2954_s15 + $0x808] sm:$0xff] %v763_v1  ;;  %v765_v2 = vld [vmem:[%s2946_s14 + $0x2040] sm:$0xff]  ;;  %v767_v3 = vld [vmem:[%s2946_s14 + $0x2048] sm:$0xff] }
  0x93   : > { %v769_v4 = vld [vmem:[%s2946_s14 + $0x2080] sm:$0xff]  ;;  %766 = vst [vmem:[%s2954_s15 + $0x810] sm:$0xff] %v765_v2  ;;  %768 = vst [vmem:[%s2954_s15 + $0x818] sm:$0xff] %v767_v3  ;;  %v771_v5 = vld [vmem:[%s2946_s14 + $0x2088] sm:$0xff] }
  0x94   : > { %770 = vst [vmem:[%s2954_s15 + $0x820] sm:$0xff] %v769_v4  ;;  %v773_v6 = vld [vmem:[%s2946_s14 + $0x20c0] sm:$0xff]  ;;  %v775_v7 = vld [vmem:[%s2946_s14 + $0x20c8] sm:$0xff]  ;;  %772 = vst [vmem:[%s2954_s15 + $0x828] sm:$0xff] %v771_v5 }
  0x95   : > { %774 = vst [vmem:[%s2954_s15 + $0x830] sm:$0xff] %v773_v6  ;;  %776 = vst [vmem:[%s2954_s15 + $0x838] sm:$0xff] %v775_v7  ;;  %v777_v8 = vld [vmem:[%s2946_s14 + $0x2100] sm:$0xff]  ;;  %v779_v9 = vld [vmem:[%s2946_s14 + $0x2108] sm:$0xff] }
  0x96   : > { %v781_v10 = vld [vmem:[%s2946_s14 + $0x2140] sm:$0xff]  ;;  %778 = vst [vmem:[%s2954_s15 + $0x840] sm:$0xff] %v777_v8  ;;  %780 = vst [vmem:[%s2954_s15 + $0x848] sm:$0xff] %v779_v9  ;;  %v783_v11 = vld [vmem:[%s2946_s14 + $0x2148] sm:$0xff] }
  0x97   : > { %782 = vst [vmem:[%s2954_s15 + $0x850] sm:$0xff] %v781_v10  ;;  %v785_v12 = vld [vmem:[%s2946_s14 + $0x2180] sm:$0xff]  ;;  %v787_v13 = vld [vmem:[%s2946_s14 + $0x2188] sm:$0xff]  ;;  %784 = vst [vmem:[%s2954_s15 + $0x858] sm:$0xff] %v783_v11 }
  0x98   : > { %786 = vst [vmem:[%s2954_s15 + $0x860] sm:$0xff] %v785_v12  ;;  %788 = vst [vmem:[%s2954_s15 + $0x868] sm:$0xff] %v787_v13  ;;  %v789_v14 = vld [vmem:[%s2946_s14 + $0x21c0] sm:$0xff]  ;;  %v791_v15 = vld [vmem:[%s2946_s14 + $0x21c8] sm:$0xff] }
  0x99   : > { %v793_v16 = vld [vmem:[%s2946_s14 + $0x2200] sm:$0xff]  ;;  %790 = vst [vmem:[%s2954_s15 + $0x870] sm:$0xff] %v789_v14  ;;  %792 = vst [vmem:[%s2954_s15 + $0x878] sm:$0xff] %v791_v15  ;;  %v795_v17 = vld [vmem:[%s2946_s14 + $0x2208] sm:$0xff] }
  0x9a   : > { %794 = vst [vmem:[%s2954_s15 + $0x880] sm:$0xff] %v793_v16  ;;  %v797_v18 = vld [vmem:[%s2946_s14 + $0x2240] sm:$0xff]  ;;  %v799_v19 = vld [vmem:[%s2946_s14 + $0x2248] sm:$0xff]  ;;  %796 = vst [vmem:[%s2954_s15 + $0x888] sm:$0xff] %v795_v17 }
  0x9b   : > { %798 = vst [vmem:[%s2954_s15 + $0x890] sm:$0xff] %v797_v18  ;;  %800 = vst [vmem:[%s2954_s15 + $0x898] sm:$0xff] %v799_v19  ;;  %v801_v20 = vld [vmem:[%s2946_s14 + $0x2280] sm:$0xff]  ;;  %v803_v21 = vld [vmem:[%s2946_s14 + $0x2288] sm:$0xff] }
  0x9c   : > { %v805_v22 = vld [vmem:[%s2946_s14 + $0x22c0] sm:$0xff]  ;;  %802 = vst [vmem:[%s2954_s15 + $0x8a0] sm:$0xff] %v801_v20  ;;  %804 = vst [vmem:[%s2954_s15 + $0x8a8] sm:$0xff] %v803_v21  ;;  %v807_v23 = vld [vmem:[%s2946_s14 + $0x22c8] sm:$0xff] }
  0x9d   : > { %806 = vst [vmem:[%s2954_s15 + $0x8b0] sm:$0xff] %v805_v22  ;;  %v809_v24 = vld [vmem:[%s2946_s14 + $0x2300] sm:$0xff]  ;;  %v811_v25 = vld [vmem:[%s2946_s14 + $0x2308] sm:$0xff]  ;;  %808 = vst [vmem:[%s2954_s15 + $0x8b8] sm:$0xff] %v807_v23 }
  0x9e   : > { %810 = vst [vmem:[%s2954_s15 + $0x8c0] sm:$0xff] %v809_v24  ;;  %812 = vst [vmem:[%s2954_s15 + $0x8c8] sm:$0xff] %v811_v25  ;;  %v813_v26 = vld [vmem:[%s2946_s14 + $0x2340] sm:$0xff]  ;;  %v815_v27 = vld [vmem:[%s2946_s14 + $0x2348] sm:$0xff] }
  0x9f   : > { %v817_v28 = vld [vmem:[%s2946_s14 + $0x2380] sm:$0xff]  ;;  %814 = vst [vmem:[%s2954_s15 + $0x8d0] sm:$0xff] %v813_v26  ;;  %816 = vst [vmem:[%s2954_s15 + $0x8d8] sm:$0xff] %v815_v27  ;;  %v819_v29 = vld [vmem:[%s2946_s14 + $0x2388] sm:$0xff] }
  0xa0   : > { %818 = vst [vmem:[%s2954_s15 + $0x8e0] sm:$0xff] %v817_v28  ;;  %v821_v30 = vld [vmem:[%s2946_s14 + $0x23c0] sm:$0xff]  ;;  %v823_v31 = vld [vmem:[%s2946_s14 + $0x23c8] sm:$0xff]  ;;  %820 = vst [vmem:[%s2954_s15 + $0x8e8] sm:$0xff] %v819_v29 }
  0xa1   : > { %822 = vst [vmem:[%s2954_s15 + $0x8f0] sm:$0xff] %v821_v30  ;;  %824 = vst [vmem:[%s2954_s15 + $0x8f8] sm:$0xff] %v823_v31  ;;  %v825_v32 = vld [vmem:[%s2946_s14 + $0x2400] sm:$0xff]  ;;  %v827_v33 = vld [vmem:[%s2946_s14 + $0x2408] sm:$0xff] }
  0xa2   : > { %v829_v34 = vld [vmem:[%s2946_s14 + $0x2440] sm:$0xff]  ;;  %826 = vst [vmem:[%s2954_s15 + $0x900] sm:$0xff] %v825_v32  ;;  %828 = vst [vmem:[%s2954_s15 + $0x908] sm:$0xff] %v827_v33  ;;  %v831_v35 = vld [vmem:[%s2946_s14 + $0x2448] sm:$0xff] }
  0xa3   : > { %830 = vst [vmem:[%s2954_s15 + $0x910] sm:$0xff] %v829_v34  ;;  %v833_v36 = vld [vmem:[%s2946_s14 + $0x2480] sm:$0xff]  ;;  %v835_v37 = vld [vmem:[%s2946_s14 + $0x2488] sm:$0xff]  ;;  %832 = vst [vmem:[%s2954_s15 + $0x918] sm:$0xff] %v831_v35 }
  0xa4   : > { %834 = vst [vmem:[%s2954_s15 + $0x920] sm:$0xff] %v833_v36  ;;  %836 = vst [vmem:[%s2954_s15 + $0x928] sm:$0xff] %v835_v37  ;;  %v837_v38 = vld [vmem:[%s2946_s14 + $0x24c0] sm:$0xff]  ;;  %v839_v39 = vld [vmem:[%s2946_s14 + $0x24c8] sm:$0xff] }
  0xa5   : > { %v841_v40 = vld [vmem:[%s2946_s14 + $0x2500] sm:$0xff]  ;;  %838 = vst [vmem:[%s2954_s15 + $0x930] sm:$0xff] %v837_v38  ;;  %840 = vst [vmem:[%s2954_s15 + $0x938] sm:$0xff] %v839_v39  ;;  %v843_v41 = vld [vmem:[%s2946_s14 + $0x2508] sm:$0xff] }
  0xa6   : > { %842 = vst [vmem:[%s2954_s15 + $0x940] sm:$0xff] %v841_v40  ;;  %v845_v42 = vld [vmem:[%s2946_s14 + $0x2540] sm:$0xff]  ;;  %v847_v43 = vld [vmem:[%s2946_s14 + $0x2548] sm:$0xff]  ;;  %844 = vst [vmem:[%s2954_s15 + $0x948] sm:$0xff] %v843_v41 }
  0xa7   : > { %846 = vst [vmem:[%s2954_s15 + $0x950] sm:$0xff] %v845_v42  ;;  %848 = vst [vmem:[%s2954_s15 + $0x958] sm:$0xff] %v847_v43  ;;  %v849_v44 = vld [vmem:[%s2946_s14 + $0x2580] sm:$0xff]  ;;  %v851_v45 = vld [vmem:[%s2946_s14 + $0x2588] sm:$0xff] }
  0xa8   : > { %v853_v46 = vld [vmem:[%s2946_s14 + $0x25c0] sm:$0xff]  ;;  %850 = vst [vmem:[%s2954_s15 + $0x960] sm:$0xff] %v849_v44  ;;  %852 = vst [vmem:[%s2954_s15 + $0x968] sm:$0xff] %v851_v45  ;;  %v855_v47 = vld [vmem:[%s2946_s14 + $0x25c8] sm:$0xff] }
  0xa9   : > { %854 = vst [vmem:[%s2954_s15 + $0x970] sm:$0xff] %v853_v46  ;;  %v857_v48 = vld [vmem:[%s2946_s14 + $0x2600] sm:$0xff]  ;;  %v859_v49 = vld [vmem:[%s2946_s14 + $0x2608] sm:$0xff]  ;;  %856 = vst [vmem:[%s2954_s15 + $0x978] sm:$0xff] %v855_v47 }
  0xaa   : > { %858 = vst [vmem:[%s2954_s15 + $0x980] sm:$0xff] %v857_v48  ;;  %860 = vst [vmem:[%s2954_s15 + $0x988] sm:$0xff] %v859_v49  ;;  %v861_v50 = vld [vmem:[%s2946_s14 + $0x2640] sm:$0xff]  ;;  %v863_v51 = vld [vmem:[%s2946_s14 + $0x2648] sm:$0xff] }
  0xab   : > { %v865_v52 = vld [vmem:[%s2946_s14 + $0x2680] sm:$0xff]  ;;  %862 = vst [vmem:[%s2954_s15 + $0x990] sm:$0xff] %v861_v50  ;;  %864 = vst [vmem:[%s2954_s15 + $0x998] sm:$0xff] %v863_v51  ;;  %v867_v53 = vld [vmem:[%s2946_s14 + $0x2688] sm:$0xff] }
  0xac   : > { %866 = vst [vmem:[%s2954_s15 + $0x9a0] sm:$0xff] %v865_v52  ;;  %v869_v54 = vld [vmem:[%s2946_s14 + $0x26c0] sm:$0xff]  ;;  %v871_v55 = vld [vmem:[%s2946_s14 + $0x26c8] sm:$0xff]  ;;  %868 = vst [vmem:[%s2954_s15 + $0x9a8] sm:$0xff] %v867_v53 }
  0xad   : > { %870 = vst [vmem:[%s2954_s15 + $0x9b0] sm:$0xff] %v869_v54  ;;  %872 = vst [vmem:[%s2954_s15 + $0x9b8] sm:$0xff] %v871_v55  ;;  %v873_v56 = vld [vmem:[%s2946_s14 + $0x2700] sm:$0xff]  ;;  %v875_v57 = vld [vmem:[%s2946_s14 + $0x2708] sm:$0xff] }
  0xae   : > { %v877_v58 = vld [vmem:[%s2946_s14 + $0x2740] sm:$0xff]  ;;  %874 = vst [vmem:[%s2954_s15 + $0x9c0] sm:$0xff] %v873_v56  ;;  %876 = vst [vmem:[%s2954_s15 + $0x9c8] sm:$0xff] %v875_v57  ;;  %v879_v59 = vld [vmem:[%s2946_s14 + $0x2748] sm:$0xff] }
  0xaf   : > { %878 = vst [vmem:[%s2954_s15 + $0x9d0] sm:$0xff] %v877_v58  ;;  %v881_v60 = vld [vmem:[%s2946_s14 + $0x2780] sm:$0xff]  ;;  %v883_v61 = vld [vmem:[%s2946_s14 + $0x2788] sm:$0xff]  ;;  %880 = vst [vmem:[%s2954_s15 + $0x9d8] sm:$0xff] %v879_v59 }
  0xb0   : > { %882 = vst [vmem:[%s2954_s15 + $0x9e0] sm:$0xff] %v881_v60  ;;  %884 = vst [vmem:[%s2954_s15 + $0x9e8] sm:$0xff] %v883_v61  ;;  %v885_v62 = vld [vmem:[%s2946_s14 + $0x27c0] sm:$0xff]  ;;  %v887_v63 = vld [vmem:[%s2946_s14 + $0x27c8] sm:$0xff] }
  0xb1   : > { %v889_v0 = vld [vmem:[%s2946_s14 + $0x2800] sm:$0xff]  ;;  %886 = vst [vmem:[%s2954_s15 + $0x9f0] sm:$0xff] %v885_v62  ;;  %888 = vst [vmem:[%s2954_s15 + $0x9f8] sm:$0xff] %v887_v63  ;;  %v891_v1 = vld [vmem:[%s2946_s14 + $0x2808] sm:$0xff] }
  0xb2   : > { %890 = vst [vmem:[%s2954_s15 + $0xa00] sm:$0xff] %v889_v0  ;;  %v893_v2 = vld [vmem:[%s2946_s14 + $0x2840] sm:$0xff]  ;;  %v895_v3 = vld [vmem:[%s2946_s14 + $0x2848] sm:$0xff]  ;;  %892 = vst [vmem:[%s2954_s15 + $0xa08] sm:$0xff] %v891_v1 }
  0xb3   : > { %894 = vst [vmem:[%s2954_s15 + $0xa10] sm:$0xff] %v893_v2  ;;  %896 = vst [vmem:[%s2954_s15 + $0xa18] sm:$0xff] %v895_v3  ;;  %v897_v4 = vld [vmem:[%s2946_s14 + $0x2880] sm:$0xff]  ;;  %v899_v5 = vld [vmem:[%s2946_s14 + $0x2888] sm:$0xff] }
  0xb4   : > { %v901_v6 = vld [vmem:[%s2946_s14 + $0x28c0] sm:$0xff]  ;;  %898 = vst [vmem:[%s2954_s15 + $0xa20] sm:$0xff] %v897_v4  ;;  %900 = vst [vmem:[%s2954_s15 + $0xa28] sm:$0xff] %v899_v5  ;;  %v903_v7 = vld [vmem:[%s2946_s14 + $0x28c8] sm:$0xff] }
  0xb5   : > { %902 = vst [vmem:[%s2954_s15 + $0xa30] sm:$0xff] %v901_v6  ;;  %v905_v8 = vld [vmem:[%s2946_s14 + $0x2900] sm:$0xff]  ;;  %v907_v9 = vld [vmem:[%s2946_s14 + $0x2908] sm:$0xff]  ;;  %904 = vst [vmem:[%s2954_s15 + $0xa38] sm:$0xff] %v903_v7 }
  0xb6   : > { %906 = vst [vmem:[%s2954_s15 + $0xa40] sm:$0xff] %v905_v8  ;;  %908 = vst [vmem:[%s2954_s15 + $0xa48] sm:$0xff] %v907_v9  ;;  %v909_v10 = vld [vmem:[%s2946_s14 + $0x2940] sm:$0xff]  ;;  %v911_v11 = vld [vmem:[%s2946_s14 + $0x2948] sm:$0xff] }
  0xb7   : > { %v913_v12 = vld [vmem:[%s2946_s14 + $0x2980] sm:$0xff]  ;;  %910 = vst [vmem:[%s2954_s15 + $0xa50] sm:$0xff] %v909_v10  ;;  %912 = vst [vmem:[%s2954_s15 + $0xa58] sm:$0xff] %v911_v11  ;;  %v915_v13 = vld [vmem:[%s2946_s14 + $0x2988] sm:$0xff] }
  0xb8   : > { %914 = vst [vmem:[%s2954_s15 + $0xa60] sm:$0xff] %v913_v12  ;;  %v917_v14 = vld [vmem:[%s2946_s14 + $0x29c0] sm:$0xff]  ;;  %v919_v15 = vld [vmem:[%s2946_s14 + $0x29c8] sm:$0xff]  ;;  %916 = vst [vmem:[%s2954_s15 + $0xa68] sm:$0xff] %v915_v13 }
  0xb9   : > { %918 = vst [vmem:[%s2954_s15 + $0xa70] sm:$0xff] %v917_v14  ;;  %920 = vst [vmem:[%s2954_s15 + $0xa78] sm:$0xff] %v919_v15  ;;  %v921_v16 = vld [vmem:[%s2946_s14 + $0x2a00] sm:$0xff]  ;;  %v923_v17 = vld [vmem:[%s2946_s14 + $0x2a08] sm:$0xff] }
  0xba   : > { %v925_v18 = vld [vmem:[%s2946_s14 + $0x2a40] sm:$0xff]  ;;  %922 = vst [vmem:[%s2954_s15 + $0xa80] sm:$0xff] %v921_v16  ;;  %924 = vst [vmem:[%s2954_s15 + $0xa88] sm:$0xff] %v923_v17  ;;  %v927_v19 = vld [vmem:[%s2946_s14 + $0x2a48] sm:$0xff] }
  0xbb   : > { %926 = vst [vmem:[%s2954_s15 + $0xa90] sm:$0xff] %v925_v18  ;;  %v929_v20 = vld [vmem:[%s2946_s14 + $0x2a80] sm:$0xff]  ;;  %v931_v21 = vld [vmem:[%s2946_s14 + $0x2a88] sm:$0xff]  ;;  %928 = vst [vmem:[%s2954_s15 + $0xa98] sm:$0xff] %v927_v19 }
  0xbc   : > { %930 = vst [vmem:[%s2954_s15 + $0xaa0] sm:$0xff] %v929_v20  ;;  %932 = vst [vmem:[%s2954_s15 + $0xaa8] sm:$0xff] %v931_v21  ;;  %v933_v22 = vld [vmem:[%s2946_s14 + $0x2ac0] sm:$0xff]  ;;  %v935_v23 = vld [vmem:[%s2946_s14 + $0x2ac8] sm:$0xff] }
  0xbd   : > { %v937_v24 = vld [vmem:[%s2946_s14 + $0x2b00] sm:$0xff]  ;;  %934 = vst [vmem:[%s2954_s15 + $0xab0] sm:$0xff] %v933_v22  ;;  %936 = vst [vmem:[%s2954_s15 + $0xab8] sm:$0xff] %v935_v23  ;;  %v939_v25 = vld [vmem:[%s2946_s14 + $0x2b08] sm:$0xff] }
  0xbe   : > { %938 = vst [vmem:[%s2954_s15 + $0xac0] sm:$0xff] %v937_v24  ;;  %v941_v26 = vld [vmem:[%s2946_s14 + $0x2b40] sm:$0xff]  ;;  %v943_v27 = vld [vmem:[%s2946_s14 + $0x2b48] sm:$0xff]  ;;  %940 = vst [vmem:[%s2954_s15 + $0xac8] sm:$0xff] %v939_v25 }
  0xbf   : > { %942 = vst [vmem:[%s2954_s15 + $0xad0] sm:$0xff] %v941_v26  ;;  %944 = vst [vmem:[%s2954_s15 + $0xad8] sm:$0xff] %v943_v27  ;;  %v945_v28 = vld [vmem:[%s2946_s14 + $0x2b80] sm:$0xff]  ;;  %v947_v29 = vld [vmem:[%s2946_s14 + $0x2b88] sm:$0xff] }
  0xc0   : > { %v949_v30 = vld [vmem:[%s2946_s14 + $0x2bc0] sm:$0xff]  ;;  %946 = vst [vmem:[%s2954_s15 + $0xae0] sm:$0xff] %v945_v28  ;;  %948 = vst [vmem:[%s2954_s15 + $0xae8] sm:$0xff] %v947_v29  ;;  %v951_v31 = vld [vmem:[%s2946_s14 + $0x2bc8] sm:$0xff] }
  0xc1   : > { %950 = vst [vmem:[%s2954_s15 + $0xaf0] sm:$0xff] %v949_v30  ;;  %v953_v32 = vld [vmem:[%s2946_s14 + $0x2c00] sm:$0xff]  ;;  %v955_v33 = vld [vmem:[%s2946_s14 + $0x2c08] sm:$0xff]  ;;  %952 = vst [vmem:[%s2954_s15 + $0xaf8] sm:$0xff] %v951_v31 }
  0xc2   : > { %954 = vst [vmem:[%s2954_s15 + $0xb00] sm:$0xff] %v953_v32  ;;  %956 = vst [vmem:[%s2954_s15 + $0xb08] sm:$0xff] %v955_v33  ;;  %v957_v34 = vld [vmem:[%s2946_s14 + $0x2c40] sm:$0xff]  ;;  %v959_v35 = vld [vmem:[%s2946_s14 + $0x2c48] sm:$0xff] }
  0xc3   : > { %v961_v36 = vld [vmem:[%s2946_s14 + $0x2c80] sm:$0xff]  ;;  %958 = vst [vmem:[%s2954_s15 + $0xb10] sm:$0xff] %v957_v34  ;;  %960 = vst [vmem:[%s2954_s15 + $0xb18] sm:$0xff] %v959_v35  ;;  %v963_v37 = vld [vmem:[%s2946_s14 + $0x2c88] sm:$0xff] }
  0xc4   : > { %962 = vst [vmem:[%s2954_s15 + $0xb20] sm:$0xff] %v961_v36  ;;  %v965_v38 = vld [vmem:[%s2946_s14 + $0x2cc0] sm:$0xff]  ;;  %v967_v39 = vld [vmem:[%s2946_s14 + $0x2cc8] sm:$0xff]  ;;  %964 = vst [vmem:[%s2954_s15 + $0xb28] sm:$0xff] %v963_v37 }
  0xc5   : > { %966 = vst [vmem:[%s2954_s15 + $0xb30] sm:$0xff] %v965_v38  ;;  %968 = vst [vmem:[%s2954_s15 + $0xb38] sm:$0xff] %v967_v39  ;;  %v969_v40 = vld [vmem:[%s2946_s14 + $0x2d00] sm:$0xff]  ;;  %v971_v41 = vld [vmem:[%s2946_s14 + $0x2d08] sm:$0xff] }
  0xc6   : > { %v973_v42 = vld [vmem:[%s2946_s14 + $0x2d40] sm:$0xff]  ;;  %970 = vst [vmem:[%s2954_s15 + $0xb40] sm:$0xff] %v969_v40  ;;  %972 = vst [vmem:[%s2954_s15 + $0xb48] sm:$0xff] %v971_v41  ;;  %v975_v43 = vld [vmem:[%s2946_s14 + $0x2d48] sm:$0xff] }
  0xc7   : > { %974 = vst [vmem:[%s2954_s15 + $0xb50] sm:$0xff] %v973_v42  ;;  %v977_v44 = vld [vmem:[%s2946_s14 + $0x2d80] sm:$0xff]  ;;  %v979_v45 = vld [vmem:[%s2946_s14 + $0x2d88] sm:$0xff]  ;;  %976 = vst [vmem:[%s2954_s15 + $0xb58] sm:$0xff] %v975_v43 }
  0xc8   : > { %978 = vst [vmem:[%s2954_s15 + $0xb60] sm:$0xff] %v977_v44  ;;  %980 = vst [vmem:[%s2954_s15 + $0xb68] sm:$0xff] %v979_v45  ;;  %v981_v46 = vld [vmem:[%s2946_s14 + $0x2dc0] sm:$0xff]  ;;  %v983_v47 = vld [vmem:[%s2946_s14 + $0x2dc8] sm:$0xff] }
  0xc9   : > { %v985_v48 = vld [vmem:[%s2946_s14 + $0x2e00] sm:$0xff]  ;;  %982 = vst [vmem:[%s2954_s15 + $0xb70] sm:$0xff] %v981_v46  ;;  %984 = vst [vmem:[%s2954_s15 + $0xb78] sm:$0xff] %v983_v47  ;;  %v987_v49 = vld [vmem:[%s2946_s14 + $0x2e08] sm:$0xff] }
  0xca   : > { %986 = vst [vmem:[%s2954_s15 + $0xb80] sm:$0xff] %v985_v48  ;;  %v989_v50 = vld [vmem:[%s2946_s14 + $0x2e40] sm:$0xff]  ;;  %v991_v51 = vld [vmem:[%s2946_s14 + $0x2e48] sm:$0xff]  ;;  %988 = vst [vmem:[%s2954_s15 + $0xb88] sm:$0xff] %v987_v49 }
  0xcb   : > { %990 = vst [vmem:[%s2954_s15 + $0xb90] sm:$0xff] %v989_v50  ;;  %992 = vst [vmem:[%s2954_s15 + $0xb98] sm:$0xff] %v991_v51  ;;  %v993_v52 = vld [vmem:[%s2946_s14 + $0x2e80] sm:$0xff]  ;;  %v995_v53 = vld [vmem:[%s2946_s14 + $0x2e88] sm:$0xff] }
  0xcc   : > { %v997_v54 = vld [vmem:[%s2946_s14 + $0x2ec0] sm:$0xff]  ;;  %994 = vst [vmem:[%s2954_s15 + $0xba0] sm:$0xff] %v993_v52  ;;  %996 = vst [vmem:[%s2954_s15 + $0xba8] sm:$0xff] %v995_v53  ;;  %v999_v55 = vld [vmem:[%s2946_s14 + $0x2ec8] sm:$0xff] }
  0xcd   : > { %998 = vst [vmem:[%s2954_s15 + $0xbb0] sm:$0xff] %v997_v54  ;;  %v1001_v56 = vld [vmem:[%s2946_s14 + $0x2f00] sm:$0xff]  ;;  %v1003_v57 = vld [vmem:[%s2946_s14 + $0x2f08] sm:$0xff]  ;;  %1000 = vst [vmem:[%s2954_s15 + $0xbb8] sm:$0xff] %v999_v55 }
  0xce   : > { %1002 = vst [vmem:[%s2954_s15 + $0xbc0] sm:$0xff] %v1001_v56  ;;  %1004 = vst [vmem:[%s2954_s15 + $0xbc8] sm:$0xff] %v1003_v57  ;;  %v1005_v58 = vld [vmem:[%s2946_s14 + $0x2f40] sm:$0xff]  ;;  %v1007_v59 = vld [vmem:[%s2946_s14 + $0x2f48] sm:$0xff] }
  0xcf   : > { %v1009_v60 = vld [vmem:[%s2946_s14 + $0x2f80] sm:$0xff]  ;;  %1006 = vst [vmem:[%s2954_s15 + $0xbd0] sm:$0xff] %v1005_v58  ;;  %1008 = vst [vmem:[%s2954_s15 + $0xbd8] sm:$0xff] %v1007_v59  ;;  %v1011_v61 = vld [vmem:[%s2946_s14 + $0x2f88] sm:$0xff] }
  0xd0   : > { %1010 = vst [vmem:[%s2954_s15 + $0xbe0] sm:$0xff] %v1009_v60  ;;  %v1013_v62 = vld [vmem:[%s2946_s14 + $0x2fc0] sm:$0xff]  ;;  %v1015_v63 = vld [vmem:[%s2946_s14 + $0x2fc8] sm:$0xff]  ;;  %1012 = vst [vmem:[%s2954_s15 + $0xbe8] sm:$0xff] %v1011_v61 }
  0xd1   : > { %1014 = vst [vmem:[%s2954_s15 + $0xbf0] sm:$0xff] %v1013_v62  ;;  %1016 = vst [vmem:[%s2954_s15 + $0xbf8] sm:$0xff] %v1015_v63 }
  0xd2 PF: > { %p2270_p5 = scmp.ge.s32.totalorder %s2863_s26, 1  ;;  %p1038_p6 = scmp.lt.s32.totalorder %s2863_s26, 5 }
  0xd4   : > { %p1039_p7 = pnand %p2270_p5, %p1038_p6 }
  0xd5   : > { %s1045_s16 = sand.u32 (!%p1039_p7), 1, %s2855_s24   ;;  %s2271_s17 = sshll.u32 (!%p1039_p7), %s2926_s27, 1 }
  0xd6   : > { %1042 = sbr.rel (%p1039_p7) target bundleno = 1089 (0x441), region = 67  ;;  %p1082_p8 = scmp.lt.s32.totalorder (!%p1039_p7), %s2271_s17, 7 }
  0xd7   : > { %s2808_s18 = smul.u32 (!%p1039_p7), 3072, %s1045_s16  ;;  %s2272_s19 = sshll.u32 (!%p1039_p7), %s2926_s27, 5 }
  0xd8   : > { %p1087_p9 = scmp.lt.s32.totalorder (!%p1039_p7), %s2272_s19, 127  ;;  %p2274_p10 = scmp.ne.s32.totalorder (!%p1039_p7), %s2926_s27, 0 }
  0xd9   : > { %s3734_s24 = scalar_lea.vmem (!%p1039_p7), [#allocation3], %s2808_s18 }
  0xdd   : > { %s4296_s17 = smov (!%p1082_p8, %s2271_s17), 7  ;;  %s4298_s19 = smov (!%p1087_p9, %s2272_s19), 127 }
  0xde   : > { %s1084_s22 = scalar_lea.vmem %s4286_s2, %s4296_s17  ;;  %s2273_s23 = sshll.u32 %s4298_s19, 3  ;;  %vm1096_vm0 = vcmask (!%p2274_p10), 812032   ;;  %v2865_v0 = vmov (!%p2274_p10), 0.0  }
  0xdf   : > { %s3732_s30 = scalar_lea.vmem %s4287_s3, %s2273_s23  ;;  %1095 = sbr.rel (%p2274_p10) target bundleno = 230 (0xe6), region = 75  ;;  %1097 = vst.msk [vmem:[#allocation2] sm:$0x3] (!%p2274_p10), %vm1096_vm0, %v2865_v0 }
  0xe6 PF: > { %v1102_v1 = vld [vmem:[%s3734_s24 + $0x8] sm:$0xff]  ;;  %v1104_v2 = vld [vmem:[%s3734_s24 + $0x18] sm:$0xff]  ;;  %v1101_v6 = vld [vmem:[%s3734_s24] sm:$0xff]  ;;  %vm2095_vm1 = vcmask 812032   ;;  %p2275_p11 = scmp.ne.s32.totalorder %s2926_s27, 3 }
  0xe7   : > { %v1294_v3 = vld [vmem:[%s3734_s24 + $0x608] sm:$0xff]  ;;  %v2361_v4 = vpack.c.bf16 %v1104_v2, %v1102_v1  ;;  %v1296_v5 = vld [vmem:[%s3734_s24 + $0x618] sm:$0xff]  ;;  %v1103_v7 = vld [vmem:[%s3734_s24 + $0x10] sm:$0xff]  ;;  %vm2868_vm2 = vmmov (!%p2275_p11), 0   ;;  %vm2135_vm3 = vcmask (!%p2275_p11), 1043456   ;;  %vm2131_vm4 = vcmask (!%p2275_p11), 818176  }
  0xe8   : > { %v2553_v8 = vpack.c.bf16 %v1296_v5, %v1294_v3  ;;  %v2363_v9 = vpack.c.bf16 %v1103_v7, %v1101_v6  ;;  %v1293_v10 = vld [vmem:[%s3734_s24 + $0x600] sm:$0xff]  ;;  %v1295_v11 = vld [vmem:[%s3734_s24 + $0x610] sm:$0xff]  ;;  %v1106_v12 = vld [vmem:[%s3734_s24 + $0x28] sm:$0xff] }
  0xe9   : > { %2362 = vmatprep.subr.bf16.mxu1 %v2361_v4  ;;  %v2555_v13 = vpack.c.bf16 %v1295_v11, %v1293_v10  ;;  %v1108_v14 = vld [vmem:[%s3734_s24 + $0x38] sm:$0xff]  ;;  %v1298_v15 = vld [vmem:[%s3734_s24 + $0x628] sm:$0xff]  ;;  %v1105_v19 = vld [vmem:[%s3734_s24 + $0x20] sm:$0xff] }
  0xea   : > { %v1300_v16 = vld [vmem:[%s3734_s24 + $0x638] sm:$0xff]  ;;  %2554 = vmatprep.subr.bf16.mxu0 %v2553_v8  ;;  %2364 = vmatpush1.bf16.msra.mxu1 %v2363_v9  ;;  %v2365_v17 = vpack.c.bf16 %v1108_v14, %v1106_v12  ;;  %v1107_v20 = vld [vmem:[%s3734_s24 + $0x30] sm:$0xff]  ;;  %v1297_v21 = vld [vmem:[%s3734_s24 + $0x620] sm:$0xff] }
  0xeb   : > { %v2557_v18 = vpack.c.bf16 %v1300_v16, %v1298_v15  ;;  %2556 = vmatpush1.bf16.msra.mxu0 %v2555_v13  ;;  %v2367_v22 = vpack.c.bf16 %v1107_v20, %v1105_v19  ;;  %v1299_v23 = vld [vmem:[%s3734_s24 + $0x630] sm:$0xff]  ;;  %v1110_v24 = vld [vmem:[%s3734_s24 + $0x48] sm:$0xff]  ;;  %v1112_v25 = vld [vmem:[%s3734_s24 + $0x58] sm:$0xff] }
  0xec   : > { %2366 = vmatprep.subr.bf16.mxu1 %v2365_v17  ;;  %v2559_v26 = vpack.c.bf16 %v1299_v23, %v1297_v21  ;;  %v2369_v27 = vpack.c.bf16 %v1112_v25, %v1110_v24  ;;  %v1302_v28 = vld [vmem:[%s3734_s24 + $0x648] sm:$0xff]  ;;  %v1304_v29 = vld [vmem:[%s3734_s24 + $0x658] sm:$0xff]  ;;  %v1109_v30 = vld [vmem:[%s3734_s24 + $0x40] sm:$0xff] }
  0xed   : > { %2558 = vmatprep.subr.bf16.mxu0 %v2557_v18  ;;  %v2561_v31 = vpack.c.bf16 %v1304_v29, %v1302_v28  ;;  %v1111_v32 = vld [vmem:[%s3734_s24 + $0x50] sm:$0xff]  ;;  %v1301_v33 = vld [vmem:[%s3734_s24 + $0x640] sm:$0xff]  ;;  %v1114_v36 = vld [vmem:[%s3734_s24 + $0x68] sm:$0xff] }
  0xee   : > { %v1303_v34 = vld [vmem:[%s3734_s24 + $0x650] sm:$0xff]  ;;  %2368 = vmatpush1.bf16.msra.mxu1 %v2367_v22  ;;  %v2371_v35 = vpack.c.bf16 %v1111_v32, %v1109_v30  ;;  %v1116_v37 = vld [vmem:[%s3734_s24 + $0x78] sm:$0xff]  ;;  %v1306_v38 = vld [vmem:[%s3734_s24 + $0x668] sm:$0xff] }
  0xef   : > { %2560 = vmatpush1.bf16.msra.mxu0 %v2559_v26  ;;  %2370 = vmatprep.subr.bf16.mxu1 %v2369_v27  ;;  %v2563_v39 = vpack.c.bf16 %v1303_v34, %v1301_v33  ;;  %v2373_v40 = vpack.c.bf16 %v1116_v37, %v1114_v36  ;;  %v1308_v41 = vld [vmem:[%s3734_s24 + $0x678] sm:$0xff]  ;;  %v1113_v42 = vld [vmem:[%s3734_s24 + $0x60] sm:$0xff]  ;;  %v1115_v43 = vld [vmem:[%s3734_s24 + $0x70] sm:$0xff] }
  0xf0   : > { %2562 = vmatprep.subr.bf16.mxu0 %v2561_v31  ;;  %v2565_v44 = vpack.c.bf16 %v1308_v41, %v1306_v38  ;;  %v1305_v45 = vld [vmem:[%s3734_s24 + $0x660] sm:$0xff]  ;;  %v1307_v46 = vld [vmem:[%s3734_s24 + $0x670] sm:$0xff]  ;;  %v1118_v47 = vld [vmem:[%s3734_s24 + $0x88] sm:$0xff]  ;;  %v2375_v51 = vpack.c.bf16 %v1115_v43, %v1113_v42 }
  0xf1   : > { %v1120_v48 = vld [vmem:[%s3734_s24 + $0x98] sm:$0xff]  ;;  %v1310_v49 = vld [vmem:[%s3734_s24 + $0x688] sm:$0xff]  ;;  %v2567_v52 = vpack.c.bf16 %v1307_v46, %v1305_v45  ;;  %v1117_v54 = vld [vmem:[%s3734_s24 + $0x80] sm:$0xff] }
  0xf2   : > { %v1312_v50 = vld [vmem:[%s3734_s24 + $0x698] sm:$0xff]  ;;  %2372 = vmatpush1.bf16.msra.mxu1 %v2371_v35  ;;  %v2377_v53 = vpack.c.bf16 %v1120_v48, %v1118_v47  ;;  %v1119_v55 = vld [vmem:[%s3734_s24 + $0x90] sm:$0xff]  ;;  %v1309_v56 = vld [vmem:[%s3734_s24 + $0x680] sm:$0xff]  ;;  %v1487_v47 = vlaneseq  ;;  %v2866_v48 = vmov 1983009808  }
  0xf3   : > { %2564 = vmatpush1.bf16.msra.mxu0 %v2563_v39  ;;  %2374 = vmatprep.subr.bf16.mxu1 %v2373_v40  ;;  %v2569_v57 = vpack.c.bf16 %v1312_v50, %v1310_v49  ;;  %v1311_v58 = vld [vmem:[%s3734_s24 + $0x690] sm:$0xff]  ;;  %v1122_v59 = vld [vmem:[%s3734_s24 + $0xa8] sm:$0xff]  ;;  %v1124_v60 = vld [vmem:[%s3734_s24 + $0xb8] sm:$0xff]  ;;  %v2379_v63 = vpack.c.bf16 %v1119_v55, %v1117_v54  ;;  %v1502_v49 = vunpack.c.l.s4 %v2866_v48 }
  0xf4   : > { %2566 = vmatprep.subr.bf16.mxu0 %v2565_v44  ;;  %v1314_v61 = vld [vmem:[%s3734_s24 + $0x6a8] sm:$0xff]  ;;  %v1316_v62 = vld [vmem:[%s3734_s24 + $0x6b8] sm:$0xff]  ;;  %v2571_v0 = vpack.c.bf16 %v1311_v58, %v1309_v56  ;;  %v2381_v1 = vpack.c.bf16 %v1124_v60, %v1122_v59  ;;  %v1121_v2 = vld [vmem:[%s3734_s24 + $0xa0] sm:$0xff] }
  0xf5   : > { %v1123_v3 = vld [vmem:[%s3734_s24 + $0xb0] sm:$0xff]  ;;  %v1313_v4 = vld [vmem:[%s3734_s24 + $0x6a0] sm:$0xff]  ;;  %v2573_v5 = vpack.c.bf16 %v1316_v62, %v1314_v61  ;;  %v1126_v7 = vld [vmem:[%s3734_s24 + $0xc8] sm:$0xff]  ;;  %v3821_v62 = vshrl.u32 %v1487_v47, 7 }
  0xf6   : > { %2376 = vmatpush1.bf16.msra.mxu1 %v2375_v51  ;;  %v1315_v6 = vld [vmem:[%s3734_s24 + $0x6b0] sm:$0xff]  ;;  %v1128_v8 = vld [vmem:[%s3734_s24 + $0xd8] sm:$0xff]  ;;  %v1318_v9 = vld [vmem:[%s3734_s24 + $0x6c8] sm:$0xff]  ;;  %v2383_v11 = vpack.c.bf16 %v1123_v3, %v1121_v2 }
  0xf7   : > { %2568 = vmatpush1.bf16.msra.mxu0 %v2567_v52  ;;  %2378 = vmatprep.subr.bf16.mxu1 %v2377_v53  ;;  %v1320_v10 = vld [vmem:[%s3734_s24 + $0x6d8] sm:$0xff]  ;;  %v2575_v12 = vpack.c.bf16 %v1315_v6, %v1313_v4  ;;  %v2385_v13 = vpack.c.bf16 %v1128_v8, %v1126_v7  ;;  %v1125_v14 = vld [vmem:[%s3734_s24 + $0xc0] sm:$0xff]  ;;  %v1127_v15 = vld [vmem:[%s3734_s24 + $0xd0] sm:$0xff] }
  0xf8   : > { %2570 = vmatprep.subr.bf16.mxu0 %v2569_v57  ;;  %v1317_v16 = vld [vmem:[%s3734_s24 + $0x6c0] sm:$0xff]  ;;  %v2577_v17 = vpack.c.bf16 %v1320_v10, %v1318_v9  ;;  %v1319_v18 = vld [vmem:[%s3734_s24 + $0x6d0] sm:$0xff]  ;;  %v1130_v19 = vld [vmem:[%s3734_s24 + $0xe8] sm:$0xff]  ;;  %v2387_v23 = vpack.c.bf16 %v1127_v15, %v1125_v14 }
  0xf9   : > { %v1132_v20 = vld [vmem:[%s3734_s24 + $0xf8] sm:$0xff]  ;;  %v1322_v21 = vld [vmem:[%s3734_s24 + $0x6e8] sm:$0xff]  ;;  %v2579_v24 = vpack.c.bf16 %v1319_v18, %v1317_v16  ;;  %v1129_v26 = vld [vmem:[%s3734_s24 + $0xe0] sm:$0xff] }
  0xfa   : > { %2380 = vmatpush1.bf16.msra.mxu1 %v2379_v63  ;;  %v1324_v22 = vld [vmem:[%s3734_s24 + $0x6f8] sm:$0xff]  ;;  %v2389_v25 = vpack.c.bf16 %v1132_v20, %v1130_v19  ;;  %v1131_v27 = vld [vmem:[%s3734_s24 + $0xf0] sm:$0xff]  ;;  %v1321_v28 = vld [vmem:[%s3734_s24 + $0x6e0] sm:$0xff]  ;;  %v1503_v63 = vunpack.c.0.s8 %v1502_v49 }
  0xfb   : > { %2572 = vmatpush1.bf16.msra.mxu0 %v2571_v0  ;;  %2382 = vmatprep.subr.bf16.mxu1 %v2381_v1  ;;  %v2581_v29 = vpack.c.bf16 %v1324_v22, %v1322_v21  ;;  %v1323_v30 = vld [vmem:[%s3734_s24 + $0x6f0] sm:$0xff]  ;;  %v1134_v31 = vld [vmem:[%s3734_s24 + $0x108] sm:$0xff]  ;;  %v1136_v32 = vld [vmem:[%s3734_s24 + $0x118] sm:$0xff]  ;;  %v2391_v35 = vpack.c.bf16 %v1131_v27, %v1129_v26 }
  0xfc   : > { %2574 = vmatprep.subr.bf16.mxu0 %v2573_v5  ;;  %v1326_v33 = vld [vmem:[%s3734_s24 + $0x708] sm:$0xff]  ;;  %v1328_v34 = vld [vmem:[%s3734_s24 + $0x718] sm:$0xff]  ;;  %v2583_v36 = vpack.c.bf16 %v1323_v30, %v1321_v28  ;;  %v2393_v37 = vpack.c.bf16 %v1136_v32, %v1134_v31  ;;  %v1133_v38 = vld [vmem:[%s3734_s24 + $0x100] sm:$0xff] }
  0xfd   : > { %v1135_v39 = vld [vmem:[%s3734_s24 + $0x110] sm:$0xff]  ;;  %v1325_v40 = vld [vmem:[%s3734_s24 + $0x700] sm:$0xff]  ;;  %v2585_v41 = vpack.c.bf16 %v1328_v34, %v1326_v33  ;;  %v1138_v43 = vld [vmem:[%s3734_s24 + $0x128] sm:$0xff] }
  0xfe   : > { %2384 = vmatpush1.bf16.msra.mxu1 %v2383_v11  ;;  %v1327_v42 = vld [vmem:[%s3734_s24 + $0x710] sm:$0xff]  ;;  %v1140_v44 = vld [vmem:[%s3734_s24 + $0x138] sm:$0xff]  ;;  %v1330_v45 = vld [vmem:[%s3734_s24 + $0x728] sm:$0xff]  ;;  %v2395_v50 = vpack.c.bf16 %v1135_v39, %v1133_v38 }
  0xff   : > { %2576 = vmatpush1.bf16.msra.mxu0 %v2575_v12  ;;  %2386 = vmatprep.subr.bf16.mxu1 %v2385_v13  ;;  %v1332_v46 = vld [vmem:[%s3734_s24 + $0x738] sm:$0xff]  ;;  %v2587_v51 = vpack.c.bf16 %v1327_v42, %v1325_v40  ;;  %v2397_v52 = vpack.c.bf16 %v1140_v44, %v1138_v43  ;;  %v1137_v53 = vld [vmem:[%s3734_s24 + $0x120] sm:$0xff]  ;;  %v1139_v54 = vld [vmem:[%s3734_s24 + $0x130] sm:$0xff]  ;;  %v3832_v12 = vsub.s32 %v1503_v63, %v3821_v62 }
 0x100   : > { %2578 = vmatprep.subr.bf16.mxu0 %v2577_v17  ;;  %v1329_v55 = vld [vmem:[%s3734_s24 + $0x720] sm:$0xff]  ;;  %v2589_v56 = vpack.c.bf16 %v1332_v46, %v1330_v45  ;;  %v1331_v57 = vld [vmem:[%s3734_s24 + $0x730] sm:$0xff]  ;;  %v1142_v58 = vld [vmem:[%s3734_s24 + $0x148] sm:$0xff]  ;;  %v2399_v0 = vpack.c.bf16 %v1139_v54, %v1137_v53 }
 0x101   : > { %v1144_v59 = vld [vmem:[%s3734_s24 + $0x158] sm:$0xff]  ;;  %v1334_v60 = vld [vmem:[%s3734_s24 + $0x748] sm:$0xff]  ;;  %v2591_v1 = vpack.c.bf16 %v1331_v57, %v1329_v55  ;;  %v1141_v3 = vld [vmem:[%s3734_s24 + $0x140] sm:$0xff] }
 0x102   : > { %2388 = vmatpush1.bf16.msra.mxu1 %v2387_v23  ;;  %v1336_v61 = vld [vmem:[%s3734_s24 + $0x758] sm:$0xff]  ;;  %v2401_v2 = vpack.c.bf16 %v1144_v59, %v1142_v58  ;;  %v1143_v4 = vld [vmem:[%s3734_s24 + $0x150] sm:$0xff]  ;;  %v1333_v5 = vld [vmem:[%s3734_s24 + $0x740] sm:$0xff] }
 0x103   : > { %2580 = vmatpush1.bf16.msra.mxu0 %v2579_v24  ;;  %2390 = vmatprep.subr.bf16.mxu1 %v2389_v25  ;;  %v2593_v6 = vpack.c.bf16 %v1336_v61, %v1334_v60  ;;  %v1335_v7 = vld [vmem:[%s3734_s24 + $0x750] sm:$0xff]  ;;  %v1146_v8 = vld [vmem:[%s3734_s24 + $0x168] sm:$0xff]  ;;  %v1148_v9 = vld [vmem:[%s3734_s24 + $0x178] sm:$0xff]  ;;  %v2403_v13 = vpack.c.bf16 %v1143_v4, %v1141_v3 }
 0x104   : > { %2582 = vmatprep.subr.bf16.mxu0 %v2581_v29  ;;  %v1338_v10 = vld [vmem:[%s3734_s24 + $0x768] sm:$0xff]  ;;  %v1340_v11 = vld [vmem:[%s3734_s24 + $0x778] sm:$0xff]  ;;  %v1145_v14 = vld [vmem:[%s3734_s24 + $0x160] sm:$0xff]  ;;  %v2595_v15 = vpack.c.bf16 %v1335_v7, %v1333_v5  ;;  %v2405_v16 = vpack.c.bf16 %v1148_v9, %v1146_v8 }
 0x105   : > { %v1147_v17 = vld [vmem:[%s3734_s24 + $0x170] sm:$0xff]  ;;  %v1337_v18 = vld [vmem:[%s3734_s24 + $0x760] sm:$0xff]  ;;  %v2597_v20 = vpack.c.bf16 %v1340_v11, %v1338_v10  ;;  %v1150_v21 = vld [vmem:[%s3734_s24 + $0x188] sm:$0xff] }
 0x106   : > { %2392 = vmatpush1.bf16.msra.mxu1 %v2391_v35  ;;  %v1339_v19 = vld [vmem:[%s3734_s24 + $0x770] sm:$0xff]  ;;  %v1152_v22 = vld [vmem:[%s3734_s24 + $0x198] sm:$0xff]  ;;  %v1342_v24 = vld [vmem:[%s3734_s24 + $0x788] sm:$0xff]  ;;  %v2407_v28 = vpack.c.bf16 %v1147_v17, %v1145_v14 }
 0x107   : > { %2584 = vmatpush1.bf16.msra.mxu0 %v2583_v36  ;;  %2394 = vmatprep.subr.bf16.mxu1 %v2393_v37  ;;  %v3843_v23 = vld [vmem:[%s4284_s0] sm:$0xff]  ;;  %v3854_v27 = vld [vmem:[%s4284_s0 + $0x8] sm:$0xff]  ;;  %v2599_v30 = vpack.c.bf16 %v1339_v19, %v1337_v18  ;;  %v2409_v31 = vpack.c.bf16 %v1152_v22, %v1150_v21  ;;  %v1151_v33 = vld [vmem:[%s3734_s24 + $0x190] sm:$0xff] }
 0x108   : > { %2586 = vmatprep.subr.bf16.mxu0 %v2585_v41  ;;  %v1344_v25 = vld [vmem:[%s3734_s24 + $0x798] sm:$0xff]  ;;  %v3849_v26 = vrot.slane %v3843_v23, %v3832_v12  ;;  %v1517_v29 = vcombine.high %v3854_v27, %v3854_v27  ;;  %v1149_v32 = vld [vmem:[%s3734_s24 + $0x180] sm:$0xff]  ;;  %v1343_v37 = vld [vmem:[%s3734_s24 + $0x790] sm:$0xff]  ;;  %v1500_v14 = vcombine.high %v3843_v23, %v3843_v23 }
 0x109   : > { %v1341_v34 = vld [vmem:[%s3734_s24 + $0x780] sm:$0xff]  ;;  %v2601_v36 = vpack.c.bf16 %v1344_v25, %v1342_v24  ;;  %v1154_v38 = vld [vmem:[%s3734_s24 + $0x1a8] sm:$0xff]  ;;  %v1156_v39 = vld [vmem:[%s3734_s24 + $0x1b8] sm:$0xff]  ;;  %v2411_v43 = vpack.c.bf16 %v1151_v33, %v1149_v32 }
 0x10a   : > { %2396 = vmatpush1.bf16.msra.mxu1 %v2395_v50  ;;  %v1515_v35 = vcombine.high %v3849_v26, %v3849_v26  ;;  %v3867_v40 = vrot.slane %v1517_v29, %v3832_v12  ;;  %v1346_v41 = vld [vmem:[%s3734_s24 + $0x7a8] sm:$0xff]  ;;  %v1348_v42 = vld [vmem:[%s3734_s24 + $0x7b8] sm:$0xff]  ;;  %v2603_v45 = vpack.c.bf16 %v1343_v37, %v1341_v34  ;;  %v2413_v46 = vpack.c.bf16 %v1156_v39, %v1154_v38  ;;  %v1153_v47 = vld [vmem:[%s3734_s24 + $0x1a0] sm:$0xff] }
 0x10b   : > { %2588 = vmatpush1.bf16.msra.mxu0 %v2587_v51  ;;  %2398 = vmatprep.subr.bf16.mxu1 %v2397_v52  ;;  %v1155_v48 = vld [vmem:[%s3734_s24 + $0x1b0] sm:$0xff]  ;;  %v1345_v49 = vld [vmem:[%s3734_s24 + $0x7a0] sm:$0xff]  ;;  %v2605_v50 = vpack.c.bf16 %v1348_v42, %v1346_v41  ;;  %v1158_v52 = vld [vmem:[%s3734_s24 + $0x1c8] sm:$0xff]  ;;  %v3912_v34 = vrot.slane %v3854_v27, %v3832_v12 }
 0x10c   : > { %2590 = vmatprep.subr.bf16.mxu0 %v2589_v56  ;;  %1627 = vmatprep.mubr.f32.mxu1 %v1515_v35  ;;  %v1533_v44 = vcombine.high %v3867_v40, %v3867_v40  ;;  %v1347_v51 = vld [vmem:[%s3734_s24 + $0x7b0] sm:$0xff]  ;;  %v1160_v53 = vld [vmem:[%s3734_s24 + $0x1d8] sm:$0xff]  ;;  %v1350_v54 = vld [vmem:[%s3734_s24 + $0x7c8] sm:$0xff]  ;;  %v2415_v56 = vpack.c.bf16 %v1155_v48, %v1153_v47 }
 0x10d   : > { %v1352_v55 = vld [vmem:[%s3734_s24 + $0x7d8] sm:$0xff]  ;;  %v2607_v57 = vpack.c.bf16 %v1347_v51, %v1345_v49  ;;  %v2417_v58 = vpack.c.bf16 %v1160_v53, %v1158_v52  ;;  %v1157_v59 = vld [vmem:[%s3734_s24 + $0x1c0] sm:$0xff]  ;;  %v1159_v60 = vld [vmem:[%s3734_s24 + $0x1d0] sm:$0xff] }
 0x10e   : > { %2400 = vmatpush1.bf16.msra.mxu1 %v2399_v0  ;;  %1840 = vmatprep.mubr.f32.mxu0 %v1533_v44  ;;  %v1349_v61 = vld [vmem:[%s3734_s24 + $0x7c0] sm:$0xff]  ;;  %v2609_v63 = vpack.c.bf16 %v1352_v55, %v1350_v54  ;;  %v1351_v0 = vld [vmem:[%s3734_s24 + $0x7d0] sm:$0xff]  ;;  %v1354_v3 = vld [vmem:[%s3734_s24 + $0x7e8] sm:$0xff]  ;;  %v2419_v5 = vpack.c.bf16 %v1159_v60, %v1157_v59 }
 0x10f   : > { %2592 = vmatpush1.bf16.msra.mxu0 %v2591_v1  ;;  %2402 = vmatprep.subr.bf16.mxu1 %v2401_v2  ;;  %v1162_v1 = vld [vmem:[%s3734_s24 + $0x1e8] sm:$0xff]  ;;  %v1164_v2 = vld [vmem:[%s3734_s24 + $0x1f8] sm:$0xff]  ;;  %v1161_v8 = vld [vmem:[%s3734_s24 + $0x1e0] sm:$0xff] }
 0x110   : > { %2594 = vmatprep.subr.bf16.mxu0 %v2593_v6  ;;  %v1356_v4 = vld [vmem:[%s3734_s24 + $0x7f8] sm:$0xff]  ;;  %v2611_v6 = vpack.c.bf16 %v1351_v0, %v1349_v61  ;;  %v2421_v7 = vpack.c.bf16 %v1164_v2, %v1162_v1  ;;  %v1163_v9 = vld [vmem:[%s3734_s24 + $0x1f0] sm:$0xff]  ;;  %v1353_v10 = vld [vmem:[%s3734_s24 + $0x7e0] sm:$0xff] }
 0x111   : > { %v2613_v11 = vpack.c.bf16 %v1356_v4, %v1354_v3  ;;  %v1358_v17 = vld [vmem:[%s3734_s24 + $0x808] sm:$0xff]  ;;  %v1360_v18 = vld [vmem:[%s3734_s24 + $0x818] sm:$0xff]  ;;  %v2423_v19 = vpack.c.bf16 %v1163_v9, %v1161_v8  ;;  %v1165_v22 = vld [vmem:[%s3734_s24 + $0x200] sm:$0xff] }
 0x112   : > { %2404 = vmatpush1.bf16.msra.mxu1 %v2403_v13  ;;  %v1355_v13 = vld [vmem:[%s3734_s24 + $0x7f0] sm:$0xff]  ;;  %v1357_v25 = vld [vmem:[%s3734_s24 + $0x800] sm:$0xff]  ;;  %v2617_v23 = vpack.c.bf16 %v1360_v18, %v1358_v17  ;;  %v1170_v29 = vld [vmem:[%s3734_s24 + $0x228] sm:$0xff] }
 0x113   : > { %2596 = vmatpush1.bf16.msra.mxu0 %v2595_v15  ;;  %2406 = vmatprep.subr.bf16.mxu1 %v2405_v16  ;;  %v1166_v15 = vld [vmem:[%s3734_s24 + $0x208] sm:$0xff]  ;;  %v1168_v16 = vld [vmem:[%s3734_s24 + $0x218] sm:$0xff]  ;;  %v1167_v24 = vld [vmem:[%s3734_s24 + $0x210] sm:$0xff] }
 0x114   : > { %2598 = vmatprep.subr.bf16.mxu0 %v2597_v20  ;;  %v2615_v20 = vpack.c.bf16 %v1355_v13, %v1353_v10  ;;  %v2425_v21 = vpack.c.bf16 %v1168_v16, %v1166_v15  ;;  %v1362_v32 = vld [vmem:[%s3734_s24 + $0x828] sm:$0xff]  ;;  %v1364_v33 = vld [vmem:[%s3734_s24 + $0x838] sm:$0xff]  ;;  %v2427_v35 = vpack.c.bf16 %v1167_v24, %v1165_v22  ;;  %v1169_v38 = vld [vmem:[%s3734_s24 + $0x220] sm:$0xff] }
 0x115   : > { %v1171_v39 = vld [vmem:[%s3734_s24 + $0x230] sm:$0xff]  ;;  %v1361_v41 = vld [vmem:[%s3734_s24 + $0x820] sm:$0xff]  ;;  %v2621_v42 = vpack.c.bf16 %v1364_v33, %v1362_v32  ;;  %v1174_v44 = vld [vmem:[%s3734_s24 + $0x248] sm:$0xff] }
 0x116   : > { %2408 = vmatpush1.bf16.msra.mxu1 %v2407_v28  ;;  %v1359_v28 = vld [vmem:[%s3734_s24 + $0x810] sm:$0xff]  ;;  %v1176_v27 = vld [vmem:[%s3734_s24 + $0x258] sm:$0xff]  ;;  %v2431_v48 = vpack.c.bf16 %v1171_v39, %v1169_v38  ;;  %v1173_v51 = vld [vmem:[%s3734_s24 + $0x240] sm:$0xff] }
 0x117   : > { %2600 = vmatpush1.bf16.msra.mxu0 %v2599_v30  ;;  %2410 = vmatprep.subr.bf16.mxu1 %v2409_v31  ;;  %v1172_v30 = vld [vmem:[%s3734_s24 + $0x238] sm:$0xff]  ;;  %v3906_v31 = vrot.slane %v1500_v14, %v3832_v12  ;;  %v1175_v52 = vld [vmem:[%s3734_s24 + $0x250] sm:$0xff]  ;;  %v1365_v53 = vld [vmem:[%s3734_s24 + $0x840] sm:$0xff] }
 0x118   : > { %2602 = vmatprep.subr.bf16.mxu0 %v2601_v36  ;;  %v2619_v36 = vpack.c.bf16 %v1359_v28, %v1357_v25  ;;  %v2429_v37 = vpack.c.bf16 %v1172_v30, %v1170_v29  ;;  %v1368_v47 = vld [vmem:[%s3734_s24 + $0x858] sm:$0xff]  ;;  %v1367_v54 = vld [vmem:[%s3734_s24 + $0x850] sm:$0xff]  ;;  %v1178_v55 = vld [vmem:[%s3734_s24 + $0x268] sm:$0xff] }
 0x119   : > { %v2627_v59 = vpack.c.bf16 %v1367_v54, %v1365_v53  ;;  %v1177_v61 = vld [vmem:[%s3734_s24 + $0x260] sm:$0xff]  ;;  %v1371_v2 = vld [vmem:[%s3734_s24 + $0x870] sm:$0xff]  ;;  %v1182_v3 = vld [vmem:[%s3734_s24 + $0x288] sm:$0xff] }
 0x11a   : > { %2412 = vmatpush1.bf16.msra.mxu1 %v2411_v43  ;;  %v1363_v43 = vld [vmem:[%s3734_s24 + $0x830] sm:$0xff]  ;;  %v1369_v0 = vld [vmem:[%s3734_s24 + $0x860] sm:$0xff]  ;;  %v1184_v4 = vld [vmem:[%s3734_s24 + $0x298] sm:$0xff] }
 0x11b   : > { %2604 = vmatpush1.bf16.msra.mxu0 %v2603_v45  ;;  %2414 = vmatprep.subr.bf16.mxu1 %v2413_v46  ;;  %v1516_v45 = vcombine.high %v3906_v31, %v3906_v31  ;;  %v1366_v46 = vld [vmem:[%s3734_s24 + $0x848] sm:$0xff]  ;;  %v2623_v49 = vpack.c.bf16 %v1363_v43, %v1361_v41  ;;  %v2631_v8 = vpack.c.bf16 %v1371_v2, %v1369_v0  ;;  %v1181_v10 = vld [vmem:[%s3734_s24 + $0x280] sm:$0xff]  ;;  %v1375_v15 = vld [vmem:[%s3734_s24 + $0x890] sm:$0xff] }
 0x11c   : > { %2606 = vmatprep.subr.bf16.mxu0 %v2605_v50  ;;  %v2433_v50 = vpack.c.bf16 %v1176_v27, %v1174_v44  ;;  %v2441_v9 = vpack.c.bf16 %v1184_v4, %v1182_v3  ;;  %v1373_v13 = vld [vmem:[%s3734_s24 + $0x880] sm:$0xff]  ;;  %v1186_v16 = vld [vmem:[%s3734_s24 + $0x2a8] sm:$0xff]  ;;  %v1188_v17 = vld [vmem:[%s3734_s24 + $0x2b8] sm:$0xff] }
 0x11d   : > { %v1378_v18 = vld [vmem:[%s3734_s24 + $0x8a8] sm:$0xff]  ;;  %v2445_v22 = vpack.c.bf16 %v1188_v17, %v1186_v16  ;;  %v1185_v24 = vld [vmem:[%s3734_s24 + $0x2a0] sm:$0xff]  ;;  %v1187_v25 = vld [vmem:[%s3734_s24 + $0x2b0] sm:$0xff] }
 0x11e   : > { %2416 = vmatpush1.bf16.msra.mxu1 %v2415_v56  ;;  %v1180_v56 = vld [vmem:[%s3734_s24 + $0x278] sm:$0xff]  ;;  %v1379_v29 = vld [vmem:[%s3734_s24 + $0x8b0] sm:$0xff]  ;;  %v1190_v30 = vld [vmem:[%s3734_s24 + $0x2c8] sm:$0xff] }
 0x11f   : > { %2608 = vmatpush1.bf16.msra.mxu0 %v2607_v57  ;;  %2418 = vmatprep.subr.bf16.mxu1 %v2417_v58  ;;  %v1372_v57 = vld [vmem:[%s3734_s24 + $0x878] sm:$0xff]  ;;  %v2435_v58 = vpack.c.bf16 %v1175_v52, %v1173_v51  ;;  %v2437_v60 = vpack.c.bf16 %v1180_v56, %v1178_v55  ;;  %v1382_v33 = vld [vmem:[%s3734_s24 + $0x8c8] sm:$0xff]  ;;  %v1191_v41 = vld [vmem:[%s3734_s24 + $0x2d0] sm:$0xff] }
 0x120   : > { %2610 = vmatprep.subr.bf16.mxu0 %v2609_v63  ;;  %v1179_v63 = vld [vmem:[%s3734_s24 + $0x270] sm:$0xff]  ;;  %v1192_v32 = vld [vmem:[%s3734_s24 + $0x2d8] sm:$0xff]  ;;  %v1194_v27 = vld [vmem:[%s3734_s24 + $0x2e8] sm:$0xff] }
 0x121   : > { %v2449_v39 = vpack.c.bf16 %v1192_v32, %v1190_v30  ;;  %v1383_v43 = vld [vmem:[%s3734_s24 + $0x8d0] sm:$0xff]  ;;  %v1193_v53 = vld [vmem:[%s3734_s24 + $0x2e0] sm:$0xff] }
 0x122   : > { %2420 = vmatpush1.bf16.msra.mxu1 %v2419_v5  ;;  %v1374_v5 = vld [vmem:[%s3734_s24 + $0x888] sm:$0xff]  ;;  %v1385_v54 = vld [vmem:[%s3734_s24 + $0x8e0] sm:$0xff]  ;;  %v1199_v2 = vld [vmem:[%s3734_s24 + $0x310] sm:$0xff] }
 0x123   : > { %2612 = vmatpush1.bf16.msra.mxu0 %v2611_v6  ;;  %2422 = vmatprep.subr.bf16.mxu1 %v2421_v7  ;;  %v1376_v6 = vld [vmem:[%s3734_s24 + $0x898] sm:$0xff]  ;;  %v2439_v7 = vpack.c.bf16 %v1179_v63, %v1177_v61  ;;  %v1389_v3 = vld [vmem:[%s3734_s24 + $0x900] sm:$0xff] }
 0x124   : > { %2614 = vmatprep.subr.bf16.mxu0 %v2613_v11  ;;  %v1183_v11 = vld [vmem:[%s3734_s24 + $0x290] sm:$0xff]  ;;  %v2633_v14 = vpack.c.bf16 %v1376_v6, %v1374_v5  ;;  %v1202_v6 = vld [vmem:[%s3734_s24 + $0x328] sm:$0xff]  ;;  %v1393_v16 = vld [vmem:[%s3734_s24 + $0x920] sm:$0xff] }
 0x125   : > { %v1391_v5 = vld [vmem:[%s3734_s24 + $0x910] sm:$0xff]  ;;  %v1397_v30 = vld [vmem:[%s3734_s24 + $0x940] sm:$0xff] }
 0x126   : > { %2424 = vmatpush1.bf16.msra.mxu1 %v2423_v19  ;;  %v1380_v19 = vld [vmem:[%s3734_s24 + $0x8b8] sm:$0xff] }
 0x127   : > { %2616 = vmatpush1.bf16.msra.mxu0 %v2615_v20  ;;  %2426 = vmatprep.subr.bf16.mxu1 %v2425_v21  ;;  %v2443_v20 = vpack.c.bf16 %v1183_v11, %v1181_v10  ;;  %v2635_v21 = vpack.c.bf16 %v1375_v15, %v1373_v13  ;;  %v2637_v28 = vpack.c.bf16 %v1380_v19, %v1378_v18  ;;  %v1203_v15 = vld [vmem:[%s3734_s24 + $0x330] sm:$0xff]  ;;  %v1206_v19 = vld [vmem:[%s3734_s24 + $0x348] sm:$0xff] }
 0x128   : > { %2618 = vmatprep.subr.bf16.mxu0 %v2617_v23  ;;  %v1377_v23 = vld [vmem:[%s3734_s24 + $0x8a0] sm:$0xff]  ;;  %v2651_v11 = vpack.c.bf16 %v1391_v5, %v1389_v3  ;;  %v1395_v18 = vld [vmem:[%s3734_s24 + $0x930] sm:$0xff] }
 0x129   : > { %1628 = vmatmul.mubr.f32.vlgmr.msra.gmra.mrb[0].mxu1 %v3849_v26  ;;  %v2625_v26 = vpack.c.bf16 %v1368_v47, %v1366_v46  ;;  %v2639_v38 = vpack.c.bf16 %v1379_v29, %v1377_v23  ;;  %v3967_v46 = vld [vmem:[%s4284_s0 + $0x10] sm:$0xff]  ;;  %v1217_v3 = vld [vmem:[%s3734_s24 + $0x3a0] sm:$0xff] }
 0x12a   : > { %2428 = vmatpush1.bf16.msra.mxu1 %v2427_v35  ;;  %1841 = vmatmul.mubr.f32.vlgmr.msra.gmra.mrb[0].mxu0 %v3867_v40  ;;  %v1370_v40 = vld [vmem:[%s3734_s24 + $0x868] sm:$0xff]  ;;  %v1384_v35 = vld [vmem:[%s3734_s24 + $0x8d8] sm:$0xff]  ;;  %v1207_v29 = vld [vmem:[%s3734_s24 + $0x350] sm:$0xff] }
 0x12b   : > { %2620 = vmatpush1.bf16.msra.mxu0 %v2619_v36  ;;  %2430 = vmatprep.subr.bf16.mxu1 %v2429_v37  ;;  %v2629_v1 = vpack.c.bf16 %v1372_v57, %v1370_v40  ;;  %v2447_v36 = vpack.c.bf16 %v1187_v25, %v1185_v24  ;;  %v1189_v37 = vld [vmem:[%s3734_s24 + $0x2c0] sm:$0xff]  ;;  %v2641_v44 = vpack.c.bf16 %v1384_v35, %v1382_v33  ;;  %v1386_v47 = vld [vmem:[%s3734_s24 + $0x8e8] sm:$0xff]  ;;  %v1387_v40 = vld [vmem:[%s3734_s24 + $0x8f0] sm:$0xff] }
 0x12c   : > { %2622 = vmatprep.subr.bf16.mxu0 %v2621_v42  ;;  %1698 = vmatprep.mubr.f32.mxu1 %v1516_v45  ;;  %v1381_v42 = vld [vmem:[%s3734_s24 + $0x8c0] sm:$0xff]  ;;  %v1196_v45 = vld [vmem:[%s3734_s24 + $0x2f8] sm:$0xff]  ;;  %v1198_v57 = vld [vmem:[%s3734_s24 + $0x308] sm:$0xff]  ;;  %v2647_v63 = vpack.c.bf16 %v1387_v40, %v1385_v54  ;;  %v2655_v25 = vpack.c.bf16 %v1395_v18, %v1393_v16 }
 0x12d   : > { %v2643_v51 = vpack.c.bf16 %v1383_v43, %v1381_v42  ;;  %v2453_v52 = vpack.c.bf16 %v1196_v45, %v1194_v27  ;;  %v1399_v33 = vld [vmem:[%s3734_s24 + $0x950] sm:$0xff]  ;;  %v1210_v35 = vld [vmem:[%s3734_s24 + $0x368] sm:$0xff]  ;;  %v1209_v43 = vld [vmem:[%s3734_s24 + $0x360] sm:$0xff] }
 0x12e   : > { %2432 = vmatpush1.bf16.msra.mxu1 %v2431_v48  ;;  %v1388_v48 = vld [vmem:[%s3734_s24 + $0x8f8] sm:$0xff]  ;;  %v1401_v27 = vld [vmem:[%s3734_s24 + $0x960] sm:$0xff] }
 0x12f   : > { %2624 = vmatpush1.bf16.msra.mxu0 %v2623_v49  ;;  %2434 = vmatprep.subr.bf16.mxu1 %v2433_v50  ;;  %v3973_v49 = vrot.slane %v3967_v46, %v3832_v12  ;;  %v2451_v50 = vpack.c.bf16 %v1191_v41, %v1189_v37  ;;  %v2645_v56 = vpack.c.bf16 %v1388_v48, %v1386_v47  ;;  %v1402_v37 = vld [vmem:[%s3734_s24 + $0x968] sm:$0xff]  ;;  %v1403_v47 = vld [vmem:[%s3734_s24 + $0x970] sm:$0xff]  ;;  %v1405_v40 = vld [vmem:[%s3734_s24 + $0x980] sm:$0xff] }
 0x130   : > { %2626 = vmatprep.subr.bf16.mxu0 %v2625_v26  ;;  %v1195_v26 = vld [vmem:[%s3734_s24 + $0x2f0] sm:$0xff]  ;;  %v2659_v41 = vpack.c.bf16 %v1399_v33, %v1397_v30  ;;  %v1214_v48 = vld [vmem:[%s3734_s24 + $0x388] sm:$0xff]  ;;  %v1409_v5 = vld [vmem:[%s3734_s24 + $0x9a0] sm:$0xff] }
 0x131   : > { %v1549_v55 = vcombine.high %v3973_v49, %v3973_v49  ;;  %v2455_v61 = vpack.c.bf16 %v1195_v26, %v1193_v53  ;;  %v2663_v26 = vpack.c.bf16 %v1403_v47, %v1401_v27  ;;  %v1221_v16 = vld [vmem:[%s3734_s24 + $0x3c0] sm:$0xff]  ;;  %v1231_v47 = vld [vmem:[%s3734_s24 + $0x410] sm:$0xff] }
 0x132   : > { %2436 = vmatpush1.bf16.msra.mxu1 %v2435_v58  ;;  %v1200_v58 = vld [vmem:[%s3734_s24 + $0x318] sm:$0xff]  ;;  %v1413_v18 = vld [vmem:[%s3734_s24 + $0x9c0] sm:$0xff] }
 0x133   : > { %2628 = vmatpush1.bf16.msra.mxu0 %v2627_v59  ;;  %2438 = vmatprep.subr.bf16.mxu1 %v2437_v60  ;;  %v1390_v59 = vld [vmem:[%s3734_s24 + $0x908] sm:$0xff]  ;;  %v1392_v60 = vld [vmem:[%s3734_s24 + $0x918] sm:$0xff]  ;;  %v2457_v0 = vpack.c.bf16 %v1200_v58, %v1198_v57  ;;  %v1407_v58 = vld [vmem:[%s3734_s24 + $0x990] sm:$0xff] }
 0x134   : > { %2630 = vmatprep.subr.bf16.mxu0 %v2629_v1  ;;  %1911 = vmatprep.mubr.f32.mxu0 %v1549_v55  ;;  %v1197_v1 = vld [vmem:[%s3734_s24 + $0x300] sm:$0xff]  ;;  %v2649_v4 = vpack.c.bf16 %v1392_v60, %v1390_v59  ;;  %v1218_v59 = vld [vmem:[%s3734_s24 + $0x3a8] sm:$0xff]  ;;  %v1220_v60 = vld [vmem:[%s3734_s24 + $0x3b8] sm:$0xff] }
 0x135   : > { %v2459_v10 = vpack.c.bf16 %v1199_v2, %v1197_v1  ;;  %v1213_v55 = vld [vmem:[%s3734_s24 + $0x380] sm:$0xff]  ;;  %v2667_v1 = vpack.c.bf16 %v1407_v58, %v1405_v40  ;;  %v2477_v2 = vpack.c.bf16 %v1220_v60, %v1218_v59  ;;  %v1235_v58 = vld [vmem:[%s3734_s24 + $0x430] sm:$0xff] }
 0x136   : > { %2440 = vmatpush1.bf16.msra.mxu1 %v2439_v7  ;;  %v1204_v7 = vld [vmem:[%s3734_s24 + $0x338] sm:$0xff]  ;;  %v1225_v30 = vld [vmem:[%s3734_s24 + $0x3e0] sm:$0xff] }
 0x137   : > { %2632 = vmatpush1.bf16.msra.mxu0 %v2631_v8  ;;  %2442 = vmatprep.subr.bf16.mxu1 %v2441_v9  ;;  %v1394_v8 = vld [vmem:[%s3734_s24 + $0x928] sm:$0xff]  ;;  %v1396_v9 = vld [vmem:[%s3734_s24 + $0x938] sm:$0xff]  ;;  %v2461_v13 = vpack.c.bf16 %v1204_v7, %v1202_v6  ;;  %v1411_v7 = vld [vmem:[%s3734_s24 + $0x9b0] sm:$0xff] }
 0x138   : > { %2634 = vmatprep.subr.bf16.mxu0 %v2633_v14  ;;  %v1201_v14 = vld [vmem:[%s3734_s24 + $0x320] sm:$0xff]  ;;  %v2653_v17 = vpack.c.bf16 %v1396_v9, %v1394_v8  ;;  %v1222_v8 = vld [vmem:[%s3734_s24 + $0x3c8] sm:$0xff]  ;;  %v1224_v9 = vld [vmem:[%s3734_s24 + $0x3d8] sm:$0xff] }
 0x139   : > { %v2463_v24 = vpack.c.bf16 %v1203_v15, %v1201_v14  ;;  %v2671_v14 = vpack.c.bf16 %v1411_v7, %v1409_v5  ;;  %v2481_v15 = vpack.c.bf16 %v1224_v9, %v1222_v8  ;;  %v1417_v33 = vld [vmem:[%s3734_s24 + $0x9e0] sm:$0xff] }
 0x13a   : > { %2444 = vmatpush1.bf16.msra.mxu1 %v2443_v20  ;;  %v1208_v20 = vld [vmem:[%s3734_s24 + $0x358] sm:$0xff]  ;;  %v1425_v59 = vld [vmem:[%s3734_s24 + $0xa20] sm:$0xff] }
 0x13b   : > { %2636 = vmatpush1.bf16.msra.mxu0 %v2635_v21  ;;  %2446 = vmatprep.subr.bf16.mxu1 %v2445_v22  ;;  %v1398_v21 = vld [vmem:[%s3734_s24 + $0x948] sm:$0xff]  ;;  %v1400_v22 = vld [vmem:[%s3734_s24 + $0x958] sm:$0xff]  ;;  %v2465_v23 = vpack.c.bf16 %v1208_v20, %v1206_v19  ;;  %v1415_v20 = vld [vmem:[%s3734_s24 + $0x9d0] sm:$0xff] }
 0x13c   : > { %2638 = vmatprep.subr.bf16.mxu0 %v2637_v28  ;;  %v1205_v28 = vld [vmem:[%s3734_s24 + $0x340] sm:$0xff]  ;;  %v2657_v32 = vpack.c.bf16 %v1400_v22, %v1398_v21  ;;  %v1226_v21 = vld [vmem:[%s3734_s24 + $0x3e8] sm:$0xff]  ;;  %v1228_v22 = vld [vmem:[%s3734_s24 + $0x3f8] sm:$0xff] }
 0x13d   : > { %v1237_v7 = vld [vmem:[%s3734_s24 + $0x440] sm:$0xff] }
 0x13e   : > { %2448 = vmatpush1.bf16.msra.mxu1 %v2447_v36  ;;  %v1212_v36 = vld [vmem:[%s3734_s24 + $0x378] sm:$0xff]  ;;  %v1429_v8 = vld [vmem:[%s3734_s24 + $0xa40] sm:$0xff] }
 0x13f   : > { %2640 = vmatpush1.bf16.msra.mxu0 %v2639_v38  ;;  %2450 = vmatprep.subr.bf16.mxu1 %v2449_v39  ;;  %v1404_v38 = vld [vmem:[%s3734_s24 + $0x978] sm:$0xff]  ;;  %v2467_v39 = vpack.c.bf16 %v1207_v29, %v1205_v28  ;;  %v2469_v42 = vpack.c.bf16 %v1212_v36, %v1210_v35  ;;  %v2675_v28 = vpack.c.bf16 %v1415_v20, %v1413_v18  ;;  %v1419_v36 = vld [vmem:[%s3734_s24 + $0x9f0] sm:$0xff]  ;;  %v1241_v18 = vld [vmem:[%s3734_s24 + $0x460] sm:$0xff] }
 0x140   : > { %2642 = vmatprep.subr.bf16.mxu0 %v2641_v44  ;;  %v1211_v44 = vld [vmem:[%s3734_s24 + $0x370] sm:$0xff]  ;;  %v2661_v45 = vpack.c.bf16 %v1404_v38, %v1402_v37  ;;  %v2485_v29 = vpack.c.bf16 %v1228_v22, %v1226_v21  ;;  %v1230_v37 = vld [vmem:[%s3734_s24 + $0x408] sm:$0xff]  ;;  %v1232_v38 = vld [vmem:[%s3734_s24 + $0x418] sm:$0xff] }
 0x141   : > { %v2471_v53 = vpack.c.bf16 %v1211_v44, %v1209_v43  ;;  %v2679_v44 = vpack.c.bf16 %v1419_v36, %v1417_v33  ;;  %v2489_v27 = vpack.c.bf16 %v1232_v38, %v1230_v37  ;;  %v1433_v20 = vld [vmem:[%s3734_s24 + $0xa60] sm:$0xff]  ;;  %v1435_v22 = vld [vmem:[%s3734_s24 + $0xa70] sm:$0xff] }
 0x142   : > { %2452 = vmatpush1.bf16.msra.mxu1 %v2451_v50  ;;  %v1216_v50 = vld [vmem:[%s3734_s24 + $0x398] sm:$0xff]  ;;  %v1245_v33 = vld [vmem:[%s3734_s24 + $0x480] sm:$0xff]  ;;  %v1439_v38 = vld [vmem:[%s3734_s24 + $0xa90] sm:$0xff] }
 0x143   : > { %2644 = vmatpush1.bf16.msra.mxu0 %v2643_v51  ;;  %2454 = vmatprep.subr.bf16.mxu1 %v2453_v52  ;;  %v1406_v51 = vld [vmem:[%s3734_s24 + $0x988] sm:$0xff]  ;;  %v1408_v52 = vld [vmem:[%s3734_s24 + $0x998] sm:$0xff]  ;;  %v2473_v54 = vpack.c.bf16 %v1216_v50, %v1214_v48  ;;  %v1421_v48 = vld [vmem:[%s3734_s24 + $0xa00] sm:$0xff] }
 0x144   : > { %2646 = vmatprep.subr.bf16.mxu0 %v2645_v56  ;;  %v1215_v56 = vld [vmem:[%s3734_s24 + $0x390] sm:$0xff]  ;;  %v2665_v57 = vpack.c.bf16 %v1408_v52, %v1406_v51  ;;  %v1234_v52 = vld [vmem:[%s3734_s24 + $0x428] sm:$0xff]  ;;  %v1437_v36 = vld [vmem:[%s3734_s24 + $0xa80] sm:$0xff] }
 0x145   : > { %v1423_v51 = vld [vmem:[%s3734_s24 + $0xa10] sm:$0xff] }
 0x146   : > { %2456 = vmatpush1.bf16.msra.mxu1 %v2455_v61  ;;  %v1410_v61 = vld [vmem:[%s3734_s24 + $0x9a8] sm:$0xff] }
 0x147   : > { %2648 = vmatpush1.bf16.msra.mxu0 %v2647_v63  ;;  %2458 = vmatprep.subr.bf16.mxu1 %v2457_v0  ;;  %v1412_v63 = vld [vmem:[%s3734_s24 + $0x9b8] sm:$0xff]  ;;  %v2475_v0 = vpack.c.bf16 %v1215_v56, %v1213_v55  ;;  %v2683_v56 = vpack.c.bf16 %v1423_v51, %v1421_v48  ;;  %v1251_v48 = vld [vmem:[%s3734_s24 + $0x4b0] sm:$0xff] }
 0x148   : > { %2650 = vmatprep.subr.bf16.mxu0 %v2649_v4  ;;  %v1219_v4 = vld [vmem:[%s3734_s24 + $0x3b0] sm:$0xff]  ;;  %v2669_v6 = vpack.c.bf16 %v1412_v63, %v1410_v61  ;;  %v1238_v63 = vld [vmem:[%s3734_s24 + $0x448] sm:$0xff] }
 0x149   : > { %v1427_v61 = vld [vmem:[%s3734_s24 + $0xa30] sm:$0xff] }
 0x14a   : > { %2460 = vmatpush1.bf16.msra.mxu1 %v2459_v10  ;;  %v1414_v10 = vld [vmem:[%s3734_s24 + $0x9c8] sm:$0xff]  ;;  %v2687_v5 = vpack.c.bf16 %v1427_v61, %v1425_v59  ;;  %v1255_v59 = vld [vmem:[%s3734_s24 + $0x4d0] sm:$0xff] }
 0x14b   : > { %2652 = vmatpush1.bf16.msra.mxu0 %v2651_v11  ;;  %2462 = vmatprep.subr.bf16.mxu1 %v2461_v13  ;;  %v1416_v11 = vld [vmem:[%s3734_s24 + $0x9d8] sm:$0xff]  ;;  %v2479_v13 = vpack.c.bf16 %v1219_v4, %v1217_v3 }
 0x14c   : > { %2654 = vmatprep.subr.bf16.mxu0 %v2653_v17  ;;  %v1223_v17 = vld [vmem:[%s3734_s24 + $0x3d0] sm:$0xff]  ;;  %v2673_v19 = vpack.c.bf16 %v1416_v11, %v1414_v10  ;;  %v1242_v11 = vld [vmem:[%s3734_s24 + $0x468] sm:$0xff] }
 0x14d   : > { %v1431_v10 = vld [vmem:[%s3734_s24 + $0xa50] sm:$0xff] }
 0x14e   : > { %2464 = vmatpush1.bf16.msra.mxu1 %v2463_v24  ;;  %v1418_v24 = vld [vmem:[%s3734_s24 + $0x9e8] sm:$0xff] }
 0x14f   : > { %2656 = vmatpush1.bf16.msra.mxu0 %v2655_v25  ;;  %2466 = vmatprep.subr.bf16.mxu1 %v2465_v23  ;;  %v1420_v25 = vld [vmem:[%s3734_s24 + $0x9f8] sm:$0xff]  ;;  %v2483_v23 = vpack.c.bf16 %v1223_v17, %v1221_v16  ;;  %v2691_v16 = vpack.c.bf16 %v1431_v10, %v1429_v8  ;;  %v1262_v10 = vld [vmem:[%s3734_s24 + $0x508] sm:$0xff] }
 0x150   : > { %2658 = vmatprep.subr.bf16.mxu0 %v2657_v32  ;;  %v1227_v32 = vld [vmem:[%s3734_s24 + $0x3f0] sm:$0xff]  ;;  %v2677_v35 = vpack.c.bf16 %v1420_v25, %v1418_v24  ;;  %v1246_v24 = vld [vmem:[%s3734_s24 + $0x488] sm:$0xff]  ;;  %v1248_v25 = vld [vmem:[%s3734_s24 + $0x498] sm:$0xff] }
 0x151   : > { %v2487_v43 = vpack.c.bf16 %v1227_v32, %v1225_v30  ;;  %v2695_v30 = vpack.c.bf16 %v1435_v22, %v1433_v20  ;;  %v2505_v32 = vpack.c.bf16 %v1248_v25, %v1246_v24  ;;  %v1266_v22 = vld [vmem:[%s3734_s24 + $0x528] sm:$0xff]  ;;  %v1268_v24 = vld [vmem:[%s3734_s24 + $0x538] sm:$0xff] }
 0x152   : > { %2468 = vmatpush1.bf16.msra.mxu1 %v2467_v39  ;;  %v1422_v39 = vld [vmem:[%s3734_s24 + $0xa08] sm:$0xff] }
 0x153   : > { %2660 = vmatpush1.bf16.msra.mxu0 %v2659_v41  ;;  %2470 = vmatprep.subr.bf16.mxu1 %v2469_v42  ;;  %v1424_v41 = vld [vmem:[%s3734_s24 + $0xa18] sm:$0xff]  ;;  %v1534_v42 = vcombine.high %v3967_v46, %v3967_v46  ;;  %v1426_v46 = vld [vmem:[%s3734_s24 + $0xa28] sm:$0xff] }
 0x154   : > { %2662 = vmatprep.subr.bf16.mxu0 %v2661_v45  ;;  %v1229_v45 = vld [vmem:[%s3734_s24 + $0x400] sm:$0xff]  ;;  %v2681_v50 = vpack.c.bf16 %v1424_v41, %v1422_v39  ;;  %v1250_v39 = vld [vmem:[%s3734_s24 + $0x4a8] sm:$0xff]  ;;  %v1252_v41 = vld [vmem:[%s3734_s24 + $0x4b8] sm:$0xff] }
 0x155   : > { %v2491_v55 = vpack.c.bf16 %v1231_v47, %v1229_v45  ;;  %v2509_v45 = vpack.c.bf16 %v1252_v41, %v1250_v39  ;;  %v1249_v47 = vld [vmem:[%s3734_s24 + $0x4a0] sm:$0xff]  ;;  %v1458_v25 = vld [vmem:[%s3734_s24 + $0xb28] sm:$0xff]  ;;  %v1272_v39 = vld [vmem:[%s3734_s24 + $0x558] sm:$0xff] }
 0x156   : > { %2472 = vmatpush1.bf16.msra.mxu1 %v2471_v53  ;;  %v1236_v53 = vld [vmem:[%s3734_s24 + $0x438] sm:$0xff]  ;;  %v1462_v41 = vld [vmem:[%s3734_s24 + $0xb48] sm:$0xff] }
 0x157   : > { %2664 = vmatpush1.bf16.msra.mxu0 %v2663_v26  ;;  %2474 = vmatprep.subr.bf16.mxu1 %v2473_v54  ;;  %v1428_v26 = vld [vmem:[%s3734_s24 + $0xa38] sm:$0xff]  ;;  %v4060_v54 = vrot.slane %v1534_v42, %v3832_v12  ;;  %v2493_v40 = vpack.c.bf16 %v1236_v53, %v1234_v52  ;;  %v1442_v42 = vld [vmem:[%s3734_s24 + $0xaa8] sm:$0xff]  ;;  %v1443_v52 = vld [vmem:[%s3734_s24 + $0xab0] sm:$0xff] }
 0x158   : > { %2666 = vmatprep.subr.bf16.mxu0 %v2665_v57  ;;  %v1233_v57 = vld [vmem:[%s3734_s24 + $0x420] sm:$0xff]  ;;  %v2685_v60 = vpack.c.bf16 %v1428_v26, %v1426_v46  ;;  %v1240_v12 = vld [vmem:[%s3734_s24 + $0x458] sm:$0xff]  ;;  %v1254_v53 = vld [vmem:[%s3734_s24 + $0x4c8] sm:$0xff] }
 0x159   : > { %v1550_v3 = vcombine.high %v4060_v54, %v4060_v54  ;;  %v2495_v4 = vpack.c.bf16 %v1235_v58, %v1233_v57  ;;  %v1256_v46 = vld [vmem:[%s3734_s24 + $0x4d8] sm:$0xff]  ;;  %v1446_v26 = vld [vmem:[%s3734_s24 + $0xac8] sm:$0xff]  ;;  %v1253_v58 = vld [vmem:[%s3734_s24 + $0x4c0] sm:$0xff] }
 0x15a   : > { %2476 = vmatpush1.bf16.msra.mxu1 %v2475_v0  ;;  %v1532_v0 = vcombine.high %v3912_v34, %v3912_v34  ;;  %v2513_v57 = vpack.c.bf16 %v1256_v46, %v1254_v53  ;;  %v1276_v53 = vld [vmem:[%s3734_s24 + $0x578] sm:$0xff]  ;;  %v1466_v46 = vld [vmem:[%s3734_s24 + $0xb68] sm:$0xff] }
 0x15b   : > { %2668 = vmatpush1.bf16.msra.mxu0 %v2667_v1  ;;  %2478 = vmatprep.subr.bf16.mxu1 %v2477_v2  ;;  %v1430_v1 = vld [vmem:[%s3734_s24 + $0xa48] sm:$0xff]  ;;  %v1432_v2 = vld [vmem:[%s3734_s24 + $0xa58] sm:$0xff] }
 0x15c   : > { %2670 = vmatprep.subr.bf16.mxu0 %v2669_v6  ;;  %v2497_v6 = vpack.c.bf16 %v1240_v12, %v1238_v63  ;;  %v2689_v9 = vpack.c.bf16 %v1432_v2, %v1430_v1  ;;  %v1447_v63 = vld [vmem:[%s3734_s24 + $0xad0] sm:$0xff]  ;;  %v1258_v12 = vld [vmem:[%s3734_s24 + $0x4e8] sm:$0xff]  ;;  %v1452_v2 = vld [vmem:[%s3734_s24 + $0xaf8] sm:$0xff] }
 0x15d   : > { %v1450_v1 = vld [vmem:[%s3734_s24 + $0xae8] sm:$0xff] }
 0x15e   : > { %2480 = vmatpush1.bf16.msra.mxu1 %v2479_v13  ;;  %v1244_v13 = vld [vmem:[%s3734_s24 + $0x478] sm:$0xff]  ;;  %v2709_v8 = vpack.c.bf16 %v1452_v2, %v1450_v1 }
 0x15f   : > { %2672 = vmatpush1.bf16.msra.mxu0 %v2671_v14  ;;  %2482 = vmatprep.subr.bf16.mxu1 %v2481_v15  ;;  %v1436_v14 = vld [vmem:[%s3734_s24 + $0xa78] sm:$0xff]  ;;  %v2501_v17 = vpack.c.bf16 %v1244_v13, %v1242_v11  ;;  %v1454_v13 = vld [vmem:[%s3734_s24 + $0xb08] sm:$0xff] }
 0x160   : > { %2674 = vmatprep.subr.bf16.mxu0 %v2673_v19  ;;  %v1243_v19 = vld [vmem:[%s3734_s24 + $0x470] sm:$0xff]  ;;  %v1264_v11 = vld [vmem:[%s3734_s24 + $0x518] sm:$0xff] }
 0x161   : > { %v1472_v1 = vld [vmem:[%s3734_s24 + $0xb98] sm:$0xff] }
 0x162   : > { %2484 = vmatpush1.bf16.msra.mxu1 %v2483_v23  ;;  %v1438_v23 = vld [vmem:[%s3734_s24 + $0xa88] sm:$0xff] }
 0x163   : > { %2676 = vmatpush1.bf16.msra.mxu0 %v2675_v28  ;;  %2486 = vmatprep.subr.bf16.mxu1 %v2485_v29  ;;  %v1440_v28 = vld [vmem:[%s3734_s24 + $0xa98] sm:$0xff]  ;;  %v2503_v29 = vpack.c.bf16 %v1243_v19, %v1241_v18  ;;  %v1263_v18 = vld [vmem:[%s3734_s24 + $0x510] sm:$0xff]  ;;  %v1453_v19 = vld [vmem:[%s3734_s24 + $0xb00] sm:$0xff] }
 0x164   : > { %2678 = vmatprep.subr.bf16.mxu0 %v2677_v35  ;;  %v1247_v35 = vld [vmem:[%s3734_s24 + $0x490] sm:$0xff]  ;;  %v2697_v37 = vpack.c.bf16 %v1440_v28, %v1438_v23  ;;  %v1460_v23 = vld [vmem:[%s3734_s24 + $0xb38] sm:$0xff] }
 0x166   : > { %2488 = vmatpush1.bf16.msra.mxu1 %v2487_v43  ;;  %v1444_v43 = vld [vmem:[%s3734_s24 + $0xab8] sm:$0xff] }
 0x167   : > { %2680 = vmatpush1.bf16.msra.mxu0 %v2679_v44  ;;  %2490 = vmatprep.subr.bf16.mxu1 %v2489_v27  ;;  %v2507_v44 = vpack.c.bf16 %v1247_v35, %v1245_v33  ;;  %v2699_v27 = vpack.c.bf16 %v1439_v38, %v1437_v36  ;;  %v2701_v51 = vpack.c.bf16 %v1444_v43, %v1442_v42  ;;  %v1267_v33 = vld [vmem:[%s3734_s24 + $0x530] sm:$0xff]  ;;  %v1457_v35 = vld [vmem:[%s3734_s24 + $0xb20] sm:$0xff]  ;;  %v1270_v38 = vld [vmem:[%s3734_s24 + $0x548] sm:$0xff] }
 0x168   : > { %2682 = vmatprep.subr.bf16.mxu0 %v2681_v50  ;;  %v1441_v50 = vld [vmem:[%s3734_s24 + $0xaa0] sm:$0xff]  ;;  %v2717_v36 = vpack.c.bf16 %v1460_v23, %v1458_v25  ;;  %v1464_v42 = vld [vmem:[%s3734_s24 + $0xb58] sm:$0xff] }
 0x169   : > { %1699 = vmatmul.mubr.f32.vlgmr.msra.gmra.mrb[0].mxu1 %v3906_v31  ;;  %v1239_v31 = vld [vmem:[%s3734_s24 + $0x450] sm:$0xff]  ;;  %v1480_v25 = vld [vmem:[%s3734_s24 + $0xbd8] sm:$0xff] }
 0x16a   : > { %2492 = vmatpush1.bf16.msra.mxu1 %v2491_v55  ;;  %1912 = vmatmul.mubr.f32.vlgmr.msra.gmra.mrb[0].mxu0 %v3973_v49  ;;  %v1434_v49 = vld [vmem:[%s3734_s24 + $0xa68] sm:$0xff]  ;;  %v2499_v15 = vpack.c.bf16 %v1239_v31, %v1237_v7  ;;  %v1448_v55 = vld [vmem:[%s3734_s24 + $0xad8] sm:$0xff]  ;;  %v1259_v7 = vld [vmem:[%s3734_s24 + $0x4f0] sm:$0xff] }
 0x16b   : > { %2684 = vmatpush1.bf16.msra.mxu0 %v2683_v56  ;;  %2494 = vmatprep.subr.bf16.mxu1 %v2493_v40  ;;  %v2693_v21 = vpack.c.bf16 %v1436_v14, %v1434_v49  ;;  %v2511_v56 = vpack.c.bf16 %v1251_v48, %v1249_v47  ;;  %v2703_v40 = vpack.c.bf16 %v1443_v52, %v1441_v50  ;;  %v1449_v31 = vld [vmem:[%s3734_s24 + $0xae0] sm:$0xff]  ;;  %v1456_v49 = vld [vmem:[%s3734_s24 + $0xb18] sm:$0xff]  ;;  %v1271_v47 = vld [vmem:[%s3734_s24 + $0x550] sm:$0xff] }
 0x16c   : > { %2686 = vmatprep.subr.bf16.mxu0 %v2685_v60  ;;  %1769 = vmatprep.mubr.f32.mxu1 %v1532_v0  ;;  %v1445_v60 = vld [vmem:[%s3734_s24 + $0xac0] sm:$0xff]  ;;  %v2705_v61 = vpack.c.bf16 %v1448_v55, %v1446_v26  ;;  %v1260_v0 = vld [vmem:[%s3734_s24 + $0x4f8] sm:$0xff]  ;;  %v2713_v20 = vpack.c.bf16 %v1456_v49, %v1454_v13  ;;  %v2721_v50 = vpack.c.bf16 %v1464_v42, %v1462_v41  ;;  %v1274_v52 = vld [vmem:[%s3734_s24 + $0x568] sm:$0xff] }
 0x16d   : > { %1982 = vmatprep.mubr.f32.mxu0 %v1550_v3  ;;  %v2515_v3 = vpack.c.bf16 %v1255_v59, %v1253_v58  ;;  %v1461_v48 = vld [vmem:[%s3734_s24 + $0xb40] sm:$0xff]  ;;  %v1468_v26 = vld [vmem:[%s3734_s24 + $0xb78] sm:$0xff]  ;;  %v1275_v58 = vld [vmem:[%s3734_s24 + $0x570] sm:$0xff] }
 0x16e   : > { %2496 = vmatpush1.bf16.msra.mxu1 %v2495_v4  ;;  %v2707_v4 = vpack.c.bf16 %v1447_v63, %v1445_v60  ;;  %v1465_v59 = vld [vmem:[%s3734_s24 + $0xb60] sm:$0xff]  ;;  %v2725_v60 = vpack.c.bf16 %v1468_v26, %v1466_v46  ;;  %v1278_v63 = vld [vmem:[%s3734_s24 + $0x588] sm:$0xff]  ;;  %v1476_v13 = vld [vmem:[%s3734_s24 + $0xbb8] sm:$0xff] }
 0x16f   : > { %2688 = vmatpush1.bf16.msra.mxu0 %v2687_v5  ;;  %2498 = vmatprep.subr.bf16.mxu1 %v2497_v6  ;;  %v2517_v5 = vpack.c.bf16 %v1260_v0, %v1258_v12  ;;  %v1257_v6 = vld [vmem:[%s3734_s24 + $0x4e0] sm:$0xff]  ;;  %v1280_v12 = vld [vmem:[%s3734_s24 + $0x598] sm:$0xff]  ;;  %v1470_v0 = vld [vmem:[%s3734_s24 + $0xb88] sm:$0xff] }
 0x170   : > { %2690 = vmatprep.subr.bf16.mxu0 %v2689_v9  ;;  %v1451_v9 = vld [vmem:[%s3734_s24 + $0xaf0] sm:$0xff]  ;;  %v2519_v14 = vpack.c.bf16 %v1259_v7, %v1257_v6  ;;  %v1469_v7 = vld [vmem:[%s3734_s24 + $0xb80] sm:$0xff]  ;;  %v1484_v41 = vld [vmem:[%s3734_s24 + $0xbf8] sm:$0xff] }
 0x171   : > { %v1279_v6 = vld [vmem:[%s3734_s24 + $0x590] sm:$0xff] }
 0x172   : > { %2500 = vmatpush1.bf16.msra.mxu1 %v2499_v15  ;;  %v2711_v15 = vpack.c.bf16 %v1451_v9, %v1449_v31  ;;  %v2729_v31 = vpack.c.bf16 %v1472_v1, %v1470_v0  ;;  %v1282_v9 = vld [vmem:[%s3734_s24 + $0x5a8] sm:$0xff] }
 0x173   : > { %2692 = vmatpush1.bf16.msra.mxu0 %v2691_v16  ;;  %2502 = vmatprep.subr.bf16.mxu1 %v2501_v17  ;;  %v2521_v16 = vpack.c.bf16 %v1264_v11, %v1262_v10  ;;  %v1261_v17 = vld [vmem:[%s3734_s24 + $0x500] sm:$0xff]  ;;  %v1284_v10 = vld [vmem:[%s3734_s24 + $0x5b8] sm:$0xff]  ;;  %v1474_v11 = vld [vmem:[%s3734_s24 + $0xba8] sm:$0xff] }
 0x174   : > { %2694 = vmatprep.subr.bf16.mxu0 %v2693_v21  ;;  %v1455_v21 = vld [vmem:[%s3734_s24 + $0xb10] sm:$0xff]  ;;  %v2523_v28 = vpack.c.bf16 %v1263_v18, %v1261_v17  ;;  %v1473_v18 = vld [vmem:[%s3734_s24 + $0xba0] sm:$0xff] }
 0x175   : > { %v1283_v17 = vld [vmem:[%s3734_s24 + $0x5b0] sm:$0xff] }
 0x176   : > { %2504 = vmatpush1.bf16.msra.mxu1 %v2503_v29  ;;  %v2715_v29 = vpack.c.bf16 %v1455_v21, %v1453_v19  ;;  %v2733_v19 = vpack.c.bf16 %v1476_v13, %v1474_v11  ;;  %v1286_v21 = vld [vmem:[%s3734_s24 + $0x5c8] sm:$0xff]  ;;  %v2000_v11 = vld [vmem:[%s3732_s30 + $0x40] sm:$0xff] }
 0x177   : > { %2696 = vmatpush1.bf16.msra.mxu0 %v2695_v30  ;;  %2506 = vmatprep.subr.bf16.mxu1 %v2505_v32  ;;  %v2525_v30 = vpack.c.bf16 %v1268_v24, %v1266_v22  ;;  %v1265_v32 = vld [vmem:[%s3734_s24 + $0x520] sm:$0xff]  ;;  %v1288_v22 = vld [vmem:[%s3734_s24 + $0x5d8] sm:$0xff]  ;;  %v1478_v24 = vld [vmem:[%s3734_s24 + $0xbc8] sm:$0xff] }
 0x178   : > { %2698 = vmatprep.subr.bf16.mxu0 %v2697_v37  ;;  %v1459_v37 = vld [vmem:[%s3734_s24 + $0xb30] sm:$0xff]  ;;  %v2527_v43 = vpack.c.bf16 %v1267_v33, %v1265_v32  ;;  %v1477_v33 = vld [vmem:[%s3734_s24 + $0xbc0] sm:$0xff] }
 0x179   : > { %v1287_v32 = vld [vmem:[%s3734_s24 + $0x5d0] sm:$0xff]  ;;  %v2001_v13 = vld [vmem:[%s3732_s30 + $0x48] sm:$0xff] }
 0x17a   : > { %2508 = vmatpush1.bf16.msra.mxu1 %v2507_v44  ;;  %v2719_v44 = vpack.c.bf16 %v1459_v37, %v1457_v35  ;;  %v2737_v35 = vpack.c.bf16 %v1480_v25, %v1478_v24  ;;  %v1290_v37 = vld [vmem:[%s3734_s24 + $0x5e8] sm:$0xff]  ;;  %v2004_v24 = vld [vmem:[%s3732_s30 + $0x60] sm:$0xff] }
 0x17b   : > { %2700 = vmatpush1.bf16.msra.mxu0 %v2699_v27  ;;  %2510 = vmatprep.subr.bf16.mxu1 %v2509_v45  ;;  %v2529_v27 = vpack.c.bf16 %v1272_v39, %v1270_v38  ;;  %v1269_v45 = vld [vmem:[%s3734_s24 + $0x540] sm:$0xff]  ;;  %v1292_v38 = vld [vmem:[%s3734_s24 + $0x5f8] sm:$0xff]  ;;  %v1482_v39 = vld [vmem:[%s3734_s24 + $0xbe8] sm:$0xff] }
 0x17c   : > { %2702 = vmatprep.subr.bf16.mxu0 %v2701_v51  ;;  %v1463_v51 = vld [vmem:[%s3734_s24 + $0xb50] sm:$0xff]  ;;  %v2531_v55 = vpack.c.bf16 %v1271_v47, %v1269_v45  ;;  %v1481_v47 = vld [vmem:[%s3734_s24 + $0xbe0] sm:$0xff] }
 0x17d   : > { %v1291_v45 = vld [vmem:[%s3734_s24 + $0x5f0] sm:$0xff]  ;;  %v2005_v25 = vld [vmem:[%s3732_s30 + $0x68] sm:$0xff] }
 0x17e   : > { %2512 = vmatpush1.bf16.msra.mxu1 %v2511_v56  ;;  %v2723_v56 = vpack.c.bf16 %v1463_v51, %v1461_v48  ;;  %v2741_v48 = vpack.c.bf16 %v1484_v41, %v1482_v39  ;;  %v2008_v51 = vld [vmem:[%s3732_s30 + $0x80] sm:$0xff] }
 0x17f   : > { %2704 = vmatpush1.bf16.msra.mxu0 %v2703_v40  ;;  %2514 = vmatprep.subr.bf16.mxu1 %v2513_v57  ;;  %v2533_v40 = vpack.c.bf16 %v1276_v53, %v1274_v52  ;;  %v1273_v57 = vld [vmem:[%s3734_s24 + $0x560] sm:$0xff] }
 0x180   : > { %2706 = vmatprep.subr.bf16.mxu0 %v2705_v61  ;;  %v1467_v61 = vld [vmem:[%s3734_s24 + $0xb70] sm:$0xff]  ;;  %v2535_v2 = vpack.c.bf16 %v1275_v58, %v1273_v57  ;;  %v2009_v52 = vld [vmem:[%s3732_s30 + $0x88] sm:$0xff] }
 0x181   : > { %v2745_v26 = vpack.c.bf16 %v2009_v52, %v2008_v51  ;;  %v2011_v57 = vld [vmem:[%s3732_s30 + $0x98] sm:$0xff] }
 0x182   : > { %2516 = vmatpush1.bf16.msra.mxu1 %v2515_v3  ;;  %v2727_v3 = vpack.c.bf16 %v1467_v61, %v1465_v59  ;;  %v1995_v61 = vld [vmem:[%s3732_s30 + $0x18] sm:$0xff] }
 0x183   : > { %2708 = vmatpush1.bf16.msra.mxu0 %v2707_v4  ;;  %2518 = vmatprep.subr.bf16.mxu1 %v2517_v5  ;;  %v2537_v4 = vpack.c.bf16 %v1280_v12, %v1278_v63  ;;  %v1277_v5 = vld [vmem:[%s3734_s24 + $0x580] sm:$0xff] }
 0x184   : > { %2710 = vmatprep.subr.bf16.mxu0 %v2709_v8  ;;  %v1471_v8 = vld [vmem:[%s3734_s24 + $0xb90] sm:$0xff]  ;;  %v2539_v49 = vpack.c.bf16 %v1279_v6, %v1277_v5  ;;  %v2012_v63 = vld [vmem:[%s3732_s30 + $0xa0] sm:$0xff]  ;;  %v2013_v12 = vld [vmem:[%s3732_s30 + $0xa8] sm:$0xff] }
 0x185   : > { %v2753_v1 = vpack.c.bf16 %v2013_v12, %v2012_v63  ;;  %v2015_v5 = vld [vmem:[%s3732_s30 + $0xb8] sm:$0xff]  ;;  %v2115_v12 = vld [vmem:[%s4289_s5 + $0x20] sm:$0xff] (!%p2275_p11) }
 0x186   : > { %2520 = vmatpush1.bf16.msra.mxu1 %v2519_v14  ;;  %v2731_v14 = vpack.c.bf16 %v1471_v8, %v1469_v7  ;;  %v1998_v7 = vld [vmem:[%s3732_s30 + $0x30] sm:$0xff]  ;;  %v2017_v8 = vld [vmem:[%s3732_s30 + $0xc8] sm:$0xff] }
 0x187   : > { %2712 = vmatpush1.bf16.msra.mxu0 %v2711_v15  ;;  %2522 = vmatprep.subr.bf16.mxu1 %v2521_v16  ;;  %v2541_v15 = vpack.c.bf16 %v1284_v10, %v1282_v9  ;;  %v1281_v16 = vld [vmem:[%s3734_s24 + $0x5a0] sm:$0xff] }
 0x188   : > { %2714 = vmatprep.subr.bf16.mxu0 %v2713_v20  ;;  %v1475_v20 = vld [vmem:[%s3734_s24 + $0xbb0] sm:$0xff]  ;;  %v2543_v23 = vpack.c.bf16 %v1283_v17, %v1281_v16 }
 0x189   : > { %v2002_v17 = vld [vmem:[%s3732_s30 + $0x50] sm:$0xff] }
 0x18a   : > { %2524 = vmatpush1.bf16.msra.mxu1 %v2523_v28  ;;  %v2735_v28 = vpack.c.bf16 %v1475_v20, %v1473_v18  ;;  %v2003_v18 = vld [vmem:[%s3732_s30 + $0x58] sm:$0xff]  ;;  %v2020_v20 = vld [vmem:[%s3732_s30 + $0xe0] sm:$0xff] }
 0x18b   : > { %2716 = vmatpush1.bf16.msra.mxu0 %v2715_v29  ;;  %2526 = vmatprep.subr.bf16.mxu1 %v2525_v30  ;;  %v2545_v29 = vpack.c.bf16 %v1288_v22, %v1286_v21  ;;  %v1285_v30 = vld [vmem:[%s3734_s24 + $0x5c0] sm:$0xff] }
 0x18c   : > { %2718 = vmatprep.subr.bf16.mxu0 %v2717_v36  ;;  %v1479_v36 = vld [vmem:[%s3734_s24 + $0xbd0] sm:$0xff]  ;;  %v2547_v42 = vpack.c.bf16 %v1287_v32, %v1285_v30  ;;  %v2021_v21 = vld [vmem:[%s3732_s30 + $0xe8] sm:$0xff] }
 0x18d   : > { %v2769_v22 = vpack.c.bf16 %v2021_v21, %v2020_v20  ;;  %v2006_v32 = vld [vmem:[%s3732_s30 + $0x70] sm:$0xff] }
 0x18e   : > { %2528 = vmatpush1.bf16.msra.mxu1 %v2527_v43  ;;  %v2739_v43 = vpack.c.bf16 %v1479_v36, %v1477_v33  ;;  %v2007_v33 = vld [vmem:[%s3732_s30 + $0x78] sm:$0xff]  ;;  %v1489_v36 = vsub.s32 0, %v3821_v62 }
 0x18f   : > { %2720 = vmatpush1.bf16.msra.mxu0 %v2719_v44  ;;  %2530 = vmatprep.subr.bf16.mxu1 %v2529_v27  ;;  %v2549_v44 = vpack.c.bf16 %v1292_v38, %v1290_v37  ;;  %v1289_v27 = vld [vmem:[%s3734_s24 + $0x5e0] sm:$0xff]  ;;  %v1485_v37 = vld [vmem:[%s1084_s22] sm:$0x3]  ;;  %v1493_v38 = vsub.s32 1, %v3821_v62 }
 0x190   : > { %2722 = vmatprep.subr.bf16.mxu0 %v2721_v50  ;;  %v1483_v50 = vld [vmem:[%s3734_s24 + $0xbf0] sm:$0xff]  ;;  %v2551_v53 = vpack.c.bf16 %v1291_v45, %v1289_v27  ;;  %v1490_v39 = vrot.slane %v1485_v37, %v1489_v36 }
 0x191   : > { %v2743_v46 = vpack.c.bf16 %v1483_v50, %v1481_v47  ;;  %v1494_v41 = vrot.slane %v1485_v37, %v1493_v38 }
 0x192   : > { %2532 = vmatpush1.bf16.msra.mxu1 %v2531_v55  ;;  %v1992_v55 = vld [vmem:[%s3732_s30] sm:$0xff] }
 0x193   : > { %2724 = vmatpush1.bf16.msra.mxu0 %v2723_v56  ;;  %2534 = vmatprep.subr.bf16.mxu1 %v2533_v40  ;;  %v1993_v56 = vld [vmem:[%s3732_s30 + $0x8] sm:$0xff]  ;;  %v2010_v40 = vld [vmem:[%s3732_s30 + $0x90] sm:$0xff] }
 0x194   : > { %2726 = vmatprep.subr.bf16.mxu0 %v2725_v60  ;;  %v2747_v58 = vpack.c.bf16 %v1993_v56, %v1992_v55  ;;  %v2749_v59 = vpack.c.bf16 %v2011_v57, %v2010_v40  ;;  %v1994_v60 = vld [vmem:[%s3732_s30 + $0x10] sm:$0xff]  ;;  %v2111_v56 = vld [vmem:[%s4289_s5] sm:$0xff] (!%p2275_p11)  ;;  %v2112_v40 = vld [vmem:[%s4289_s5 + $0x8] sm:$0xff] (!%p2275_p11) }
 0x195   : > { %v2751_v0 = vpack.c.bf16 %v1995_v61, %v1994_v60  ;;  %v2113_v57 = vld [vmem:[%s4289_s5 + $0x10] sm:$0xff] (!%p2275_p11)  ;;  %v2114_v60 = vld [vmem:[%s4289_s5 + $0x18] sm:$0xff] (!%p2275_p11)  ;;  %v2869_v61 = vmov (!%p2275_p11), 0.0  }
 0x196   : > { %2536 = vmatpush1.bf16.msra.mxu1 %v2535_v2  ;;  %v1996_v2 = vld [vmem:[%s3732_s30 + $0x20] sm:$0xff]  ;;  %v2781_v63 = vpack.c.bf16 (!%p2275_p11), %v2114_v60, %v2113_v57 }
 0x197   : > { %2728 = vmatpush1.bf16.msra.mxu0 %v2727_v3  ;;  %2538 = vmatprep.subr.bf16.mxu1 %v2537_v4  ;;  %v1997_v3 = vld [vmem:[%s3732_s30 + $0x28] sm:$0xff]  ;;  %v2014_v4 = vld [vmem:[%s3732_s30 + $0xb0] sm:$0xff] }
 0x198   : > { %2730 = vmatprep.subr.bf16.mxu0 %v2729_v31  ;;  %v2755_v6 = vpack.c.bf16 %v1997_v3, %v1996_v2  ;;  %v2016_v31 = vld [vmem:[%s3732_s30 + $0xc0] sm:$0xff]  ;;  %v2117_v2 = vld [vmem:[%s4289_s5 + $0x30] sm:$0xff] (!%p2275_p11)  ;;  %v2118_v3 = vld [vmem:[%s4289_s5 + $0x38] sm:$0xff] (!%p2275_p11) }
 0x199   : > { %v2761_v10 = vpack.c.bf16 %v2017_v8, %v2016_v31  ;;  %v2276_v8 = vld [vmem:[%s4288_s4] ss:$0 sm:$0xff] (!%p2275_p11) }
 0x19a   : > { %2540 = vmatpush1.bf16.msra.mxu1 %v2539_v49  ;;  %v2018_v49 = vld [vmem:[%s3732_s30 + $0xd0] sm:$0xff] }
 0x19b   : > { %2732 = vmatpush1.bf16.msra.mxu0 %v2731_v14  ;;  %2542 = vmatprep.subr.bf16.mxu1 %v2541_v15  ;;  %v2019_v14 = vld [vmem:[%s3732_s30 + $0xd8] sm:$0xff]  ;;  %v2763_v15 = vpack.c.bf16 %v2001_v13, %v2000_v11  ;;  %v2123_v11 = vld [vmem:[%s4289_s5 + $0x60] sm:$0xf] (!%p2275_p11) }
 0x19c   : > { %2734 = vmatprep.subr.bf16.mxu0 %v2733_v19  ;;  %v2765_v16 = vpack.c.bf16 %v2019_v14, %v2018_v49  ;;  %v2767_v19 = vpack.c.bf16 %v2003_v18, %v2002_v17  ;;  %v2277_v49 = vld [vmem:[%s4290_s6] ss:$0 sm:$0xff] (!%p2275_p11) }
 0x19e   : > { %2544 = vmatpush1.bf16.msra.mxu1 %v2543_v23  ;;  %v2771_v23 = vpack.c.bf16 %v2005_v25, %v2004_v24 }
 0x19f   : > { %2736 = vmatpush1.bf16.msra.mxu0 %v2735_v28  ;;  %2546 = vmatprep.subr.bf16.mxu1 %v2545_v29  ;;  %v2022_v28 = vld [vmem:[%s3732_s30 + $0xf0] sm:$0xff]  ;;  %v2023_v29 = vld [vmem:[%s3732_s30 + $0xf8] sm:$0xff] }
 0x1a0   : > { %2738 = vmatprep.subr.bf16.mxu0 %v2737_v35  ;;  %v2773_v30 = vpack.c.bf16 %v2023_v29, %v2022_v28  ;;  %v2775_v35 = vpack.c.bf16 %v2007_v33, %v2006_v32 }
 0x1a2   : > { %2548 = vmatpush1.bf16.msra.mxu1 %v2547_v42 }
 0x1a3   : > { %2740 = vmatpush1.bf16.msra.mxu0 %v2739_v43  ;;  %2550 = vmatprep.subr.bf16.mxu1 %v2549_v44 }
 0x1a4   : > { %2742 = vmatprep.subr.bf16.mxu0 %v2741_v48 }
 0x1a6   : > { %2552 = vmatpush1.bf16.msra.mxu1 %v2551_v53 }
 0x1a7   : > { %2744 = vmatpush1.bf16.msra.mxu0 %v2743_v46  ;;  %2746 = vmatprep.subr.bf16.mxu1 %v2745_v26  ;;  %v1991_v46 = vld [vmem:[#allocation2] sm:$0x3] }
 0x1a9   : > { %1770 = vmatmul.mubr.f32.vlgmr.msra.gmra.mrb[0].mxu1 %v3912_v34  ;;  %v2757_v34 = vpack.c.bf16 %v2015_v5, %v2014_v4  ;;  %v2787_v4 = vpack.c.bf16 (!%p2275_p11), %v2118_v3, %v2117_v2  ;;  %v2119_v5 = vld [vmem:[%s4289_s5 + $0x40] sm:$0xff] (!%p2275_p11) }
 0x1aa   : > { %1983 = vmatmul.mubr.f32.vlgmr.msra.gmra.mrb[0].mxu0 %v4060_v54  ;;  %2748 = vmatpush3.bf16.msra.mxu1 %v2747_v58  ;;  %v1999_v54 = vld [vmem:[%s3732_s30 + $0x38] sm:$0xff]  ;;  %v2867_v58 = vmov (!%p2275_p11), 0.0|0.0  }
 0x1ab   : > { %2750 = vmatprep.subr.bf16.mxu1 %v2749_v59  ;;  %v2759_v9 = vpack.c.bf16 %v1999_v54, %v1998_v7  ;;  %2777 = vmatprep.subr.bf16.mxu0 (!%p2275_p11), %v2867_v58  ;;  %v2778_v59 = vpack.c.bf16 (!%p2275_p11), %v2112_v40, %v2111_v56  ;;  %v2121_v7 = vld [vmem:[%s4289_s5 + $0x50] sm:$0xff] (!%p2275_p11)  ;;  %v2122_v54 = vld [vmem:[%s4289_s5 + $0x58] sm:$0xff] (!%p2275_p11) }
 0x1ac   : > { %2358 = vmatprep.mubr.msk.f32.mxu0 (!%p2275_p11), %vm2868_vm2, %v2869_v61 }
 0x1ad   : > { %2779 = vmatpush3.bf16.msra.mxu0 (!%p2275_p11), %v2778_v59 }
 0x1ae   : > { %2752 = vmatpush3.bf16.msra.mxu1 %v2751_v0  ;;  %2780 = vmatprep.subr.bf16.mxu0 (!%p2275_p11), %v2867_v58  ;;  %v2116_v0 = vld [vmem:[%s4289_s5 + $0x28] sm:$0xff] (!%p2275_p11) }
 0x1af   : > { %2754 = vmatprep.subr.bf16.mxu1 %v2753_v1  ;;  %v2784_v1 = vpack.c.bf16 (!%p2275_p11), %v2116_v0, %v2115_v12 }
 0x1b1   : > { %2782 = vmatpush3.bf16.msra.mxu0 (!%p2275_p11), %v2781_v63 }
 0x1b2   : > { %2756 = vmatpush3.bf16.msra.mxu1 %v2755_v6  ;;  %2783 = vmatprep.subr.bf16.mxu0 (!%p2275_p11), %v2867_v58  ;;  %v2120_v6 = vld [vmem:[%s4289_s5 + $0x48] sm:$0xff] (!%p2275_p11) }
 0x1b3   : > { %2758 = vmatprep.subr.bf16.mxu1 %v2757_v34  ;;  %v2790_v34 = vpack.c.bf16 (!%p2275_p11), %v2120_v6, %v2119_v5 }
 0x1b5   : > { %2785 = vmatpush3.bf16.msra.mxu0 (!%p2275_p11), %v2784_v1 }
 0x1b6   : > { %2760 = vmatpush3.bf16.msra.mxu1 %v2759_v9  ;;  %2786 = vmatprep.subr.bf16.mxu0 (!%p2275_p11), %v2867_v58  ;;  %v2793_v9 = vpack.c.bf16 (!%p2275_p11), %v2122_v54, %v2121_v7 }
 0x1b7   : > { %2762 = vmatprep.subr.bf16.mxu1 %v2761_v10 }
 0x1b9   : > { %2788 = vmatpush3.bf16.msra.mxu0 (!%p2275_p11), %v2787_v4 }
 0x1ba   : > { %2764 = vmatpush3.bf16.msra.mxu1 %v2763_v15  ;;  %2789 = vmatprep.subr.bf16.mxu0 (!%p2275_p11), %v2867_v58 }
 0x1bb   : > { %2766 = vmatprep.subr.bf16.mxu1 %v2765_v16 }
 0x1bd   : > { %2791 = vmatpush3.bf16.msra.mxu0 (!%p2275_p11), %v2790_v34 }
 0x1be   : > { %2768 = vmatpush3.bf16.msra.mxu1 %v2767_v19  ;;  %2792 = vmatprep.subr.bf16.mxu0 (!%p2275_p11), %v2867_v58 }
 0x1bf   : > { %2770 = vmatprep.subr.bf16.mxu1 %v2769_v22 }
 0x1c1   : > { %2794 = vmatpush3.bf16.msra.mxu0 (!%p2275_p11), %v2793_v9 }
 0x1c2   : > { %2772 = vmatpush3.bf16.msra.mxu1 %v2771_v23  ;;  %2356 = vmatprep.subr.mxu0 (!%p2275_p11), %v2869_v61 }
 0x1c3   : > { %2774 = vmatprep.subr.bf16.mxu1 %v2773_v30 }
 0x1c5   : > { %2357 = vmatpush3.msk.msra.mxu0 (!%p2275_p11), %vm2135_vm3, %v2123_v11 }
 0x1c6   : > { %2776 = vmatpush3.bf16.msra.mxu1 %v2775_v35 }
 0x27c   : > { %v1771_v42 = vpop.f32.mrb[0].mxu1 }
 0x27d   : > { %v2795_v43 = vadd.f32 %v1771_v42, %v1490_v39  ;;  %v1984_v44 = vpop.f32.mrb[0].mxu0  ;;  %v1773_v27 = vpop.f32.mrb[1].mxu1 }
 0x27e   : > { %v2797_v45 = vadd.f32 %v1773_v27, %v1494_v41  ;;  %v1986_v47 = vpop.f32.mrb[1].mxu0 }
 0x27f   : > { %v2796_v48 = vadd.f32 %v2795_v43, %v1984_v44 }
 0x280   : > { %v2798_v50 = vadd.f32 %v2797_v45, %v1986_v47 }
 0x281   : > { %v1989_v52 = vmax.f32 %v2796_v48, 0.0 }
 0x282   : > { %v1990_v51 = vmax.f32 %v2798_v50, 0.0 }
 0x284   : > { %2088 = vmatprep.mubr.f32.mxu1 %v1990_v51 }
 0x285   : > { %2089 = vmatmul.mubr.f32.vlgmr.msra.gmra.mrb[2].mxu1 %v1989_v52 }
 0x358   : > { %v2315_v53 = vpop.f32.mrb[2].mxu1  ;;  %2100 = sbr.rel (%p2275_p11) target bundleno = 1089 (0x441), region = 79 }
 0x359   : > { %v2316_v26 = vpop.f32.mrb[3].mxu1 }
 0x35a   : > { %v2317_v55 = vadd.f32 %v2316_v26, %v2315_v53 }
 0x35c   : > { %v2094_v62 = vadd.f32 %v2317_v55, %v1991_v46 }
 0x35e   : > { %2096 = vst.msk [vmem:[#allocation2] sm:$0x3] %vm2095_vm1, %v2094_v62 }
 0x365   : > { %v2101_v31 = vld [vmem:[#allocation2] sm:$0x3] }
 0x366   : > { %v2109_v10 = vadd.f32 %v2276_v8, %v2101_v31 }
 0x368   : > { %v2110_v13 = vmax.f32 %v2109_v10, 0.0 }
 0x36a   : > { %2359 = vmatmul.mubr.msk.f32.vlgmr.msra.gmra.mrb[0].mxu0 %vm2131_vm4, %v2110_v13 }
 0x43d   : > { %v2205_v14 = vpop.f32.mrb[0].mxu0 }
 0x43e   : > { %v2206_v15 = vadd.f32 %v2277_v49, %v2205_v14  ;;  %v2360_v16 = vpop.f32.mrb[1].mxu0 }
 0x440   : > { %2209 = vst [vmem:[%s4291_s7] sm:$0x3] %v2206_v15 }
 0x441 PF: > { %p14_p12 = scmp.ge.s32.totalorder %s2929_s28, 6   ;;  %s4292_s24 = smov %s2859_s25 }
 0x442   : > { %s4293_s25 = smov %s2938_s8  ;;  %s4294_s26 = smov %s2929_s28 }
 0x443   :  { %16 = sbr.rel (!%p14_p12) target bundleno = 2 (0x2), region = 116 }

</bundles_post_ra>
